<compile_context>
chip_gen: v6e
topology: v6e:2x2x1
jax: 0.10.0
libtpu: 0.0.40
codegen_flags: <defaults>
</compile_context>

<pallas_src>
import functools

import numpy as np
import jax
import jax.numpy as jnp
from jax import lax
from jax.experimental import pallas as pl
from jax.experimental.pallas import tpu as pltpu

EXPANSION = 4
LANE = 128


def _round_up(x, m):
    return (x + m - 1) // m * m


def _pad_axis(a, axis, target):
    pad = target - a.shape[axis]
    if pad <= 0:
        return a
    widths = [(0, 0)] * a.ndim
    widths[axis] = (0, pad)
    return jnp.pad(a, widths)


def _bottleneck_kernel(x_ref, w1_ref, b1_ref, w2_ref, b2_ref, w3_ref, b3_ref,
                       out_ref, hp_ref, *, H, W, Cin, width, Cout):
    # ---- conv1 (1x1, BN scale folded into w1) -> + bias -> ReLU (f32 epilogue)
    h1 = jnp.dot(x_ref[0].reshape(H * W, Cin), w1_ref[...],
                 preferred_element_type=jnp.float32)
    h1 = jnp.maximum(h1 + b1_ref[...], 0.0)                  # (H*W, width) f32

    # ---- stage h1 into the persistent zero-padded VMEM scratch.
    # Interior slab is stored directly (no sublane-axis concatenate / full-row
    # f32 temp); only the 1-pixel border is re-zeroed each step so the kernel
    # stays self-contained per grid point under megacore sharding.
    hp_ref[0:1, :, :] = jnp.zeros((1, W + 2, width), hp_ref.dtype)
    hp_ref[H + 1:H + 2, :, :] = jnp.zeros((1, W + 2, width), hp_ref.dtype)
    hp_ref[1:H + 1, 0:1, :] = jnp.zeros((H, 1, width), hp_ref.dtype)
    hp_ref[1:H + 1, W + 1:W + 2, :] = jnp.zeros((H, 1, width), hp_ref.dtype)
    hp_ref[1:H + 1, 1:W + 1, :] = h1.reshape(H, W, width).astype(hp_ref.dtype)

    # ---- conv2 (3x3, stride 1, pad 1) as a 9-tap accumulate (static unroll).
    # No (H*W, 9*width) im2col patches matrix is materialized: only MXU + VPU
    # work remains, dropping the dominant VMEM round-trip of the old version.
    acc = jnp.zeros((H * W, width), jnp.float32)
    for dy in range(3):
        for dx in range(3):
            k0 = (dy * 3 + dx) * width
            tap = hp_ref[dy:dy + H, dx:dx + W, :].reshape(H * W, width)
            acc = acc + jnp.dot(tap, w2_ref[k0:k0 + width, :],
                                preferred_element_type=jnp.float32)
    h2 = jnp.maximum(acc + b2_ref[...], 0.0)                  # (H*W, width) f32

    # ---- conv3 (1x1) -> + bias -> + identity -> ReLU
    h3 = jnp.dot(h2.astype(jnp.bfloat16), w3_ref[...],
                 preferred_element_type=jnp.float32)
    # Residual read at the point of use: x_ref is already resident in VMEM, so
    # re-reading here is free and keeps the live set small across the matmuls.
    identity = x_ref[0].reshape(H * W, Cin).astype(jnp.float32)
    out = jnp.maximum(h3 + b3_ref[...] + identity, 0.0)
    out_ref[0] = out.reshape(H, W, Cout).astype(out_ref.dtype)


def fold_params(p):
    """Fold eval-mode BN into conv weights, pad channels to lane multiples,
    cast matmul operands to bf16.  In a full network this runs once (hoisted
    out of the per-block call)."""
    Cin, width = p["w1"].shape
    Cout = p["w3"].shape[1]
    cin_p = _round_up(Cin, LANE)
    wid_p = _round_up(width, LANE)
    cout_p = _round_up(Cout, LANE)
    w1 = _pad_axis(_pad_axis(p["w1"] * p["s1"], 0, cin_p), 1, wid_p)
    w2 = p["w2"] * p["s2"].reshape(1, 1, 1, width)
    w2 = _pad_axis(_pad_axis(w2, 2, wid_p), 3, wid_p).reshape(9 * wid_p, wid_p)
    w3 = _pad_axis(_pad_axis(p["w3"] * p["s3"], 0, wid_p), 1, cout_p)
    return dict(
        w1=w1.astype(jnp.bfloat16),
        w2=w2.astype(jnp.bfloat16),
        w3=w3.astype(jnp.bfloat16),
        # Biases stay f32 and are zero-padded: ReLU(0 + 0) = 0 keeps the padded
        # lanes exactly zero through the whole chain (required invariant).
        b1=_pad_axis(p["b1"], 1, wid_p).astype(jnp.float32),
        b2=_pad_axis(p["b2"], 1, wid_p).astype(jnp.float32),
        b3=_pad_axis(p["b3"], 1, cout_p).astype(jnp.float32),
        cin=Cin, width=width, cout=Cout,
        cin_p=cin_p, wid_p=wid_p, cout_p=cout_p)


def _build_call(N, H, W, cin_p, wid_p, cout_p, out_dtype,
                single_buffer_weights, cost_estimate, vmem_limit_bytes):
    kernel = functools.partial(_bottleneck_kernel, H=H, W=W,
                               Cin=cin_p, width=wid_p, Cout=cout_p)

    def wspec(shape):
        # Grid-invariant weights/biases: single-buffer them (they never change
        # across the batch grid), halving their VMEM residency.
        if single_buffer_weights:
            return pl.BlockSpec(shape, lambda n: (0,) * len(shape),
                                pipeline_mode=pl.Buffered(1))
        return pl.BlockSpec(shape, lambda n: (0,) * len(shape))

    return pl.pallas_call(
        kernel,
        out_shape=jax.ShapeDtypeStruct((N, H, W, cout_p), out_dtype),
        grid_spec=pltpu.PrefetchScalarGridSpec(
            num_scalar_prefetch=0,
            grid=(N,),
            in_specs=[
                pl.BlockSpec((1, H, W, cin_p), lambda n: (n, 0, 0, 0)),
                wspec((cin_p, wid_p)),
                wspec((1, wid_p)),
                wspec((9 * wid_p, wid_p)),
                wspec((1, wid_p)),
                wspec((wid_p, cout_p)),
                wspec((1, cout_p)),
            ],
            out_specs=pl.BlockSpec((1, H, W, cout_p), lambda n: (n, 0, 0, 0)),
            scratch_shapes=[pltpu.VMEM((H + 2, W + 2, wid_p), jnp.bfloat16)],
        ),
        compiler_params=pltpu.CompilerParams(
            dimension_semantics=("parallel",),
            vmem_limit_bytes=vmem_limit_bytes),
        cost_estimate=cost_estimate,
    )


def bottleneck_pallas_nhwc(x_nhwc, fp, *, out_dtype=jnp.bfloat16):
    """Fast path: x_nhwc is channel-padded bf16 NHWC; fp from fold_params()."""
    N, H, W, cin_p = x_nhwc.shape
    wid_p, cout_p = fp["wid_p"], fp["cout_p"]
    assert cin_p == fp["cin_p"] and cin_p == cout_p

    out_isz = np.dtype(out_dtype).itemsize
    wbytes = 2 * (fp["w1"].size + fp["w2"].size + fp["w3"].size) \
        + 4 * (fp["b1"].size + fp["b2"].size + fp["b3"].size)
    flops = 2 * N * H * W * (cin_p * wid_p + 9 * wid_p * wid_p + wid_p * cout_p)
    bytes_accessed = x_nhwc.size * 2 + N * H * W * cout_p * out_isz + wbytes
    ce = pl.CostEstimate(flops=int(flops), transcendentals=0,
                         bytes_accessed=int(bytes_accessed))

    # Explicit scoped-VMEM budget: double-buffered activation blocks + weights
    # + padded-h1 scratch + f32 temporaries, with 2x headroom, clamped to the
    # default (32 MiB) at the low end and v7x physical (64 MiB) at the top.
    est = (2 * H * W * (cin_p * 2 + cout_p * out_isz) + 2 * wbytes
           + (H + 2) * (W + 2) * wid_p * 2 + 6 * H * W * wid_p * 4)
    vmem_limit = int(min(max(2 * est, 32 << 20), 64 << 20))

    args = (x_nhwc, fp["w1"], fp["b1"], fp["w2"], fp["b2"], fp["w3"], fp["b3"])
    try:
        call = _build_call(N, H, W, cin_p, wid_p, cout_p, out_dtype,
                           True, ce, vmem_limit)
        return call(*args)
    except Exception:
        # Fallback if pipeline_mode=pl.Buffered(1) weight specs are rejected by
        # the installed Pallas/Mosaic version; same kernel, double-buffered.
        call = _build_call(N, H, W, cin_p, wid_p, cout_p, out_dtype,
                           False, ce, vmem_limit)
        return call(*args)


def bottleneck_pallas(x_nchw, p, *, out_dtype=jnp.bfloat16):
    """NCHW convenience wrapper mirroring the PyTorch module interface."""
    N, Cin, H, W = x_nchw.shape
    fp = fold_params(p)
    assert Cin == fp["cout"], "residual add requires inplanes == planes*expansion"
    assert fp["cin_p"] == fp["cout_p"]
    # TODO(synk): in a full ResNet, hoist the NCHW<->NHWC transpose, channel
    # padding and bf16 cast to the network boundary (call bottleneck_pallas_nhwc
    # directly); doing them per block roughly doubles HBM traffic.
    x = jnp.transpose(x_nchw, (0, 2, 3, 1))                   # NCHW -> NHWC
    x = _pad_axis(x, 3, fp["cin_p"]).astype(jnp.bfloat16)
    out_nhwc = bottleneck_pallas_nhwc(x, fp, out_dtype=out_dtype)
    out = out_nhwc[..., :fp["cout"]]
    return jnp.transpose(out, (0, 3, 1, 2))                   # NHWC -> NCHW


def _fold_bn(kg, kb, km, kv, c, eps=1e-5):
    gamma = jax.random.uniform(kg, (c,), jnp.float32, 0.5, 1.5)
    beta = 0.1 * jax.random.normal(kb, (c,), jnp.float32)
    mean = 0.1 * jax.random.normal(km, (c,), jnp.float32)
    var = jax.random.uniform(kv, (c,), jnp.float32, 0.5, 1.5)
    scale = gamma / jnp.sqrt(var + eps)
    bias = beta - mean * scale
    return scale.reshape(1, c), bias.reshape(1, c)


def init_params(key, inplanes, planes, groups=1, base_width=64):
    assert groups == 1, "grouped conv2 not supported by this kernel"
    width = int(planes * (base_width / 64.0)) * groups
    out_c = planes * EXPANSION
    ks = jax.random.split(key, 15)
    # Conv weights stored as (Cin, Cout) for 1x1 and (ky, kx, Cin, Cout) for 3x3.
    w1 = 0.1 * jax.random.normal(ks[0], (inplanes, width), jnp.float32)
    w2 = 0.1 * jax.random.normal(ks[1], (3, 3, width, width), jnp.float32)
    w3 = 0.1 * jax.random.normal(ks[2], (width, out_c), jnp.float32)
    s1, b1 = _fold_bn(ks[3], ks[4], ks[5], ks[6], width)
    s2, b2 = _fold_bn(ks[7], ks[8], ks[9], ks[10], width)
    s3, b3 = _fold_bn(ks[11], ks[12], ks[13], ks[14], out_c)
    return dict(w1=w1, w2=w2, w3=w3, s1=s1, b1=b1, s2=s2, b2=b2, s3=s3, b3=b3)


def bottleneck_ref(x_nchw, p):
    """Pure-JAX f32 reference (NHWC internally), mirrors the PyTorch forward."""
    x = jnp.transpose(x_nchw, (0, 2, 3, 1)).astype(jnp.float32)

    def bn(h, s, b):
        return h * s.reshape(1, 1, 1, -1) + b.reshape(1, 1, 1, -1)

    h = jnp.einsum("nhwc,co->nhwo", x, p["w1"],
                   precision=lax.Precision.HIGHEST)
    h = jnp.maximum(bn(h, p["s1"], p["b1"]), 0.0)
    h = lax.conv_general_dilated(h, p["w2"], window_strides=(1, 1),
                                 padding=((1, 1), (1, 1)),
                                 dimension_numbers=("NHWC", "HWIO", "NHWC"),
                                 precision=lax.Precision.HIGHEST)
    h = jnp.maximum(bn(h, p["s2"], p["b2"]), 0.0)
    h = jnp.einsum("nhwc,co->nhwo", h, p["w3"],
                   precision=lax.Precision.HIGHEST)
    h = bn(h, p["s3"], p["b3"])
    h = jnp.maximum(h + x, 0.0)
    return jnp.transpose(h, (0, 3, 1, 2))


if __name__ == "__main__":
    key = jax.random.PRNGKey(0)
    # inplanes must equal planes * expansion since downsample=None.
    inplanes, planes = 16, 4
    N, H, W = 2, 16, 16

    kx, kp = jax.random.split(key)
    x = jax.random.normal(kx, (N, inplanes, H, W), jnp.float32)
    params = init_params(kp, inplanes, planes)

    out = jax.block_until_ready(bottleneck_pallas(x, params))
    ref = bottleneck_ref(x, params)

    assert out.shape == (N, planes * EXPANSION, H, W), out.shape
    out_f32 = out.astype(jnp.float32)
    err = float(jnp.max(jnp.abs(out_f32 - ref)))
    # bf16 matmul operands + bf16 output vs f32 HIGHEST reference -> relaxed tol.
    assert jnp.allclose(out_f32, ref, rtol=5e-2, atol=5e-2), f"max abs err {err}"
    print("KERNEL_OK")
</pallas_src>

<mosaic_0001>
module attributes {stable_mosaic.version = 11 : i64} {
  func.func @_bottleneck_kernel(%arg0: i32, %arg1: memref<1x16x16x128xbf16, #tpu.memory_space<vmem>>, %arg2: memref<128x128xbf16, #tpu.memory_space<vmem>>, %arg3: memref<1x128xf32, #tpu.memory_space<vmem>>, %arg4: memref<1152x128xbf16, #tpu.memory_space<vmem>>, %arg5: memref<1x128xf32, #tpu.memory_space<vmem>>, %arg6: memref<128x128xbf16, #tpu.memory_space<vmem>>, %arg7: memref<1x128xf32, #tpu.memory_space<vmem>>, %arg8: memref<1x16x16x128xbf16, #tpu.memory_space<vmem>>, %arg9: memref<18x18x128xbf16, #tpu.memory_space<vmem>>) attributes {dimension_semantics = [#tpu.dimension_semantics<parallel>], iteration_bounds = array<i64: 2>, scalar_prefetch = 0 : i64, scratch_operands = 1 : i64, tpu.core_type = #tpu.core_type<tc>, window_params = [{transform_indices = @transform_0, window_bounds = array<i64: 1, 16, 16, 128>}, {pipeline_mode = #tpu.pipeline_mode<synchronous>, transform_indices = @transform_1, window_bounds = array<i64: 128, 128>}, {pipeline_mode = #tpu.pipeline_mode<synchronous>, transform_indices = @transform_2, window_bounds = array<i64: 1, 128>}, {pipeline_mode = #tpu.pipeline_mode<synchronous>, transform_indices = @transform_3, window_bounds = array<i64: 1152, 128>}, {pipeline_mode = #tpu.pipeline_mode<synchronous>, transform_indices = @transform_4, window_bounds = array<i64: 1, 128>}, {pipeline_mode = #tpu.pipeline_mode<synchronous>, transform_indices = @transform_5, window_bounds = array<i64: 128, 128>}, {pipeline_mode = #tpu.pipeline_mode<synchronous>, transform_indices = @transform_6, window_bounds = array<i64: 1, 128>}, {transform_indices = @transform_7, window_bounds = array<i64: 1, 16, 16, 128>}]} {
    %c0 = arith.constant 0 : index
    %c0_0 = arith.constant 0 : index
    %c0_1 = arith.constant 0 : index
    %c0_2 = arith.constant 0 : index
    %0 = vector.load %arg1[%c0, %c0_0, %c0_1, %c0_2] : memref<1x16x16x128xbf16, #tpu.memory_space<vmem>>, vector<1x16x16x128xbf16>
    %1 = vector.shape_cast %0 : vector<1x16x16x128xbf16> to vector<16x16x128xbf16>
    %2 = vector.shape_cast %1 : vector<16x16x128xbf16> to vector<256x128xbf16>
    %c0_3 = arith.constant 0 : index
    %c0_4 = arith.constant 0 : index
    %3 = vector.load %arg2[%c0_3, %c0_4] : memref<128x128xbf16, #tpu.memory_space<vmem>>, vector<128x128xbf16>
    %cst = arith.constant dense<0.000000e+00> : vector<256x128xf32>
    %4 = tpu.matmul %2, %3, %cst {dimension_numbers = #tpu.dot_dimension_numbers<[1], [0], [0], [1], [0, 0, 1, 1], [], []>} : vector<256x128xbf16>, vector<128x128xbf16>, vector<256x128xf32> -> vector<256x128xf32>
    %c0_5 = arith.constant 0 : index
    %c0_6 = arith.constant 0 : index
    %5 = vector.load %arg3[%c0_5, %c0_6] : memref<1x128xf32, #tpu.memory_space<vmem>>, vector<1x128xf32>
    %6 = vector.broadcast %5 : vector<1x128xf32> to vector<256x128xf32>
    %7 = arith.addf %4, %6 : vector<256x128xf32>
    %cst_7 = arith.constant 0.000000e+00 : f32
    %8 = vector.broadcast %cst_7 : f32 to vector<256x128xf32>
    %9 = arith.maximumf %7, %8 : vector<256x128xf32>
    %cst_8 = arith.constant 0.000000e+00 : bf16
    %10 = vector.broadcast %cst_8 : bf16 to vector<1x18x128xbf16>
    %c0_9 = arith.constant 0 : index
    %c0_10 = arith.constant 0 : index
    %c0_11 = arith.constant 0 : index
    %11 = vector.load %arg9[%c0_9, %c0_10, %c0_11] : memref<18x18x128xbf16, #tpu.memory_space<vmem>>, vector<1x18x128xbf16>
    tpu.vector_store %arg9[%c0_9, %c0_10, %c0_11], %10 {strides = array<i32>} : memref<18x18x128xbf16, #tpu.memory_space<vmem>>, vector<1x18x128xbf16>,
    %cst_12 = arith.constant 0.000000e+00 : bf16
    %12 = vector.broadcast %cst_12 : bf16 to vector<1x18x128xbf16>
    %c17 = arith.constant 17 : index
    %c0_13 = arith.constant 0 : index
    %c0_14 = arith.constant 0 : index
    %13 = vector.load %arg9[%c17, %c0_13, %c0_14] : memref<18x18x128xbf16, #tpu.memory_space<vmem>>, vector<1x18x128xbf16>
    tpu.vector_store %arg9[%c17, %c0_13, %c0_14], %12 {strides = array<i32>} : memref<18x18x128xbf16, #tpu.memory_space<vmem>>, vector<1x18x128xbf16>,
    %cst_15 = arith.constant 0.000000e+00 : bf16
    %14 = vector.broadcast %cst_15 : bf16 to vector<16x1x128xbf16>
    %c1 = arith.constant 1 : index
    %c0_16 = arith.constant 0 : index
    %c0_17 = arith.constant 0 : index
    %15 = vector.load %arg9[%c1, %c0_16, %c0_17] : memref<18x18x128xbf16, #tpu.memory_space<vmem>>, vector<16x1x128xbf16>
    tpu.vector_store %arg9[%c1, %c0_16, %c0_17], %14 {strides = array<i32>} : memref<18x18x128xbf16, #tpu.memory_space<vmem>>, vector<16x1x128xbf16>,
    %cst_18 = arith.constant 0.000000e+00 : bf16
    %16 = vector.broadcast %cst_18 : bf16 to vector<16x1x128xbf16>
    %c1_19 = arith.constant 1 : index
    %c17_20 = arith.constant 17 : index
    %c0_21 = arith.constant 0 : index
    %17 = vector.load %arg9[%c1_19, %c17_20, %c0_21] : memref<18x18x128xbf16, #tpu.memory_space<vmem>>, vector<16x1x128xbf16>
    tpu.vector_store %arg9[%c1_19, %c17_20, %c0_21], %16 {strides = array<i32>} : memref<18x18x128xbf16, #tpu.memory_space<vmem>>, vector<16x1x128xbf16>,
    %18 = vector.shape_cast %9 : vector<256x128xf32> to vector<16x16x128xf32>
    %19 = arith.truncf %18 : vector<16x16x128xf32> to vector<16x16x128xbf16>
    %c1_22 = arith.constant 1 : index
    %c1_23 = arith.constant 1 : index
    %c0_24 = arith.constant 0 : index
    %20 = vector.load %arg9[%c1_22, %c1_23, %c0_24] : memref<18x18x128xbf16, #tpu.memory_space<vmem>>, vector<16x16x128xbf16>
    tpu.vector_store %arg9[%c1_22, %c1_23, %c0_24], %19 {strides = array<i32>} : memref<18x18x128xbf16, #tpu.memory_space<vmem>>, vector<16x16x128xbf16>,
    %cst_25 = arith.constant 0.000000e+00 : f32
    %21 = vector.broadcast %cst_25 : f32 to vector<256x128xf32>
    %c0_26 = arith.constant 0 : index
    %c0_27 = arith.constant 0 : index
    %c0_28 = arith.constant 0 : index
    %22 = vector.load %arg9[%c0_26, %c0_27, %c0_28] : memref<18x18x128xbf16, #tpu.memory_space<vmem>>, vector<16x16x128xbf16>
    %23 = vector.shape_cast %22 : vector<16x16x128xbf16> to vector<256x128xbf16>
    %c0_29 = arith.constant 0 : index
    %c0_30 = arith.constant 0 : index
    %24 = vector.load %arg4[%c0_29, %c0_30] : memref<1152x128xbf16, #tpu.memory_space<vmem>>, vector<128x128xbf16>
    %cst_31 = arith.constant dense<0.000000e+00> : vector<256x128xf32>
    %25 = tpu.matmul %23, %24, %cst_31 {dimension_numbers = #tpu.dot_dimension_numbers<[1], [0], [0], [1], [0, 0, 1, 1], [], []>} : vector<256x128xbf16>, vector<128x128xbf16>, vector<256x128xf32> -> vector<256x128xf32>
    %26 = arith.addf %21, %25 : vector<256x128xf32>
    %c0_32 = arith.constant 0 : index
    %c1_33 = arith.constant 1 : index
    %c0_34 = arith.constant 0 : index
    %27 = vector.load %arg9[%c0_32, %c1_33, %c0_34] : memref<18x18x128xbf16, #tpu.memory_space<vmem>>, vector<16x16x128xbf16>
    %28 = vector.shape_cast %27 : vector<16x16x128xbf16> to vector<256x128xbf16>
    %c128 = arith.constant 128 : index
    %c0_35 = arith.constant 0 : index
    %29 = vector.load %arg4[%c128, %c0_35] : memref<1152x128xbf16, #tpu.memory_space<vmem>>, vector<128x128xbf16>
    %cst_36 = arith.constant dense<0.000000e+00> : vector<256x128xf32>
    %30 = tpu.matmul %28, %29, %cst_36 {dimension_numbers = #tpu.dot_dimension_numbers<[1], [0], [0], [1], [0, 0, 1, 1], [], []>} : vector<256x128xbf16>, vector<128x128xbf16>, vector<256x128xf32> -> vector<256x128xf32>
    %31 = arith.addf %26, %30 : vector<256x128xf32>
    %c0_37 = arith.constant 0 : index
    %c2 = arith.constant 2 : index
    %c0_38 = arith.constant 0 : index
    %32 = vector.load %arg9[%c0_37, %c2, %c0_38] : memref<18x18x128xbf16, #tpu.memory_space<vmem>>, vector<16x16x128xbf16>
    %33 = vector.shape_cast %32 : vector<16x16x128xbf16> to vector<256x128xbf16>
    %c256 = arith.constant 256 : index
    %c0_39 = arith.constant 0 : index
    %34 = vector.load %arg4[%c256, %c0_39] : memref<1152x128xbf16, #tpu.memory_space<vmem>>, vector<128x128xbf16>
    %cst_40 = arith.constant dense<0.000000e+00> : vector<256x128xf32>
    %35 = tpu.matmul %33, %34, %cst_40 {dimension_numbers = #tpu.dot_dimension_numbers<[1], [0], [0], [1], [0, 0, 1, 1], [], []>} : vector<256x128xbf16>, vector<128x128xbf16>, vector<256x128xf32> -> vector<256x128xf32>
    %36 = arith.addf %31, %35 : vector<256x128xf32>
    %c1_41 = arith.constant 1 : index
    %c0_42 = arith.constant 0 : index
    %c0_43 = arith.constant 0 : index
    %37 = vector.load %arg9[%c1_41, %c0_42, %c0_43] : memref<18x18x128xbf16, #tpu.memory_space<vmem>>, vector<16x16x128xbf16>
    %38 = vector.shape_cast %37 : vector<16x16x128xbf16> to vector<256x128xbf16>
    %c384 = arith.constant 384 : index
    %c0_44 = arith.constant 0 : index
    %39 = vector.load %arg4[%c384, %c0_44] : memref<1152x128xbf16, #tpu.memory_space<vmem>>, vector<128x128xbf16>
    %cst_45 = arith.constant dense<0.000000e+00> : vector<256x128xf32>
    %40 = tpu.matmul %38, %39, %cst_45 {dimension_numbers = #tpu.dot_dimension_numbers<[1], [0], [0], [1], [0, 0, 1, 1], [], []>} : vector<256x128xbf16>, vector<128x128xbf16>, vector<256x128xf32> -> vector<256x128xf32>
    %41 = arith.addf %36, %40 : vector<256x128xf32>
    %c1_46 = arith.constant 1 : index
    %c1_47 = arith.constant 1 : index
    %c0_48 = arith.constant 0 : index
    %42 = vector.load %arg9[%c1_46, %c1_47, %c0_48] : memref<18x18x128xbf16, #tpu.memory_space<vmem>>, vector<16x16x128xbf16>
    %43 = vector.shape_cast %42 : vector<16x16x128xbf16> to vector<256x128xbf16>
    %c512 = arith.constant 512 : index
    %c0_49 = arith.constant 0 : index
    %44 = vector.load %arg4[%c512, %c0_49] : memref<1152x128xbf16, #tpu.memory_space<vmem>>, vector<128x128xbf16>
    %cst_50 = arith.constant dense<0.000000e+00> : vector<256x128xf32>
    %45 = tpu.matmul %43, %44, %cst_50 {dimension_numbers = #tpu.dot_dimension_numbers<[1], [0], [0], [1], [0, 0, 1, 1], [], []>} : vector<256x128xbf16>, vector<128x128xbf16>, vector<256x128xf32> -> vector<256x128xf32>
    %46 = arith.addf %41, %45 : vector<256x128xf32>
    %c1_51 = arith.constant 1 : index
    %c2_52 = arith.constant 2 : index
    %c0_53 = arith.constant 0 : index
    %47 = vector.load %arg9[%c1_51, %c2_52, %c0_53] : memref<18x18x128xbf16, #tpu.memory_space<vmem>>, vector<16x16x128xbf16>
    %48 = vector.shape_cast %47 : vector<16x16x128xbf16> to vector<256x128xbf16>
    %c640 = arith.constant 640 : index
    %c0_54 = arith.constant 0 : index
    %49 = vector.load %arg4[%c640, %c0_54] : memref<1152x128xbf16, #tpu.memory_space<vmem>>, vector<128x128xbf16>
    %cst_55 = arith.constant dense<0.000000e+00> : vector<256x128xf32>
    %50 = tpu.matmul %48, %49, %cst_55 {dimension_numbers = #tpu.dot_dimension_numbers<[1], [0], [0], [1], [0, 0, 1, 1], [], []>} : vector<256x128xbf16>, vector<128x128xbf16>, vector<256x128xf32> -> vector<256x128xf32>
    %51 = arith.addf %46, %50 : vector<256x128xf32>
    %c2_56 = arith.constant 2 : index
    %c0_57 = arith.constant 0 : index
    %c0_58 = arith.constant 0 : index
    %52 = vector.load %arg9[%c2_56, %c0_57, %c0_58] : memref<18x18x128xbf16, #tpu.memory_space<vmem>>, vector<16x16x128xbf16>
    %53 = vector.shape_cast %52 : vector<16x16x128xbf16> to vector<256x128xbf16>
    %c768 = arith.constant 768 : index
    %c0_59 = arith.constant 0 : index
    %54 = vector.load %arg4[%c768, %c0_59] : memref<1152x128xbf16, #tpu.memory_space<vmem>>, vector<128x128xbf16>
    %cst_60 = arith.constant dense<0.000000e+00> : vector<256x128xf32>
    %55 = tpu.matmul %53, %54, %cst_60 {dimension_numbers = #tpu.dot_dimension_numbers<[1], [0], [0], [1], [0, 0, 1, 1], [], []>} : vector<256x128xbf16>, vector<128x128xbf16>, vector<256x128xf32> -> vector<256x128xf32>
    %56 = arith.addf %51, %55 : vector<256x128xf32>
    %c2_61 = arith.constant 2 : index
    %c1_62 = arith.constant 1 : index
    %c0_63 = arith.constant 0 : index
    %57 = vector.load %arg9[%c2_61, %c1_62, %c0_63] : memref<18x18x128xbf16, #tpu.memory_space<vmem>>, vector<16x16x128xbf16>
    %58 = vector.shape_cast %57 : vector<16x16x128xbf16> to vector<256x128xbf16>
    %c896 = arith.constant 896 : index
    %c0_64 = arith.constant 0 : index
    %59 = vector.load %arg4[%c896, %c0_64] : memref<1152x128xbf16, #tpu.memory_space<vmem>>, vector<128x128xbf16>
    %cst_65 = arith.constant dense<0.000000e+00> : vector<256x128xf32>
    %60 = tpu.matmul %58, %59, %cst_65 {dimension_numbers = #tpu.dot_dimension_numbers<[1], [0], [0], [1], [0, 0, 1, 1], [], []>} : vector<256x128xbf16>, vector<128x128xbf16>, vector<256x128xf32> -> vector<256x128xf32>
    %61 = arith.addf %56, %60 : vector<256x128xf32>
    %c2_66 = arith.constant 2 : index
    %c2_67 = arith.constant 2 : index
    %c0_68 = arith.constant 0 : index
    %62 = vector.load %arg9[%c2_66, %c2_67, %c0_68] : memref<18x18x128xbf16, #tpu.memory_space<vmem>>, vector<16x16x128xbf16>
    %63 = vector.shape_cast %62 : vector<16x16x128xbf16> to vector<256x128xbf16>
    %c1024 = arith.constant 1024 : index
    %c0_69 = arith.constant 0 : index
    %64 = vector.load %arg4[%c1024, %c0_69] : memref<1152x128xbf16, #tpu.memory_space<vmem>>, vector<128x128xbf16>
    %cst_70 = arith.constant dense<0.000000e+00> : vector<256x128xf32>
    %65 = tpu.matmul %63, %64, %cst_70 {dimension_numbers = #tpu.dot_dimension_numbers<[1], [0], [0], [1], [0, 0, 1, 1], [], []>} : vector<256x128xbf16>, vector<128x128xbf16>, vector<256x128xf32> -> vector<256x128xf32>
    %66 = arith.addf %61, %65 : vector<256x128xf32>
    %c0_71 = arith.constant 0 : index
    %c0_72 = arith.constant 0 : index
    %67 = vector.load %arg5[%c0_71, %c0_72] : memref<1x128xf32, #tpu.memory_space<vmem>>, vector<1x128xf32>
    %68 = vector.broadcast %67 : vector<1x128xf32> to vector<256x128xf32>
    %69 = arith.addf %66, %68 : vector<256x128xf32>
    %cst_73 = arith.constant 0.000000e+00 : f32
    %70 = vector.broadcast %cst_73 : f32 to vector<256x128xf32>
    %71 = arith.maximumf %69, %70 : vector<256x128xf32>
    %72 = arith.truncf %71 : vector<256x128xf32> to vector<256x128xbf16>
    %c0_74 = arith.constant 0 : index
    %c0_75 = arith.constant 0 : index
    %73 = vector.load %arg6[%c0_74, %c0_75] : memref<128x128xbf16, #tpu.memory_space<vmem>>, vector<128x128xbf16>
    %cst_76 = arith.constant dense<0.000000e+00> : vector<256x128xf32>
    %74 = tpu.matmul %72, %73, %cst_76 {dimension_numbers = #tpu.dot_dimension_numbers<[1], [0], [0], [1], [0, 0, 1, 1], [], []>} : vector<256x128xbf16>, vector<128x128xbf16>, vector<256x128xf32> -> vector<256x128xf32>
    %c0_77 = arith.constant 0 : index
    %c0_78 = arith.constant 0 : index
    %c0_79 = arith.constant 0 : index
    %c0_80 = arith.constant 0 : index
    %75 = vector.load %arg1[%c0_77, %c0_78, %c0_79, %c0_80] : memref<1x16x16x128xbf16, #tpu.memory_space<vmem>>, vector<1x16x16x128xbf16>
    %76 = vector.shape_cast %75 : vector<1x16x16x128xbf16> to vector<16x16x128xbf16>
    %77 = vector.shape_cast %76 : vector<16x16x128xbf16> to vector<256x128xbf16>
    %78 = arith.extf %77 : vector<256x128xbf16> to vector<256x128xf32>
    %c0_81 = arith.constant 0 : index
    %c0_82 = arith.constant 0 : index
    %79 = vector.load %arg7[%c0_81, %c0_82] : memref<1x128xf32, #tpu.memory_space<vmem>>, vector<1x128xf32>
    %80 = vector.broadcast %79 : vector<1x128xf32> to vector<256x128xf32>
    %81 = arith.addf %74, %80 : vector<256x128xf32>
    %82 = arith.addf %81, %78 : vector<256x128xf32>
    %cst_83 = arith.constant 0.000000e+00 : f32
    %83 = vector.broadcast %cst_83 : f32 to vector<256x128xf32>
    %84 = arith.maximumf %82, %83 : vector<256x128xf32>
    %85 = vector.shape_cast %84 : vector<256x128xf32> to vector<16x16x128xf32>
    %86 = arith.truncf %85 : vector<16x16x128xf32> to vector<16x16x128xbf16>
    %c0_84 = arith.constant 0 : index
    %c0_85 = arith.constant 0 : index
    %c0_86 = arith.constant 0 : index
    %c0_87 = arith.constant 0 : index
    %87 = vector.load %arg8[%c0_84, %c0_85, %c0_86, %c0_87] : memref<1x16x16x128xbf16, #tpu.memory_space<vmem>>, vector<1x16x16x128xbf16>
    %88 = vector.shape_cast %87 : vector<1x16x16x128xbf16> to vector<16x16x128xbf16>
    %89 = vector.shape_cast %86 : vector<16x16x128xbf16> to vector<1x16x16x128xbf16>
    tpu.vector_store %arg8[%c0_84, %c0_85, %c0_86, %c0_87], %89 {strides = array<i32>} : memref<1x16x16x128xbf16, #tpu.memory_space<vmem>>, vector<1x16x16x128xbf16>,
    return
  }
  func.func @transform_0(%arg0: i32) -> (i32, i32, i32, i32) {
    %c0_i32 = arith.constant 0 : i32
    %c0_i32_0 = arith.constant 0 : i32
    %c0_i32_1 = arith.constant 0 : i32
    %c0_i32_2 = arith.constant 0 : i32
    return %arg0, %c0_i32, %c0_i32_0, %c0_i32_1 : i32, i32, i32, i32
  }
  func.func @transform_1(%arg0: i32) -> (i32, i32) {
    %c0_i32 = arith.constant 0 : i32
    %c0_i32_0 = arith.constant 0 : i32
    %c0_i32_1 = arith.constant 0 : i32
    return %c0_i32, %c0_i32_0 : i32, i32
  }
  func.func @transform_2(%arg0: i32) -> (i32, i32) {
    %c0_i32 = arith.constant 0 : i32
    %c0_i32_0 = arith.constant 0 : i32
    %c0_i32_1 = arith.constant 0 : i32
    return %c0_i32, %c0_i32_0 : i32, i32
  }
  func.func @transform_3(%arg0: i32) -> (i32, i32) {
    %c0_i32 = arith.constant 0 : i32
    %c0_i32_0 = arith.constant 0 : i32
    %c0_i32_1 = arith.constant 0 : i32
    return %c0_i32, %c0_i32_0 : i32, i32
  }
  func.func @transform_4(%arg0: i32) -> (i32, i32) {
    %c0_i32 = arith.constant 0 : i32
    %c0_i32_0 = arith.constant 0 : i32
    %c0_i32_1 = arith.constant 0 : i32
    return %c0_i32, %c0_i32_0 : i32, i32
  }
  func.func @transform_5(%arg0: i32) -> (i32, i32) {
    %c0_i32 = arith.constant 0 : i32
    %c0_i32_0 = arith.constant 0 : i32
    %c0_i32_1 = arith.constant 0 : i32
    return %c0_i32, %c0_i32_0 : i32, i32
  }
  func.func @transform_6(%arg0: i32) -> (i32, i32) {
    %c0_i32 = arith.constant 0 : i32
    %c0_i32_0 = arith.constant 0 : i32
    %c0_i32_1 = arith.constant 0 : i32
    return %c0_i32, %c0_i32_0 : i32, i32
  }
  func.func @transform_7(%arg0: i32) -> (i32, i32, i32, i32) {
    %c0_i32 = arith.constant 0 : i32
    %c0_i32_0 = arith.constant 0 : i32
    %c0_i32_1 = arith.constant 0 : i32
    %c0_i32_2 = arith.constant 0 : i32
    return %arg0, %c0_i32, %c0_i32_0, %c0_i32_1 : i32, i32, i32, i32
  }
}

module attributes {stable_mosaic.version = 11 : i64} {
  func.func @_bottleneck_kernel(%arg0: i32, %arg1: memref<1x16x16x128xbf16, #tpu.memory_space<vmem>>, %arg2: memref<128x128xbf16, #tpu.memory_space<vmem>>, %arg3: memref<1x128xf32, #tpu.memory_space<vmem>>, %arg4: memref<1152x128xbf16, #tpu.memory_space<vmem>>, %arg5: memref<1x128xf32, #tpu.memory_space<vmem>>, %arg6: memref<128x128xbf16, #tpu.memory_space<vmem>>, %arg7: memref<1x128xf32, #tpu.memory_space<vmem>>, %arg8: memref<1x16x16x128xbf16, #tpu.memory_space<vmem>>, %arg9: memref<18x18x128xbf16, #tpu.memory_space<vmem>>) attributes {dimension_semantics = [#tpu.dimension_semantics<parallel>], iteration_bounds = array<i64: 2>, scalar_prefetch = 0 : i64, scratch_operands = 1 : i64, tpu.core_type = #tpu.core_type<tc>, window_params = [{transform_indices = @transform_0, window_bounds = array<i64: 1, 16, 16, 128>}, {pipeline_mode = #tpu.pipeline_mode<synchronous>, transform_indices = @transform_1, window_bounds = array<i64: 128, 128>}, {pipeline_mode = #tpu.pipeline_mode<synchronous>, transform_indices = @transform_2, window_bounds = array<i64: 1, 128>}, {pipeline_mode = #tpu.pipeline_mode<synchronous>, transform_indices = @transform_3, window_bounds = array<i64: 1152, 128>}, {pipeline_mode = #tpu.pipeline_mode<synchronous>, transform_indices = @transform_4, window_bounds = array<i64: 1, 128>}, {pipeline_mode = #tpu.pipeline_mode<synchronous>, transform_indices = @transform_5, window_bounds = array<i64: 128, 128>}, {pipeline_mode = #tpu.pipeline_mode<synchronous>, transform_indices = @transform_6, window_bounds = array<i64: 1, 128>}, {transform_indices = @transform_7, window_bounds = array<i64: 1, 16, 16, 128>}]} {
    %c0 = arith.constant 0 : index
    %c0_0 = arith.constant 0 : index
    %c0_1 = arith.constant 0 : index
    %c0_2 = arith.constant 0 : index
    %0 = vector.load %arg1[%c0, %c0_0, %c0_1, %c0_2] : memref<1x16x16x128xbf16, #tpu.memory_space<vmem>>, vector<1x16x16x128xbf16>
    %1 = vector.shape_cast %0 : vector<1x16x16x128xbf16> to vector<16x16x128xbf16>
    %2 = vector.shape_cast %1 : vector<16x16x128xbf16> to vector<256x128xbf16>
    %c0_3 = arith.constant 0 : index
    %c0_4 = arith.constant 0 : index
    %3 = vector.load %arg2[%c0_3, %c0_4] : memref<128x128xbf16, #tpu.memory_space<vmem>>, vector<128x128xbf16>
    %cst = arith.constant dense<0.000000e+00> : vector<256x128xf32>
    %4 = tpu.matmul %2, %3, %cst {dimension_numbers = #tpu.dot_dimension_numbers<[1], [0], [0], [1], [0, 0, 1, 1], [], []>} : vector<256x128xbf16>, vector<128x128xbf16>, vector<256x128xf32> -> vector<256x128xf32>
    %c0_5 = arith.constant 0 : index
    %c0_6 = arith.constant 0 : index
    %5 = vector.load %arg3[%c0_5, %c0_6] : memref<1x128xf32, #tpu.memory_space<vmem>>, vector<1x128xf32>
    %6 = vector.broadcast %5 : vector<1x128xf32> to vector<256x128xf32>
    %7 = arith.addf %4, %6 : vector<256x128xf32>
    %cst_7 = arith.constant 0.000000e+00 : f32
    %8 = vector.broadcast %cst_7 : f32 to vector<256x128xf32>
    %9 = arith.maximumf %7, %8 : vector<256x128xf32>
    %cst_8 = arith.constant 0.000000e+00 : bf16
    %10 = vector.broadcast %cst_8 : bf16 to vector<1x18x128xbf16>
    %c0_9 = arith.constant 0 : index
    %c0_10 = arith.constant 0 : index
    %c0_11 = arith.constant 0 : index
    %11 = vector.load %arg9[%c0_9, %c0_10, %c0_11] : memref<18x18x128xbf16, #tpu.memory_space<vmem>>, vector<1x18x128xbf16>
    tpu.vector_store %arg9[%c0_9, %c0_10, %c0_11], %10 {strides = array<i32>} : memref<18x18x128xbf16, #tpu.memory_space<vmem>>, vector<1x18x128xbf16>,
    %cst_12 = arith.constant 0.000000e+00 : bf16
    %12 = vector.broadcast %cst_12 : bf16 to vector<1x18x128xbf16>
    %c17 = arith.constant 17 : index
    %c0_13 = arith.constant 0 : index
    %c0_14 = arith.constant 0 : index
    %13 = vector.load %arg9[%c17, %c0_13, %c0_14] : memref<18x18x128xbf16, #tpu.memory_space<vmem>>, vector<1x18x128xbf16>
    tpu.vector_store %arg9[%c17, %c0_13, %c0_14], %12 {strides = array<i32>} : memref<18x18x128xbf16, #tpu.memory_space<vmem>>, vector<1x18x128xbf16>,
    %cst_15 = arith.constant 0.000000e+00 : bf16
    %14 = vector.broadcast %cst_15 : bf16 to vector<16x1x128xbf16>
    %c1 = arith.constant 1 : index
    %c0_16 = arith.constant 0 : index
    %c0_17 = arith.constant 0 : index
    %15 = vector.load %arg9[%c1, %c0_16, %c0_17] : memref<18x18x128xbf16, #tpu.memory_space<vmem>>, vector<16x1x128xbf16>
    tpu.vector_store %arg9[%c1, %c0_16, %c0_17], %14 {strides = array<i32>} : memref<18x18x128xbf16, #tpu.memory_space<vmem>>, vector<16x1x128xbf16>,
    %cst_18 = arith.constant 0.000000e+00 : bf16
    %16 = vector.broadcast %cst_18 : bf16 to vector<16x1x128xbf16>
    %c1_19 = arith.constant 1 : index
    %c17_20 = arith.constant 17 : index
    %c0_21 = arith.constant 0 : index
    %17 = vector.load %arg9[%c1_19, %c17_20, %c0_21] : memref<18x18x128xbf16, #tpu.memory_space<vmem>>, vector<16x1x128xbf16>
    tpu.vector_store %arg9[%c1_19, %c17_20, %c0_21], %16 {strides = array<i32>} : memref<18x18x128xbf16, #tpu.memory_space<vmem>>, vector<16x1x128xbf16>,
    %18 = vector.shape_cast %9 : vector<256x128xf32> to vector<16x16x128xf32>
    %19 = arith.truncf %18 : vector<16x16x128xf32> to vector<16x16x128xbf16>
    %c1_22 = arith.constant 1 : index
    %c1_23 = arith.constant 1 : index
    %c0_24 = arith.constant 0 : index
    %20 = vector.load %arg9[%c1_22, %c1_23, %c0_24] : memref<18x18x128xbf16, #tpu.memory_space<vmem>>, vector<16x16x128xbf16>
    tpu.vector_store %arg9[%c1_22, %c1_23, %c0_24], %19 {strides = array<i32>} : memref<18x18x128xbf16, #tpu.memory_space<vmem>>, vector<16x16x128xbf16>,
    %cst_25 = arith.constant 0.000000e+00 : f32
    %21 = vector.broadcast %cst_25 : f32 to vector<256x128xf32>
    %c0_26 = arith.constant 0 : index
    %c0_27 = arith.constant 0 : index
    %c0_28 = arith.constant 0 : index
    %22 = vector.load %arg9[%c0_26, %c0_27, %c0_28] : memref<18x18x128xbf16, #tpu.memory_space<vmem>>, vector<16x16x128xbf16>
    %23 = vector.shape_cast %22 : vector<16x16x128xbf16> to vector<256x128xbf16>
    %c0_29 = arith.constant 0 : index
    %c0_30 = arith.constant 0 : index
    %24 = vector.load %arg4[%c0_29, %c0_30] : memref<1152x128xbf16, #tpu.memory_space<vmem>>, vector<128x128xbf16>
    %cst_31 = arith.constant dense<0.000000e+00> : vector<256x128xf32>
    %25 = tpu.matmul %23, %24, %cst_31 {dimension_numbers = #tpu.dot_dimension_numbers<[1], [0], [0], [1], [0, 0, 1, 1], [], []>} : vector<256x128xbf16>, vector<128x128xbf16>, vector<256x128xf32> -> vector<256x128xf32>
    %26 = arith.addf %21, %25 : vector<256x128xf32>
    %c0_32 = arith.constant 0 : index
    %c1_33 = arith.constant 1 : index
    %c0_34 = arith.constant 0 : index
    %27 = vector.load %arg9[%c0_32, %c1_33, %c0_34] : memref<18x18x128xbf16, #tpu.memory_space<vmem>>, vector<16x16x128xbf16>
    %28 = vector.shape_cast %27 : vector<16x16x128xbf16> to vector<256x128xbf16>
    %c128 = arith.constant 128 : index
    %c0_35 = arith.constant 0 : index
    %29 = vector.load %arg4[%c128, %c0_35] : memref<1152x128xbf16, #tpu.memory_space<vmem>>, vector<128x128xbf16>
    %cst_36 = arith.constant dense<0.000000e+00> : vector<256x128xf32>
    %30 = tpu.matmul %28, %29, %cst_36 {dimension_numbers = #tpu.dot_dimension_numbers<[1], [0], [0], [1], [0, 0, 1, 1], [], []>} : vector<256x128xbf16>, vector<128x128xbf16>, vector<256x128xf32> -> vector<256x128xf32>
    %31 = arith.addf %26, %30 : vector<256x128xf32>
    %c0_37 = arith.constant 0 : index
    %c2 = arith.constant 2 : index
    %c0_38 = arith.constant 0 : index
    %32 = vector.load %arg9[%c0_37, %c2, %c0_38] : memref<18x18x128xbf16, #tpu.memory_space<vmem>>, vector<16x16x128xbf16>
    %33 = vector.shape_cast %32 : vector<16x16x128xbf16> to vector<256x128xbf16>
    %c256 = arith.constant 256 : index
    %c0_39 = arith.constant 0 : index
    %34 = vector.load %arg4[%c256, %c0_39] : memref<1152x128xbf16, #tpu.memory_space<vmem>>, vector<128x128xbf16>
    %cst_40 = arith.constant dense<0.000000e+00> : vector<256x128xf32>
    %35 = tpu.matmul %33, %34, %cst_40 {dimension_numbers = #tpu.dot_dimension_numbers<[1], [0], [0], [1], [0, 0, 1, 1], [], []>} : vector<256x128xbf16>, vector<128x128xbf16>, vector<256x128xf32> -> vector<256x128xf32>
    %36 = arith.addf %31, %35 : vector<256x128xf32>
    %c1_41 = arith.constant 1 : index
    %c0_42 = arith.constant 0 : index
    %c0_43 = arith.constant 0 : index
    %37 = vector.load %arg9[%c1_41, %c0_42, %c0_43] : memref<18x18x128xbf16, #tpu.memory_space<vmem>>, vector<16x16x128xbf16>
    %38 = vector.shape_cast %37 : vector<16x16x128xbf16> to vector<256x128xbf16>
    %c384 = arith.constant 384 : index
    %c0_44 = arith.constant 0 : index
    %39 = vector.load %arg4[%c384, %c0_44] : memref<1152x128xbf16, #tpu.memory_space<vmem>>, vector<128x128xbf16>
    %cst_45 = arith.constant dense<0.000000e+00> : vector<256x128xf32>
    %40 = tpu.matmul %38, %39, %cst_45 {dimension_numbers = #tpu.dot_dimension_numbers<[1], [0], [0], [1], [0, 0, 1, 1], [], []>} : vector<256x128xbf16>, vector<128x128xbf16>, vector<256x128xf32> -> vector<256x128xf32>
    %41 = arith.addf %36, %40 : vector<256x128xf32>
    %c1_46 = arith.constant 1 : index
    %c1_47 = arith.constant 1 : index
    %c0_48 = arith.constant 0 : index
    %42 = vector.load %arg9[%c1_46, %c1_47, %c0_48] : memref<18x18x128xbf16, #tpu.memory_space<vmem>>, vector<16x16x128xbf16>
    %43 = vector.shape_cast %42 : vector<16x16x128xbf16> to vector<256x128xbf16>
    %c512 = arith.constant 512 : index
    %c0_49 = arith.constant 0 : index
    %44 = vector.load %arg4[%c512, %c0_49] : memref<1152x128xbf16, #tpu.memory_space<vmem>>, vector<128x128xbf16>
    %cst_50 = arith.constant dense<0.000000e+00> : vector<256x128xf32>
    %45 = tpu.matmul %43, %44, %cst_50 {dimension_numbers = #tpu.dot_dimension_numbers<[1], [0], [0], [1], [0, 0, 1, 1], [], []>} : vector<256x128xbf16>, vector<128x128xbf16>, vector<256x128xf32> -> vector<256x128xf32>
    %46 = arith.addf %41, %45 : vector<256x128xf32>
    %c1_51 = arith.constant 1 : index
    %c2_52 = arith.constant 2 : index
    %c0_53 = arith.constant 0 : index
    %47 = vector.load %arg9[%c1_51, %c2_52, %c0_53] : memref<18x18x128xbf16, #tpu.memory_space<vmem>>, vector<16x16x128xbf16>
    %48 = vector.shape_cast %47 : vector<16x16x128xbf16> to vector<256x128xbf16>
    %c640 = arith.constant 640 : index
    %c0_54 = arith.constant 0 : index
    %49 = vector.load %arg4[%c640, %c0_54] : memref<1152x128xbf16, #tpu.memory_space<vmem>>, vector<128x128xbf16>
    %cst_55 = arith.constant dense<0.000000e+00> : vector<256x128xf32>
    %50 = tpu.matmul %48, %49, %cst_55 {dimension_numbers = #tpu.dot_dimension_numbers<[1], [0], [0], [1], [0, 0, 1, 1], [], []>} : vector<256x128xbf16>, vector<128x128xbf16>, vector<256x128xf32> -> vector<256x128xf32>
    %51 = arith.addf %46, %50 : vector<256x128xf32>
    %c2_56 = arith.constant 2 : index
    %c0_57 = arith.constant 0 : index
    %c0_58 = arith.constant 0 : index
    %52 = vector.load %arg9[%c2_56, %c0_57, %c0_58] : memref<18x18x128xbf16, #tpu.memory_space<vmem>>, vector<16x16x128xbf16>
    %53 = vector.shape_cast %52 : vector<16x16x128xbf16> to vector<256x128xbf16>
    %c768 = arith.constant 768 : index
    %c0_59 = arith.constant 0 : index
    %54 = vector.load %arg4[%c768, %c0_59] : memref<1152x128xbf16, #tpu.memory_space<vmem>>, vector<128x128xbf16>
    %cst_60 = arith.constant dense<0.000000e+00> : vector<256x128xf32>
    %55 = tpu.matmul %53, %54, %cst_60 {dimension_numbers = #tpu.dot_dimension_numbers<[1], [0], [0], [1], [0, 0, 1, 1], [], []>} : vector<256x128xbf16>, vector<128x128xbf16>, vector<256x128xf32> -> vector<256x128xf32>
    %56 = arith.addf %51, %55 : vector<256x128xf32>
    %c2_61 = arith.constant 2 : index
    %c1_62 = arith.constant 1 : index
    %c0_63 = arith.constant 0 : index
    %57 = vector.load %arg9[%c2_61, %c1_62, %c0_63] : memref<18x18x128xbf16, #tpu.memory_space<vmem>>, vector<16x16x128xbf16>
    %58 = vector.shape_cast %57 : vector<16x16x128xbf16> to vector<256x128xbf16>
    %c896 = arith.constant 896 : index
    %c0_64 = arith.constant 0 : index
    %59 = vector.load %arg4[%c896, %c0_64] : memref<1152x128xbf16, #tpu.memory_space<vmem>>, vector<128x128xbf16>
    %cst_65 = arith.constant dense<0.000000e+00> : vector<256x128xf32>
    %60 = tpu.matmul %58, %59, %cst_65 {dimension_numbers = #tpu.dot_dimension_numbers<[1], [0], [0], [1], [0, 0, 1, 1], [], []>} : vector<256x128xbf16>, vector<128x128xbf16>, vector<256x128xf32> -> vector<256x128xf32>
    %61 = arith.addf %56, %60 : vector<256x128xf32>
    %c2_66 = arith.constant 2 : index
    %c2_67 = arith.constant 2 : index
    %c0_68 = arith.constant 0 : index
    %62 = vector.load %arg9[%c2_66, %c2_67, %c0_68] : memref<18x18x128xbf16, #tpu.memory_space<vmem>>, vector<16x16x128xbf16>
    %63 = vector.shape_cast %62 : vector<16x16x128xbf16> to vector<256x128xbf16>
    %c1024 = arith.constant 1024 : index
    %c0_69 = arith.constant 0 : index
    %64 = vector.load %arg4[%c1024, %c0_69] : memref<1152x128xbf16, #tpu.memory_space<vmem>>, vector<128x128xbf16>
    %cst_70 = arith.constant dense<0.000000e+00> : vector<256x128xf32>
    %65 = tpu.matmul %63, %64, %cst_70 {dimension_numbers = #tpu.dot_dimension_numbers<[1], [0], [0], [1], [0, 0, 1, 1], [], []>} : vector<256x128xbf16>, vector<128x128xbf16>, vector<256x128xf32> -> vector<256x128xf32>
    %66 = arith.addf %61, %65 : vector<256x128xf32>
    %c0_71 = arith.constant 0 : index
    %c0_72 = arith.constant 0 : index
    %67 = vector.load %arg5[%c0_71, %c0_72] : memref<1x128xf32, #tpu.memory_space<vmem>>, vector<1x128xf32>
    %68 = vector.broadcast %67 : vector<1x128xf32> to vector<256x128xf32>
    %69 = arith.addf %66, %68 : vector<256x128xf32>
    %cst_73 = arith.constant 0.000000e+00 : f32
    %70 = vector.broadcast %cst_73 : f32 to vector<256x128xf32>
    %71 = arith.maximumf %69, %70 : vector<256x128xf32>
    %72 = arith.truncf %71 : vector<256x128xf32> to vector<256x128xbf16>
    %c0_74 = arith.constant 0 : index
    %c0_75 = arith.constant 0 : index
    %73 = vector.load %arg6[%c0_74, %c0_75] : memref<128x128xbf16, #tpu.memory_space<vmem>>, vector<128x128xbf16>
    %cst_76 = arith.constant dense<0.000000e+00> : vector<256x128xf32>
    %74 = tpu.matmul %72, %73, %cst_76 {dimension_numbers = #tpu.dot_dimension_numbers<[1], [0], [0], [1], [0, 0, 1, 1], [], []>} : vector<256x128xbf16>, vector<128x128xbf16>, vector<256x128xf32> -> vector<256x128xf32>
    %c0_77 = arith.constant 0 : index
    %c0_78 = arith.constant 0 : index
    %c0_79 = arith.constant 0 : index
    %c0_80 = arith.constant 0 : index
    %75 = vector.load %arg1[%c0_77, %c0_78, %c0_79, %c0_80] : memref<1x16x16x128xbf16, #tpu.memory_space<vmem>>, vector<1x16x16x128xbf16>
    %76 = vector.shape_cast %75 : vector<1x16x16x128xbf16> to vector<16x16x128xbf16>
    %77 = vector.shape_cast %76 : vector<16x16x128xbf16> to vector<256x128xbf16>
    %78 = arith.extf %77 : vector<256x128xbf16> to vector<256x128xf32>
    %c0_81 = arith.constant 0 : index
    %c0_82 = arith.constant 0 : index
    %79 = vector.load %arg7[%c0_81, %c0_82] : memref<1x128xf32, #tpu.memory_space<vmem>>, vector<1x128xf32>
    %80 = vector.broadcast %79 : vector<1x128xf32> to vector<256x128xf32>
    %81 = arith.addf %74, %80 : vector<256x128xf32>
    %82 = arith.addf %81, %78 : vector<256x128xf32>
    %cst_83 = arith.constant 0.000000e+00 : f32
    %83 = vector.broadcast %cst_83 : f32 to vector<256x128xf32>
    %84 = arith.maximumf %82, %83 : vector<256x128xf32>
    %85 = vector.shape_cast %84 : vector<256x128xf32> to vector<16x16x128xf32>
    %86 = arith.truncf %85 : vector<16x16x128xf32> to vector<16x16x128xbf16>
    %c0_84 = arith.constant 0 : index
    %c0_85 = arith.constant 0 : index
    %c0_86 = arith.constant 0 : index
    %c0_87 = arith.constant 0 : index
    %87 = vector.load %arg8[%c0_84, %c0_85, %c0_86, %c0_87] : memref<1x16x16x128xbf16, #tpu.memory_space<vmem>>, vector<1x16x16x128xbf16>
    %88 = vector.shape_cast %87 : vector<1x16x16x128xbf16> to vector<16x16x128xbf16>
    %89 = vector.shape_cast %86 : vector<16x16x128xbf16> to vector<1x16x16x128xbf16>
    tpu.vector_store %arg8[%c0_84, %c0_85, %c0_86, %c0_87], %89 {strides = array<i32>} : memref<1x16x16x128xbf16, #tpu.memory_space<vmem>>, vector<1x16x16x128xbf16>,
    return
  }
  func.func @transform_0(%arg0: i32) -> (i32, i32, i32, i32) {
    %c0_i32 = arith.constant 0 : i32
    %c0_i32_0 = arith.constant 0 : i32
    %c0_i32_1 = arith.constant 0 : i32
    %c0_i32_2 = arith.constant 0 : i32
    return %arg0, %c0_i32, %c0_i32_0, %c0_i32_1 : i32, i32, i32, i32
  }
  func.func @transform_1(%arg0: i32) -> (i32, i32) {
    %c0_i32 = arith.constant 0 : i32
    %c0_i32_0 = arith.constant 0 : i32
    %c0_i32_1 = arith.constant 0 : i32
    return %c0_i32, %c0_i32_0 : i32, i32
  }
  func.func @transform_2(%arg0: i32) -> (i32, i32) {
    %c0_i32 = arith.constant 0 : i32
    %c0_i32_0 = arith.constant 0 : i32
    %c0_i32_1 = arith.constant 0 : i32
    return %c0_i32, %c0_i32_0 : i32, i32
  }
  func.func @transform_3(%arg0: i32) -> (i32, i32) {
    %c0_i32 = arith.constant 0 : i32
    %c0_i32_0 = arith.constant 0 : i32
    %c0_i32_1 = arith.constant 0 : i32
    return %c0_i32, %c0_i32_0 : i32, i32
  }
  func.func @transform_4(%arg0: i32) -> (i32, i32) {
    %c0_i32 = arith.constant 0 : i32
    %c0_i32_0 = arith.constant 0 : i32
    %c0_i32_1 = arith.constant 0 : i32
    return %c0_i32, %c0_i32_0 : i32, i32
  }
  func.func @transform_5(%arg0: i32) -> (i32, i32) {
    %c0_i32 = arith.constant 0 : i32
    %c0_i32_0 = arith.constant 0 : i32
    %c0_i32_1 = arith.constant 0 : i32
    return %c0_i32, %c0_i32_0 : i32, i32
  }
  func.func @transform_6(%arg0: i32) -> (i32, i32) {
    %c0_i32 = arith.constant 0 : i32
    %c0_i32_0 = arith.constant 0 : i32
    %c0_i32_1 = arith.constant 0 : i32
    return %c0_i32, %c0_i32_0 : i32, i32
  }
  func.func @transform_7(%arg0: i32) -> (i32, i32, i32, i32) {
    %c0_i32 = arith.constant 0 : i32
    %c0_i32_0 = arith.constant 0 : i32
    %c0_i32_1 = arith.constant 0 : i32
    %c0_i32_2 = arith.constant 0 : i32
    return %arg0, %c0_i32, %c0_i32_0, %c0_i32_1 : i32, i32, i32, i32
  }
}

</mosaic_0001>

<bundles_post_ra>
// kernel: tpu_custom_call.1
= control target key start
LH: loop header
LB: loop body
LE: loop exit
PB: predicated region body
PF: predicated region fallthrough
CT: control target
= control target key end

     0   :  { %s11423_s0 = inlined_call_operand.hbm [shape: bf16[2,16,16,128], index: 0, kind: input, shape index: {}]   ;;  %s11424_s1 = inlined_call_operand.hbm [shape: bf16[128,128], index: 1, kind: input, shape index: {}]   ;;  %s11425_s2 = inlined_call_operand.vmem [shape: f32[1,128], index: 2, kind: input, shape index: {}]   ;;  %s11426_s3 = inlined_call_operand.hbm [shape: bf16[1152,128], index: 3, kind: input, shape index: {}]   ;;  %s11427_s4 = inlined_call_operand.vmem [shape: f32[1,128], index: 4, kind: input, shape index: {}]   ;;  %s11428_s5 = inlined_call_operand.hbm [shape: bf16[128,128], index: 5, kind: input, shape index: {}]   ;;  %s11429_s6 = inlined_call_operand.vmem [shape: f32[1,128], index: 6, kind: input, shape index: {}]   ;;  %s11430_s7 = inlined_call_operand.hbm [shape: bf16[2,16,16,128], index: 7, kind: output, shape index: {}]  }
   0x1   :  { %11445 = sst [smem:[#allocation49_spill]] %s11424_s1 }
   0x2   :  { %12 = vsyncpa [#allocation4], 0 }
   0x3   :  { %14 = vsyncpa [#allocation4 + $0x1], 0 }
   0x4   :  { %15 = vsyncpa [#allocation7], 0 }
   0x5   :  { %16 = vsyncpa [#allocation10], 0 }
   0x6   :  { %17 = vsyncpa [#allocation5], 0 }
   0x7   :  { %19 = vsyncpa [#allocation5 + $0x1], 0  ;;  %s8801_s24 = smov 0   ;;  %s8803_s25 = smov 0  }
   0x8   :  { %s8805_s26 = smov 0   ;;  %s8807_s27 = smov 0  }
   0x9 LB: > { %s8822_s28 = sadd.s32 4294967295, %s8749_s27   ;;  %s6898_s29 = sadd.s32 4294967294, %s8749_s27   ;;  %s8749_s27 = sphi %s8807_s27, %s11607_s27   ;;  %s8745_s26 = sphi %s8805_s26, %s11606_s26   ;;  %s8741_s25 = sphi %s8803_s25, %s11605_s25   ;;  %s8737_s24 = sphi %s8801_s24, %s11604_s24  }
   0xa   : > { %p45_p0 = scmp.ne.s32.totalorder %s8741_s25, %s8737_s24  ;;  %p11431_p1 = scmp.eq.s32.totalorder %s8822_s28, 0 }
   0xb   : > { %p195_p2 = scmp.eq.s32.totalorder %s8822_s28, 1  ;;  %p201_p3 = scmp.eq.s32.totalorder %s6898_s29, 1 }
   0xc   : > { %p8831_p4 = por %p11431_p1, %p45_p0  ;;  %p6899_p5 = scmp.ge.s32.totalorder %s8749_s27, 1 }
   0xd   : > { %p8836_p6 = por %p201_p3, %p45_p0  ;;  %p208_p7 = scmp.lt.s32.totalorder %s8749_s27, 3 }
   0xe   : > { %s11446_s30 = scalar_select %p8831_p4, 1, 0 }
   0xf   : > { %s11447_s8 = scalar_select %p8836_p6, 1, 0 }
  0x10   : > { %p8841_p8 = pnand %p6899_p5, %p208_p7  ;;  %s8751_s10 = smov [#allocation6]  }
  0x11   : > { %s220_s11 = sshll.u32 %s8751_s10, 4  ;;  %s8752_s13 = smov [#allocation8]   ;;  %s221_s11 = int_to_ptr.vmem [resolvable:$true] %s220_s11 }
  0x12   : > { %s11448_s9 = scalar_select %p8841_p8, 1, 0 }
  0x13   : > { %p8345_p9 = pneg %p8841_p8  ;;  %s236_s14 = sshll.u32 %s8752_s13, 4  ;;  %s237_s14 = int_to_ptr.vmem [resolvable:$true] %s236_s14 }
  0x14   : > { %s8753_s15 = smov [#allocation9]   ;;  %s8582_s17 = scalar_lea.vmem %s221_s11, 1024 }
  0x15   : > { %p8850_p11 = pnand %p8345_p9, %p11431_p1  ;;  %s252_s16 = sshll.u32 %s8753_s15, 4  ;;  %s253_s16 = int_to_ptr.vmem [resolvable:$true] %s252_s16 }
  0x16   : > { %p8583_p13 = scmp.ne.s32.totalorder %s221_s11, %s8582_s17  ;;  %p8590_p5 = scmp.lt.s32.totalorder %s221_s11, %s221_s11 }
  0x17   : > { %p8573_p12 = pneg %p8850_p11  ;;  %p8591_p7 = scmp.lt.s32.totalorder %s8582_s17, %s8582_s17 }
  0x19   : > { %p8585_p0 = pnand %p8583_p13, %p8573_p12  ;;  %p8592_p9 = por %p8591_p7, %p8590_p5 }
  0x1b   : > { %p8586_p3 = pneg %p8585_p0 }
  0x1d   : > { %p8593_p10 = pnand %p8592_p9, %p8586_p3 }
  0x1f   : > { %8596 = shalt.err (!%p8593_p10)
}
  0x20   : > { %s11432_s18 = smov 64   ;;  %s11433_s19 = smov 4  }
  0x21   : > { %s11450_s1 = sld [smem:[#allocation49_spill]]  ;;  %s8608_s22 = scalar_lea.vmem %s237_s14, 9216 }
  0x22   : > { %p8609_p13 = scmp.ne.s32.totalorder %s237_s14, %s8608_s22  ;;  %p8616_p3 = scmp.lt.s32.totalorder %s237_s14, %s237_s14 }
  0x23   : > { %p8617_p10 = scmp.lt.s32.totalorder %s8608_s22, %s8608_s22 }
  0x24   : > { %p8611_p0 = pnand %p8609_p13, %p8573_p12 }
  0x25   : > { %p8618_p7 = por %p8617_p10, %p8616_p3 }
  0x26   : > { %p8612_p5 = pneg %p8611_p0 }
  0x27   : > { %8348 = dma.hbm_to_vmem [thread:$0]  (!%p8850_p11), %s11450_s1, 1024, %s221_s11, [#allocation7], %s11432_s18, %s11432_s18, %s11433_s19  }
  0x28   : > { %p8619_p9 = pnand %p8618_p7, %p8612_p5 }
  0x2a   : > { %8622 = shalt.err (!%p8619_p9)
}
  0x2b   : > { %8351 = dma.hbm_to_vmem [thread:$0]  (!%p8850_p11), %s11426_s3, 9216, %s237_s14, [#allocation7], %s11432_s18, %s11432_s18, %s11433_s19  }
  0x2c   : > { %s8634_s10 = scalar_lea.vmem %s253_s16, 1024  ;;  %p8642_p3 = scmp.lt.s32.totalorder %s253_s16, %s253_s16 }
  0x2d   : > { %p8635_p1 = scmp.ne.s32.totalorder %s253_s16, %s8634_s10  ;;  %p8643_p5 = scmp.lt.s32.totalorder %s8634_s10, %s8634_s10 }
  0x2f   : > { %p8637_p13 = pnand %p8635_p1, %p8573_p12  ;;  %p8644_p10 = por %p8643_p5, %p8642_p3 }
  0x31   : > { %p8638_p0 = pneg %p8637_p13 }
  0x33   : > { %p8645_p7 = pnand %p8644_p10, %p8638_p0 }
  0x35   : > { %8648 = shalt.err (!%p8645_p7)
}
  0x36   : > { %8354 = dma.hbm_to_vmem [thread:$0]  (!%p8850_p11), %s11428_s5, 1024, %s253_s16, [#allocation10], %s11432_s18, %s11432_s18, %s11433_s19  }
  0x37   : > { %s8890_s14 = sadd.s32 1, %s8749_s27   ;;  %s32_s15 = sadd.s32 1, %s8745_s26 }
  0x38   : > { %s29_s12 = ssub.s32 %s8749_s27, %s8890_s14  ;;  %p39_p12 = scmp.ne.s32.totalorder %s8745_s26, %s8741_s25 }
  0x39   : > { %p30_p1 = scmp.eq.s32.totalorder %s29_s12, 0  ;;  %p40_p9 = scmp.eq.s32.totalorder %s8749_s27, 0 }
  0x3a   : > { %p8366_p13 = scmp.lt.s32.totalorder %s8749_s27, 2  ;;  %p8904_p3 = por %p195_p2, %p39_p12 }
  0x3b   : > { %s8900_s17 = scalar_select %p30_p1, %s8745_s26, %s32_s15  }
  0x3c   : > { %p41_p0 = por %p40_p9, %p39_p12  ;;  %s269_s21 = sand.u32 1, %s8745_s26  }
  0x3d   : > { %s11451_s20 = scalar_select %p8904_p3, 1, 0 }
  0x3e   : > { %s7281_s22 = sshll.u32 %s8749_s27, 11  ;;  %s6904_s16 = sshll.u32 %s269_s21, 7 }
  0x3f   : > { %s8913_s10 = scalar_lea.hbm %s11423_s0, %s7281_s22  ;;  %s273_s11 = scalar_lea.vmem [#allocation3], %s6904_s16 }
  0x40   : > { %s280_s13 = sshll.u32 %s273_s11, 4  ;;  %p8915_p11 = pnand %p8366_p13, %p41_p0  ;;  %s8919_s13 = int_to_ptr.vmem [resolvable:$true] %s280_s13 }
  0x41   : > { %s8921_s15 = scalar_lea.sflag [#allocation4], %s269_s21  ;;  %s8649_s18 = scalar_lea.hbm %s8913_s10, 2048 }
  0x42   : > { %p8650_p2 = scmp.ne.s32.totalorder %s8913_s10, %s8649_s18  ;;  %p8651_p5 = pneg %p8915_p11 }
  0x43   : > { %s8654_s16 = scalar_lea.hbm %s11423_s0, 4096  ;;  %p8655_p1 = scmp.lt.s32.totalorder %s8913_s10, %s11423_s0 }
  0x44   : > { %p8652_p10 = pnand %p8651_p5, %p8650_p2  ;;  %p8656_p12 = scmp.lt.s32.totalorder %s8654_s16, %s8649_s18 }
  0x46   : > { %p8653_p7 = pneg %p8652_p10  ;;  %p8657_p9 = por %p8656_p12, %p8655_p1 }
  0x48   : > { %p8658_p13 = pnand %p8657_p9, %p8653_p7 }
  0x4a   : > { %8661 = shalt.err (!%p8658_p13)
}
  0x4b   : > { %s8662_s21 = scalar_lea.vmem %s8919_s13, 2048  ;;  %s8756_s19 = smov [#allocation3]  }
  0x4c   : > { %p8663_p0 = scmp.ne.s32.totalorder %s8919_s13, %s8662_s21  ;;  %s8667_s1 = sshll.u32 %s8756_s19, 4  ;;  %s8668_s1 = int_to_ptr.vmem [resolvable:$false] %s8667_s1 }
  0x4d   : > { %s8669_s22 = scalar_lea.vmem %s8668_s1, 4096  ;;  %p8670_p10 = scmp.lt.s32.totalorder %s8919_s13, %s8668_s1 }
  0x4e   : > { %p8665_p6 = pnand %p8663_p0, %p8651_p5  ;;  %p8671_p3 = scmp.lt.s32.totalorder %s8669_s22, %s8662_s21 }
  0x50   : > { %p8666_p2 = pneg %p8665_p6  ;;  %p8672_p4 = por %p8671_p3, %p8670_p10 }
  0x52   : > { %p8673_p8 = pnand %p8672_p4, %p8666_p2 }
  0x54   : > { %8676 = shalt.err (!%p8673_p8)
}
  0x55   : > { %s11453_s18 = smov 4   ;;  %s11454_s23 = smov 64  }
  0x56   : > { %8358 = dma.hbm_to_vmem [thread:$0]  (!%p8915_p11), %s8913_s10, 2048, %s8919_s13, %s8921_s15, %s11454_s23, %s11454_s23, %s11453_s18  }
  0x57   : > { %p11455_p6 = scmp.ne.s32.totalorder %s11448_s9, 0 }
  0x59   : > { %292 = sbr.rel (%p11455_p6) target bundleno = 1172 (0x494), region = 48 }
  0x5e   : > { %s8948_s19 = sand.u32 1, %s8741_s25   ;;  %p11456_p4 = scmp.ne.s32.totalorder %s11446_s30, 0 }
  0x5f   : > { %s6908_s1 = sshll.u32 %s8948_s19, 7  ;;  %s295_s16 = scalar_lea.sflag [#allocation4], %s8948_s19 }
  0x60   : > { %s8954_s12 = scalar_lea.vmem [#allocation3], %s6908_s1 }
  0x61   : > { %8720 = dma.done.wait (%p11456_p4), %s295_s16, 2048  }
  0x62   : > { %8722 = vsyncadd (%p11456_p4), %s295_s16, 4294965248  ;;  %p11457_p8 = scmp.eq.s32.totalorder %s8822_s28, 0 }
  0x64   : > { %8724 = dma.done.wait (%p11457_p8), [#allocation7], 10240   ;;  %p11458_p3 = pmov %p11457_p8 }
  0x66   : > { %8726 = vsyncadd (%p11458_p3), [#allocation7], 4294957056  ;;  %p11459_p11 = pmov %p11458_p3 }
  0x67   : > { %p11460_p5 = pmov %p11458_p3 }
  0x68   : > { %8728 = dma.done.wait (%p11459_p11), [#allocation10], 1024  }
  0x69   : > { %8730 = vsyncadd (%p11460_p5), [#allocation10], 4294966272  ;;  %v8411_v0 = vld [vmem:[#allocation6 + $0x38] sm:$0xff]   ;;  %v8412_v1 = vld [vmem:[#allocation6 + $0x30] sm:$0xff]   ;;  %vm742_vm0 = vcmask 1040384   ;;  %v8757_v61 = vmov 0  }
  0x6a   : > { %7785 = vmatprep.subr.bf16.mxu0 %v8411_v0  ;;  %8313 = vmatprep.subr.bf16.mxu1 %v8411_v0  ;;  %v8413_v2 = vld [vmem:[#allocation6 + $0x28] sm:$0xff]   ;;  %v8414_v3 = vld [vmem:[#allocation6 + $0x20] sm:$0xff]   ;;  %v8415_v5 = vld [vmem:[#allocation6 + $0x18] sm:$0xff]   ;;  %vm743_vm1 = vsmask.f32 256  ;;  %vm1261_vm8 = vcmask 1043456  }
  0x6b   : > { %7786 = vmatpush3.bf16.msra.mxu0 %v8411_v0  ;;  %8321 = vmatpush3.bf16.msra.mxu1 %v8411_v0  ;;  %v8419_v4 = vld [vmem:[%s8954_s12] sm:$0xff]   ;;  %v8416_v7 = vld [vmem:[#allocation6 + $0x10] sm:$0xff]   ;;  %v8417_v8 = vld [vmem:[#allocation6 + $0x8] sm:$0xff]   ;;  %vm793_vm3 = vsmask.f32 7938  ;;  %vm2468_vm12 = vcmask 1042432  }
  0x6c   : > { %7787 = vmatprep.subr.bf16.mxu0 %v8412_v1  ;;  %8314 = vmatprep.subr.bf16.mxu1 %v8412_v1  ;;  %v8425_v6 = vld [vmem:[%s8954_s12 + $0x40] sm:$0xff]   ;;  %v8435_v10 = vld [vmem:[#allocation8 + $0x38] sm:$0xff]   ;;  %v8420_v11 = vld [vmem:[%s8954_s12 + $0x8] sm:$0xff]   ;;  %734 = vst [vmem:[#allocation2] sm:$0xf] %v8757_v61  ;;  %vm2469_vm13 = vcmask 1046532  }
  0x6d   : > { %7801 = vmatprep.mubr.bf16.mxu0 %v8419_v4  ;;  %7817 = vmatprep.mubr.bf16.mxu1 %v8425_v6  ;;  %v8418_v9 = vld [vmem:[#allocation6] sm:$0xff]   ;;  %v8426_v12 = vld [vmem:[%s8954_s12 + $0x48] sm:$0xff]   ;;  %v8421_v13 = vld [vmem:[%s8954_s12 + $0x10] sm:$0xff]   ;;  %735 = vst [vmem:[#allocation2 + $0x4] sm:$0xf] %v8757_v61  ;;  %s11317_s22 = scalar_lea.vmem [#allocation11], %s6908_s1 }
  0x6e   : > { %v8429_v14 = vld [vmem:[%s8954_s12 + $0x50] sm:$0xff]   ;;  %v8422_v15 = vld [vmem:[%s8954_s12 + $0x18] sm:$0xff]   ;;  %v8423_v17 = vld [vmem:[%s8954_s12 + $0x20] sm:$0xff]   ;;  %736 = vst [vmem:[#allocation2 + $0x8] sm:$0x1] %v8757_v61  ;;  %s7346_s18 = sshll.u32 %s8822_s28, 11 }
  0x6f   : > { %7788 = vmatpush3.bf16.msra.mxu0 %v8412_v1  ;;  %8322 = vmatpush3.bf16.msra.mxu1 %v8412_v1  ;;  %v8430_v16 = vld [vmem:[%s8954_s12 + $0x58] sm:$0xff]   ;;  %v8431_v18 = vld [vmem:[%s8954_s12 + $0x60] sm:$0xff]   ;;  %v8424_v19 = vld [vmem:[%s8954_s12 + $0x28] sm:$0xff]   ;;  %738 = vst [vmem:[#allocation2 + $0xcc] sm:$0xf] %v8757_v61  ;;  %s6796_s23 = sshll.u32 %s11317_s22, 4  ;;  %s11378_s23 = int_to_ptr.vmem [resolvable:$true] %s6796_s23 }
  0x70   : > { %7789 = vmatprep.subr.bf16.mxu0 %v8413_v2  ;;  %8315 = vmatprep.subr.bf16.mxu1 %v8413_v2  ;;  %v8432_v20 = vld [vmem:[%s8954_s12 + $0x68] sm:$0xff]   ;;  %v8427_v21 = vld [vmem:[%s8954_s12 + $0x30] sm:$0xff]   ;;  %v8428_v23 = vld [vmem:[%s8954_s12 + $0x38] sm:$0xff]   ;;  %739 = vst [vmem:[#allocation2 + $0xd0] sm:$0xf] %v8757_v61  ;;  %s6783_s30 = scalar_lea.sflag [#allocation5], %s8948_s19 }
  0x71   : > { %v8433_v22 = vld [vmem:[%s8954_s12 + $0x70] sm:$0xff]   ;;  %v8434_v24 = vld [vmem:[%s8954_s12 + $0x78] sm:$0xff]   ;;  %vm8985_vm2 = vmand %vm742_vm0, %vm743_vm1  ;;  %740 = vst [vmem:[#allocation2 + $0xd4] sm:$0x1] %v8757_v61  ;;  %vm1439_vm5 = vsmask.f32 3328 }
  0x72   : > { %v8436_v25 = vld [vmem:[#allocation8 + $0x30] sm:$0xff]   ;;  %v748_v27 = vld [vmem:[#allocation2 + $0x18] sm:$0x1]  ;;  %vm8992_vm4 = vmand %vm742_vm0, %vm793_vm3  ;;  %vm1440_vm6 = vsmask.f32 7440  ;;  %s8677_s9 = scalar_lea.vmem %s11378_s23, 2048 }
  0x73   : > { %7790 = vmatpush3.bf16.msra.mxu0 %v8413_v2  ;;  %8323 = vmatpush3.bf16.msra.mxu1 %v8413_v2  ;;  %v749_v28 = vsel %vm8985_vm2, 0, %v748_v27  ;;  %v745_v30 = vld [vmem:[#allocation2 + $0xc] sm:$0x1]  ;;  %v8438_v31 = vld [vmem:[#allocation8 + $0x28] sm:$0xff]   ;;  %v8437_v33 = vld [vmem:[#allocation8 + $0x78] sm:$0xff]   ;;  %p8678_p7 = scmp.ne.s32.totalorder %s11378_s23, %s8677_s9  ;;  %p11601_p1 = scmp.ne.s32.totalorder %s11451_s20, 0 }
  0x74   : > { %7791 = vmatprep.subr.bf16.mxu0 %v8414_v3  ;;  %8316 = vmatprep.subr.bf16.mxu1 %v8414_v3  ;;  %750 = vst [vmem:[#allocation2 + $0x18] sm:$0x1] %v749_v28  ;;  %v746_v32 = vsel %vm8985_vm2, 0, %v745_v30  ;;  %v798_v34 = vld [vmem:[#allocation2 + $0x20] sm:$0x1]  ;;  %v8440_v37 = vld [vmem:[#allocation8 + $0x20] sm:$0xff]   ;;  %vm9040_vm7 = vmor %vm1439_vm5, %vm1440_vm6 }
  0x75   : > { %747 = vst [vmem:[#allocation2 + $0xc] sm:$0x1] %v746_v32  ;;  %v799_v35 = vsel %vm8992_vm4, 0, %v798_v34  ;;  %v795_v36 = vld [vmem:[#allocation2 + $0x14] sm:$0x1]  ;;  %v8439_v39 = vld [vmem:[#allocation8 + $0x70] sm:$0xff]   ;;  %vm9094_vm10 = vmand %vm1261_vm8, %vm793_vm3  ;;  %p8679_p12 = pnand %p8678_p7, %p11601_p1 }
  0x76   : > { %800 = vst [vmem:[#allocation2 + $0x20] sm:$0x1] %v799_v35  ;;  %v796_v38 = vsel %vm8992_vm4, 0, %v795_v36  ;;  %v754_v40 = vld [vmem:[#allocation2 + $0x30] sm:$0x1]  ;;  %v8441_v45 = vld [vmem:[#allocation8 + $0x68] sm:$0xff]   ;;  %vm9555_vm14 = vmor %vm2468_vm12, %vm2469_vm13 }
  0x77   : > { %7792 = vmatpush3.bf16.msra.mxu0 %v8414_v3  ;;  %8324 = vmatpush3.bf16.msra.mxu1 %v8414_v3  ;;  %797 = vst [vmem:[#allocation2 + $0x14] sm:$0x1] %v796_v38  ;;  %v755_v41 = vsel %vm8985_vm2, 0, %v754_v40  ;;  %v751_v42 = vld [vmem:[#allocation2 + $0x24] sm:$0x1]  ;;  %v8442_v44 = vld [vmem:[#allocation8 + $0x18] sm:$0xff]   ;;  %p8680_p9 = pneg %p8679_p12 }
  0x78   : > { %7793 = vmatprep.subr.bf16.mxu0 %v8415_v5  ;;  %8317 = vmatprep.subr.bf16.mxu1 %v8415_v5  ;;  %756 = vst [vmem:[#allocation2 + $0x30] sm:$0x1] %v755_v41  ;;  %v752_v43 = vsel %vm8985_vm2, 0, %v751_v42  ;;  %v804_v46 = vld [vmem:[#allocation2 + $0x38] sm:$0x1]  ;;  %v8444_v49 = vld [vmem:[#allocation8 + $0x10] sm:$0xff]  }
  0x79   : > { %753 = vst [vmem:[#allocation2 + $0x24] sm:$0x1] %v752_v43  ;;  %v805_v47 = vsel %vm8992_vm4, 0, %v804_v46  ;;  %v801_v48 = vld [vmem:[#allocation2 + $0x2c] sm:$0x1]  ;;  %v8443_v51 = vld [vmem:[#allocation8 + $0x60] sm:$0xff]  }
  0x7a   : > { %806 = vst [vmem:[#allocation2 + $0x38] sm:$0x1] %v805_v47  ;;  %v802_v50 = vsel %vm8992_vm4, 0, %v801_v48  ;;  %v760_v52 = vld [vmem:[#allocation2 + $0x48] sm:$0x1]  ;;  %v8446_v58 = vld [vmem:[#allocation8 + $0x8] sm:$0xff]  }
  0x7b   : > { %7794 = vmatpush3.bf16.msra.mxu0 %v8415_v5  ;;  %8325 = vmatpush3.bf16.msra.mxu1 %v8415_v5  ;;  %803 = vst [vmem:[#allocation2 + $0x2c] sm:$0x1] %v802_v50  ;;  %v761_v53 = vsel %vm8985_vm2, 0, %v760_v52  ;;  %v757_v54 = vld [vmem:[#allocation2 + $0x3c] sm:$0x1]  ;;  %v8445_v59 = vld [vmem:[#allocation8 + $0x58] sm:$0xff]  }
  0x7c   : > { %7795 = vmatprep.subr.bf16.mxu0 %v8416_v7  ;;  %8318 = vmatprep.subr.bf16.mxu1 %v8416_v7  ;;  %762 = vst [vmem:[#allocation2 + $0x48] sm:$0x1] %v761_v53  ;;  %v758_v55 = vsel %vm8985_vm2, 0, %v757_v54  ;;  %v810_v56 = vld [vmem:[#allocation2 + $0x50] sm:$0x1]  ;;  %v8448_v1 = vld [vmem:[#allocation8] sm:$0xff]  }
  0x7d   : > { %759 = vst [vmem:[#allocation2 + $0x3c] sm:$0x1] %v758_v55  ;;  %v811_v57 = vsel %vm8992_vm4, 0, %v810_v56  ;;  %v772_v60 = vld [vmem:[#allocation2 + $0x78] sm:$0x1]  ;;  %v8447_v2 = vld [vmem:[#allocation8 + $0x50] sm:$0xff]  }
  0x7e   : > { %812 = vst [vmem:[#allocation2 + $0x50] sm:$0x1] %v811_v57  ;;  %v773_v62 = vsel %vm8985_vm2, 0, %v772_v60  ;;  %v807_v63 = vld [vmem:[#allocation2 + $0x44] sm:$0x1]  ;;  %v8453_v41 = vld [vmem:[#allocation8 + $0x40] sm:$0xff]  }
  0x7f   : > { %7796 = vmatpush3.bf16.msra.mxu0 %v8416_v7  ;;  %8326 = vmatpush3.bf16.msra.mxu1 %v8416_v7  ;;  %774 = vst [vmem:[#allocation2 + $0x78] sm:$0x1] %v773_v62  ;;  %v808_v0 = vsel %vm8992_vm4, 0, %v807_v63  ;;  %v766_v3 = vld [vmem:[#allocation2 + $0x60] sm:$0x1]  ;;  %v9052_v54 = vld [vmem:[#allocation8 + $0xb8] sm:$0xff]  }
  0x80   : > { %7797 = vmatprep.subr.bf16.mxu0 %v8417_v8  ;;  %8319 = vmatprep.subr.bf16.mxu1 %v8417_v8  ;;  %809 = vst [vmem:[#allocation2 + $0x44] sm:$0x1] %v808_v0  ;;  %v769_v4 = vld [vmem:[#allocation2 + $0x6c] sm:$0x1]  ;;  %v767_v5 = vsel %vm8985_vm2, 0, %v766_v3  ;;  %s8758_s28 = smov [#allocation11]  }
  0x81   : > { %v770_v6 = vsel %vm8985_vm2, 0, %v769_v4  ;;  %768 = vst [vmem:[#allocation2 + $0x60] sm:$0x1] %v767_v5  ;;  %v763_v7 = vld [vmem:[#allocation2 + $0x54] sm:$0x1]  ;;  %s8681_s10 = sshll.u32 %s8758_s28, 4  ;;  %s8682_s10 = int_to_ptr.vmem [resolvable:$false] %s8681_s10 }
  0x82   : > { %771 = vst [vmem:[#allocation2 + $0x6c] sm:$0x1] %v770_v6  ;;  %v784_v50 = vld [vmem:[#allocation2 + $0xa8] sm:$0x1]  ;;  %v781_v53 = vld [vmem:[#allocation2 + $0x9c] sm:$0x1]  ;;  %p8684_p13 = scmp.lt.s32.totalorder %s11378_s23, %s8682_s10 }
  0x83   : > { %7798 = vmatpush3.bf16.msra.mxu0 %v8417_v8  ;;  %8327 = vmatpush3.bf16.msra.mxu1 %v8417_v8  ;;  %v764_v8 = vsel %vm8985_vm2, 0, %v763_v7  ;;  %v785_v52 = vsel %vm8985_vm2, 0, %v784_v50  ;;  %v782_v55 = vsel %vm8985_vm2, 0, %v781_v53  ;;  %v834_v56 = vld [vmem:[#allocation2 + $0xb0] sm:$0x1]  ;;  %s8683_s13 = scalar_lea.vmem %s8682_s10, 4096 }
  0x84   : > { %7799 = vmatprep.subr.bf16.mxu0 %v8418_v9  ;;  %8320 = vmatprep.subr.bf16.mxu1 %v8418_v9  ;;  %765 = vst [vmem:[#allocation2 + $0x54] sm:$0x1] %v764_v8  ;;  %786 = vst [vmem:[#allocation2 + $0xa8] sm:$0x1] %v785_v52  ;;  %v835_v57 = vsel %vm8992_vm4, 0, %v834_v56  ;;  %v9069_v4 = vld [vmem:[#allocation8 + $0xf8] sm:$0xff]   ;;  %p8685_p0 = scmp.lt.s32.totalorder %s8683_s13, %s8677_s9 }
  0x85   : > { %783 = vst [vmem:[#allocation2 + $0x9c] sm:$0x1] %v782_v55  ;;  %836 = vst [vmem:[#allocation2 + $0xb0] sm:$0x1] %v835_v57  ;;  %v790_v60 = vld [vmem:[#allocation2 + $0xc0] sm:$0x1] }
  0x86   : > { %v787_v61 = vld [vmem:[#allocation2 + $0xb4] sm:$0x1]  ;;  %v791_v62 = vsel %vm8985_vm2, 0, %v790_v60  ;;  %v840_v0 = vld [vmem:[#allocation2 + $0xc8] sm:$0x1]  ;;  %p8686_p2 = por %p8685_p0, %p8684_p13 }
  0x87   : > { %7800 = vmatpush3.bf16.msra.mxu0 %v8418_v9  ;;  %8328 = vmatpush3.bf16.msra.mxu1 %v8418_v9  ;;  %v1375_v9 = vld [vmem:[#allocation2] sm:$0xf]  ;;  %v788_v63 = vsel %vm8985_vm2, 0, %v787_v61  ;;  %792 = vst [vmem:[#allocation2 + $0xc0] sm:$0x1] %v791_v62 }
  0x88   : > { %7881 = vmatprep.subr.bf16.mxu0 %v8435_v10  ;;  %7833 = vmatprep.subr.bf16.mxu1 %v8437_v33  ;;  %v1446_v27 = vshll.u32 %v1375_v9, 16  ;;  %789 = vst [vmem:[#allocation2 + $0xb4] sm:$0x1] %v788_v63  ;;  %v9075_v5 = vld [vmem:[%s11425_s2] ss:$0 sm:$0xff]  ;;  %p8687_p10 = pnand %p8686_p2, %p8680_p9 }
  0x89   : > { %vm939_vm9 = vsmask.f32 4368  ;;  %v1274_v63 = vld [vmem:[#allocation2 + $0x20] sm:$0x1] }
  0x8a   : > { %7802 = vmatmul.mubr.bf16.vlgmr.msra.gmra.mxu0 %v8420_v11  ;;  %7818 = vmatmul.mubr.bf16.vlgmr.msra.gmra.mxu1 %v8426_v12  ;;  %v816_v12 = vld [vmem:[#allocation2 + $0x68] sm:$0x1]  ;;  %vm9107_vm11 = vmor %vm743_vm1, %vm939_vm9 }
  0x8b   : > { %7805 = vmatprep.mubr.bf16.mxu0 %v8421_v13  ;;  %7821 = vmatprep.mubr.bf16.mxu1 %v8429_v14  ;;  %v822_v13 = vld [vmem:[#allocation2 + $0x80] sm:$0x1]  ;;  %v819_v14 = vld [vmem:[#allocation2 + $0x74] sm:$0x1] }
  0x8c   : > { %7882 = vmatpush3.bf16.msra.mxu0 %v8435_v10  ;;  %7834 = vmatpush3.bf16.msra.mxu1 %v8437_v33  ;;  %v1376_v10 = vld [vmem:[#allocation2 + $0x4] sm:$0xf]  ;;  %v828_v33 = vld [vmem:[#allocation2 + $0x98] sm:$0x1] }
  0x8d   : > { %7883 = vmatprep.subr.bf16.mxu0 %v8436_v25  ;;  %7835 = vmatprep.subr.bf16.mxu1 %v8439_v39  ;;  %v6994_v11 = vcombine.low %v1375_v9, %v1376_v10  ;;  %v1456_v28 = vshrl.u32 %v1376_v10, 16  ;;  %v1452_v32 = vshll.u32 %v1376_v10, 16  ;;  %v829_v34 = vsel %vm8992_vm4, 0, %v828_v33 }
  0x8e   : > { %830 = vst [vmem:[#allocation2 + $0x98] sm:$0x1] %v829_v34 }
  0x8f   : > { %v1454_v35 = vrot.slane %v1452_v32, 5  ;;  %v1458_v36 = vrot.slane %v1456_v28, 4 }
  0x90   : > { %7884 = vmatpush3.bf16.msra.mxu0 %v8436_v25  ;;  %7836 = vmatpush3.bf16.msra.mxu1 %v8439_v39  ;;  %v1443_v25 = vshrl.u32 %v1375_v9, 16 }
  0x91   : > { %7885 = vmatprep.subr.bf16.mxu0 %v8438_v31  ;;  %7837 = vmatprep.subr.bf16.mxu1 %v8441_v45  ;;  %v1459_v39 = vor.u32 %v1458_v36, %v1454_v35 }
  0x92   : > { %7806 = vmatmul.mubr.bf16.gmra.mxu0 %v8422_v15  ;;  %7822 = vmatmul.mubr.bf16.gmra.mxu1 %v8430_v16  ;;  %v823_v15 = vsel %vm8992_vm4, 0, %v822_v13  ;;  %v820_v16 = vsel %vm8992_vm4, 0, %v819_v14  ;;  %v1445_v30 = vrot.slane %v1443_v25, 4 }
  0x93   : > { %7809 = vmatprep.mubr.bf16.mxu0 %v8423_v17  ;;  %7825 = vmatprep.mubr.bf16.mxu1 %v8431_v18  ;;  %v817_v17 = vsel %vm8992_vm4, 0, %v816_v12  ;;  %824 = vst [vmem:[#allocation2 + $0x80] sm:$0x1] %v823_v15  ;;  %821 = vst [vmem:[#allocation2 + $0x74] sm:$0x1] %v820_v16  ;;  %v8450_v18 = vld [vmem:[#allocation8 + $0x48] sm:$0xff]  }
  0x94   : > { %7886 = vmatpush3.bf16.msra.mxu0 %v8438_v31  ;;  %7838 = vmatpush3.bf16.msra.mxu1 %v8441_v45  ;;  %818 = vst [vmem:[#allocation2 + $0x68] sm:$0x1] %v817_v17  ;;  %v1448_v31 = vrot.slane %v1446_v27, 5  ;;  %v1460_v43 = vrot.slane %v1459_v39, 4 }
  0x95   : > { %7887 = vmatprep.subr.bf16.mxu0 %v8440_v37  ;;  %7839 = vmatprep.subr.bf16.mxu1 %v8443_v51 }
  0x96   : > { %v1449_v38 = vor.u32 %v1448_v31, %v1445_v30 }
  0x98   : > { %7888 = vmatpush3.bf16.msra.mxu0 %v8440_v37  ;;  %7840 = vmatpush3.bf16.msra.mxu1 %v8443_v51  ;;  %v1423_v37 = vld [vmem:[#allocation2 + $0x8] sm:$0x1]  ;;  %v1450_v42 = vrot.slane %v1449_v38, 4 }
  0x99   : > { %7889 = vmatprep.subr.bf16.mxu0 %v8442_v44  ;;  %7841 = vmatprep.subr.bf16.mxu1 %v8445_v59  ;;  %v1462_v40 = vshll.u32 %v1423_v37, 16 }
  0x9a   : > { %7810 = vmatmul.mubr.bf16.gmra.mxu0 %v8424_v19  ;;  %7826 = vmatmul.mubr.bf16.gmra.mxu1 %v8432_v20  ;;  %v813_v19 = vld [vmem:[#allocation2 + $0x5c] sm:$0x1]  ;;  %v1455_v46 = vsel %vm9040_vm7, %v1450_v42, %v1454_v35 }
  0x9b   : > { %7813 = vmatprep.mubr.bf16.mxu0 %v8427_v21  ;;  %7829 = vmatprep.mubr.bf16.mxu1 %v8433_v22  ;;  %v814_v20 = vsel %vm8992_vm4, 0, %v813_v19  ;;  %v778_v21 = vld [vmem:[#allocation2 + $0x90] sm:$0x1] }
  0x9c   : > { %7890 = vmatpush3.bf16.msra.mxu0 %v8442_v44  ;;  %7842 = vmatpush3.bf16.msra.mxu1 %v8445_v59  ;;  %815 = vst [vmem:[#allocation2 + $0x5c] sm:$0x1] %v814_v20  ;;  %v779_v22 = vsel %vm8985_vm2, 0, %v778_v21  ;;  %v1464_v44 = vrot.slane %v1462_v40, 5  ;;  %v1270_v40 = vld [vmem:[#allocation2 + $0x18] sm:$0xf] }
  0x9d   : > { %7891 = vmatprep.subr.bf16.mxu0 %v8444_v49  ;;  %7843 = vmatprep.subr.bf16.mxu1 %v8447_v2  ;;  %780 = vst [vmem:[#allocation2 + $0x90] sm:$0x1] %v779_v22 }
  0x9e   : > { %v1465_v47 = vsel %vm9040_vm7, %v1460_v43, %v1464_v44 }
  0x9f   : > { %v6970_v48 = vcombine.low %v1455_v46, %v1465_v47 }
  0xa0   : > { %7892 = vmatpush3.bf16.msra.mxu0 %v8444_v49  ;;  %7844 = vmatpush3.bf16.msra.mxu1 %v8447_v2  ;;  %v825_v49 = vld [vmem:[#allocation2 + $0x8c] sm:$0x1]  ;;  %v837_v2 = vld [vmem:[#allocation2 + $0xbc] sm:$0x1] }
  0xa1   : > { %7893 = vmatprep.subr.bf16.mxu0 %v8446_v58  ;;  %7845 = vmatprep.subr.bf16.mxu1 %v8450_v18  ;;  %v826_v51 = vsel %vm8992_vm4, 0, %v825_v49  ;;  %v838_v3 = vsel %vm8992_vm4, 0, %v837_v2 }
  0xa2   : > { %7814 = vmatmul.mubr.bf16.gmra.mxu0 %v8428_v23  ;;  %7830 = vmatmul.mubr.bf16.gmra.mxu1 %v8434_v24  ;;  %v775_v23 = vld [vmem:[#allocation2 + $0x84] sm:$0x1]  ;;  %827 = vst [vmem:[#allocation2 + $0x8c] sm:$0x1] %v826_v51  ;;  %839 = vst [vmem:[#allocation2 + $0xbc] sm:$0x1] %v838_v3 }
  0xa3   : > { %7897 = vmatprep.mubr.bf16.mxu0 %v6994_v11  ;;  %v776_v24 = vsel %vm8985_vm2, 0, %v775_v23  ;;  %7849 = vmatprep.mubr.bf16.mxu1 %v6970_v48  ;;  %v1263_v51 = vld [vmem:[#allocation2 + $0xc] sm:$0xf] }
  0xa4   : > { %7894 = vmatpush3.bf16.msra.mxu0 %v8446_v58  ;;  %7846 = vmatpush3.bf16.msra.mxu1 %v8450_v18  ;;  %777 = vst [vmem:[#allocation2 + $0x84] sm:$0x1] %v776_v24  ;;  %v831_v58 = vld [vmem:[#allocation2 + $0xa4] sm:$0x1] }
  0xa5   : > { %7895 = vmatprep.subr.bf16.mxu0 %v8448_v1  ;;  %7847 = vmatprep.subr.bf16.mxu1 %v8453_v41  ;;  %v832_v59 = vsel %vm8992_vm4, 0, %v831_v58 }
  0xa6   : > { %833 = vst [vmem:[#allocation2 + $0xa4] sm:$0x1] %v832_v59 }
  0xa8   : > { %7896 = vmatpush3.bf16.msra.mxu0 %v8448_v1  ;;  %7848 = vmatpush3.bf16.msra.mxu1 %v8453_v41  ;;  %v841_v1 = vsel %vm8992_vm4, 0, %v840_v0 }
  0xa9   : > { %7929 = vmatprep.subr.bf16.mxu1 %v9052_v54  ;;  %842 = vst [vmem:[#allocation2 + $0xc8] sm:$0x1] %v841_v1  ;;  %7977 = vmatprep.subr.bf16.mxu0 %v9069_v4 }
 0x14a   : > { %v7803_v6 = vpop.f32.mrf.mxu0  ;;  %v7819_v7 = vpop.f32.mrf.mxu1 }
 0x14b   : > { %v584_v8 = vadd.f32 %v7803_v6, %v9075_v5  ;;  %v648_v9 = vadd.f32 %v7819_v7, %v9075_v5 }
 0x14c   : > { %v575_v10 = vpop.f32.mrf.mxu0  ;;  %v639_v11 = vpop.f32.mrf.mxu1 }
 0x14d   : > { %v704_v29 = vmax.f32 %v584_v8, 0.0  ;;  %v576_v12 = vadd.f32 %v9075_v5, %v575_v10  ;;  %v720_v13 = vmax.f32 %v648_v9, 0.0  ;;  %v640_v14 = vadd.f32 %v9075_v5, %v639_v11 }
 0x14e   : > { %v7804_v15 = vpop.f32.mrf.mxu0  ;;  %v7820_v20 = vpop.f32.mrf.mxu1 }
 0x14f   : > { %v7284_v16 = vpack.c.bf16 %v704_v29, %v704_v29  ;;  %v702_v17 = vmax.f32 %v576_v12, 0.0  ;;  %v587_v18 = vadd.f32 %v7804_v15, %v9075_v5  ;;  %v9082_v19 = vpack.c.bf16 %v720_v13, %v720_v13 }
 0x150   : > { %v578_v21 = vpop.f32.mrf.mxu0  ;;  %v718_v22 = vmax.f32 %v640_v14, 0.0  ;;  %v9085_v23 = vadd.f32 %v7820_v20, %v9075_v5 }
 0x151   : > { %v959_v24 = vshrl.u32 %v7284_v16, 16  ;;  %v962_v25 = vshll.u32 %v7284_v16, 16  ;;  %v7282_v27 = vpack.c.bf16 %v702_v17, %v702_v17  ;;  %v705_v28 = vmax.f32 %v587_v18, 0.0  ;;  %v1267_v17 = vld [vmem:[#allocation2 + $0x14] sm:$0x1] }
 0x152   : > { %v579_v30 = vadd.f32 %v9075_v5, %v578_v21  ;;  %v7807_v31 = vpop.f32.mrf.mxu0  ;;  %v1095_v32 = vshrl.u32 %v9082_v19, 16  ;;  %v1098_v33 = vshll.u32 %v9082_v19, 16  ;;  %v9090_v34 = vpack.c.bf16 %v718_v22, %v718_v22 }
 0x153   : > { %v961_v35 = vrot.slane %v959_v24, 7  ;;  %v942_v36 = vshrl.u32 %v7282_v27, 16  ;;  %v945_v37 = vshll.u32 %v7282_v27, 16  ;;  %v7285_v38 = vpack.c.bf16 %v705_v28, %v705_v28  ;;  %v1284_v28 = vld [vmem:[#allocation2 + $0x30] sm:$0xf] }
 0x154   : > { %v703_v41 = vmax.f32 %v579_v30, 0.0  ;;  %v600_v42 = vadd.f32 %v7807_v31, %v9075_v5  ;;  %v591_v43 = vpop.f32.mrf.mxu0  ;;  %v9099_v44 = vrot.slane %v1095_v32, 7  ;;  %v1078_v46 = vshrl.u32 %v9090_v34, 16 }
 0x155   : > { %v964_v47 = vor.u32 %v962_v25, %v961_v35  ;;  %v965_v48 = vrot.slane %v961_v35, 4  ;;  %v944_v49 = vrot.slane %v942_v36, 7  ;;  %v967_v50 = vshrl.u32 %v7285_v38, 16 }
 0x156   : > { %v970_v52 = vshll.u32 %v7285_v38, 16  ;;  %v7283_v53 = vpack.c.bf16 %v703_v41, %v703_v41  ;;  %v708_v55 = vmax.f32 %v600_v42, 0.0  ;;  %v592_v56 = vadd.f32 %v9075_v5, %v591_v43  ;;  %v7808_v57 = vpop.f32.mrf.mxu0 }
 0x157   : > { %v1271_v58 = vsel %vm9094_vm10, %v964_v47, %v1270_v40  ;;  %v947_v59 = vor.u32 %v945_v37, %v944_v49  ;;  %v948_v60 = vrot.slane %v944_v49, 4  ;;  %v969_v61 = vrot.slane %v967_v50, 7  ;;  %v1277_v50 = vld [vmem:[#allocation2 + $0x24] sm:$0xf] }
 0x158   : > { %1272 = vst [vmem:[#allocation2 + $0x18] sm:$0xf] %v1271_v58  ;;  %v950_v0 = vshrl.u32 %v7283_v53, 16  ;;  %v953_v1 = vshll.u32 %v7283_v53, 16  ;;  %v7288_v2 = vpack.c.bf16 %v708_v55, %v708_v55  ;;  %v706_v3 = vmax.f32 %v592_v56, 0.0  ;;  %v594_v6 = vpop.f32.mrf.mxu0 }
 0x159   : > { %v1264_v7 = vsel %vm9094_vm10, %v947_v59, %v1263_v51  ;;  %v972_v8 = vor.u32 %v970_v52, %v969_v61  ;;  %v974_v9 = vrot.slane %v969_v61, 4  ;;  %v603_v10 = vadd.f32 %v7808_v57, %v9075_v5  ;;  %v1288_v59 = vld [vmem:[#allocation2 + $0x38] sm:$0x1] }
 0x15a   : > { %1265 = vst [vmem:[#allocation2 + $0xc] sm:$0xf] %v1264_v7  ;;  %v952_v11 = vrot.slane %v950_v0, 7  ;;  %v993_v29 = vshrl.u32 %v7288_v2, 16  ;;  %v996_v12 = vshll.u32 %v7288_v2, 16  ;;  %v7286_v13 = vpack.c.bf16 %v706_v3, %v706_v3  ;;  %v7811_v14 = vpop.f32.mrf.mxu0 }
 0x15b   : > { %v973_v15 = vsel %vm9107_vm11, %v965_v48, %v972_v8  ;;  %v1275_v16 = vsel %vm8985_vm2, %v974_v9, %v1274_v63  ;;  %v709_v18 = vmax.f32 %v603_v10, 0.0  ;;  %v595_v20 = vadd.f32 %v9075_v5, %v594_v6  ;;  %v1281_v9 = vld [vmem:[#allocation2 + $0x2c] sm:$0x1] }
 0x15c   : > { %1273 = vst [vmem:[#allocation2 + $0x1c] sm:$0xf] %v973_v15  ;;  %1276 = vst [vmem:[#allocation2 + $0x20] sm:$0x1] %v1275_v16  ;;  %v955_v21 = vor.u32 %v953_v1, %v952_v11  ;;  %v957_v22 = vrot.slane %v952_v11, 4  ;;  %v995_v24 = vrot.slane %v993_v29, 7  ;;  %v607_v27 = vpop.f32.mrf.mxu0  ;;  %v616_v35 = vadd.f32 %v7811_v14, %v9075_v5 }
 0x15d   : > { %v976_v25 = vshrl.u32 %v7286_v13, 16  ;;  %v979_v30 = vshll.u32 %v7286_v13, 16  ;;  %v7289_v31 = vpack.c.bf16 %v709_v18, %v709_v18  ;;  %v707_v32 = vmax.f32 %v595_v20, 0.0 }
 0x15e   : > { %v956_v36 = vsel %vm9107_vm11, %v948_v60, %v955_v21  ;;  %v1268_v37 = vsel %vm8985_vm2, %v957_v22, %v1267_v17  ;;  %v998_v38 = vor.u32 %v996_v12, %v995_v24  ;;  %v999_v40 = vrot.slane %v995_v24, 4  ;;  %v7812_v41 = vpop.f32.mrf.mxu0  ;;  %v1326_v22 = vld [vmem:[#allocation2 + $0x78] sm:$0xf] }
 0x15f   : > { %1266 = vst [vmem:[#allocation2 + $0x10] sm:$0xf] %v956_v36  ;;  %1269 = vst [vmem:[#allocation2 + $0x14] sm:$0x1] %v1268_v37  ;;  %v978_v42 = vrot.slane %v976_v25, 7  ;;  %v1001_v43 = vshrl.u32 %v7289_v31, 16  ;;  %v7287_v48 = vpack.c.bf16 %v707_v32, %v707_v32  ;;  %v608_v52 = vadd.f32 %v9075_v5, %v607_v27 }
 0x160   : > { %v1004_v47 = vshll.u32 %v7289_v31, 16  ;;  %v1285_v49 = vsel %vm9094_vm10, %v998_v38, %v1284_v28  ;;  %v712_v51 = vmax.f32 %v616_v35, 0.0  ;;  %v619_v53 = vadd.f32 %v7812_v41, %v9075_v5  ;;  %v610_v55 = vpop.f32.mrf.mxu0  ;;  %v1298_v27 = vld [vmem:[#allocation2 + $0x48] sm:$0xf]  ;;  %v1291_v38 = vld [vmem:[#allocation2 + $0x3c] sm:$0xf] }
 0x161   : > { %1286 = vst [vmem:[#allocation2 + $0x30] sm:$0xf] %v1285_v49  ;;  %v981_v56 = vor.u32 %v979_v30, %v978_v42  ;;  %v982_v57 = vrot.slane %v978_v42, 4  ;;  %v1003_v58 = vrot.slane %v1001_v43, 7  ;;  %v984_v60 = vshrl.u32 %v7287_v48, 16 }
 0x162   : > { %v987_v61 = vshll.u32 %v7287_v48, 16  ;;  %v7292_v63 = vpack.c.bf16 %v712_v51, %v712_v51  ;;  %v710_v0 = vmax.f32 %v608_v52, 0.0  ;;  %v713_v1 = vmax.f32 %v619_v53, 0.0  ;;  %v7815_v8 = vpop.f32.mrf.mxu0  ;;  %v1302_v49 = vld [vmem:[#allocation2 + $0x50] sm:$0x1] }
 0x163   : > { %v1278_v2 = vsel %vm9094_vm10, %v981_v56, %v1277_v50  ;;  %v1006_v3 = vor.u32 %v1004_v47, %v1003_v58  ;;  %v1008_v6 = vrot.slane %v1003_v58, 4  ;;  %v986_v7 = vrot.slane %v984_v60, 7  ;;  %v1319_v58 = vld [vmem:[#allocation2 + $0x6c] sm:$0xf] }
 0x164   : > { %1279 = vst [vmem:[#allocation2 + $0x24] sm:$0xf] %v1278_v2  ;;  %v1027_v10 = vshrl.u32 %v7292_v63, 16  ;;  %v1030_v11 = vshll.u32 %v7292_v63, 16  ;;  %v7290_v29 = vpack.c.bf16 %v710_v0, %v710_v0  ;;  %v7293_v12 = vpack.c.bf16 %v713_v1, %v713_v1  ;;  %v623_v31 = vpop.f32.mrf.mxu0 }
 0x165   : > { %v1007_v13 = vsel %vm9107_vm11, %v999_v40, %v1006_v3  ;;  %v1289_v14 = vsel %vm8985_vm2, %v1008_v6, %v1288_v59  ;;  %v989_v15 = vor.u32 %v987_v61, %v986_v7  ;;  %v991_v16 = vrot.slane %v986_v7, 4 }
 0x166   : > { %1287 = vst [vmem:[#allocation2 + $0x34] sm:$0xf] %v1007_v13  ;;  %1290 = vst [vmem:[#allocation2 + $0x38] sm:$0x1] %v1289_v14  ;;  %v1029_v17 = vrot.slane %v1027_v10, 7  ;;  %v1010_v18 = vshrl.u32 %v7290_v29, 16  ;;  %v1100_v30 = vor.u32 %v1098_v33, %v9099_v44  ;;  %v611_v42 = vadd.f32 %v9075_v5, %v610_v55  ;;  %v642_v55 = vpop.f32.mrf.mxu1 }
 0x167   : > { %v1013_v20 = vshll.u32 %v7290_v29, 16  ;;  %v1035_v21 = vshrl.u32 %v7293_v12, 16  ;;  %v990_v24 = vsel %vm9107_vm11, %v982_v57, %v989_v15  ;;  %v1282_v25 = vsel %vm8985_vm2, %v991_v16, %v1281_v9  ;;  %v1295_v15 = vld [vmem:[#allocation2 + $0x44] sm:$0x1] }
 0x168   : > { %v1038_v28 = vshll.u32 %v7293_v12, 16  ;;  %1280 = vst [vmem:[#allocation2 + $0x28] sm:$0xf] %v990_v24  ;;  %1283 = vst [vmem:[#allocation2 + $0x2c] sm:$0x1] %v1282_v25  ;;  %v1032_v32 = vor.u32 %v1030_v11, %v1029_v17  ;;  %v1033_v35 = vrot.slane %v1029_v17, 4  ;;  %v1327_v41 = vsel %vm9094_vm10, %v1100_v30, %v1326_v22  ;;  %v7823_v13 = vpop.f32.mrf.mxu1 }
 0x169   : > { %v9141_v36 = vrot.slane %v1010_v18, 7  ;;  %v1037_v37 = vrot.slane %v1035_v21, 7  ;;  %v1101_v40 = vrot.slane %v9099_v44, 4  ;;  %v9149_v19 = vrot.slane %v1078_v46, 7  ;;  %1328 = vst [vmem:[#allocation2 + $0x78] sm:$0xf] %v1327_v41  ;;  %v7816_v46 = vpop.f32.mrf.mxu0 }
 0x16a   : > { %v1299_v33 = vsel %vm9094_vm10, %v1032_v32, %v1298_v27  ;;  %v711_v51 = vmax.f32 %v611_v42, 0.0  ;;  %v1081_v52 = vshll.u32 %v9090_v34, 16  ;;  %v632_v59 = vadd.f32 %v7815_v8, %v9075_v5  ;;  %v1330_v24 = vld [vmem:[#allocation2 + $0x80] sm:$0x1] }
 0x16b   : > { %v1015_v43 = vor.u32 %v1013_v20, %v9141_v36  ;;  %v1016_v47 = vrot.slane %v9141_v36, 4  ;;  %v1040_v48 = vor.u32 %v1038_v28, %v1037_v37  ;;  %1300 = vst [vmem:[#allocation2 + $0x48] sm:$0xf] %v1299_v33  ;;  %v1042_v50 = vrot.slane %v1037_v37, 4  ;;  %v1312_v33 = vld [vmem:[#allocation2 + $0x60] sm:$0xf] }
 0x16c   : > { %v1084_v53 = vrot.slane %v9149_v19, 4  ;;  %v721_v60 = vmax.f32 %v9085_v23, 0.0  ;;  %v7291_v61 = vpack.c.bf16 %v711_v51, %v711_v51  ;;  %v1083_v63 = vor.u32 %v1081_v52, %v9149_v19 }
 0x16d   : > { %v1292_v56 = vsel %vm9094_vm10, %v1015_v43, %v1291_v38  ;;  %v1041_v57 = vsel %vm9107_vm11, %v1033_v35, %v1040_v48  ;;  %v1303_v34 = vsel %vm8985_vm2, %v1042_v50, %v1302_v49  ;;  %v624_v0 = vadd.f32 %v9075_v5, %v623_v31  ;;  %v655_v38 = vpop.f32.mrf.mxu1  ;;  %v1305_v48 = vld [vmem:[#allocation2 + $0x54] sm:$0xf]  ;;  %v626_v50 = vpop.f32.mrf.mxu0 }
 0x16e   : > { %1293 = vst [vmem:[#allocation2 + $0x3c] sm:$0xf] %v1292_v56  ;;  %1301 = vst [vmem:[#allocation2 + $0x4c] sm:$0xf] %v1041_v57  ;;  %v716_v1 = vmax.f32 %v632_v59, 0.0  ;;  %v7301_v2 = vpack.c.bf16 %v721_v60, %v721_v60  ;;  %v643_v3 = vadd.f32 %v9075_v5, %v642_v55  ;;  %v635_v6 = vadd.f32 %v7816_v46, %v9075_v5 }
 0x16f   : > { %1304 = vst [vmem:[#allocation2 + $0x50] sm:$0x1] %v1303_v34  ;;  %v1018_v7 = vshrl.u32 %v7291_v61, 16  ;;  %v1021_v8 = vshll.u32 %v7291_v61, 16  ;;  %v1320_v23 = vsel %vm9094_vm10, %v1083_v63, %v1319_v58  ;;  %v714_v9 = vmax.f32 %v624_v0, 0.0  ;;  %v9194_v63 = vpop.f32.mrf.mxu1 }
 0x170   : > { %1321 = vst [vmem:[#allocation2 + $0x6c] sm:$0xf] %v1320_v23  ;;  %v7296_v10 = vpack.c.bf16 %v716_v1, %v716_v1  ;;  %v1103_v11 = vshrl.u32 %v7301_v2, 16  ;;  %v1106_v29 = vshll.u32 %v7301_v2, 16  ;;  %v719_v12 = vmax.f32 %v643_v3, 0.0 }
 0x171   : > { %v1020_v14 = vrot.slane %v1018_v7, 7  ;;  %v7294_v16 = vpack.c.bf16 %v714_v9, %v714_v9  ;;  %v717_v17 = vmax.f32 %v635_v6, 0.0  ;;  %v664_v18 = vadd.f32 %v7823_v13, %v9075_v5  ;;  %v1323_v58 = vld [vmem:[#allocation2 + $0x74] sm:$0x1]  ;;  %v1377_v61 = vld [vmem:[#allocation2 + $0xc] sm:$0xf] }
 0x172   : > { %v1061_v20 = vshrl.u32 %v7296_v10, 16  ;;  %v1064_v21 = vshll.u32 %v7296_v10, 16  ;;  %v1105_v22 = vrot.slane %v1103_v11, 7  ;;  %v7299_v25 = vpack.c.bf16 %v719_v12, %v719_v12  ;;  %v1316_v12 = vld [vmem:[#allocation2 + $0x68] sm:$0x1] }
 0x173   : > { %v1023_v27 = vor.u32 %v1021_v8, %v1020_v14  ;;  %v1025_v28 = vrot.slane %v1020_v14, 4  ;;  %v1044_v30 = vshrl.u32 %v7294_v16, 16  ;;  %v1047_v31 = vshll.u32 %v7294_v16, 16 }
 0x174   : > { %v9172_v32 = vrot.slane %v1061_v20, 7  ;;  %v1108_v35 = vor.u32 %v1106_v29, %v1105_v22  ;;  %v1110_v36 = vrot.slane %v1105_v22, 4  ;;  %v1086_v37 = vshrl.u32 %v7299_v25, 16  ;;  %v1379_v22 = vld [vmem:[#allocation2 + $0x18] sm:$0xf] }
 0x175   : > { %v1024_v41 = vsel %vm9107_vm11, %v1016_v47, %v1023_v27  ;;  %v1296_v42 = vsel %vm8985_vm2, %v1025_v28, %v1295_v15  ;;  %v9178_v43 = vrot.slane %v1044_v30, 7  ;;  %v1089_v49 = vshll.u32 %v7299_v25, 16  ;;  %v9208_v28 = vld [vmem:[#allocation2 + $0x10] sm:$0xf] }
 0x176   : > { %1294 = vst [vmem:[#allocation2 + $0x40] sm:$0xf] %v1024_v41  ;;  %1297 = vst [vmem:[#allocation2 + $0x44] sm:$0x1] %v1296_v42  ;;  %v1066_v51 = vor.u32 %v1064_v21, %v9172_v32  ;;  %v1067_v52 = vrot.slane %v9172_v32, 4  ;;  %v1109_v47 = vsel %vm9107_vm11, %v1101_v40, %v1108_v35  ;;  %v1331_v55 = vsel %vm8985_vm2, %v1110_v36, %v1330_v24 }
 0x177   : > { %1329 = vst [vmem:[#allocation2 + $0x7c] sm:$0xf] %v1109_v47  ;;  %1332 = vst [vmem:[#allocation2 + $0x80] sm:$0x1] %v1331_v55  ;;  %v1049_v46 = vor.u32 %v1047_v31, %v9178_v43  ;;  %v1050_v56 = vrot.slane %v9178_v43, 4  ;;  %v1088_v57 = vrot.slane %v1086_v37, 7  ;;  %v7297_v59 = vpack.c.bf16 %v717_v17, %v717_v17  ;;  %v658_v17 = vpop.f32.mrf.mxu1 }
 0x178   : > { %v1313_v60 = vsel %vm9094_vm10, %v1066_v51, %v1312_v33  ;;  %v724_v34 = vmax.f32 %v664_v18, 0.0  ;;  %v627_v44 = vadd.f32 %v9075_v5, %v626_v50  ;;  %v656_v40 = vadd.f32 %v9075_v5, %v655_v38  ;;  %v1340_v32 = vld [vmem:[#allocation2 + $0x90] sm:$0xf]  ;;  %v1309_v35 = vld [vmem:[#allocation2 + $0x5c] sm:$0x1] }
 0x179   : > { %1314 = vst [vmem:[#allocation2 + $0x60] sm:$0xf] %v1313_v60  ;;  %v1306_v0 = vsel %vm9094_vm10, %v1049_v46, %v1305_v48  ;;  %v1091_v1 = vor.u32 %v1089_v49, %v1088_v57  ;;  %v1093_v2 = vrot.slane %v1088_v57, 4  ;;  %v1069_v3 = vshrl.u32 %v7297_v59, 16  ;;  %v1333_v37 = vld [vmem:[#allocation2 + $0x84] sm:$0xf]  ;;  %v7827_v50 = vpop.f32.mrf.mxu1 }
 0x17a   : > { %1307 = vst [vmem:[#allocation2 + $0x54] sm:$0xf] %v1306_v0  ;;  %v1072_v6 = vshll.u32 %v7297_v59, 16  ;;  %v7304_v7 = vpack.c.bf16 %v724_v34, %v724_v34  ;;  %v715_v8 = vmax.f32 %v627_v44, 0.0  ;;  %v722_v23 = vmax.f32 %v656_v40, 0.0  ;;  %v8467_v57 = vld [vmem:[#allocation8 + $0xf0] sm:$0xff]  }
 0x17b   : > { %v1092_v9 = vsel %vm9107_vm11, %v1084_v53, %v1091_v1  ;;  %v1324_v10 = vsel %vm8985_vm2, %v1093_v2, %v1323_v58  ;;  %v1071_v11 = vrot.slane %v1069_v3, 7  ;;  %v1467_v29 = vshrl.u32 %v1377_v61, 16  ;;  %v9218_v49 = vld [vmem:[#allocation2 + $0x1c] sm:$0xf]  ;;  %v1381_v46 = vld [vmem:[#allocation2 + $0x24] sm:$0xf] }
 0x17c   : > { %1322 = vst [vmem:[#allocation2 + $0x70] sm:$0xf] %v1092_v9  ;;  %1325 = vst [vmem:[#allocation2 + $0x74] sm:$0x1] %v1324_v10  ;;  %v1129_v13 = vshrl.u32 %v7304_v7, 16  ;;  %v1132_v14 = vshll.u32 %v7304_v7, 16  ;;  %v7295_v15 = vpack.c.bf16 %v715_v8, %v715_v8  ;;  %v7302_v16 = vpack.c.bf16 %v722_v23, %v722_v23  ;;  %v671_v8 = vpop.f32.mrf.mxu1 }
 0x17d   : > { %v1074_v18 = vor.u32 %v1072_v6, %v1071_v11  ;;  %v1076_v20 = vrot.slane %v1071_v11, 4  ;;  %v9204_v21 = vrot.slane %v1467_v29, 4  ;;  %v1470_v19 = vshll.u32 %v1377_v61, 16  ;;  %v9231_v1 = vld [vmem:[#allocation2 + $0x28] sm:$0xf]  ;;  %v8470_v10 = vld [vmem:[#allocation8 + $0xe8] sm:$0xff]  }
 0x17e   : > { %v9206_v53 = vrot.slane %v1129_v13, 7  ;;  %v1052_v24 = vshrl.u32 %v7295_v15, 16  ;;  %v1055_v25 = vshll.u32 %v7295_v15, 16  ;;  %v1112_v27 = vshrl.u32 %v7302_v16, 16 }
 0x17f   : > { %v1075_v30 = vsel %vm9107_vm11, %v1067_v52, %v1074_v18  ;;  %v1317_v31 = vsel %vm8985_vm2, %v1076_v20, %v1316_v12  ;;  %v1115_v36 = vshll.u32 %v7302_v16, 16  ;;  %v1472_v38 = vrot.slane %v1470_v19, 5 }
 0x180   : > { %1315 = vst [vmem:[#allocation2 + $0x64] sm:$0xf] %v1075_v30  ;;  %1318 = vst [vmem:[#allocation2 + $0x68] sm:$0x1] %v1317_v31  ;;  %v1134_v41 = vor.u32 %v1132_v14, %v9206_v53  ;;  %v1135_v42 = vrot.slane %v9206_v53, 4  ;;  %v1054_v33 = vrot.slane %v1052_v24, 7  ;;  %v6995_v52 = vcombine.low %v1377_v61, %v9208_v28 }
 0x181   : > { %v9216_v48 = vrot.slane %v1112_v27, 7  ;;  %v1480_v51 = vshrl.u32 %v9208_v28, 16  ;;  %v1491_v47 = vshrl.u32 %v1379_v22, 16  ;;  %v1494_v55 = vshll.u32 %v1379_v22, 16  ;;  %v8472_v30 = vld [vmem:[#allocation8 + $0xe0] sm:$0xff]  }
 0x182   : > { %v1341_v58 = vsel %vm9094_vm10, %v1134_v41, %v1340_v32  ;;  %v1057_v59 = vor.u32 %v1055_v25, %v1054_v33  ;;  %v1059_v60 = vrot.slane %v1054_v33, 4  ;;  %7898 = vmatmul.mubr.bf16.vlgmr.msra.gmra.mxu0 %v6995_v52  ;;  %v1504_v61 = vshrl.u32 %v9218_v49, 16  ;;  %v7828_v41 = vpop.f32.mrf.mxu1  ;;  %v1337_v52 = vld [vmem:[#allocation2 + $0x8c] sm:$0x1] }
 0x183   : > { %v1117_v34 = vor.u32 %v1115_v36, %v9216_v48  ;;  %1342 = vst [vmem:[#allocation2 + $0x90] sm:$0xf] %v1341_v58  ;;  %v1118_v44 = vrot.slane %v9216_v48, 4  ;;  %v9226_v40 = vrot.slane %v1491_v47, 4  ;;  %v9228_v0 = vrot.slane %v1494_v55, 5  ;;  %7978 = vmatpush3.bf16.msra.mxu0 %v9069_v4 }
 0x184   : > { %v1058_v2 = vsel %vm9107_vm11, %v1050_v56, %v1057_v59  ;;  %v1310_v3 = vsel %vm8985_vm2, %v1059_v60, %v1309_v35  ;;  %v6996_v7 = vcombine.low %v1379_v22, %v9218_v49  ;;  %v667_v43 = vadd.f32 %v9194_v63, %v9075_v5  ;;  %7979 = vmatprep.subr.bf16.mxu0 %v8467_v57  ;;  %v1424_v63 = vld [vmem:[#allocation2 + $0x14] sm:$0x1]  ;;  %v1354_v60 = vld [vmem:[#allocation2 + $0xa8] sm:$0xf] }
 0x185   : > { %v1334_v6 = vsel %vm9094_vm10, %v1117_v34, %v1333_v37  ;;  %1308 = vst [vmem:[#allocation2 + $0x58] sm:$0xf] %v1058_v2  ;;  %1311 = vst [vmem:[#allocation2 + $0x5c] sm:$0x1] %v1310_v3  ;;  %v659_v23 = vadd.f32 %v9075_v5, %v658_v17  ;;  %v680_v56 = vadd.f32 %v7827_v50, %v9075_v5  ;;  %v1515_v11 = vshrl.u32 %v1381_v46, 16  ;;  %v8475_v2 = vld [vmem:[#allocation8 + $0xd8] sm:$0xff]  }
 0x186   : > { %1335 = vst [vmem:[#allocation2 + $0x84] sm:$0xf] %v1334_v6  ;;  %v672_v9 = vadd.f32 %v9075_v5, %v671_v8  ;;  %7901 = vmatprep.mubr.bf16.mxu0 %v6996_v7  ;;  %v1518_v29 = vshll.u32 %v1381_v46, 16  ;;  %v1528_v12 = vshrl.u32 %v9231_v1, 16  ;;  %v6997_v4 = vcombine.low %v1381_v46, %v9231_v1  ;;  %v9260_v37 = vld [vmem:[#allocation2 + $0x30] sm:$0xf] }
 0x187   : > { %v725_v13 = vmax.f32 %v667_v43, 0.0  ;;  %v723_v14 = vmax.f32 %v659_v23, 0.0  ;;  %v728_v15 = vmax.f32 %v680_v56, 0.0  ;;  %v9250_v18 = vrot.slane %v1515_v11, 4  ;;  %7980 = vmatpush3.bf16.msra.mxu0 %v8467_v57  ;;  %v1344_v50 = vld [vmem:[#allocation2 + $0x98] sm:$0x1]  ;;  %v674_v43 = vpop.f32.mrf.mxu1 }
 0x188   : > { %v726_v16 = vmax.f32 %v672_v9, 0.0  ;;  %v9252_v17 = vrot.slane %v1518_v29, 5  ;;  %v1473_v20 = vor.u32 %v1472_v38, %v9204_v21  ;;  %v1476_v19 = vshll.u32 %v9208_v28, 16  ;;  %7981 = vmatprep.subr.bf16.mxu0 %v8470_v10  ;;  %v1347_v11 = vld [vmem:[#allocation2 + $0x9c] sm:$0xf] }
 0x189   : > { %v7305_v22 = vpack.c.bf16 %v725_v13, %v725_v13  ;;  %v7303_v24 = vpack.c.bf16 %v723_v14, %v723_v14  ;;  %v7308_v25 = vpack.c.bf16 %v728_v15, %v728_v15  ;;  %v1482_v35 = vrot.slane %v1480_v51, 4  ;;  %v9276_v15 = vld [vmem:[#allocation2 + $0x34] sm:$0xf] }
 0x18a   : > { %v7306_v27 = vpack.c.bf16 %v726_v16, %v726_v16  ;;  %v9256_v31 = vrot.slane %v1473_v20, 4  ;;  %v9258_v32 = vrot.slane %v1476_v19, 5  ;;  %v1486_v36 = vshll.u32 %v1424_v63, 16  ;;  %7902 = vmatmul.mubr.bf16.gmra.mxu0 %v6997_v4 }
 0x18b   : > { %v1137_v33 = vshrl.u32 %v7305_v22, 16  ;;  %v1140_v21 = vshll.u32 %v7305_v22, 16  ;;  %v1120_v38 = vshrl.u32 %v7303_v24, 16  ;;  %v1123_v28 = vshll.u32 %v7303_v24, 16  ;;  %7982 = vmatpush3.bf16.msra.mxu0 %v8470_v10  ;;  %v8477_v22 = vld [vmem:[#allocation8 + $0xd0] sm:$0xff]  }
 0x18c   : > { %v1163_v47 = vshrl.u32 %v7308_v25, 16  ;;  %v1166_v55 = vshll.u32 %v7308_v25, 16  ;;  %v1146_v46 = vshrl.u32 %v7306_v27, 16  ;;  %v1149_v57 = vshll.u32 %v7306_v27, 16  ;;  %7983 = vmatprep.subr.bf16.mxu0 %v8472_v30  ;;  %v9296_v25 = vld [vmem:[#allocation2 + $0x20] sm:$0x1] }
 0x18d   : > { %v1139_v58 = vrot.slane %v1137_v33, 7  ;;  %v1122_v59 = vrot.slane %v1120_v38, 7  ;;  %v1479_v51 = vsel %vm9040_vm7, %v9256_v31, %v9258_v32  ;;  %v1483_v34 = vor.u32 %v1482_v35, %v9258_v32  ;;  %v9310_v38 = vld [vmem:[#allocation2 + $0x3c] sm:$0xf] }
 0x18e   : > { %v9267_v3 = vrot.slane %v1163_v47, 7  ;;  %v9269_v6 = vrot.slane %v1146_v46, 7  ;;  %v1488_v7 = vrot.slane %v1486_v36, 5  ;;  %v1539_v8 = vshrl.u32 %v9260_v37, 16  ;;  %v8480_v47 = vld [vmem:[#allocation8 + $0xc8] sm:$0xff]  }
 0x18f   : > { %v1142_v23 = vor.u32 %v1140_v21, %v1139_v58  ;;  %v1144_v56 = vrot.slane %v1139_v58, 4  ;;  %v1125_v9 = vor.u32 %v1123_v28, %v1122_v59  ;;  %v1127_v10 = vrot.slane %v1122_v59, 4  ;;  %7984 = vmatpush3.bf16.msra.mxu0 %v8472_v30 }
 0x190   : > { %v1168_v29 = vor.u32 %v1166_v55, %v9267_v3  ;;  %v1169_v4 = vrot.slane %v9267_v3, 4  ;;  %v1151_v13 = vor.u32 %v1149_v57, %v9269_v6  ;;  %v1152_v14 = vrot.slane %v9269_v6, 4  ;;  %7985 = vmatprep.subr.bf16.mxu0 %v8475_v2 }
 0x191   : > { %v1143_v16 = vsel %vm9107_vm11, %v1135_v42, %v1142_v23  ;;  %v1345_v63 = vsel %vm8985_vm2, %v1144_v56, %v1344_v50  ;;  %v1126_v20 = vsel %vm9107_vm11, %v1118_v44, %v1125_v9  ;;  %v1338_v19 = vsel %vm8985_vm2, %v1127_v10, %v1337_v52  ;;  %v7831_v44 = vpop.f32.mrf.mxu1  ;;  %v8458_v52 = vld [vmem:[#allocation8 + $0xb0] sm:$0xff]  }
 0x192   : > { %1343 = vst [vmem:[#allocation2 + $0x94] sm:$0xf] %v1143_v16  ;;  %1346 = vst [vmem:[#allocation2 + $0x98] sm:$0x1] %v1345_v63  ;;  %v1355_v53 = vsel %vm9094_vm10, %v1168_v29, %v1354_v60  ;;  %v1348_v42 = vsel %vm9094_vm10, %v1151_v13, %v1347_v11  ;;  %v1484_v24 = vrot.slane %v1483_v34, 4  ;;  %v9294_v48 = vrot.slane %v1539_v8, 4 }
 0x193   : > { %1336 = vst [vmem:[#allocation2 + $0x88] sm:$0xf] %v1126_v20  ;;  %1339 = vst [vmem:[#allocation2 + $0x8c] sm:$0x1] %v1338_v19  ;;  %v1542_v27 = vshll.u32 %v9260_v37, 16  ;;  %v1552_v30 = vshrl.u32 %v9276_v15, 16  ;;  %v6998_v31 = vcombine.low %v9260_v37, %v9276_v15  ;;  %v683_v32 = vadd.f32 %v7828_v41, %v9075_v5  ;;  %7986 = vmatpush3.bf16.msra.mxu0 %v8475_v2 }
 0x194   : > { %1356 = vst [vmem:[#allocation2 + $0xa8] sm:$0xf] %v1355_v53  ;;  %1349 = vst [vmem:[#allocation2 + $0x9c] sm:$0xf] %v1348_v42  ;;  %v1489_v35 = vsel %vm9040_vm7, %v1484_v24, %v1488_v7  ;;  %v1497_v36 = vor.u32 %v9228_v0, %v9226_v40  ;;  %v1500_v33 = vshll.u32 %v9218_v49, 16  ;;  %v1506_v21 = vrot.slane %v1504_v61, 4  ;;  %7987 = vmatprep.subr.bf16.mxu0 %v8477_v22  ;;  %v687_v61 = vpop.f32.mrf.mxu1 }
 0x195   : > { %v6971_v28 = vcombine.low %v1479_v51, %v1489_v35  ;;  %v9312_v50 = vrot.slane %v1542_v27, 5  ;;  %7905 = vmatprep.mubr.bf16.mxu0 %v6998_v31  ;;  %v729_v37 = vmax.f32 %v683_v32, 0.0  ;;  %v1510_v41 = vshll.u32 %v9296_v25, 16  ;;  %v9322_v7 = vld [vmem:[#allocation2 + $0x40] sm:$0xf]  ;;  %v8482_v29 = vld [vmem:[#allocation8 + $0xc0] sm:$0xff]  }
 0x196   : > { %v1498_v55 = vrot.slane %v1497_v36, 4  ;;  %v1502_v40 = vrot.slane %v1500_v33, 5  ;;  %v675_v0 = vadd.f32 %v9075_v5, %v674_v43  ;;  %v696_v49 = vadd.f32 %v7831_v44, %v9075_v5  ;;  %v1358_v16 = vld [vmem:[#allocation2 + $0xb0] sm:$0x1]  ;;  %v8464_v44 = vld [vmem:[#allocation8 + $0xa0] sm:$0xff]  }
 0x197   : > { %7850 = vmatmul.mubr.bf16.vlgmr.msra.gmra.mxu1 %v6971_v28  ;;  %v7309_v46 = vpack.c.bf16 %v729_v37, %v729_v37  ;;  %v1512_v57 = vrot.slane %v1510_v41, 5  ;;  %v688_v58 = vadd.f32 %v9075_v5, %v687_v61  ;;  %v1563_v59 = vshrl.u32 %v9310_v38, 16  ;;  %7988 = vmatpush3.bf16.msra.mxu0 %v8477_v22  ;;  %v8461_v5 = vld [vmem:[#allocation8 + $0xa8] sm:$0xff]   ;;  %v9332_v27 = vld [vmem:[#allocation8 + $0x178] sm:$0xff]  }
 0x198   : > { %7930 = vmatpush3.bf16.msra.mxu1 %v9052_v54  ;;  %v1503_v60 = vsel %vm9040_vm7, %v1498_v55, %v1502_v40  ;;  %v1507_v51 = vor.u32 %v1506_v21, %v1502_v40  ;;  %v727_v34 = vmax.f32 %v675_v0, 0.0  ;;  %v732_v2 = vmax.f32 %v696_v49, 0.0  ;;  %7989 = vmatprep.subr.bf16.mxu0 %v8480_v47  ;;  %v1351_v36 = vld [vmem:[#allocation2 + $0xa4] sm:$0x1]  ;;  %v1368_v21 = vld [vmem:[#allocation2 + $0xc0] sm:$0xf] }
 0x199   : > { %v1171_v8 = vshrl.u32 %v7309_v46, 16  ;;  %v1174_v43 = vshll.u32 %v7309_v46, 16  ;;  %v730_v23 = vmax.f32 %v688_v58, 0.0  ;;  %v9324_v56 = vrot.slane %v1563_v59, 4  ;;  %7931 = vmatprep.subr.bf16.mxu1 %v8458_v52  ;;  %v9336_v55 = vld [vmem:[#allocation2 + $0x2c] sm:$0x1]  ;;  %v7832_v58 = vpop.f32.mrf.mxu1 }
 0x19a   : > { %v1508_v9 = vrot.slane %v1507_v51, 4  ;;  %v7307_v10 = vpack.c.bf16 %v727_v34, %v727_v34  ;;  %v7312_v54 = vpack.c.bf16 %v732_v2, %v732_v2  ;;  %v1566_v11 = vshll.u32 %v9310_v38, 16 }
 0x19b   : > { %v1173_v13 = vrot.slane %v1171_v8, 7  ;;  %v7310_v63 = vpack.c.bf16 %v730_v23, %v730_v23  ;;  %v1576_v20 = vshrl.u32 %v9322_v7, 16  ;;  %v6999_v19 = vcombine.low %v9310_v38, %v9322_v7  ;;  %7990 = vmatpush3.bf16.msra.mxu0 %v8480_v47 }
 0x19c   : > { %v1513_v22 = vsel %vm9040_vm7, %v1508_v9, %v1512_v57  ;;  %v1154_v53 = vshrl.u32 %v7307_v10, 16  ;;  %v1157_v42 = vshll.u32 %v7307_v10, 16  ;;  %v1197_v24 = vshrl.u32 %v7312_v54, 16  ;;  %7932 = vmatpush3.bf16.msra.mxu1 %v8458_v52  ;;  %7991 = vmatprep.subr.bf16.mxu0 %v8482_v29  ;;  %v1387_v57 = vld [vmem:[#allocation2 + $0x48] sm:$0xf] }
 0x19d   : > { %v1176_v31 = vor.u32 %v1174_v43, %v1173_v13  ;;  %v1178_v32 = vrot.slane %v1173_v13, 4  ;;  %v6972_v35 = vcombine.low %v1503_v60, %v1513_v22  ;;  %v1200_v33 = vshll.u32 %v7312_v54, 16  ;;  %7906 = vmatmul.mubr.bf16.gmra.mxu0 %v6999_v19  ;;  %7933 = vmatprep.subr.bf16.mxu1 %v8461_v5  ;;  %v1361_v43 = vld [vmem:[#allocation2 + $0xb4] sm:$0xf] }
 0x19e   : > { %v1156_v38 = vrot.slane %v1154_v53, 7  ;;  %v9334_v28 = vrot.slane %v1197_v24, 7  ;;  %v1180_v37 = vshrl.u32 %v7310_v63, 16  ;;  %v1183_v41 = vshll.u32 %v7310_v63, 16  ;;  %v1389_v22 = vld [vmem:[#allocation2 + $0x54] sm:$0xf] }
 0x19f   : > { %v1177_v52 = vsel %vm9107_vm11, %v1169_v4, %v1176_v31  ;;  %v1359_v47 = vsel %vm8985_vm2, %v1178_v32, %v1358_v16  ;;  %7853 = vmatprep.mubr.bf16.mxu1 %v6972_v35  ;;  %v9344_v40 = vrot.slane %v1566_v11, 5  ;;  %v1521_v0 = vor.u32 %v9252_v17, %v9250_v18  ;;  %v8469_v4 = vld [vmem:[#allocation8 + $0x98] sm:$0xff]   ;;  %7992 = vmatpush3.bf16.msra.mxu0 %v8482_v29  ;;  %v9355_v17 = vld [vmem:[#allocation2 + $0x4c] sm:$0xf]  ;;  %v9371_v11 = vld [vmem:[#allocation2 + $0x38] sm:$0x1]  ;;  %v690_v29 = vpop.f32.mrf.mxu1 }
 0x1a0   : > { %1357 = vst [vmem:[#allocation2 + $0xac] sm:$0xf] %v1177_v52  ;;  %1360 = vst [vmem:[#allocation2 + $0xb0] sm:$0x1] %v1359_v47  ;;  %v1159_v49 = vor.u32 %v1157_v42, %v1156_v38  ;;  %v1161_v61 = vrot.slane %v1156_v38, 4  ;;  %v1202_v46 = vor.u32 %v1200_v33, %v9334_v28  ;;  %v1203_v3 = vrot.slane %v9334_v28, 4  ;;  %7934 = vmatpush3.bf16.msra.mxu1 %v8461_v5 }
 0x1a1   : > { %v9350_v59 = vrot.slane %v1180_v37, 7  ;;  %v1522_v60 = vrot.slane %v1521_v0, 4  ;;  %v1524_v51 = vshll.u32 %v9231_v1, 16  ;;  %v1530_v18 = vrot.slane %v1528_v12, 4  ;;  %7935 = vmatprep.subr.bf16.mxu1 %v8464_v44  ;;  %8073 = vmatprep.subr.bf16.mxu0 %v9332_v27  ;;  %v8474_v53 = vld [vmem:[#allocation8 + $0x90] sm:$0xff]  }
 0x1a2   : > { %v1160_v34 = vsel %vm9107_vm11, %v1152_v14, %v1159_v49  ;;  %v1352_v2 = vsel %vm8985_vm2, %v1161_v61, %v1351_v36  ;;  %v1369_v8 = vsel %vm9094_vm10, %v1202_v46, %v1368_v21  ;;  %v1534_v1 = vshll.u32 %v9336_v55, 16  ;;  %v8563_v24 = vld [vmem:[%s11425_s2] ss:$0 sm:$0xff]  ;;  %v9396_v46 = vld [vmem:[#allocation2 + $0x44] sm:$0x1] }
 0x1a3   : > { %1350 = vst [vmem:[#allocation2 + $0xa0] sm:$0xf] %v1160_v34  ;;  %1353 = vst [vmem:[#allocation2 + $0xa4] sm:$0x1] %v1352_v2  ;;  %v1185_v12 = vor.u32 %v1183_v41, %v9350_v59  ;;  %v1186_v23 = vrot.slane %v9350_v59, 4  ;;  %v1526_v6 = vrot.slane %v1524_v51, 5  ;;  %v7000_v54 = vcombine.low %v1387_v57, %v9355_v17 }
 0x1a4   : > { %1370 = vst [vmem:[#allocation2 + $0xc0] sm:$0xf] %v1369_v8  ;;  %v1587_v5 = vshrl.u32 %v1387_v57, 16  ;;  %v1536_v9 = vrot.slane %v1534_v1, 5  ;;  %v1590_v14 = vshll.u32 %v1387_v57, 16  ;;  %v1600_v10 = vshrl.u32 %v9355_v17, 16  ;;  %7936 = vmatpush3.bf16.msra.mxu1 %v8464_v44 }
 0x1a5   : > { %v1362_v13 = vsel %vm9094_vm10, %v1185_v12, %v1361_v43  ;;  %v1527_v16 = vsel %vm9040_vm7, %v1522_v60, %v1526_v6  ;;  %v1531_v63 = vor.u32 %v1530_v18, %v1526_v6  ;;  %7937 = vmatprep.subr.bf16.mxu1 %v8469_v4  ;;  %7909 = vmatprep.mubr.bf16.mxu0 %v7000_v54  ;;  %v1548_v31 = vshll.u32 %v9276_v15, 16  ;;  %v9390_v41 = vld [vmem:[#allocation2 + $0x58] sm:$0xf]  ;;  %v8479_v57 = vld [vmem:[#allocation8 + $0x88] sm:$0xff]   ;;  %v1372_v43 = vld [vmem:[#allocation2 + $0xc8] sm:$0x1] }
 0x1a6   : > { %v9377_v19 = vrot.slane %v1587_v5, 4  ;;  %1363 = vst [vmem:[#allocation2 + $0xb4] sm:$0xf] %v1362_v13  ;;  %v9379_v42 = vrot.slane %v1590_v14, 5  ;;  %v699_v44 = vadd.f32 %v8563_v24, %v7832_v58  ;;  %v1545_v39 = vor.u32 %v9312_v50, %v9294_v48  ;;  %v9439_v59 = vld [vmem:[#allocation2 + $0x70] sm:$0xf] }
 0x1a7   : > { %v1532_v32 = vrot.slane %v1531_v63, 4  ;;  %v1554_v35 = vrot.slane %v1552_v30, 4  ;;  %v1558_v36 = vshll.u32 %v9371_v11, 16  ;;  %v691_v33 = vadd.f32 %v8563_v24, %v690_v29  ;;  %v1365_v24 = vld [vmem:[#allocation2 + $0xbc] sm:$0x1] }
 0x1a8   : > { %v733_v21 = vmax.f32 %v699_v44, 0.0  ;;  %v1546_v38 = vrot.slane %v1545_v39, 4  ;;  %v1550_v37 = vrot.slane %v1548_v31, 5  ;;  %v1611_v52 = vshrl.u32 %v1389_v22, 16  ;;  %7938 = vmatpush3.bf16.msra.mxu1 %v8469_v4  ;;  %v9412_v31 = vld [vmem:[#allocation2 + $0x64] sm:$0xf] }
 0x1a9   : > { %v1537_v47 = vsel %vm9040_vm7, %v1532_v32, %v1536_v9  ;;  %v1560_v48 = vrot.slane %v1558_v36, 5  ;;  %v731_v50 = vmax.f32 %v691_v33, 0.0  ;;  %v1614_v0 = vshll.u32 %v1389_v22, 16  ;;  %7939 = vmatprep.subr.bf16.mxu1 %v8474_v53  ;;  %v1391_v9 = vld [vmem:[#allocation2 + $0x60] sm:$0xf] }
 0x1aa   : > { %v6973_v49 = vcombine.low %v1527_v16, %v1537_v47  ;;  %v7313_v15 = vpack.c.bf16 %v733_v21, %v733_v21  ;;  %v1551_v30 = vsel %vm9040_vm7, %v1546_v38, %v1550_v37  ;;  %v1555_v61 = vor.u32 %v1554_v35, %v1550_v37  ;;  %v8483_v16 = vld [vmem:[#allocation8 + $0x80] sm:$0xff]   ;;  %v9416_v21 = vld [vmem:[#allocation8 + $0x138] sm:$0xff]  }
 0x1ab   : > { %v7311_v58 = vpack.c.bf16 %v731_v50, %v731_v50  ;;  %v9398_v60 = vrot.slane %v1611_v52, 4  ;;  %v9400_v4 = vrot.slane %v1614_v0, 5  ;;  %v1624_v51 = vshrl.u32 %v9390_v41, 16  ;;  %v1393_v50 = vld [vmem:[#allocation2 + $0x6c] sm:$0xf] }
 0x1ac   : > { %7854 = vmatmul.mubr.bf16.gmra.mxu1 %v6973_v49  ;;  %v1205_v18 = vshrl.u32 %v7313_v15, 16  ;;  %v1208_v34 = vshll.u32 %v7313_v15, 16  ;;  %v1556_v2 = vrot.slane %v1555_v61, 4  ;;  %v7001_v8 = vcombine.low %v1389_v22, %v9390_v41 }
 0x1ad   : > { %v1188_v1 = vshrl.u32 %v7311_v58, 16  ;;  %v1191_v12 = vshll.u32 %v7311_v58, 16  ;;  %v1569_v6 = vor.u32 %v9344_v40, %v9324_v56  ;;  %v1572_v5 = vshll.u32 %v9322_v7, 16  ;;  %7940 = vmatpush3.bf16.msra.mxu1 %v8474_v53 }
 0x1ae   : > { %v1207_v14 = vrot.slane %v1205_v18, 7  ;;  %v1561_v54 = vsel %vm9040_vm7, %v1556_v2, %v1560_v48  ;;  %7910 = vmatmul.mubr.bf16.gmra.mxu0 %v7001_v8  ;;  %v1578_v29 = vrot.slane %v1576_v20, 4  ;;  %v1582_v13 = vshll.u32 %v9396_v46, 16  ;;  %7941 = vmatprep.subr.bf16.mxu1 %v8479_v57  ;;  %v9426_v48 = vld [vmem:[#allocation2 + $0x50] sm:$0x1] }
 0x1af   : > { %v6974_v63 = vcombine.low %v1551_v30, %v1561_v54  ;;  %v1190_v22 = vrot.slane %v1188_v1, 7  ;;  %v1570_v56 = vrot.slane %v1569_v6, 4  ;;  %v1574_v40 = vrot.slane %v1572_v5, 5  ;;  %v1395_v18 = vld [vmem:[#allocation2 + $0x78] sm:$0xf] }
 0x1b0   : > { %v1210_v44 = vor.u32 %v1208_v34, %v1207_v14  ;;  %v1212_v39 = vrot.slane %v1207_v14, 4  ;;  %v1584_v53 = vrot.slane %v1582_v13, 5  ;;  %v1635_v32 = vshrl.u32 %v1391_v9, 16  ;;  %v9451_v6 = vld [vmem:[#allocation2 + $0x7c] sm:$0xf] }
 0x1b1   : > { %7857 = vmatprep.mubr.bf16.mxu1 %v6974_v63  ;;  %v1193_v35 = vor.u32 %v1191_v12, %v1190_v22  ;;  %v1195_v36 = vrot.slane %v1190_v22, 4  ;;  %v1575_v20 = vsel %vm9040_vm7, %v1570_v56, %v1574_v40  ;;  %v1579_v33 = vor.u32 %v1578_v29, %v1574_v40  ;;  %7942 = vmatpush3.bf16.msra.mxu1 %v8479_v57  ;;  %v9461_v22 = vld [vmem:[#allocation2 + $0x68] sm:$0x1] }
 0x1b2   : > { %v1211_v38 = vsel %vm9107_vm11, %v1203_v3, %v1210_v44  ;;  %v1373_v37 = vsel %vm8985_vm2, %v1212_v39, %v1372_v43  ;;  %v9424_v52 = vrot.slane %v1635_v32, 4  ;;  %v1638_v47 = vshll.u32 %v1391_v9, 16  ;;  %7943 = vmatprep.subr.bf16.mxu1 %v8483_v16 }
 0x1b3   : > { %1371 = vst [vmem:[#allocation2 + $0xc4] sm:$0xf] %v1211_v38  ;;  %1374 = vst [vmem:[#allocation2 + $0xc8] sm:$0x1] %v1373_v37  ;;  %v1194_v28 = vsel %vm9107_vm11, %v1186_v23, %v1193_v35  ;;  %v1366_v3 = vsel %vm8985_vm2, %v1195_v36, %v1365_v24  ;;  %v1580_v0 = vrot.slane %v1579_v33, 4  ;;  %v1648_v49 = vshrl.u32 %v9412_v31, 16 }
 0x1b4   : > { %1364 = vst [vmem:[#allocation2 + $0xb8] sm:$0xf] %v1194_v28  ;;  %1367 = vst [vmem:[#allocation2 + $0xbc] sm:$0x1] %v1366_v3  ;;  %v1640_v15 = vrot.slane %v1638_v47, 5  ;;  %v7002_v30 = vcombine.low %v1391_v9, %v9412_v31  ;;  %v1593_v61 = vor.u32 %v9379_v42, %v9377_v19  ;;  %v1596_v57 = vshll.u32 %v9355_v17, 16 }
 0x1b5   : > { %v1585_v62 = vsel %vm9040_vm7, %v1580_v0, %v1584_v53  ;;  %v1602_v26 = vrot.slane %v1600_v10, 4  ;;  %v1606_v23 = vshll.u32 %v9426_v48, 16  ;;  %v1659_v58 = vshrl.u32 %v1393_v50, 16  ;;  %7944 = vmatpush3.bf16.msra.mxu1 %v8483_v16  ;;  %v9446_v42 = vld [vmem:[#allocation2 + $0x5c] sm:$0x1] }
 0x1b6   : > { %v6975_v34 = vcombine.low %v1575_v20, %v1585_v62  ;;  %7913 = vmatprep.mubr.bf16.mxu0 %v7002_v30  ;;  %v1594_v2 = vrot.slane %v1593_v61, 4  ;;  %v1598_v8 = vrot.slane %v1596_v57, 5  ;;  %v1662_v19 = vshll.u32 %v1393_v50, 16  ;;  %8025 = vmatprep.subr.bf16.mxu1 %v9416_v21  ;;  %v9471_v33 = vld [vmem:[#allocation2 + $0x88] sm:$0xf] }
 0x1b7   : > { %v1608_v43 = vrot.slane %v1606_v23, 5  ;;  %v1661_v1 = vrot.slane %v1659_v58, 4  ;;  %v1672_v12 = vshrl.u32 %v9439_v59, 16  ;;  %v7003_v10 = vcombine.low %v1393_v50, %v9439_v59  ;;  %v9478_v62 = vld [vmem:[#allocation2 + $0x74] sm:$0x1] }
 0x1b8   : > { %7858 = vmatmul.mubr.bf16.gmra.mxu1 %v6975_v34  ;;  %v1599_v5 = vsel %vm9040_vm7, %v1594_v2, %v1598_v8  ;;  %v1603_v9 = vor.u32 %v1602_v26, %v1598_v8  ;;  %v1664_v14 = vrot.slane %v1662_v19, 5  ;;  %v1617_v54 = vor.u32 %v9400_v4, %v9398_v60  ;;  %v1397_v4 = vld [vmem:[#allocation2 + $0x84] sm:$0xf] }
 0x1b9   : > { %7914 = vmatmul.mubr.bf16.gmra.mxu0 %v7003_v10  ;;  %v1620_v29 = vshll.u32 %v9390_v41, 16  ;;  %v1626_v13 = vrot.slane %v1624_v51, 4  ;;  %v1630_v16 = vshll.u32 %v9446_v42, 16  ;;  %v1683_v63 = vshrl.u32 %v1395_v18, 16 }
 0x1ba   : > { %v1604_v24 = vrot.slane %v1603_v9, 4  ;;  %v1618_v56 = vrot.slane %v1617_v54, 4  ;;  %v1686_v40 = vshll.u32 %v1395_v18, 16  ;;  %v1696_v44 = vshrl.u32 %v9451_v6, 16 }
 0x1bb   : > { %v1622_v39 = vrot.slane %v1620_v29, 5  ;;  %v1632_v53 = vrot.slane %v1630_v16, 5  ;;  %v9464_v32 = vrot.slane %v1683_v63, 4  ;;  %v7004_v60 = vcombine.low %v1395_v18, %v9451_v6  ;;  %v1399_v18 = vld [vmem:[#allocation2 + $0x90] sm:$0xf] }
 0x1bc   : > { %v1609_v51 = vsel %vm9040_vm7, %v1604_v24, %v1608_v43  ;;  %v1688_v35 = vrot.slane %v1686_v40, 5  ;;  %v1641_v36 = vor.u32 %v1640_v15, %v9424_v52  ;;  %v1644_v20 = vshll.u32 %v9412_v31, 16  ;;  %v9485_v43 = vld [vmem:[#allocation2 + $0x94] sm:$0xf]  ;;  %v9488_v24 = vld [vmem:[#allocation2 + $0x80] sm:$0x1] }
 0x1bd   : > { %v6976_v38 = vcombine.low %v1599_v5, %v1609_v51  ;;  %v1623_v37 = vsel %vm9040_vm7, %v1618_v56, %v1622_v39  ;;  %v1627_v47 = vor.u32 %v1626_v13, %v1622_v39  ;;  %7917 = vmatprep.mubr.bf16.mxu0 %v7004_v60  ;;  %v1650_v50 = vrot.slane %v1648_v49, 4  ;;  %v1401_v39 = vld [vmem:[#allocation2 + $0x9c] sm:$0xf] }
 0x1be   : > { %v1642_v28 = vrot.slane %v1641_v36, 4  ;;  %v1646_v3 = vrot.slane %v1644_v20, 5  ;;  %v1654_v0 = vshll.u32 %v9461_v22, 16  ;;  %v1707_v30 = vshrl.u32 %v1397_v4, 16 }
 0x1bf   : > { %7861 = vmatprep.mubr.bf16.mxu1 %v6976_v38  ;;  %v1628_v61 = vrot.slane %v1627_v47, 4  ;;  %v1710_v57 = vshll.u32 %v1397_v4, 16  ;;  %v1720_v52 = vshrl.u32 %v9471_v33, 16  ;;  %v7005_v15 = vcombine.low %v1397_v4, %v9471_v33 }
 0x1c0   : > { %v1647_v26 = vsel %vm9040_vm7, %v1642_v28, %v1646_v3  ;;  %v1651_v23 = vor.u32 %v1650_v50, %v1646_v3  ;;  %v1656_v58 = vrot.slane %v1654_v0, 5  ;;  %v1709_v49 = vrot.slane %v1707_v30, 4  ;;  %v9501_v0 = vld [vmem:[#allocation2 + $0x8c] sm:$0x1] }
 0x1c1   : > { %v1633_v34 = vsel %vm9040_vm7, %v1628_v61, %v1632_v53  ;;  %v1712_v2 = vrot.slane %v1710_v57, 5  ;;  %7918 = vmatmul.mubr.bf16.gmra.mxu0 %v7005_v15  ;;  %v1665_v8 = vor.u32 %v1664_v14, %v1661_v1  ;;  %v1668_v19 = vshll.u32 %v9439_v59, 16  ;;  %v9494_v53 = vld [vmem:[#allocation2 + $0xa0] sm:$0xf] }
 0x1c2   : > { %v6977_v10 = vcombine.low %v1623_v37, %v1633_v34  ;;  %v1652_v5 = vrot.slane %v1651_v23, 4  ;;  %v1674_v9 = vrot.slane %v1672_v12, 4  ;;  %v1678_v54 = vshll.u32 %v9478_v62, 16 }
 0x1c3   : > { %v1666_v29 = vrot.slane %v1665_v8, 4  ;;  %v1670_v13 = vrot.slane %v1668_v19, 5  ;;  %v1731_v16 = vshrl.u32 %v1399_v18, 16  ;;  %v1734_v63 = vshll.u32 %v1399_v18, 16 }
 0x1c4   : > { %7862 = vmatmul.mubr.bf16.gmra.mxu1 %v6977_v10  ;;  %v1657_v56 = vsel %vm9040_vm7, %v1652_v5, %v1656_v58  ;;  %v1680_v1 = vrot.slane %v1678_v54, 5  ;;  %v1744_v14 = vshrl.u32 %v9485_v43, 16  ;;  %v7006_v40 = vcombine.low %v1399_v18, %v9485_v43  ;;  %v9507_v58 = vld [vmem:[#allocation2 + $0xac] sm:$0xf] }
 0x1c5   : > { %v6978_v12 = vcombine.low %v1647_v26, %v1657_v56  ;;  %v1671_v60 = vsel %vm9040_vm7, %v1666_v29, %v1670_v13  ;;  %v1675_v4 = vor.u32 %v1674_v9, %v1670_v13  ;;  %v1733_v51 = vrot.slane %v1731_v16, 4  ;;  %v1403_v26 = vld [vmem:[#allocation2 + $0xa8] sm:$0xf]  ;;  %v9513_v29 = vld [vmem:[#allocation2 + $0x98] sm:$0x1] }
 0x1c6   : > { %v1736_v36 = vrot.slane %v1734_v63, 5  ;;  %7921 = vmatprep.mubr.bf16.mxu0 %v7006_v40  ;;  %v1689_v20 = vor.u32 %v1688_v35, %v9464_v32  ;;  %v1692_v38 = vshll.u32 %v9451_v6, 16  ;;  %v1698_v37 = vrot.slane %v1696_v44, 4  ;;  %v1405_v13 = vld [vmem:[#allocation2 + $0xb4] sm:$0xf] }
 0x1c7   : > { %7865 = vmatprep.mubr.bf16.mxu1 %v6978_v12  ;;  %v1676_v47 = vrot.slane %v1675_v4, 4  ;;  %v1702_v50 = vshll.u32 %v9488_v24, 16  ;;  %v1755_v28 = vshrl.u32 %v1401_v39, 16  ;;  %v1758_v3 = vshll.u32 %v1401_v39, 16  ;;  %v9516_v40 = vld [vmem:[#allocation2 + $0xb8] sm:$0xf] }
 0x1c8   : > { %v1690_v30 = vrot.slane %v1689_v20, 4  ;;  %v1694_v61 = vrot.slane %v1692_v38, 5  ;;  %v1768_v57 = vshrl.u32 %v9494_v53, 16  ;;  %v7007_v15 = vcombine.low %v1401_v39, %v9494_v53 }
 0x1c9   : > { %v1681_v32 = vsel %vm9040_vm7, %v1676_v47, %v1680_v1  ;;  %v1704_v35 = vrot.slane %v1702_v50, 5  ;;  %v1757_v44 = vrot.slane %v1755_v28, 4  ;;  %v1760_v23 = vrot.slane %v1758_v3, 5 }
 0x1ca   : > { %v6979_v18 = vcombine.low %v1671_v60, %v1681_v32  ;;  %v1695_v34 = vsel %vm9040_vm7, %v1690_v30, %v1694_v61  ;;  %v1699_v8 = vor.u32 %v1698_v37, %v1694_v61  ;;  %7922 = vmatmul.mubr.bf16.gmra.mxu0 %v7007_v15  ;;  %v1713_v19 = vor.u32 %v1712_v2, %v1709_v49 }
 0x1cb   : > { %v1716_v10 = vshll.u32 %v9471_v33, 16  ;;  %v1722_v5 = vrot.slane %v1720_v52, 4  ;;  %v1726_v9 = vshll.u32 %v9501_v0, 16  ;;  %v1779_v54 = vshrl.u32 %v1403_v26, 16 }
 0x1cc   : > { %7866 = vmatmul.mubr.bf16.gmra.mxu1 %v6979_v18  ;;  %v1700_v16 = vrot.slane %v1699_v8, 4  ;;  %v1714_v63 = vrot.slane %v1713_v19, 4  ;;  %v1782_v56 = vshll.u32 %v1403_v26, 16  ;;  %v1792_v1 = vshrl.u32 %v9507_v58, 16 }
 0x1cd   : > { %v1718_v39 = vrot.slane %v1716_v10, 5  ;;  %v1728_v12 = vrot.slane %v1726_v9, 5  ;;  %v1781_v49 = vrot.slane %v1779_v54, 4  ;;  %v7008_v2 = vcombine.low %v1403_v26, %v9507_v58  ;;  %v9534_v54 = vld [vmem:[#allocation2 + $0xb0] sm:$0x1] }
 0x1ce   : > { %v1705_v52 = vsel %vm9040_vm7, %v1700_v16, %v1704_v35  ;;  %v1784_v60 = vrot.slane %v1782_v56, 5  ;;  %v1737_v4 = vor.u32 %v1736_v36, %v1733_v51  ;;  %v1740_v20 = vshll.u32 %v9485_v43, 16  ;;  %v9527_v36 = vld [vmem:[#allocation2 + $0xa4] sm:$0x1]  ;;  %v8481_v35 = vld [vmem:[#allocation2 + $0xc] sm:$0xff]  }
 0x1cf   : > { %v6980_v38 = vcombine.low %v1695_v34, %v1705_v52  ;;  %v1719_v37 = vsel %vm9040_vm7, %v1714_v63, %v1718_v39  ;;  %v1723_v47 = vor.u32 %v1722_v5, %v1718_v39  ;;  %7925 = vmatprep.mubr.bf16.mxu0 %v7008_v2  ;;  %v1746_v50 = vrot.slane %v1744_v14, 4 }
 0x1d0   : > { %v1738_v28 = vrot.slane %v1737_v4, 4  ;;  %v1742_v3 = vrot.slane %v1740_v20, 5  ;;  %v1750_v30 = vshll.u32 %v9513_v29, 16  ;;  %v1803_v61 = vshrl.u32 %v1405_v13, 16  ;;  %v2420_v20 = vld [vmem:[#allocation2] sm:$0xe] }
 0x1d1   : > { %7869 = vmatprep.mubr.bf16.mxu1 %v6980_v38  ;;  %v1724_v15 = vrot.slane %v1723_v47, 4  ;;  %v1806_v26 = vshll.u32 %v1405_v13, 16  ;;  %v1816_v32 = vshrl.u32 %v9516_v40, 16  ;;  %v7009_v51 = vcombine.low %v1405_v13, %v9516_v40 }
 0x1d2   : > { %v1743_v14 = vsel %vm9040_vm7, %v1738_v28, %v1742_v3  ;;  %v1747_v18 = vor.u32 %v1746_v50, %v1742_v3  ;;  %v1752_v34 = vrot.slane %v1750_v30, 5  ;;  %v1805_v8 = vrot.slane %v1803_v61, 4  ;;  %v8484_v3 = vld [vmem:[#allocation2 + $0x18] sm:$0xff]  }
 0x1d3   : > { %v1729_v19 = vsel %vm9040_vm7, %v1724_v15, %v1728_v12  ;;  %v1808_v10 = vrot.slane %v1806_v26, 5  ;;  %7926 = vmatmul.mubr.bf16.gmra.mxu0 %v7009_v51  ;;  %v1761_v5 = vor.u32 %v1760_v23, %v1757_v44  ;;  %v1764_v9 = vshll.u32 %v9494_v53, 16  ;;  %v8499_v15 = vld [vmem:[#allocation8 + $0x170] sm:$0xff]  }
 0x1d4   : > { %v6981_v13 = vcombine.low %v1719_v37, %v1729_v19  ;;  %v1748_v16 = vrot.slane %v1747_v18, 4  ;;  %v1770_v63 = vrot.slane %v1768_v57, 4  ;;  %v1774_v56 = vshll.u32 %v9527_v36, 16  ;;  %7993 = vmatprep.mubr.bf16.mxu0 %v8481_v35  ;;  %v9541_v37 = vld [vmem:[#allocation2 + $0xbc] sm:$0x1] }
 0x1d5   : > { %v1762_v39 = vrot.slane %v1761_v5, 4  ;;  %v1766_v2 = vrot.slane %v1764_v9, 5  ;;  %v1785_v52 = vor.u32 %v1784_v60, %v1781_v49  ;;  %v1788_v4 = vshll.u32 %v9507_v58, 16  ;;  %v2422_v18 = vld [vmem:[#allocation2 + $0x18] sm:$0xe]  ;;  %v8485_v9 = vld [vmem:[#allocation2 + $0x24] sm:$0xff]  }
 0x1d6   : > { %7870 = vmatmul.mubr.bf16.gmra.mxu1 %v6981_v13  ;;  %v1753_v44 = vsel %vm9040_vm7, %v1748_v16, %v1752_v34  ;;  %v1776_v23 = vrot.slane %v1774_v56, 5  ;;  %v1794_v12 = vrot.slane %v1792_v1, 4  ;;  %v1798_v38 = vshll.u32 %v9534_v54, 16  ;;  %v2421_v13 = vld [vmem:[#allocation2 + $0xc] sm:$0xe] }
 0x1d7   : > { %v6982_v57 = vcombine.low %v1743_v14, %v1753_v44  ;;  %v1767_v47 = vsel %vm9040_vm7, %v1762_v39, %v1766_v2  ;;  %v1771_v50 = vor.u32 %v1770_v63, %v1766_v2  ;;  %v1786_v28 = vrot.slane %v1785_v52, 4  ;;  %v8564_v16 = vld [vmem:[#allocation2 + $0x4] sm:$0xf] }
 0x1d8   : > { %v1790_v49 = vrot.slane %v1788_v4, 5  ;;  %v1800_v60 = vrot.slane %v1798_v38, 5  ;;  %v1809_v30 = vor.u32 %v1808_v10, %v1805_v8  ;;  %v1812_v61 = vshll.u32 %v9516_v40, 16  ;;  %v8566_v38 = vld [vmem:[#allocation2 + $0x10] sm:$0xf] }
 0x1d9   : > { %7873 = vmatprep.mubr.bf16.mxu1 %v6982_v57  ;;  %v1772_v26 = vrot.slane %v1771_v50, 4  ;;  %v1818_v1 = vrot.slane %v1816_v32, 4  ;;  %v1822_v51 = vshll.u32 %v9541_v37, 16  ;;  %v7018_v35 = vrot.slane %v2420_v20, 9  ;;  %v8565_v32 = vld [vmem:[#allocation2 + $0x8] sm:$0x1] }
 0x1da   : > { %v1791_v14 = vsel %vm9040_vm7, %v1786_v28, %v1790_v49  ;;  %v1795_v34 = vor.u32 %v1794_v12, %v1790_v49  ;;  %v1810_v19 = vrot.slane %v1809_v30, 4  ;;  %v1814_v5 = vrot.slane %v1812_v61, 5  ;;  %v8567_v49 = vld [vmem:[#allocation2 + $0x14] sm:$0x1]  ;;  %v2423_v61 = vld [vmem:[#allocation2 + $0x24] sm:$0xe] }
 0x1db   : > { %v1777_v8 = vsel %vm9040_vm7, %v1772_v26, %v1776_v23  ;;  %7994 = vmatmul.mubr.bf16.vlgmr.msra.gmra.mxu0 %v8484_v3  ;;  %v1824_v10 = vrot.slane %v1822_v51, 5  ;;  %v2473_v63 = vrot.slane %v8564_v16, 5  ;;  %v2476_v56 = vrot.slane %v8565_v32, 5  ;;  %v8486_v51 = vld [vmem:[#allocation2 + $0x30] sm:$0xff]  }
 0x1dc   : > { %v6983_v39 = vcombine.low %v1767_v47, %v1777_v8  ;;  %v1796_v2 = vrot.slane %v1795_v34, 4  ;;  %v1815_v52 = vsel %vm9040_vm7, %v1810_v19, %v1814_v5  ;;  %v1819_v4 = vor.u32 %v1818_v1, %v1814_v5  ;;  %7997 = vmatprep.mubr.bf16.mxu0 %v8485_v9  ;;  %8074 = vmatpush3.bf16.msra.mxu0 %v9332_v27  ;;  %v8502_v47 = vld [vmem:[#allocation8 + $0x168] sm:$0xff]   ;;  %v2424_v27 = vld [vmem:[#allocation2 + $0x30] sm:$0xe]  ;;  %v2425_v19 = vld [vmem:[#allocation2 + $0x3c] sm:$0xe] }
 0x1dd   : > { %v9562_v44 = vsel %vm9555_vm14, %v7018_v35, %v2473_v63  ;;  %v2475_v23 = vrot.slane %v2473_v63, 4  ;;  %v7019_v12 = vrot.slane %v2421_v13, 9  ;;  %v2480_v57 = vrot.slane %v8566_v38, 5  ;;  %8075 = vmatprep.subr.bf16.mxu0 %v8499_v15  ;;  %v8488_v9 = vld [vmem:[#allocation2 + $0x3c] sm:$0xff]  }
 0x1de   : > { %7874 = vmatmul.mubr.bf16.gmra.mxu1 %v6983_v39  ;;  %v1801_v50 = vsel %vm9040_vm7, %v1796_v2, %v1800_v60  ;;  %v1820_v28 = vrot.slane %v1819_v4, 4  ;;  %v2483_v3 = vrot.slane %v8567_v49, 5  ;;  %v7020_v30 = vrot.slane %v2422_v18, 9  ;;  %v8568_v18 = vld [vmem:[#allocation2 + $0x1c] sm:$0xf] }
 0x1df   : > { %v6984_v26 = vcombine.low %v1791_v14, %v1801_v50  ;;  %v2477_v1 = vsel %vm9555_vm14, %v2475_v23, %v2476_v56  ;;  %v9570_v35 = vsel %vm9555_vm14, %v7019_v12, %v2480_v57  ;;  %v2482_v34 = vrot.slane %v2480_v57, 4  ;;  %v8504_v8 = vld [vmem:[#allocation8 + $0x160] sm:$0xff]   ;;  %v8569_v56 = vld [vmem:[#allocation2 + $0x28] sm:$0xf]  ;;  %v8570_v12 = vld [vmem:[#allocation2 + $0x34] sm:$0xf] }
 0x1e0   : > { %v1825_v60 = vsel %vm9040_vm7, %v1820_v28, %v1824_v10  ;;  %v7034_v5 = vcombine.low %v9562_v44, %v2477_v1  ;;  %v2487_v13 = vrot.slane %v8568_v18, 5  ;;  %v2490_v14 = vrot.slane %v9296_v25, 5  ;;  %8076 = vmatpush3.bf16.msra.mxu0 %v8499_v15  ;;  %v2426_v4 = vld [vmem:[#allocation2 + $0x48] sm:$0xe]  ;;  %v2427_v49 = vld [vmem:[#allocation2 + $0x54] sm:$0xe] }
 0x1e1   : > { %7877 = vmatprep.mubr.bf16.mxu1 %v6984_v26  ;;  %v6985_v16 = vcombine.low %v1815_v52, %v1825_v60  ;;  %v9578_v63 = vsel %vm9555_vm14, %v2482_v34, %v2483_v3  ;;  %v7021_v32 = vrot.slane %v2423_v61, 9  ;;  %v2494_v39 = vrot.slane %v8569_v56, 5  ;;  %8077 = vmatprep.subr.bf16.mxu0 %v8502_v47  ;;  %v8507_v26 = vld [vmem:[#allocation8 + $0x158] sm:$0xff]   ;;  %v2428_v18 = vld [vmem:[#allocation2 + $0x60] sm:$0xe] }
 0x1e2   : > { %v7035_v10 = vcombine.low %v9570_v35, %v9578_v63  ;;  %v9584_v2 = vsel %vm9555_vm14, %v7020_v30, %v2487_v13  ;;  %v2489_v25 = vrot.slane %v2487_v13, 4  ;;  %v2497_v15 = vrot.slane %v9336_v55, 5 }
 0x1e3   : > { %7998 = vmatmul.mubr.bf16.gmra.mxu0 %v8486_v51  ;;  %v9589_v52 = vsel %vm9555_vm14, %v7021_v32, %v2494_v39  ;;  %v2496_v44 = vrot.slane %v2494_v39, 4  ;;  %v7022_v23 = vrot.slane %v2424_v27, 9  ;;  %v2501_v38 = vrot.slane %v8570_v12, 5  ;;  %v2429_v51 = vld [vmem:[#allocation2 + $0x6c] sm:$0xe] }
 0x1e4   : > { %8001 = vmatprep.mubr.bf16.mxu0 %v8488_v9  ;;  %v9593_v57 = vsel %vm9555_vm14, %v2489_v25, %v2490_v14  ;;  %v2504_v50 = vrot.slane %v9371_v11, 5  ;;  %v7023_v28 = vrot.slane %v2425_v19, 9  ;;  %v2508_v55 = vrot.slane %v9322_v7, 5  ;;  %8078 = vmatpush3.bf16.msra.mxu0 %v8502_v47  ;;  %v8509_v39 = vld [vmem:[#allocation8 + $0x150] sm:$0xff]   ;;  %v2430_v12 = vld [vmem:[#allocation2 + $0x78] sm:$0xe] }
 0x1e5   : > { %v7036_v3 = vcombine.low %v9584_v2, %v9593_v57  ;;  %v9601_v30 = vsel %vm9555_vm14, %v2496_v44, %v2497_v15  ;;  %v9605_v61 = vsel %vm9555_vm14, %v7022_v23, %v2501_v38  ;;  %v2503_v27 = vrot.slane %v2501_v38, 4  ;;  %8079 = vmatprep.subr.bf16.mxu0 %v8504_v8  ;;  %v8491_v2 = vld [vmem:[#allocation2 + $0x54] sm:$0xff]   ;;  %v8490_v38 = vld [vmem:[#allocation8 + $0x130] sm:$0xff]  }
 0x1e6   : > { %7878 = vmatmul.mubr.bf16.gmra.mxu1 %v6985_v16  ;;  %v7037_v7 = vcombine.low %v9589_v52, %v9601_v30  ;;  %v9611_v11 = vsel %vm9555_vm14, %v7023_v28, %v2508_v55  ;;  %v2510_v47 = vrot.slane %v2508_v55, 4  ;;  %v2511_v1 = vrot.slane %v9396_v46, 5  ;;  %v8489_v16 = vld [vmem:[#allocation2 + $0x48] sm:$0xff]   ;;  %v2431_v55 = vld [vmem:[#allocation2 + $0x84] sm:$0xe] }
 0x1e7   : > { %7945 = vmatprep.mubr.bf16.mxu1 %v7034_v5  ;;  %v9616_v34 = vsel %vm9555_vm14, %v2503_v27, %v2504_v50  ;;  %v7024_v19 = vrot.slane %v2426_v4, 9  ;;  %v2515_v60 = vrot.slane %v9355_v17, 5  ;;  %v2518_v9 = vrot.slane %v9426_v48, 5 }
 0x1e8   : > { %v7038_v13 = vcombine.low %v9605_v61, %v9616_v34  ;;  %v9624_v14 = vsel %vm9555_vm14, %v2510_v47, %v2511_v1  ;;  %v7025_v46 = vrot.slane %v2427_v49, 9  ;;  %v2522_v5 = vrot.slane %v9390_v41, 5  ;;  %8080 = vmatpush3.bf16.msra.mxu0 %v8504_v8  ;;  %v2432_v47 = vld [vmem:[#allocation2 + $0x90] sm:$0xe]  ;;  %v8512_v1 = vld [vmem:[#allocation8 + $0x148] sm:$0xff]  }
 0x1e9   : > { %v7039_v32 = vcombine.low %v9611_v11, %v9624_v14  ;;  %v9631_v17 = vsel %vm9555_vm14, %v7024_v19, %v2515_v60  ;;  %v2517_v48 = vrot.slane %v2515_v60, 4  ;;  %v2525_v56 = vrot.slane %v9446_v42, 5  ;;  %8081 = vmatprep.subr.bf16.mxu0 %v8507_v26 }
 0x1ea   : > { %v9636_v25 = vsel %vm9555_vm14, %v7025_v46, %v2522_v5  ;;  %v2524_v41 = vrot.slane %v2522_v5, 4  ;;  %v7026_v8 = vrot.slane %v2428_v18, 9  ;;  %v2529_v15 = vrot.slane %v9412_v31, 5  ;;  %v8493_v18 = vld [vmem:[#allocation8 + $0x128] sm:$0xff]   ;;  %v9686_v46 = vld [vmem:[#allocation2 + $0x10] sm:$0xf] }
 0x1eb   : > { %8002 = vmatmul.mubr.bf16.gmra.mxu0 %v8489_v16  ;;  %v9641_v4 = vsel %vm9555_vm14, %v2517_v48, %v2518_v9  ;;  %v2532_v44 = vrot.slane %v9461_v22, 5  ;;  %v7027_v23 = vrot.slane %v2429_v51, 9  ;;  %v2536_v42 = vrot.slane %v9439_v59, 5  ;;  %v4042_v5 = vld [vmem:[#allocation2 + $0xc] sm:$0xe]  ;;  %v8492_v16 = vld [vmem:[#allocation2 + $0x60] sm:$0xff]  }
 0x1ec   : > { %8005 = vmatprep.mubr.bf16.mxu0 %v8491_v2  ;;  %v7040_v57 = vcombine.low %v9631_v17, %v9641_v4  ;;  %v9649_v50 = vsel %vm9555_vm14, %v2524_v41, %v2525_v56  ;;  %v9653_v31 = vsel %vm9555_vm14, %v7026_v8, %v2529_v15  ;;  %v2531_v28 = vrot.slane %v2529_v15, 4  ;;  %8082 = vmatpush3.bf16.msra.mxu0 %v8507_v26  ;;  %v9693_v41 = vld [vmem:[#allocation2 + $0x14] sm:$0x1]  ;;  %v8494_v8 = vld [vmem:[#allocation2 + $0x6c] sm:$0xff]  }
 0x1ed   : > { %v7041_v59 = vcombine.low %v9636_v25, %v9649_v50  ;;  %v9659_v22 = vsel %vm9555_vm14, %v7027_v23, %v2536_v42  ;;  %v2538_v49 = vrot.slane %v2536_v42, 4  ;;  %v2539_v27 = vrot.slane %v9478_v62, 5  ;;  %8083 = vmatprep.subr.bf16.mxu0 %v8509_v39  ;;  %v8513_v23 = vld [vmem:[#allocation8 + $0x140] sm:$0xff]   ;;  %v8500_v17 = vld [vmem:[#allocation2 + $0x90] sm:$0xff]  }
 0x1ee   : > { %7946 = vmatmul.mubr.bf16.vlgmr.msra.gmra.mxu1 %v7035_v10  ;;  %v9667_v26 = vsel %vm9555_vm14, %v2531_v28, %v2532_v44  ;;  %v7028_v51 = vrot.slane %v2430_v12, 9  ;;  %v2543_v19 = vrot.slane %v9451_v6, 5  ;;  %v2546_v60 = vrot.slane %v9488_v24, 5  ;;  %v2433_v10 = vld [vmem:[#allocation2 + $0x9c] sm:$0xe]  ;;  %v9853_v50 = vld [vmem:[#allocation8 + $0x1b8] sm:$0xff]  }
 0x1ef   : > { %8026 = vmatpush3.bf16.msra.mxu1 %v9416_v21  ;;  %7949 = vmatprep.mubr.bf16.mxu1 %v7036_v3  ;;  %v7042_v62 = vcombine.low %v9653_v31, %v9667_v26  ;;  %v9676_v9 = vsel %vm9555_vm14, %v2538_v49, %v2539_v27  ;;  %v7029_v35 = vrot.slane %v2431_v55, 9  ;;  %v2550_v63 = vrot.slane %v9471_v33, 5  ;;  %v2434_v55 = vld [vmem:[#allocation2 + $0xa8] sm:$0xe] }
 0x1f0   : > { %8027 = vmatprep.subr.bf16.mxu1 %v8490_v38  ;;  %v7043_v6 = vcombine.low %v9659_v22, %v9676_v9  ;;  %v9683_v21 = vsel %vm9555_vm14, %v7028_v51, %v2543_v19  ;;  %v2545_v24 = vrot.slane %v2543_v19, 4  ;;  %v2553_v3 = vrot.slane %v9501_v0, 5  ;;  %8084 = vmatpush3.bf16.msra.mxu0 %v8509_v39  ;;  %v9720_v51 = vld [vmem:[#allocation2 + $0x20] sm:$0x1]  ;;  %v8505_v31 = vld [vmem:[#allocation2 + $0xa8] sm:$0xff]  }
 0x1f1   : > { %v9690_v33 = vsel %vm9555_vm14, %v7029_v35, %v2550_v63  ;;  %v2552_v48 = vrot.slane %v2550_v63, 4  ;;  %v7030_v56 = vrot.slane %v2432_v47, 9  ;;  %v2557_v2 = vrot.slane %v9485_v43, 5  ;;  %8085 = vmatprep.subr.bf16.mxu0 %v8512_v1  ;;  %v4048_v9 = vld [vmem:[#allocation2 + $0x54] sm:$0xe] }
 0x1f2   : > { %v9697_v0 = vsel %vm9555_vm14, %v2545_v24, %v2546_v60  ;;  %v2560_v39 = vrot.slane %v9513_v29, 5  ;;  %v7031_v15 = vrot.slane %v2433_v10, 9  ;;  %v2564_v44 = vrot.slane %v9494_v53, 5  ;;  %v9711_v29 = vld [vmem:[#allocation2 + $0x1c] sm:$0xf] }
 0x1f3   : > { %8028 = vmatpush3.bf16.msra.mxu1 %v8490_v38  ;;  %8006 = vmatmul.mubr.bf16.gmra.mxu0 %v8492_v16  ;;  %v7044_v42 = vcombine.low %v9683_v21, %v9697_v0  ;;  %v9705_v43 = vsel %vm9555_vm14, %v2552_v48, %v2553_v3  ;;  %v9709_v12 = vsel %vm9555_vm14, %v7030_v56, %v2557_v2  ;;  %v2559_v28 = vrot.slane %v2557_v2, 4  ;;  %v8496_v53 = vld [vmem:[#allocation8 + $0x120] sm:$0xff]   ;;  %v9738_v16 = vld [vmem:[#allocation8 + $0x1f8] sm:$0xff]   ;;  %v8510_v21 = vld [vmem:[#allocation2 + $0xc0] sm:$0xff]  }
 0x1f4   : > { %8029 = vmatprep.subr.bf16.mxu1 %v8493_v18  ;;  %8009 = vmatprep.mubr.bf16.mxu0 %v8494_v8  ;;  %v7045_v38 = vcombine.low %v9690_v33, %v9705_v43  ;;  %v9717_v49 = vsel %vm9555_vm14, %v7031_v15, %v2564_v44  ;;  %v2566_v27 = vrot.slane %v2564_v44, 4  ;;  %v2567_v47 = vrot.slane %v9527_v36, 5  ;;  %v4043_v10 = vld [vmem:[#allocation2 + $0x18] sm:$0xe]  ;;  %v8501_v56 = vld [vmem:[#allocation8 + $0x118] sm:$0xff]  }
 0x1f5   : > { %v9724_v19 = vsel %vm9555_vm14, %v2559_v28, %v2560_v39  ;;  %8086 = vmatpush3.bf16.msra.mxu0 %v8512_v1  ;;  %v7106_v60 = vrot.slane %v4042_v5, 9  ;;  %v4108_v35 = vrot.slane %v9686_v46, 5  ;;  %v4111_v63 = vrot.slane %v9693_v41, 5  ;;  %v2435_v5 = vld [vmem:[#allocation2 + $0xb4] sm:$0xe]  ;;  %v8495_v8 = vld [vmem:[#allocation2 + $0x78] sm:$0xff]  }
 0x1f6   : > { %7950 = vmatmul.mubr.bf16.gmra.mxu1 %v7037_v7  ;;  %v7046_v36 = vcombine.low %v9709_v12, %v9724_v19  ;;  %v9735_v24 = vsel %vm9555_vm14, %v2566_v27, %v2567_v47  ;;  %v7032_v3 = vrot.slane %v2434_v55, 9  ;;  %v2571_v1 = vrot.slane %v9507_v58, 5  ;;  %8087 = vmatprep.subr.bf16.mxu0 %v8513_v23  ;;  %v9750_v58 = vld [vmem:[#allocation2 + $0x28] sm:$0xf]  ;;  %v4044_v28 = vld [vmem:[#allocation2 + $0x24] sm:$0xe] }
 0x1f7   : > { %7953 = vmatprep.mubr.bf16.mxu1 %v7038_v13  ;;  %8030 = vmatpush3.bf16.msra.mxu1 %v8493_v18  ;;  %v9747_v30 = vsel %vm9555_vm14, %v7106_v60, %v4108_v35  ;;  %v4110_v7 = vrot.slane %v4108_v35, 4  ;;  %v2574_v48 = vrot.slane %v9534_v54, 5  ;;  %v7107_v34 = vrot.slane %v4043_v10, 9  ;;  %v9757_v18 = vld [vmem:[#allocation2 + $0x2c] sm:$0x1]  ;;  %v8498_v55 = vld [vmem:[#allocation2 + $0x84] sm:$0xff]  }
 0x1f8   : > { %8031 = vmatprep.subr.bf16.mxu1 %v8496_v53  ;;  %v9754_v2 = vsel %vm9555_vm14, %v7032_v3, %v2571_v1  ;;  %v2573_v61 = vrot.slane %v2571_v1, 4  ;;  %v4115_v13 = vrot.slane %v9711_v29, 5  ;;  %v4118_v54 = vrot.slane %v9720_v51, 5  ;;  %v8506_v1 = vld [vmem:[#allocation8 + $0x110] sm:$0xff]  }
 0x1f9   : > { %v9761_v39 = vsel %vm9555_vm14, %v4110_v7, %v4111_v63  ;;  %8088 = vmatpush3.bf16.msra.mxu0 %v8513_v23  ;;  %v7033_v15 = vrot.slane %v2435_v5, 9  ;;  %v2578_v44 = vrot.slane %v9516_v40, 5  ;;  %v3289_v23 = vld [vmem:[#allocation2 + $0xc] sm:$0xf]  ;;  %v2581_v3 = vrot.slane %v9541_v37, 5 }
 0x1fa   : > { %v7122_v27 = vcombine.low %v9747_v30, %v9761_v39  ;;  %v9769_v47 = vsel %vm9555_vm14, %v2573_v61, %v2574_v48  ;;  %v9773_v60 = vsel %vm9555_vm14, %v7107_v34, %v4115_v13  ;;  %v4117_v35 = vrot.slane %v4115_v13, 4  ;;  %8169 = vmatprep.subr.bf16.mxu0 %v9738_v16  ;;  %v9936_v43 = vld [vmem:[#allocation2 + $0x68] sm:$0x1] }
 0x1fb   : > { %8010 = vmatmul.mubr.bf16.gmra.mxu0 %v8495_v8  ;;  %8032 = vmatpush3.bf16.msra.mxu1 %v8496_v53  ;;  %v9780_v63 = vsel %vm9555_vm14, %v7033_v15, %v2578_v44  ;;  %v2580_v10 = vrot.slane %v2578_v44, 4  ;;  %v7108_v7 = vrot.slane %v4044_v28, 9  ;;  %v4122_v53 = vrot.slane %v9750_v58, 5  ;;  %v9795_v8 = vld [vmem:[#allocation2 + $0x34] sm:$0xf] }
 0x1fc   : > { %8013 = vmatprep.mubr.bf16.mxu0 %v8498_v55  ;;  %8033 = vmatprep.subr.bf16.mxu1 %v8501_v56  ;;  %v9785_v5 = vsel %vm9555_vm14, %v4117_v35, %v4118_v54  ;;  %v4125_v48 = vrot.slane %v9757_v18, 5  ;;  %v3338_v37 = vshrl.u32 %v3289_v23, 16  ;;  %v3341_v13 = vshll.u32 %v3289_v23, 16  ;;  %v4045_v15 = vld [vmem:[#allocation2 + $0x30] sm:$0xe] }
 0x1fd   : > { %v9793_v34 = vsel %vm9555_vm14, %v2580_v10, %v2581_v3  ;;  %v9804_v44 = vsel %vm9555_vm14, %v7108_v7, %v4122_v53  ;;  %v4124_v28 = vrot.slane %v4122_v53, 4  ;;  %v3347_v55 = vshll.u32 %v9686_v46, 16  ;;  %v9807_v35 = vld [vmem:[#allocation2 + $0x38] sm:$0x1]  ;;  %v8511_v3 = vld [vmem:[#allocation8 + $0x108] sm:$0xff]  }
 0x1fe   : > { %7954 = vmatmul.mubr.bf16.gmra.mxu1 %v7039_v32  ;;  %v3340_v23 = vrot.slane %v3338_v37, 4  ;;  %v3343_v11 = vrot.slane %v3341_v13, 5  ;;  %v3351_v14 = vshrl.u32 %v9686_v46, 16  ;;  %v3357_v32 = vshll.u32 %v9693_v41, 16  ;;  %v3292_v10 = vld [vmem:[#allocation2 + $0x18] sm:$0xf] }
 0x1ff   : > { %7957 = vmatprep.mubr.bf16.mxu1 %v7040_v57  ;;  %8034 = vmatpush3.bf16.msra.mxu1 %v8501_v56  ;;  %v9816_v7 = vsel %vm9555_vm14, %v4124_v28, %v4125_v48  ;;  %v3349_v53 = vrot.slane %v3347_v55, 5  ;;  %v7109_v54 = vrot.slane %v4045_v15, 9  ;;  %v4129_v40 = vrot.slane %v9795_v8, 5  ;;  %v8503_v37 = vld [vmem:[#allocation2 + $0x9c] sm:$0xff]  }
 0x200   : > { %8035 = vmatprep.subr.bf16.mxu1 %v8506_v1  ;;  %v3344_v57 = vor.u32 %v3343_v11, %v3340_v23  ;;  %v3353_v56 = vrot.slane %v3351_v14, 4  ;;  %v3359_v46 = vrot.slane %v3357_v32, 5  ;;  %v4132_v48 = vrot.slane %v9807_v35, 5  ;;  %v4046_v55 = vld [vmem:[#allocation2 + $0x3c] sm:$0xe] }
 0x201   : > { %v9823_v41 = vsel %vm9555_vm14, %v7109_v54, %v4129_v40  ;;  %v4131_v13 = vrot.slane %v4129_v40, 4  ;;  %v3362_v28 = vshrl.u32 %v3292_v10, 16  ;;  %v3365_v61 = vshll.u32 %v3292_v10, 16  ;;  %v9827_v23 = vld [vmem:[#allocation2 + $0x40] sm:$0xf]  ;;  %v8514_v11 = vld [vmem:[#allocation8 + $0x100] sm:$0xff]  }
 0x202   : > { %v3345_v15 = vrot.slane %v3344_v57, 4  ;;  %v3354_v52 = vor.u32 %v3353_v56, %v3349_v53  ;;  %v3371_v4 = vshll.u32 %v9711_v29, 16  ;;  %v3375_v14 = vshrl.u32 %v9711_v29, 16 }
 0x203   : > { %8014 = vmatmul.mubr.bf16.gmra.mxu0 %v8500_v17  ;;  %8036 = vmatpush3.bf16.msra.mxu1 %v8506_v1  ;;  %v9831_v54 = vsel %vm9555_vm14, %v4131_v13, %v4132_v48  ;;  %v3364_v40 = vrot.slane %v3362_v28, 4  ;;  %v3381_v32 = vshll.u32 %v9720_v51, 16  ;;  %v9835_v1 = vld [vmem:[#allocation2 + $0x44] sm:$0x1]  ;;  %v3367_v56 = vrot.slane %v3365_v61, 5 }
 0x204   : > { %8017 = vmatprep.mubr.bf16.mxu0 %v8503_v37  ;;  %8037 = vmatprep.subr.bf16.mxu1 %v8511_v3  ;;  %v3350_v10 = vsel %vm9040_vm7, %v3345_v15, %v3349_v53  ;;  %v3355_v17 = vrot.slane %v3354_v52, 4  ;;  %v7125_v57 = vcombine.low %v9823_v41, %v9831_v54  ;;  %v3295_v37 = vld [vmem:[#allocation2 + $0x24] sm:$0xf]  ;;  %v3373_v13 = vrot.slane %v3371_v4, 5  ;;  %v9855_v15 = vld [vmem:[#allocation2 + $0x4c] sm:$0xf] }
 0x205   : > { %v3377_v48 = vrot.slane %v3375_v14, 4  ;;  %v3383_v29 = vrot.slane %v3381_v32, 5  ;;  %v7110_v28 = vrot.slane %v4046_v55, 9  ;;  %v3368_v52 = vor.u32 %v3367_v56, %v3364_v40  ;;  %v4047_v40 = vld [vmem:[#allocation2 + $0x48] sm:$0xe]  ;;  %v8508_v14 = vld [vmem:[#allocation2 + $0xb4] sm:$0xff]  }
 0x206   : > { %7958 = vmatmul.mubr.bf16.gmra.mxu1 %v7041_v59  ;;  %v3360_v51 = vsel %vm9040_vm7, %v3355_v17, %v3359_v46  ;;  %v4136_v61 = vrot.slane %v9827_v23, 5  ;;  %v4139_v53 = vrot.slane %v9835_v1, 5  ;;  %v3386_v4 = vshrl.u32 %v3295_v37, 16 }
 0x207   : > { %7961 = vmatprep.mubr.bf16.mxu1 %v7042_v62  ;;  %8038 = vmatpush3.bf16.msra.mxu1 %v8511_v3  ;;  %v9851_v25 = vcombine.low %v3350_v10, %v3360_v51  ;;  %v3378_v59 = vor.u32 %v3377_v48, %v3373_v13  ;;  %v3389_v55 = vshll.u32 %v3295_v37, 16  ;;  %v3369_v26 = vrot.slane %v3368_v52, 4  ;;  %v9870_v52 = vld [vmem:[#allocation2 + $0x50] sm:$0x1] }
 0x208   : > { %8039 = vmatprep.subr.bf16.mxu1 %v8514_v11  ;;  %v9859_v62 = vsel %vm9555_vm14, %v7110_v28, %v4136_v61  ;;  %v4138_v3 = vrot.slane %v4136_v61, 4  ;;  %v3395_v46 = vshll.u32 %v9750_v58, 16  ;;  %v3388_v10 = vrot.slane %v3386_v4, 4  ;;  %v3298_v61 = vld [vmem:[#allocation2 + $0x30] sm:$0xf] }
 0x209   : > { %v3379_v32 = vrot.slane %v3378_v59, 4  ;;  %v3391_v17 = vrot.slane %v3389_v55, 5  ;;  %v3399_v56 = vshrl.u32 %v9750_v58, 16  ;;  %v3374_v37 = vsel %vm9040_vm7, %v3369_v26, %v3373_v13 }
 0x20a   : > { %v9867_v48 = vsel %vm9555_vm14, %v4138_v3, %v4139_v53  ;;  %v3397_v28 = vrot.slane %v3395_v46, 5  ;;  %v3405_v51 = vshll.u32 %v9757_v18, 16  ;;  %v7111_v55 = vrot.slane %v4047_v40, 9  ;;  %v9884_v46 = vld [vmem:[#allocation2 + $0x58] sm:$0xf] }
 0x20b   : > { %8018 = vmatmul.mubr.bf16.gmra.mxu0 %v8505_v31  ;;  %8040 = vmatpush3.bf16.msra.mxu1 %v8514_v11  ;;  %v3384_v58 = vsel %vm9040_vm7, %v3379_v32, %v3383_v29  ;;  %v7126_v11 = vcombine.low %v9859_v62, %v9867_v48  ;;  %v3392_v13 = vor.u32 %v3391_v17, %v3388_v10  ;;  %v3401_v59 = vrot.slane %v3399_v56, 4  ;;  %v8525_v62 = vld [vmem:[#allocation8 + $0x1d8] sm:$0xff]  }
 0x20c   : > { %8021 = vmatprep.mubr.bf16.mxu0 %v8508_v14  ;;  %8121 = vmatprep.subr.bf16.mxu1 %v9853_v50  ;;  %v9877_v4 = vcombine.low %v3374_v37, %v3384_v58  ;;  %v3407_v53 = vrot.slane %v3405_v51, 5  ;;  %v4143_v18 = vrot.slane %v9855_v15, 5  ;;  %v4146_v3 = vrot.slane %v9870_v52, 5  ;;  %v9897_v37 = vld [vmem:[#allocation2 + $0x5c] sm:$0x1] }
 0x20d   : > { %v3393_v31 = vrot.slane %v3392_v13, 4  ;;  %v3402_v26 = vor.u32 %v3401_v59, %v3397_v28  ;;  %v3410_v29 = vshrl.u32 %v3298_v61, 16  ;;  %v3413_v32 = vshll.u32 %v3298_v61, 16  ;;  %v3301_v58 = vld [vmem:[#allocation2 + $0x3c] sm:$0xf] }
 0x20e   : > { %7962 = vmatmul.mubr.bf16.gmra.mxu1 %v7043_v6  ;;  %v9891_v40 = vsel %vm9555_vm14, %v7111_v55, %v4143_v18  ;;  %v4145_v14 = vrot.slane %v4143_v18, 4  ;;  %v3419_v22 = vshll.u32 %v9795_v8, 16  ;;  %v3423_v56 = vshrl.u32 %v9795_v8, 16 }
 0x20f   : > { %7965 = vmatprep.mubr.bf16.mxu1 %v7044_v42  ;;  %v3398_v6 = vsel %vm9040_vm7, %v3393_v31, %v3397_v28  ;;  %v3403_v10 = vrot.slane %v3402_v26, 4  ;;  %v3412_v17 = vrot.slane %v3410_v29, 4  ;;  %v3415_v42 = vrot.slane %v3413_v32, 5 }
 0x210   : > { %v9901_v0 = vsel %vm9555_vm14, %v4145_v14, %v4146_v3  ;;  %v3421_v51 = vrot.slane %v3419_v22, 5  ;;  %v3429_v61 = vshll.u32 %v9807_v35, 16  ;;  %v3425_v59 = vrot.slane %v3423_v56, 4 }
 0x211   : > { %v3408_v13 = vsel %vm9040_vm7, %v3403_v10, %v3407_v53  ;;  %v7127_v28 = vcombine.low %v9891_v40, %v9901_v0  ;;  %v7112_v8 = vrot.slane %v4048_v9, 9  ;;  %v3416_v18 = vor.u32 %v3415_v42, %v3412_v17  ;;  %v4049_v17 = vld [vmem:[#allocation2 + $0x60] sm:$0xe] }
 0x212   : > { %v9908_v55 = vcombine.low %v3398_v6, %v3408_v13  ;;  %v3431_v31 = vrot.slane %v3429_v61, 5  ;;  %v4150_v26 = vrot.slane %v9884_v46, 5  ;;  %v3426_v35 = vor.u32 %v3425_v59, %v3421_v51  ;;  %v9920_v6 = vld [vmem:[#allocation2 + $0x64] sm:$0xf]  ;;  %v8520_v59 = vld [vmem:[#allocation8 + $0x1f0] sm:$0xff]  }
 0x213   : > { %8022 = vmatmul.mubr.bf16.gmra.mxu0 %v8510_v21  ;;  %v4153_v3 = vrot.slane %v9897_v37, 5  ;;  %v3434_v53 = vshrl.u32 %v3301_v58, 16  ;;  %v3437_v29 = vshll.u32 %v3301_v58, 16  ;;  %v3417_v14 = vrot.slane %v3416_v18, 4 }
 0x214   : > { %8089 = vmatprep.mubr.bf16.mxu0 %v7122_v27  ;;  %v9917_v32 = vsel %vm9555_vm14, %v7112_v8, %v4150_v26  ;;  %v4152_v22 = vrot.slane %v4150_v26, 4  ;;  %v3443_v9 = vshll.u32 %v9827_v23, 16  ;;  %v3427_v30 = vrot.slane %v3426_v35, 4 }
 0x215   : > { %v3436_v39 = vrot.slane %v3434_v53, 4  ;;  %v3439_v27 = vrot.slane %v3437_v29, 5  ;;  %v3447_v10 = vshrl.u32 %v9827_v23, 16  ;;  %v3422_v56 = vsel %vm9040_vm7, %v3417_v14, %v3421_v51  ;;  %v4050_v14 = vld [vmem:[#allocation2 + $0x6c] sm:$0xe] }
 0x216   : > { %7966 = vmatmul.mubr.bf16.gmra.mxu1 %v7045_v38  ;;  %v9933_v21 = vsel %vm9555_vm14, %v4152_v22, %v4153_v3  ;;  %v3445_v42 = vrot.slane %v3443_v9, 5  ;;  %v3453_v33 = vshll.u32 %v9835_v1, 16  ;;  %v3304_v38 = vld [vmem:[#allocation2 + $0x48] sm:$0xf]  ;;  %v3432_v23 = vsel %vm9040_vm7, %v3427_v30, %v3431_v31 }
 0x217   : > { %7969 = vmatprep.mubr.bf16.mxu1 %v7046_v36  ;;  %v7128_v12 = vcombine.low %v9917_v32, %v9933_v21  ;;  %v3440_v19 = vor.u32 %v3439_v27, %v3436_v39  ;;  %v3449_v36 = vrot.slane %v3447_v10, 4  ;;  %v9942_v61 = vcombine.low %v3422_v56, %v3432_v23  ;;  %v8522_v56 = vld [vmem:[#allocation8 + $0x1e8] sm:$0xff]  }
 0x218   : > { %v3455_v51 = vrot.slane %v3453_v33, 5  ;;  %v7113_v58 = vrot.slane %v4049_v17, 9  ;;  %v4157_v13 = vrot.slane %v9920_v6, 5  ;;  %v4160_v18 = vrot.slane %v9936_v43, 5 }
 0x219   : > { %v3441_v8 = vrot.slane %v3440_v19, 4  ;;  %v3450_v1 = vor.u32 %v3449_v36, %v3445_v42  ;;  %v3458_v26 = vshrl.u32 %v3304_v38, 16  ;;  %v11473_v31 = vcombine.low %v9773_v60, %v9785_v5  ;;  %v9960_v5 = vld [vmem:[#allocation2 + $0x74] sm:$0x1] }
 0x21a   : > { %v9951_v35 = vsel %vm9555_vm14, %v7113_v58, %v4157_v13  ;;  %v4159_v3 = vrot.slane %v4157_v13, 4  ;;  %v3461_v53 = vshll.u32 %v3304_v38, 16  ;;  %v3467_v29 = vshll.u32 %v9855_v15, 16  ;;  %v9975_v38 = vld [vmem:[#allocation2 + $0x70] sm:$0xf] }
 0x21b   : > { %8090 = vmatmul.mubr.bf16.vlgmr.msra.gmra.mxu0 %v11473_v31  ;;  %v11474_v22 = vcombine.low %v9804_v44, %v9816_v7  ;;  %v3446_v9 = vsel %vm9040_vm7, %v3441_v8, %v3445_v42  ;;  %v3451_v30 = vrot.slane %v3450_v1, 4  ;;  %v3460_v39 = vrot.slane %v3458_v26, 4  ;;  %v3307_v7 = vld [vmem:[#allocation2 + $0x54] sm:$0xf] }
 0x21c   : > { %v3471_v60 = vshrl.u32 %v9855_v15, 16  ;;  %8170 = vmatpush3.bf16.msra.mxu0 %v9738_v16  ;;  %v9965_v27 = vsel %vm9555_vm14, %v4159_v3, %v4160_v18  ;;  %v3463_v10 = vrot.slane %v3461_v53, 5  ;;  %v3469_v17 = vrot.slane %v3467_v29, 5 }
 0x21d   : > { %8093 = vmatprep.mubr.bf16.mxu0 %v11474_v22  ;;  %v3477_v44 = vshll.u32 %v9870_v52, 16  ;;  %8171 = vmatprep.subr.bf16.mxu0 %v8520_v59  ;;  %v11475_v42 = vcombine.low %v9717_v49, %v9735_v24  ;;  %v3456_v15 = vsel %vm9040_vm7, %v3451_v30, %v3455_v51  ;;  %v7129_v16 = vcombine.low %v9951_v35, %v9965_v27 }
 0x21e   : > { %v3473_v33 = vrot.slane %v3471_v60, 4  ;;  %v7114_v23 = vrot.slane %v4050_v14, 9  ;;  %v11476_v52 = vcombine.low %v9754_v2, %v9769_v47  ;;  %v9980_v19 = vcombine.low %v3446_v9, %v3456_v15  ;;  %v8523_v47 = vld [vmem:[#allocation8 + $0x1e0] sm:$0xff]   ;;  %v3310_v60 = vld [vmem:[#allocation2 + $0x60] sm:$0xf] }
 0x21f   : > { %7970 = vmatmul.mubr.bf16.gmra.mxu1 %v11475_v42  ;;  %v3464_v36 = vor.u32 %v3463_v10, %v3460_v39  ;;  %v3479_v58 = vrot.slane %v3477_v44, 5  ;;  %v4164_v49 = vrot.slane %v9975_v38, 5  ;;  %v4167_v51 = vrot.slane %v9960_v5, 5  ;;  %v4051_v14 = vld [vmem:[#allocation2 + $0x78] sm:$0xe] }
 0x220   : > { %7973 = vmatprep.mubr.bf16.mxu1 %v11476_v52  ;;  %v3474_v24 = vor.u32 %v3473_v33, %v3469_v17  ;;  %v3482_v13 = vshrl.u32 %v3307_v7, 16  ;;  %v3485_v8 = vshll.u32 %v3307_v7, 16  ;;  %8172 = vmatpush3.bf16.msra.mxu0 %v8520_v59  ;;  %v3491_v2 = vshll.u32 %v9884_v46, 16  ;;  %v10000_v39 = vld [vmem:[#allocation2 + $0x80] sm:$0x1] }
 0x221   : > { %v3465_v1 = vrot.slane %v3464_v36, 4  ;;  %v9986_v18 = vsel %vm9555_vm14, %v7114_v23, %v4164_v49  ;;  %v4166_v26 = vrot.slane %v4164_v49, 4  ;;  %8173 = vmatprep.subr.bf16.mxu0 %v8522_v56  ;;  %v3495_v29 = vshrl.u32 %v9884_v46, 16  ;;  %v10009_v10 = vld [vmem:[#allocation2 + $0x7c] sm:$0xf] }
 0x222   : > { %v3475_v31 = vrot.slane %v3474_v24, 4  ;;  %v3484_v3 = vrot.slane %v3482_v13, 4  ;;  %v3487_v53 = vrot.slane %v3485_v8, 5  ;;  %v3493_v9 = vrot.slane %v3491_v2, 5  ;;  %v8526_v2 = vld [vmem:[#allocation8 + $0x1d0] sm:$0xff]  }
 0x223   : > { %8094 = vmatmul.mubr.bf16.gmra.mxu0 %v7125_v57  ;;  %v3470_v59 = vsel %vm9040_vm7, %v3465_v1, %v3469_v17  ;;  %v9997_v22 = vsel %vm9555_vm14, %v4166_v26, %v4167_v51  ;;  %v3501_v30 = vshll.u32 %v9897_v37, 16  ;;  %v3497_v46 = vrot.slane %v3495_v29, 4  ;;  %v10027_v51 = vld [vmem:[#allocation2 + $0x8c] sm:$0x1] }
 0x224   : > { %8097 = vmatprep.mubr.bf16.mxu0 %v7126_v11  ;;  %v3480_v41 = vsel %vm9040_vm7, %v3475_v31, %v3479_v58  ;;  %v7130_v54 = vcombine.low %v9986_v18, %v9997_v22  ;;  %v3488_v57 = vor.u32 %v3487_v53, %v3484_v3  ;;  %8174 = vmatpush3.bf16.msra.mxu0 %v8522_v56  ;;  %v7115_v44 = vrot.slane %v4051_v14, 9  ;;  %v4052_v58 = vld [vmem:[#allocation2 + $0x84] sm:$0xe]  ;;  %v3313_v26 = vld [vmem:[#allocation2 + $0x6c] sm:$0xf] }
 0x225   : > { %v10011_v17 = vcombine.low %v3470_v59, %v3480_v41  ;;  %v3503_v37 = vrot.slane %v3501_v30, 5  ;;  %v4171_v7 = vrot.slane %v10009_v10, 5  ;;  %8175 = vmatprep.subr.bf16.mxu0 %v8523_v47  ;;  %v11477_v48 = vcombine.low %v9780_v63, %v9793_v34  ;;  %v10038_v53 = vld [vmem:[#allocation2 + $0x88] sm:$0xf] }
 0x226   : > { %v3489_v11 = vrot.slane %v3488_v57, 4  ;;  %v3498_v42 = vor.u32 %v3497_v46, %v3493_v9  ;;  %v4174_v15 = vrot.slane %v10000_v39, 5  ;;  %v3506_v33 = vshrl.u32 %v3310_v60, 16 }
 0x227   : > { %7974 = vmatmul.mubr.bf16.gmra.mxu1 %v11477_v48  ;;  %v10021_v56 = vsel %vm9555_vm14, %v7115_v44, %v4171_v7  ;;  %v4173_v23 = vrot.slane %v4171_v7, 4  ;;  %v3509_v52 = vshll.u32 %v3310_v60, 16  ;;  %v3515_v36 = vshll.u32 %v9920_v6, 16  ;;  %v4053_v7 = vld [vmem:[#allocation2 + $0x90] sm:$0xe] }
 0x228   : > { %8041 = vmatprep.mubr.bf16.mxu1 %v9851_v25  ;;  %v3494_v63 = vsel %vm9040_vm7, %v3489_v11, %v3493_v9  ;;  %v3499_v34 = vrot.slane %v3498_v42, 4  ;;  %v3508_v49 = vrot.slane %v3506_v33, 4  ;;  %v3519_v24 = vshrl.u32 %v9920_v6, 16  ;;  %8176 = vmatpush3.bf16.msra.mxu0 %v8523_v47  ;;  %v8516_v9 = vld [vmem:[#allocation8 + $0x1b0] sm:$0xff]   ;;  %v10066_v42 = vld [vmem:[#allocation2 + $0x98] sm:$0x1] }
 0x229   : > { %v10031_v25 = vsel %vm9555_vm14, %v4173_v23, %v4174_v15  ;;  %v3511_v13 = vrot.slane %v3509_v52, 5  ;;  %v3517_v8 = vrot.slane %v3515_v36, 5  ;;  %v3525_v1 = vshll.u32 %v9936_v43, 16  ;;  %8177 = vmatprep.subr.bf16.mxu0 %v8525_v62  ;;  %v3316_v15 = vld [vmem:[#allocation2 + $0x78] sm:$0xf] }
 0x22a   : > { %v3504_v31 = vsel %vm9040_vm7, %v3499_v34, %v3503_v37  ;;  %v7131_v6 = vcombine.low %v10021_v56, %v10031_v25  ;;  %v3521_v3 = vrot.slane %v3519_v24, 4  ;;  %v7116_v47 = vrot.slane %v4052_v58, 9  ;;  %v8528_v37 = vld [vmem:[#allocation8 + $0x1c8] sm:$0xff]   ;;  %v10072_v52 = vld [vmem:[#allocation2 + $0x94] sm:$0xf] }
 0x22b   : > { %8098 = vmatmul.mubr.bf16.gmra.mxu0 %v7127_v28  ;;  %v10043_v29 = vcombine.low %v3494_v63, %v3504_v31  ;;  %v3512_v43 = vor.u32 %v3511_v13, %v3508_v49  ;;  %v3527_v14 = vrot.slane %v3525_v1, 5  ;;  %v4178_v59 = vrot.slane %v10038_v53, 5 }
 0x22c   : > { %8101 = vmatprep.mubr.bf16.mxu0 %v7128_v12  ;;  %v3522_v30 = vor.u32 %v3521_v3, %v3517_v8  ;;  %v4181_v60 = vrot.slane %v10027_v51, 5  ;;  %v3530_v41 = vshrl.u32 %v3313_v26, 16  ;;  %v3533_v57 = vshll.u32 %v3313_v26, 16  ;;  %8178 = vmatpush3.bf16.msra.mxu0 %v8525_v62  ;;  %v4054_v3 = vld [vmem:[#allocation2 + $0x9c] sm:$0xe] }
 0x22d   : > { %v3513_v46 = vrot.slane %v3512_v43, 4  ;;  %v10052_v40 = vsel %vm9555_vm14, %v7116_v47, %v4178_v59  ;;  %v4180_v0 = vrot.slane %v4178_v59, 4  ;;  %v3539_v28 = vshll.u32 %v9975_v38, 16  ;;  %8179 = vmatprep.subr.bf16.mxu0 %v8526_v2  ;;  %v8518_v47 = vld [vmem:[#allocation8 + $0x1a0] sm:$0xff]  }
 0x22e   : > { %v3523_v32 = vrot.slane %v3522_v30, 4  ;;  %v3532_v21 = vrot.slane %v3530_v41, 4  ;;  %v3535_v12 = vrot.slane %v3533_v57, 5  ;;  %v3543_v44 = vshrl.u32 %v9975_v38, 16  ;;  %v8517_v38 = vld [vmem:[#allocation8 + $0x1a8] sm:$0xff]  }
 0x22f   : > { %8042 = vmatmul.mubr.bf16.vlgmr.msra.gmra.mxu1 %v9877_v4  ;;  %v3518_v62 = vsel %vm9040_vm7, %v3513_v46, %v3517_v8  ;;  %v10063_v48 = vsel %vm9555_vm14, %v4180_v0, %v4181_v60  ;;  %v3541_v11 = vrot.slane %v3539_v28, 5  ;;  %v3549_v4 = vshll.u32 %v9960_v5, 16  ;;  %v8529_v8 = vld [vmem:[#allocation8 + $0x1c0] sm:$0xff]   ;;  %v10097_v41 = vld [vmem:[#allocation2 + $0xa4] sm:$0x1]  ;;  %v8521_v28 = vld [vmem:[#allocation8 + $0x198] sm:$0xff]  }
 0x230   : > { %8122 = vmatpush3.bf16.msra.mxu1 %v9853_v50  ;;  %8045 = vmatprep.mubr.bf16.mxu1 %v9908_v55  ;;  %v3528_v50 = vsel %vm9040_vm7, %v3523_v32, %v3527_v14  ;;  %v7132_v55 = vcombine.low %v10052_v40, %v10063_v48  ;;  %v3536_v33 = vor.u32 %v3535_v12, %v3532_v21  ;;  %v3545_v23 = vrot.slane %v3543_v44, 4  ;;  %v3319_v14 = vld [vmem:[#allocation2 + $0x84] sm:$0xf] }
 0x231   : > { %8123 = vmatprep.subr.bf16.mxu1 %v8516_v9  ;;  %8180 = vmatpush3.bf16.msra.mxu0 %v8526_v2  ;;  %v10074_v36 = vcombine.low %v3518_v62, %v3528_v50  ;;  %v3551_v58 = vrot.slane %v3549_v4, 5  ;;  %v7117_v5 = vrot.slane %v4053_v7, 9  ;;  %v4185_v63 = vrot.slane %v10072_v52, 5  ;;  %v4055_v50 = vld [vmem:[#allocation2 + $0xa8] sm:$0xe] }
 0x232   : > { %8181 = vmatprep.subr.bf16.mxu0 %v8528_v37  ;;  %v3537_v34 = vrot.slane %v3536_v33, 4  ;;  %v3546_v49 = vor.u32 %v3545_v23, %v3541_v11  ;;  %v4188_v24 = vrot.slane %v10066_v42, 5  ;;  %v3554_v13 = vshrl.u32 %v3316_v15, 16 }
 0x233   : > { %8102 = vmatmul.mubr.bf16.gmra.mxu0 %v7129_v16  ;;  %v10083_v1 = vsel %vm9555_vm14, %v7117_v5, %v4185_v63  ;;  %v4187_v26 = vrot.slane %v4185_v63, 4  ;;  %v3557_v2 = vshll.u32 %v3316_v15, 16  ;;  %v3563_v31 = vshll.u32 %v10009_v10, 16  ;;  %v10125_v63 = vld [vmem:[#allocation2 + $0xb0] sm:$0x1] }
 0x234   : > { %8124 = vmatpush3.bf16.msra.mxu1 %v8516_v9  ;;  %8105 = vmatprep.mubr.bf16.mxu0 %v7130_v54  ;;  %v3542_v43 = vsel %vm9040_vm7, %v3537_v34, %v3541_v11  ;;  %v3547_v35 = vrot.slane %v3546_v49, 4  ;;  %v3556_v27 = vrot.slane %v3554_v13, 4  ;;  %v3567_v16 = vshrl.u32 %v10009_v10, 16  ;;  %v10104_v10 = vld [vmem:[#allocation2 + $0xa0] sm:$0xf] }
 0x235   : > { %8125 = vmatprep.subr.bf16.mxu1 %v8517_v38  ;;  %v10094_v59 = vsel %vm9555_vm14, %v4187_v26, %v4188_v24  ;;  %v3559_v9 = vrot.slane %v3557_v2, 5  ;;  %v3565_v30 = vrot.slane %v3563_v31, 5  ;;  %v3573_v60 = vshll.u32 %v10000_v39, 16  ;;  %8182 = vmatpush3.bf16.msra.mxu0 %v8528_v37  ;;  %v3322_v34 = vld [vmem:[#allocation2 + $0x90] sm:$0xf]  ;;  %v8524_v24 = vld [vmem:[#allocation8 + $0x190] sm:$0xff]  }
 0x236   : > { %v3552_v18 = vsel %vm9040_vm7, %v3547_v35, %v3551_v58  ;;  %v7133_v22 = vcombine.low %v10083_v1, %v10094_v59  ;;  %v3569_v54 = vrot.slane %v3567_v16, 4  ;;  %v7118_v57 = vrot.slane %v4054_v3, 9  ;;  %8183 = vmatprep.subr.bf16.mxu0 %v8529_v8  ;;  %v10133_v49 = vld [vmem:[#allocation2 + $0xac] sm:$0xf]  ;;  %v4056_v35 = vld [vmem:[#allocation2 + $0xb4] sm:$0xe] }
 0x237   : > { %8046 = vmatmul.mubr.bf16.gmra.mxu1 %v9942_v61  ;;  %v10107_v39 = vcombine.low %v3542_v43, %v3552_v18  ;;  %v3560_v46 = vor.u32 %v3559_v9, %v3556_v27  ;;  %v3575_v0 = vrot.slane %v3573_v60, 5  ;;  %v4192_v61 = vrot.slane %v10104_v10, 5  ;;  %v3325_v9 = vld [vmem:[#allocation2 + $0x9c] sm:$0xf] }
 0x238   : > { %8049 = vmatprep.mubr.bf16.mxu1 %v9980_v19  ;;  %8126 = vmatpush3.bf16.msra.mxu1 %v8517_v38  ;;  %v3570_v37 = vor.u32 %v3569_v54, %v3565_v30  ;;  %v4195_v32 = vrot.slane %v10097_v41, 5  ;;  %v3578_v21 = vshrl.u32 %v3319_v14, 16  ;;  %v3581_v12 = vshll.u32 %v3319_v14, 16 }
 0x239   : > { %8127 = vmatprep.subr.bf16.mxu1 %v8518_v47  ;;  %v3561_v44 = vrot.slane %v3560_v46, 4  ;;  %v10113_v7 = vsel %vm9555_vm14, %v7118_v57, %v4192_v61  ;;  %v4194_v19 = vrot.slane %v4192_v61, 4  ;;  %v3587_v62 = vshll.u32 %v10038_v53, 16  ;;  %8184 = vmatpush3.bf16.msra.mxu0 %v8529_v8  ;;  %v10152_v57 = vld [vmem:[#allocation2 + $0xbc] sm:$0x1] }
 0x23a   : > { %v3571_v11 = vrot.slane %v3570_v37, 4  ;;  %v3580_v4 = vrot.slane %v3578_v21, 4  ;;  %v3583_v15 = vrot.slane %v3581_v12, 5  ;;  %v3591_v38 = vshrl.u32 %v10038_v53, 16 }
 0x23b   : > { %8106 = vmatmul.mubr.bf16.gmra.mxu0 %v7131_v6  ;;  %v3566_v33 = vsel %vm9040_vm7, %v3561_v44, %v3565_v30  ;;  %v4196_v23 = vsel %vm9555_vm14, %v4194_v19, %v4195_v32  ;;  %v3589_v58 = vrot.slane %v3587_v62, 5  ;;  %v3597_v5 = vshll.u32 %v10027_v51, 16 }
 0x23c   : > { %8128 = vmatpush3.bf16.msra.mxu1 %v8518_v47  ;;  %8109 = vmatprep.mubr.bf16.mxu0 %v7132_v55  ;;  %v3576_v56 = vsel %vm9040_vm7, %v3571_v11, %v3575_v0  ;;  %v7134_v25 = vcombine.low %v10113_v7, %v4196_v23  ;;  %v3584_v6 = vor.u32 %v3583_v15, %v3580_v4  ;;  %v3593_v53 = vrot.slane %v3591_v38, 4  ;;  %v8530_v11 = vld [vmem:[#allocation8 + $0x180] sm:$0xff]  }
 0x23d   : > { %8129 = vmatprep.subr.bf16.mxu1 %v8521_v28  ;;  %v10135_v13 = vcombine.low %v3566_v33, %v3576_v56  ;;  %v3599_v51 = vrot.slane %v3597_v5, 5  ;;  %v7119_v8 = vrot.slane %v4055_v50, 9  ;;  %v4199_v26 = vrot.slane %v10133_v49, 5 }
 0x23e   : > { %v3585_v40 = vrot.slane %v3584_v6, 4  ;;  %v3594_v48 = vor.u32 %v3593_v53, %v3589_v58  ;;  %v4202_v55 = vrot.slane %v10125_v63, 5  ;;  %v3602_v2 = vshrl.u32 %v3322_v34, 16  ;;  %v10181_v6 = vld [vmem:[#allocation2 + $0xc8] sm:$0x1] }
 0x23f   : > { %8050 = vmatmul.mubr.bf16.gmra.mxu1 %v10011_v17  ;;  %v10143_v31 = vsel %vm9555_vm14, %v7119_v8, %v4199_v26  ;;  %v4201_v3 = vrot.slane %v4199_v26, 4  ;;  %v3605_v47 = vshll.u32 %v3322_v34, 16  ;;  %v3611_v43 = vshll.u32 %v10072_v52, 16  ;;  %v10187_v8 = vld [vmem:[#allocation2 + $0xc4] sm:$0xf]  ;;  %v10189_v26 = vld [vmem:[#allocation8 + $0x238] sm:$0xff]  }
 0x240   : > { %8053 = vmatprep.mubr.bf16.mxu1 %v10043_v29  ;;  %8130 = vmatpush3.bf16.msra.mxu1 %v8521_v28  ;;  %v3590_v17 = vsel %vm9040_vm7, %v3585_v40, %v3589_v58  ;;  %v3595_v27 = vrot.slane %v3594_v48, 4  ;;  %v3604_v16 = vrot.slane %v3602_v2, 4  ;;  %v3615_v14 = vshrl.u32 %v10072_v52, 16  ;;  %v8527_v29 = vld [vmem:[#allocation8 + $0x188] sm:$0xff]   ;;  %v10157_v28 = vld [vmem:[#allocation2 + $0xb8] sm:$0xf] }
 0x241   : > { %8131 = vmatprep.subr.bf16.mxu1 %v8524_v24  ;;  %v4203_v30 = vsel %vm9555_vm14, %v4201_v3, %v4202_v55  ;;  %v3607_v60 = vrot.slane %v3605_v47, 5  ;;  %v3613_v18 = vrot.slane %v3611_v43, 5  ;;  %v3621_v54 = vshll.u32 %v10066_v42, 16  ;;  %v4057_v58 = vld [vmem:[#allocation2 + $0xc0] sm:$0xe] }
 0x242   : > { %v3600_v46 = vsel %vm9040_vm7, %v3595_v27, %v3599_v51  ;;  %v7135_v0 = vcombine.low %v10143_v31, %v4203_v30  ;;  %v3617_v61 = vrot.slane %v3615_v14, 4  ;;  %v7120_v52 = vrot.slane %v4056_v35, 9  ;;  %v10165_v12 = vpop.f32.mrf.mxu0  ;;  %v4925_v14 = vld [vmem:[#allocation2 + $0x18] sm:$0xf] }
 0x243   : > { %8110 = vmatmul.mubr.bf16.gmra.mxu0 %v7133_v22  ;;  %v10162_v37 = vcombine.low %v3590_v17, %v3600_v46  ;;  %v3608_v32 = vor.u32 %v3607_v60, %v3604_v16  ;;  %v3623_v21 = vrot.slane %v3621_v54, 5  ;;  %v4206_v42 = vrot.slane %v10157_v28, 5 }
 0x244   : > { %8132 = vmatpush3.bf16.msra.mxu1 %v8524_v24  ;;  %8113 = vmatprep.mubr.bf16.mxu0 %v7134_v25  ;;  %v3618_v44 = vor.u32 %v3617_v61, %v3613_v18  ;;  %v4209_v7 = vrot.slane %v10152_v57, 5  ;;  %v3626_v19 = vshrl.u32 %v3325_v9, 16  ;;  %v3629_v62 = vshll.u32 %v3325_v9, 16  ;;  %v10171_v15 = vpop.f32.mrf.mxu0  ;;  %v10207_v61 = vld [vmem:[#allocation2 + $0x1c] sm:$0xf] }
 0x245   : > { %8133 = vmatprep.subr.bf16.mxu1 %v8527_v29  ;;  %v3609_v4 = vrot.slane %v3608_v32, 4  ;;  %v4207_v1 = vsel %vm9555_vm14, %v7120_v52, %v4206_v42  ;;  %v4208_v59 = vrot.slane %v4206_v42, 4  ;;  %v3635_v22 = vshll.u32 %v10104_v10, 16  ;;  %v10212_v42 = vld [vmem:[#allocation2 + $0x20] sm:$0x1] }
 0x246   : > { %v3619_v38 = vrot.slane %v3618_v44, 4  ;;  %v3628_v50 = vrot.slane %v3626_v19, 4  ;;  %v3631_v33 = vrot.slane %v3629_v62, 5  ;;  %v3639_v23 = vshrl.u32 %v10104_v10, 16  ;;  %v10183_v53 = vpop.f32.mrf.mxu0  ;;  %v3331_v44 = vld [vmem:[#allocation2 + $0xb4] sm:$0xf] }
 0x247   : > { %8054 = vmatmul.mubr.bf16.gmra.mxu1 %v10074_v36  ;;  %v3614_v5 = vsel %vm9040_vm7, %v3609_v4, %v3613_v18  ;;  %v4210_v34 = vsel %vm9555_vm14, %v4208_v59, %v4209_v7  ;;  %v3637_v56 = vrot.slane %v3635_v22, 5  ;;  %v3645_v25 = vshll.u32 %v10097_v41, 16  ;;  %v3328_v36 = vld [vmem:[#allocation2 + $0xa8] sm:$0xf] }
 0x248   : > { %8057 = vmatprep.mubr.bf16.mxu1 %v10107_v39  ;;  %8134 = vmatpush3.bf16.msra.mxu1 %v8527_v29  ;;  %v3624_v10 = vsel %vm9040_vm7, %v3619_v38, %v3623_v21  ;;  %v7136_v24 = vcombine.low %v4207_v1, %v4210_v34  ;;  %v3632_v39 = vor.u32 %v3631_v33, %v3628_v50  ;;  %v3641_v51 = vrot.slane %v3639_v23, 4  ;;  %v10195_v43 = vpop.f32.mrf.mxu0 }
 0x249   : > { %8135 = vmatprep.subr.bf16.mxu1 %v8530_v11  ;;  %v10191_v40 = vcombine.low %v3614_v5, %v3624_v10  ;;  %v3647_v41 = vrot.slane %v3645_v25, 5  ;;  %v7121_v48 = vrot.slane %v4057_v58, 9  ;;  %v4213_v55 = vrot.slane %v10187_v8, 5 }
 0x24a   : > { %v3633_v2 = vrot.slane %v3632_v39, 4  ;;  %v3642_v31 = vor.u32 %v3641_v51, %v3637_v56  ;;  %v4216_v3 = vrot.slane %v10181_v6, 5  ;;  %v3650_v47 = vshrl.u32 %v3328_v36, 16  ;;  %v10214_v7 = vpop.f32.mrf.mxu0 }
 0x24b   : > { %8114 = vmatmul.mubr.bf16.gmra.mxu0 %v7135_v0  ;;  %v4214_v35 = vsel %vm9555_vm14, %v7121_v48, %v4213_v55  ;;  %v4215_v17 = vrot.slane %v4213_v55, 4  ;;  %v3653_v27 = vshll.u32 %v3328_v36, 16  ;;  %v3659_v16 = vshll.u32 %v10133_v49, 16 }
 0x24c   : > { %8136 = vmatpush3.bf16.msra.mxu1 %v8530_v11  ;;  %8117 = vmatprep.mubr.bf16.mxu0 %v7136_v24  ;;  %v3638_v9 = vsel %vm9040_vm7, %v3633_v2, %v3637_v56  ;;  %v3643_v29 = vrot.slane %v3642_v31, 4  ;;  %v3652_v30 = vrot.slane %v3650_v47, 4  ;;  %v3663_v60 = vshrl.u32 %v10133_v49, 16  ;;  %v4928_v24 = vld [vmem:[#allocation2 + $0x24] sm:$0xf] }
 0x24d   : > { %8217 = vmatprep.subr.bf16.mxu1 %v10189_v26  ;;  %v4217_v18 = vsel %vm9555_vm14, %v4215_v17, %v4216_v3  ;;  %v3655_v54 = vrot.slane %v3653_v27, 5  ;;  %v3661_v46 = vrot.slane %v3659_v16, 5  ;;  %v3669_v0 = vshll.u32 %v10125_v63, 16  ;;  %v10229_v47 = vld [vmem:[#allocation2 + $0x28] sm:$0xf] }
 0x24e   : > { %v3648_v52 = vsel %vm9040_vm7, %v3643_v29, %v3647_v41  ;;  %v7137_v32 = vcombine.low %v4214_v35, %v4217_v18  ;;  %v3665_v21 = vrot.slane %v3663_v60, 4  ;;  %v4974_v49 = vshrl.u32 %v4925_v14, 16  ;;  %v10232_v16 = vld [vmem:[#allocation2 + $0x2c] sm:$0x1] }
 0x24f   : > { %8058 = vmatmul.mubr.bf16.gmra.mxu1 %v10135_v13  ;;  %v7094_v19 = vcombine.low %v3638_v9, %v3648_v52  ;;  %v3656_v62 = vor.u32 %v3655_v54, %v3652_v30  ;;  %v3671_v63 = vrot.slane %v3669_v0, 5  ;;  %v4977_v11 = vshll.u32 %v4925_v14, 16 }
 0x250   : > { %8061 = vmatprep.mubr.bf16.mxu1 %v10162_v37  ;;  %v3666_v4 = vor.u32 %v3665_v21, %v3661_v46  ;;  %v4976_v1 = vrot.slane %v4974_v49, 4  ;;  %v4983_v13 = vshll.u32 %v10207_v61, 16  ;;  %v4987_v59 = vshrl.u32 %v10207_v61, 16  ;;  %v10220_v37 = vpop.f32.mrf.mxu0 }
 0x251   : > { %v3657_v22 = vrot.slane %v3656_v62, 4  ;;  %v4979_v38 = vrot.slane %v4977_v11, 5  ;;  %v4993_v50 = vshll.u32 %v10212_v42, 16  ;;  %v3674_v33 = vshrl.u32 %v3331_v44, 16 }
 0x252   : > { %v3667_v23 = vrot.slane %v3666_v4, 4  ;;  %v4985_v58 = vrot.slane %v4983_v13, 5  ;;  %v4989_v5 = vrot.slane %v4987_v59, 4  ;;  %v3677_v34 = vshll.u32 %v3331_v44, 16  ;;  %v10234_v9 = vpop.f32.mrf.mxu0 }
 0x253   : > { %8118 = vmatmul.mubr.bf16.gmra.mxu0 %v7137_v32  ;;  %v3662_v56 = vsel %vm9040_vm7, %v3657_v22, %v3661_v46  ;;  %v4980_v25 = vor.u32 %v4979_v38, %v4976_v1  ;;  %v4995_v36 = vrot.slane %v4993_v50, 5  ;;  %v3676_v10 = vrot.slane %v3674_v33, 4  ;;  %v4931_v33 = vld [vmem:[#allocation2 + $0x30] sm:$0xf] }
 0x254   : > { %v3672_v39 = vsel %vm9040_vm7, %v3667_v23, %v3671_v63  ;;  %v4990_v51 = vor.u32 %v4989_v5, %v4985_v58  ;;  %v3679_v41 = vrot.slane %v3677_v34, 5  ;;  %v3683_v48 = vshll.u32 %v10157_v28, 16  ;;  %v10245_v63 = vpop.f32.mrf.mxu0 }
 0x255   : > { %v7095_v55 = vcombine.low %v3662_v56, %v3672_v39  ;;  %v4981_v2 = vrot.slane %v4980_v25, 4  ;;  %v3687_v31 = vshrl.u32 %v10157_v28, 16  ;;  %v3693_v3 = vshll.u32 %v10152_v57, 16  ;;  %v3334_v57 = vld [vmem:[#allocation2 + $0xc0] sm:$0xf] }
 0x256   : > { %v4991_v35 = vrot.slane %v4990_v51, 4  ;;  %v3680_v17 = vor.u32 %v3679_v41, %v3676_v10  ;;  %v3685_v27 = vrot.slane %v3683_v48, 5  ;;  %v4998_v14 = vshrl.u32 %v4928_v24, 16  ;;  %v10251_v25 = vld [vmem:[#allocation2 + $0x34] sm:$0xf] }
 0x257   : > { %8062 = vmatmul.mubr.bf16.gmra.mxu1 %v10191_v40  ;;  %v4986_v29 = vsel %vm9040_vm7, %v4981_v2, %v4985_v58  ;;  %v3689_v30 = vrot.slane %v3687_v31, 4  ;;  %v3695_v28 = vrot.slane %v3693_v3, 5  ;;  %v5001_v60 = vshll.u32 %v4928_v24, 16  ;;  %v7851_v23 = vpop.f32.mrf.mxu1  ;;  %v10258_v2 = vld [vmem:[#allocation2 + $0x38] sm:$0x1] }
 0x258   : > { %8065 = vmatprep.mubr.bf16.mxu1 %v7094_v19  ;;  %v4996_v18 = vsel %vm9040_vm7, %v4991_v35, %v4995_v36  ;;  %v3681_v40 = vrot.slane %v3680_v17, 4  ;;  %v5000_v54 = vrot.slane %v4998_v14, 4  ;;  %v5007_v46 = vshll.u32 %v10229_v47, 16 }
 0x259   : > { %v7170_v0 = vcombine.low %v4986_v29, %v4996_v18  ;;  %v3690_v52 = vor.u32 %v3689_v30, %v3685_v27  ;;  %v5003_v32 = vrot.slane %v5001_v60, 5  ;;  %v5011_v21 = vshrl.u32 %v10229_v47, 16  ;;  %v1988_v14 = vpop.f32.mrf.mxu1  ;;  %v10264_v60 = vld [vmem:[#allocation2 + $0x40] sm:$0xf] }
 0x25a   : > { %v3686_v49 = vsel %vm9040_vm7, %v3681_v40, %v3685_v27  ;;  %v5009_v44 = vrot.slane %v5007_v46, 5  ;;  %v5017_v19 = vshll.u32 %v10232_v16, 16  ;;  %v3698_v62 = vshrl.u32 %v3334_v57, 16  ;;  %v4934_v27 = vld [vmem:[#allocation2 + $0x3c] sm:$0xf] }
 0x25b   : > { %8185 = vmatprep.mubr.bf16.mxu0 %v7170_v0  ;;  %v3691_v11 = vrot.slane %v3690_v52, 4  ;;  %v5004_v4 = vor.u32 %v5003_v32, %v5000_v54  ;;  %v5013_v1 = vrot.slane %v5011_v21, 4  ;;  %v3701_v13 = vshll.u32 %v3334_v57, 16 }
 0x25c   : > { %v5019_v59 = vrot.slane %v5017_v19, 5  ;;  %v3700_v22 = vrot.slane %v3698_v62, 4  ;;  %v3707_v38 = vshll.u32 %v10187_v8, 16  ;;  %v3711_v50 = vshrl.u32 %v10187_v8, 16 }
 0x25d   : > { %v3696_v58 = vsel %vm9040_vm7, %v3691_v11, %v3695_v28  ;;  %v5005_v5 = vrot.slane %v5004_v4, 4  ;;  %v5014_v34 = vor.u32 %v5013_v1, %v5009_v44  ;;  %v3703_v56 = vrot.slane %v3701_v13, 5  ;;  %v10254_v51 = vpop.f32.mrf.mxu0  ;;  %v4937_v11 = vld [vmem:[#allocation2 + $0x48] sm:$0xf]  ;;  %v7852_v4 = vpop.f32.mrf.mxu1 }
 0x25e   : > { %v7096_v36 = vcombine.low %v3686_v49, %v3696_v58  ;;  %v3709_v10 = vrot.slane %v3707_v38, 5  ;;  %v3713_v24 = vrot.slane %v3711_v50, 4  ;;  %v3717_v39 = vshll.u32 %v10181_v6, 16 }
 0x25f   : > { %8066 = vmatmul.mubr.bf16.gmra.mxu1 %v7095_v55  ;;  %v5010_v8 = vsel %vm9040_vm7, %v5005_v5, %v5009_v44  ;;  %v5015_v41 = vrot.slane %v5014_v34, 4  ;;  %v3704_v48 = vor.u32 %v3703_v56, %v3700_v22  ;;  %v5022_v31 = vshrl.u32 %v4931_v33, 16  ;;  %v10266_v46 = vpop.f32.mrf.mxu0  ;;  %v10274_v22 = vld [vmem:[#allocation2 + $0x44] sm:$0x1]  ;;  %v10277_v34 = vld [vmem:[#allocation2 + $0x4c] sm:$0xf] }
 0x260   : > { %8069 = vmatprep.mubr.bf16.mxu1 %v7096_v36  ;;  %v3714_v3 = vor.u32 %v3713_v24, %v3709_v10  ;;  %v3719_v35 = vrot.slane %v3717_v39, 5  ;;  %v5025_v17 = vshll.u32 %v4931_v33, 16  ;;  %v5031_v55 = vshll.u32 %v10251_v25, 16 }
 0x261   : > { %v5020_v6 = vsel %vm9040_vm7, %v5015_v41, %v5019_v59  ;;  %v3705_v29 = vrot.slane %v3704_v48, 4  ;;  %v5024_v30 = vrot.slane %v5022_v31, 4  ;;  %v5035_v28 = vshrl.u32 %v10251_v25, 16  ;;  %v8531_v59 = vld [vmem:[#allocation2 + $0x18] sm:$0xff]   ;;  %v10279_v56 = vpop.f32.mrf.mxu0  ;;  %v10285_v31 = vld [vmem:[#allocation2 + $0x50] sm:$0x1] }
 0x262   : > { %v7171_v57 = vcombine.low %v5010_v8, %v5020_v6  ;;  %v3715_v18 = vrot.slane %v3714_v3, 4  ;;  %v5027_v40 = vrot.slane %v5025_v17, 5  ;;  %v5033_v54 = vrot.slane %v5031_v55, 5 }
 0x263   : > { %v3710_v0 = vsel %vm9040_vm7, %v3705_v29, %v3709_v10  ;;  %v5037_v52 = vrot.slane %v5035_v28, 4  ;;  %v5041_v32 = vshll.u32 %v10258_v2, 16  ;;  %v5046_v21 = vshrl.u32 %v4934_v27, 16  ;;  %v4940_v28 = vld [vmem:[#allocation2 + $0x54] sm:$0xf] }
 0x264   : > { %8186 = vmatmul.mubr.bf16.vlgmr.msra.gmra.mxu0 %v7171_v57  ;;  %v3720_v49 = vsel %vm9040_vm7, %v3715_v18, %v3719_v35  ;;  %v5028_v44 = vor.u32 %v5027_v40, %v5024_v30  ;;  %v5049_v19 = vshll.u32 %v4934_v27, 16  ;;  %v5055_v62 = vshll.u32 %v10264_v60, 16  ;;  %v10287_v35 = vpop.f32.mrf.mxu1  ;;  %v10294_v57 = vpop.f32.mrf.mxu0 }
 0x265   : > { %v7097_v1 = vcombine.low %v3710_v0, %v3720_v49  ;;  %v5038_v13 = vor.u32 %v5037_v52, %v5033_v54  ;;  %v5048_v38 = vrot.slane %v5046_v21, 4  ;;  %v5059_v5 = vshrl.u32 %v10264_v60, 16  ;;  %v10301_v52 = vld [vmem:[#allocation2 + $0x58] sm:$0xf]  ;;  %v8533_v49 = vld [vmem:[#allocation2 + $0x24] sm:$0xff]  }
 0x266   : > { %v5029_v50 = vrot.slane %v5028_v44, 4  ;;  %v5051_v33 = vrot.slane %v5049_v19, 5  ;;  %v5057_v58 = vrot.slane %v5055_v62, 5  ;;  %v5043_v10 = vrot.slane %v5041_v32, 5 }
 0x267   : > { %8070 = vmatmul.mubr.bf16.gmra.mxu1 %v7097_v1  ;;  %v5039_v36 = vrot.slane %v5038_v13, 4  ;;  %v10282_v24 = vadd.f32 %v10165_v12, %v7851_v23  ;;  %v5070_v39 = vshrl.u32 %v4937_v11, 16  ;;  %v5061_v41 = vrot.slane %v5059_v5, 4 }
 0x268   : > { %8137 = vmatprep.mubr.bf16.mxu1 %v8531_v59  ;;  %v5052_v8 = vor.u32 %v5051_v33, %v5048_v38  ;;  %v5065_v48 = vshll.u32 %v10274_v22, 16  ;;  %v5073_v3 = vshll.u32 %v4937_v11, 16  ;;  %v5034_v17 = vsel %vm9040_vm7, %v5029_v50, %v5033_v54  ;;  %v10308_v59 = vld [vmem:[#allocation2 + $0x5c] sm:$0x1]  ;;  %v8534_v33 = vld [vmem:[#allocation2 + $0x30] sm:$0xff]  }
 0x269   : > { %v5044_v55 = vsel %vm9040_vm7, %v5039_v36, %v5043_v10  ;;  %v5072_v27 = vrot.slane %v5070_v39, 4  ;;  %v5079_v12 = vshll.u32 %v10277_v34, 16  ;;  %v5062_v29 = vor.u32 %v5061_v41, %v5057_v58 }
 0x26a   : > { %v7172_v23 = vcombine.low %v5034_v17, %v5044_v55  ;;  %v5053_v6 = vrot.slane %v5052_v8, 4  ;;  %v5075_v30 = vrot.slane %v5073_v3, 5  ;;  %v5083_v40 = vshrl.u32 %v10277_v34, 16 }
 0x26b   : > { %v5081_v18 = vrot.slane %v5079_v12, 5  ;;  %v5089_v0 = vshll.u32 %v10285_v31, 16  ;;  %v10299_v54 = vadd.f32 %v10171_v15, %v1988_v14  ;;  %v5063_v32 = vrot.slane %v5062_v29, 4  ;;  %v8535_v14 = vld [vmem:[#allocation8 + $0x230] sm:$0xff]  }
 0x26c   : > { %8189 = vmatprep.mubr.bf16.mxu0 %v7172_v23  ;;  %v5067_v21 = vrot.slane %v5065_v48, 5  ;;  %v5076_v44 = vor.u32 %v5075_v30, %v5072_v27  ;;  %v10304_v19 = vadd.f32 %v10183_v53, %v7852_v4  ;;  %v7855_v62 = vpop.f32.mrf.mxu1  ;;  %v5058_v11 = vsel %vm9040_vm7, %v5053_v6, %v5057_v58  ;;  %v4943_v53 = vld [vmem:[#allocation2 + $0x60] sm:$0xf]  ;;  %v10316_v48 = vld [vmem:[#allocation2 + $0x64] sm:$0xf] }
 0x26d   : > { %v5085_v1 = vrot.slane %v5083_v40, 4  ;;  %v5091_v13 = vrot.slane %v5089_v0, 5  ;;  %v5094_v15 = vshrl.u32 %v4940_v28, 16  ;;  %v5097_v5 = vshll.u32 %v4940_v28, 16  ;;  %v8538_v40 = vld [vmem:[#allocation8 + $0x228] sm:$0xff]  }
 0x26e   : > { %v5068_v38 = vsel %vm9040_vm7, %v5063_v32, %v5067_v21  ;;  %v5077_v50 = vrot.slane %v5076_v44, 4  ;;  %v5103_v36 = vshll.u32 %v10301_v52, 16  ;;  %v2004_v4 = vpop.f32.mrf.mxu1  ;;  %v10313_v10 = vpop.f32.mrf.mxu0  ;;  %v5107_v41 = vshrl.u32 %v10301_v52, 16 }
 0x26f   : > { %v7173_v39 = vcombine.low %v5058_v11, %v5068_v38  ;;  %8138 = vmatmul.mubr.bf16.vlgmr.msra.gmra.mxu1 %v8533_v49  ;;  %v5086_v58 = vor.u32 %v5085_v1, %v5081_v18  ;;  %v5096_v8 = vrot.slane %v5094_v15, 4  ;;  %v5099_v17 = vrot.slane %v5097_v5, 5 }
 0x270   : > { %v5082_v3 = vsel %vm9040_vm7, %v5077_v50, %v5081_v18  ;;  %8218 = vmatpush3.bf16.msra.mxu1 %v10189_v26  ;;  %8141 = vmatprep.mubr.bf16.mxu1 %v8534_v33  ;;  %v5105_v55 = vrot.slane %v5103_v36, 5  ;;  %v5113_v27 = vshll.u32 %v10308_v59, 16  ;;  %v7856_v12 = vpop.f32.mrf.mxu1  ;;  %v10322_v23 = vpop.f32.mrf.mxu0  ;;  %v5109_v29 = vrot.slane %v5107_v41, 4  ;;  %v10327_v26 = vld [vmem:[#allocation2 + $0x68] sm:$0x1]  ;;  %v8536_v50 = vld [vmem:[#allocation2 + $0x3c] sm:$0xff]  }
 0x271   : > { %8190 = vmatmul.mubr.bf16.gmra.mxu0 %v7173_v39  ;;  %v5087_v6 = vrot.slane %v5086_v58, 4  ;;  %8219 = vmatprep.subr.bf16.mxu1 %v8535_v14  ;;  %v10325_v30 = vadd.f32 %v10214_v7, %v7855_v62  ;;  %v5118_v28 = vshrl.u32 %v4943_v53, 16  ;;  %v5100_v18 = vor.u32 %v5099_v17, %v5096_v8  ;;  %v4946_v36 = vld [vmem:[#allocation2 + $0x6c] sm:$0xf]  ;;  %v8541_v17 = vld [vmem:[#allocation8 + $0x220] sm:$0xff]  }
 0x272   : > { %v5115_v0 = vrot.slane %v5113_v27, 5  ;;  %v5121_v32 = vshll.u32 %v4943_v53, 16  ;;  %v5127_v21 = vshll.u32 %v10316_v48, 16  ;;  %v10330_v49 = vpop.f32.mrf.mxu0  ;;  %v5110_v11 = vor.u32 %v5109_v29, %v5105_v55  ;;  %v2007_v7 = vpop.f32.mrf.mxu1 }
 0x273   : > { %11478 = vst [vmem:[#allocation16_spill] sm:$0xff] %v10325_v30  ;;  %v5092_v44 = vsel %vm9040_vm7, %v5087_v6, %v5091_v13  ;;  %v5120_v1 = vrot.slane %v5118_v28, 4  ;;  %v5131_v15 = vshrl.u32 %v10316_v48, 16  ;;  %v5101_v38 = vrot.slane %v5100_v18, 4  ;;  %v10339_v13 = vld [vmem:[#allocation2 + $0x70] sm:$0xf] }
 0x274   : > { %v7174_v62 = vcombine.low %v5082_v3, %v5092_v44  ;;  %v5123_v33 = vrot.slane %v5121_v32, 5  ;;  %v5129_v5 = vrot.slane %v5127_v21, 5  ;;  %8220 = vmatpush3.bf16.msra.mxu1 %v8535_v14  ;;  %v5111_v53 = vrot.slane %v5110_v11, 4  ;;  %v10341_v41 = vpop.f32.mrf.mxu0  ;;  %v8537_v14 = vld [vmem:[#allocation2 + $0x48] sm:$0xff]   ;;  %v4949_v21 = vld [vmem:[#allocation2 + $0x78] sm:$0xf] }
 0x275   : > { %v5133_v39 = vrot.slane %v5131_v15, 4  ;;  %v5137_v58 = vshll.u32 %v10327_v26, 16  ;;  %v10337_v8 = vadd.f32 %v10220_v37, %v2004_v4  ;;  %8221 = vmatprep.subr.bf16.mxu1 %v8538_v40  ;;  %v5106_v3 = vsel %vm9040_vm7, %v5101_v38, %v5105_v55  ;;  %v10351_v37 = vld [vmem:[#allocation2 + $0x74] sm:$0x1]  ;;  %v8543_v30 = vld [vmem:[#allocation2 + $0x78] sm:$0xff]  }
 0x276   : > { %8193 = vmatprep.mubr.bf16.mxu0 %v7174_v62  ;;  %v5124_v27 = vor.u32 %v5123_v33, %v5120_v1  ;;  %v10346_v6 = vadd.f32 %v10234_v9, %v7856_v12  ;;  %v10349_v29 = vadd.f32 %v10245_v63, %v2007_v7  ;;  %v5116_v4 = vsel %vm9040_vm7, %v5111_v53, %v5115_v0  ;;  %v10356_v1 = vld [vmem:[#allocation2 + $0x7c] sm:$0xf]  ;;  %v8544_v38 = vld [vmem:[#allocation8 + $0x218] sm:$0xff]  }
 0x277   : > { %11479 = vst [vmem:[#allocation17_spill] sm:$0xff] %v10337_v8  ;;  %8142 = vmatmul.mubr.bf16.gmra.mxu1 %v8536_v50  ;;  %v5134_v28 = vor.u32 %v5133_v39, %v5129_v5  ;;  %v5139_v18 = vrot.slane %v5137_v58, 5  ;;  %v5142_v32 = vshrl.u32 %v4946_v36, 16  ;;  %v7175_v44 = vcombine.low %v5106_v3, %v5116_v4 }
 0x278   : > { %11480 = vst [vmem:[#allocation18_spill] sm:$0xff] %v10346_v6  ;;  %11481 = vst [vmem:[#allocation19_spill] sm:$0xff] %v10349_v29  ;;  %v5125_v55 = vrot.slane %v5124_v27, 4  ;;  %8145 = vmatprep.mubr.bf16.mxu1 %v8537_v14  ;;  %v5145_v11 = vshll.u32 %v4946_v36, 16  ;;  %v5151_v9 = vshll.u32 %v10339_v13, 16  ;;  %v7859_v12 = vpop.f32.mrf.mxu1  ;;  %8222 = vmatpush3.bf16.msra.mxu1 %v8538_v40  ;;  %v5155_v7 = vshrl.u32 %v10339_v13, 16 }
 0x279   : > { %v5135_v63 = vrot.slane %v5134_v28, 4  ;;  %v5144_v15 = vrot.slane %v5142_v32, 4  ;;  %v5161_v0 = vshll.u32 %v10351_v37, 16  ;;  %v10360_v62 = vpop.f32.mrf.mxu0  ;;  %8223 = vmatprep.subr.bf16.mxu1 %v8541_v17  ;;  %8194 = vmatmul.mubr.bf16.gmra.mxu0 %v7175_v44  ;;  %v10365_v53 = vadd.f32 %v10254_v51, %v7859_v12  ;;  %v10367_v40 = vld [vmem:[#allocation2 + $0x80] sm:$0x1]  ;;  %v8539_v44 = vld [vmem:[#allocation2 + $0x54] sm:$0xff]  }
 0x27a   : > { %v5130_v50 = vsel %vm9040_vm7, %v5125_v55, %v5129_v5  ;;  %v5147_v33 = vrot.slane %v5145_v11, 5  ;;  %v5153_v36 = vrot.slane %v5151_v9, 5  ;;  %v2020_v39 = vpop.f32.mrf.mxu1  ;;  %v5157_v3 = vrot.slane %v5155_v7, 4  ;;  %v8547_v7 = vld [vmem:[#allocation8 + $0x210] sm:$0xff]  }
 0x27b   : > { %11482 = vst [vmem:[#allocation20_spill] sm:$0xff] %v10365_v53  ;;  %v5140_v58 = vsel %vm9040_vm7, %v5135_v63, %v5139_v18  ;;  %v5163_v27 = vrot.slane %v5161_v0, 5  ;;  %v5166_v14 = vshrl.u32 %v4949_v21, 16  ;;  %v10371_v4 = vpop.f32.mrf.mxu0  ;;  %v5169_v5 = vshll.u32 %v4949_v21, 16  ;;  %v4952_v18 = vld [vmem:[#allocation2 + $0x84] sm:$0xf] }
 0x27c   : > { %v7176_v28 = vcombine.low %v5130_v50, %v5140_v58  ;;  %v5148_v32 = vor.u32 %v5147_v33, %v5144_v15  ;;  %v5175_v55 = vshll.u32 %v10356_v1, 16  ;;  %v7860_v11 = vpop.f32.mrf.mxu1  ;;  %8224 = vmatpush3.bf16.msra.mxu1 %v8541_v17  ;;  %v5158_v51 = vor.u32 %v5157_v3, %v5153_v36  ;;  %v8540_v21 = vld [vmem:[#allocation2 + $0x60] sm:$0xff]   ;;  %v10381_v58 = vld [vmem:[#allocation2 + $0x88] sm:$0xf] }
 0x27d   : > { %v5168_v9 = vrot.slane %v5166_v14, 4  ;;  %v5179_v12 = vshrl.u32 %v10356_v1, 16  ;;  %v5185_v53 = vshll.u32 %v10367_v40, 16  ;;  %v10376_v63 = vpop.f32.mrf.mxu0  ;;  %8225 = vmatprep.subr.bf16.mxu1 %v8544_v38  ;;  %v5171_v15 = vrot.slane %v5169_v5, 5 }
 0x27e   : > { %8197 = vmatprep.mubr.bf16.mxu0 %v7176_v28  ;;  %v5149_v0 = vrot.slane %v5148_v32, 4  ;;  %v5177_v50 = vrot.slane %v5175_v55, 5  ;;  %v10379_v33 = vadd.f32 %v10266_v46, %v2020_v39  ;;  %v2023_v17 = vpop.f32.mrf.mxu1  ;;  %v5159_v3 = vrot.slane %v5158_v51, 4  ;;  %v10393_v39 = vld [vmem:[#allocation2 + $0x8c] sm:$0x1] }
 0x27f   : > { %8146 = vmatmul.mubr.bf16.gmra.mxu1 %v8539_v44  ;;  %v5181_v14 = vrot.slane %v5179_v12, 4  ;;  %v5187_v29 = vrot.slane %v5185_v53, 5  ;;  %v10384_v6 = vadd.f32 %v10279_v56, %v7860_v11  ;;  %v10386_v8 = vpop.f32.mrf.mxu0  ;;  %v5172_v32 = vor.u32 %v5171_v15, %v5168_v9  ;;  %11487 = vst [vmem:[#allocation25_spill] sm:$0xff] %v10393_v39  ;;  %v4955_v11 = vld [vmem:[#allocation2 + $0x90] sm:$0xf] }
 0x280   : > { %11483 = vst [vmem:[#allocation21_spill] sm:$0xff] %v10379_v33  ;;  %11485 = vst [vmem:[#allocation23_spill] sm:$0xff] %v10386_v8  ;;  %v5154_v28 = vsel %vm9040_vm7, %v5149_v0, %v5153_v36  ;;  %8149 = vmatprep.mubr.bf16.mxu1 %v8540_v21  ;;  %v10391_v46 = vadd.f32 %v10294_v57, %v2023_v17  ;;  %v5190_v5 = vshrl.u32 %v4952_v18, 16  ;;  %8226 = vmatpush3.bf16.msra.mxu1 %v8544_v38  ;;  %v8550_v36 = vld [vmem:[#allocation8 + $0x208] sm:$0xff]  }
 0x281   : > { %11484 = vst [vmem:[#allocation22_spill] sm:$0xff] %v10384_v6  ;;  %v5164_v53 = vsel %vm9040_vm7, %v5159_v3, %v5163_v27  ;;  %v5182_v44 = vor.u32 %v5181_v14, %v5177_v50  ;;  %v5193_v56 = vshll.u32 %v4952_v18, 16  ;;  %v5199_v55 = vshll.u32 %v10381_v58, 16  ;;  %v10398_v51 = vpop.f32.mrf.mxu0  ;;  %8227 = vmatprep.subr.bf16.mxu1 %v8547_v7  ;;  %v10402_v27 = vld [vmem:[#allocation2 + $0x94] sm:$0xf] }
 0x282   : > { %11486 = vst [vmem:[#allocation24_spill] sm:$0xff] %v10391_v46  ;;  %v7177_v9 = vcombine.low %v5154_v28, %v5164_v53  ;;  %v5173_v12 = vrot.slane %v5172_v32, 4  ;;  %v5192_v57 = vrot.slane %v5190_v5, 4  ;;  %v5203_v0 = vshrl.u32 %v10381_v58, 16  ;;  %v10408_v28 = vld [vmem:[#allocation2 + $0x98] sm:$0x1] }
 0x283   : > { %v5183_v15 = vrot.slane %v5182_v44, 4  ;;  %v5195_v21 = vrot.slane %v5193_v56, 5  ;;  %v5201_v38 = vrot.slane %v5199_v55, 5  ;;  %v5209_v17 = vshll.u32 %v10393_v39, 16  ;;  %v10404_v18 = vpop.f32.mrf.mxu0  ;;  %11488 = vst [vmem:[#allocation26_spill] sm:$0xff] %v10408_v28  ;;  %v8542_v46 = vld [vmem:[#allocation2 + $0x6c] sm:$0xff]  }
 0x284   : > { %8198 = vmatmul.mubr.bf16.gmra.mxu0 %v7177_v9  ;;  %v5178_v3 = vsel %vm9040_vm7, %v5173_v12, %v5177_v50  ;;  %v5205_v14 = vrot.slane %v5203_v0, 4  ;;  %v7863_v8 = vpop.f32.mrf.mxu1  ;;  %v5214_v32 = vshrl.u32 %v4955_v11, 16  ;;  %v5217_v5 = vshll.u32 %v4955_v11, 16  ;;  %8228 = vmatpush3.bf16.msra.mxu1 %v8547_v7  ;;  %v4958_v9 = vld [vmem:[#allocation2 + $0x9c] sm:$0xf] }
 0x285   : > { %v5188_v53 = vsel %vm9040_vm7, %v5183_v15, %v5187_v29  ;;  %v5196_v44 = vor.u32 %v5195_v21, %v5192_v57  ;;  %v5211_v56 = vrot.slane %v5209_v17, 5  ;;  %v10413_v55 = vadd.f32 %v10313_v10, %v7863_v8  ;;  %v10415_v6 = vpop.f32.mrf.mxu0  ;;  %8229 = vmatprep.subr.bf16.mxu1 %v8550_v36  ;;  %v8553_v7 = vld [vmem:[#allocation8 + $0x200] sm:$0xff]  }
 0x286   : > { %v7178_v50 = vcombine.low %v5178_v3, %v5188_v53  ;;  %v5206_v12 = vor.u32 %v5205_v14, %v5201_v38  ;;  %v5216_v0 = vrot.slane %v5214_v32, 4  ;;  %v5219_v33 = vrot.slane %v5217_v5, 5  ;;  %v2036_v11 = vpop.f32.mrf.mxu1  ;;  %v10425_v14 = vld [vmem:[#allocation2 + $0xa0] sm:$0xf] }
 0x287   : > { %11489 = vst [vmem:[#allocation27_spill] sm:$0xff] %v10413_v55  ;;  %v5197_v39 = vrot.slane %v5196_v44, 4  ;;  %8150 = vmatmul.mubr.bf16.gmra.mxu1 %v8542_v46  ;;  %v5223_v29 = vshll.u32 %v10402_v27, 16  ;;  %v5227_v57 = vshrl.u32 %v10402_v27, 16  ;;  %v5233_v10 = vshll.u32 %v10408_v28, 16  ;;  %v10420_v8 = vpop.f32.mrf.mxu0  ;;  %11492 = vst [vmem:[#allocation30_spill] sm:$0xff] %v10425_v14 }
 0x288   : > { %11490 = vst [vmem:[#allocation28_spill] sm:$0xff] %v10420_v8  ;;  %8201 = vmatprep.mubr.bf16.mxu0 %v7178_v50  ;;  %v5207_v15 = vrot.slane %v5206_v12, 4  ;;  %v5220_v21 = vor.u32 %v5219_v33, %v5216_v0  ;;  %8153 = vmatprep.mubr.bf16.mxu1 %v8543_v30  ;;  %v10423_v17 = vadd.f32 %v10322_v23, %v2036_v11  ;;  %v7864_v3 = vpop.f32.mrf.mxu1  ;;  %v5238_v32 = vshrl.u32 %v4958_v9, 16  ;;  %v10429_v55 = vld [vmem:[#allocation2 + $0xa4] sm:$0x1] }
 0x289   : > { %v5202_v46 = vsel %vm9040_vm7, %v5197_v39, %v5201_v38  ;;  %v5225_v5 = vrot.slane %v5223_v29, 5  ;;  %v5229_v53 = vrot.slane %v5227_v57, 4  ;;  %v5235_v44 = vrot.slane %v5233_v10, 5  ;;  %11493 = vst [vmem:[#allocation31_spill] sm:$0xff] %v10429_v55  ;;  %8230 = vmatpush3.bf16.msra.mxu1 %v8550_v36  ;;  %v4961_v0 = vld [vmem:[#allocation2 + $0xa8] sm:$0xf] }
 0x28a   : > { %11491 = vst [vmem:[#allocation29_spill] sm:$0xff] %v10423_v17  ;;  %v5212_v33 = vsel %vm9040_vm7, %v5207_v15, %v5211_v56  ;;  %v5221_v30 = vrot.slane %v5220_v21, 4  ;;  %v10434_v23 = vadd.f32 %v10330_v49, %v7864_v3  ;;  %v2039_v50 = vpop.f32.mrf.mxu1  ;;  %v5240_v12 = vrot.slane %v5238_v32, 4  ;;  %v10436_v11 = vpop.f32.mrf.mxu0  ;;  %8231 = vmatprep.subr.bf16.mxu1 %v8553_v7  ;;  %v10446_v21 = vld [vmem:[#allocation2 + $0xac] sm:$0xf] }
 0x28b   : > { %v7179_v39 = vcombine.low %v5202_v46, %v5212_v33  ;;  %v5230_v38 = vor.u32 %v5229_v53, %v5225_v5  ;;  %v10439_v29 = vadd.f32 %v10341_v41, %v2039_v50  ;;  %v5241_v57 = vshll.u32 %v4958_v9, 16  ;;  %11496 = vst [vmem:[#allocation34_spill] sm:$0xff] %v10446_v21  ;;  %v8545_v9 = vld [vmem:[#allocation2 + $0x84] sm:$0xff]   ;;  %v10453_v8 = vld [vmem:[#allocation2 + $0xb0] sm:$0x1] }
 0x28c   : > { %11494 = vst [vmem:[#allocation32_spill] sm:$0xff] %v10434_v23  ;;  %v5226_v36 = vsel %vm9040_vm7, %v5221_v30, %v5225_v5  ;;  %v5247_v56 = vshll.u32 %v10425_v14, 16  ;;  %v5251_v49 = vshrl.u32 %v10425_v14, 16  ;;  %v5257_v10 = vshll.u32 %v10429_v55, 16  ;;  %v7867_v15 = vpop.f32.mrf.mxu1  ;;  %v10448_v3 = vpop.f32.mrf.mxu0  ;;  %v8546_v5 = vld [vmem:[#allocation2 + $0x90] sm:$0xff]   ;;  %11498 = vst [vmem:[#allocation36_spill] sm:$0xff] %v10453_v8 }
 0x28d   : > { %11495 = vst [vmem:[#allocation33_spill] sm:$0xff] %v10439_v29  ;;  %8202 = vmatmul.mubr.bf16.gmra.mxu0 %v7179_v39  ;;  %v5231_v32 = vrot.slane %v5230_v38, 4  ;;  %v5243_v46 = vrot.slane %v5241_v57, 5  ;;  %v10451_v41 = vadd.f32 %v10360_v62, %v7867_v15  ;;  %v5262_v53 = vshrl.u32 %v4961_v0, 16  ;;  %8232 = vmatpush3.bf16.msra.mxu1 %v8553_v7 }
 0x28e   : > { %v5249_v33 = vrot.slane %v5247_v56, 5  ;;  %v5253_v30 = vrot.slane %v5251_v49, 4  ;;  %v5259_v50 = vrot.slane %v5257_v10, 5  ;;  %v5265_v29 = vshll.u32 %v4961_v0, 16  ;;  %v2052_v23 = vpop.f32.mrf.mxu1  ;;  %v10455_v17 = vpop.f32.mrf.mxu0  ;;  %v4964_v10 = vld [vmem:[#allocation2 + $0xb4] sm:$0xf] }
 0x28f   : > { %11497 = vst [vmem:[#allocation35_spill] sm:$0xff] %v10451_v41  ;;  %v5236_v39 = vsel %vm9040_vm7, %v5231_v32, %v5235_v44  ;;  %v5244_v38 = vor.u32 %v5243_v46, %v5240_v12  ;;  %8154 = vmatmul.mubr.bf16.gmra.mxu1 %v8545_v9  ;;  %v5264_v62 = vrot.slane %v5262_v53, 4  ;;  %v5271_v57 = vshll.u32 %v10446_v21, 16  ;;  %v10472_v9 = vld [vmem:[#allocation2 + $0xb8] sm:$0xf] }
 0x290   : > { %v7180_v15 = vcombine.low %v5226_v36, %v5236_v39  ;;  %v5254_v41 = vor.u32 %v5253_v30, %v5249_v33  ;;  %v5267_v7 = vrot.slane %v5265_v29, 5  ;;  %v5275_v56 = vshrl.u32 %v10446_v21, 16  ;;  %8157 = vmatprep.mubr.bf16.mxu1 %v8546_v5  ;;  %v7868_v49 = vpop.f32.mrf.mxu1  ;;  %v10461_v0 = vpop.f32.mrf.mxu0  ;;  %v10476_v30 = vld [vmem:[#allocation2 + $0xbc] sm:$0x1] }
 0x291   : > { %11499 = vst [vmem:[#allocation37_spill] sm:$0xff] %v10461_v0  ;;  %v5245_v55 = vrot.slane %v5244_v38, 4  ;;  %v5273_v14 = vrot.slane %v5271_v57, 5  ;;  %v5281_v28 = vshll.u32 %v10453_v8, 16  ;;  %v10465_v44 = vadd.f32 %v10371_v4, %v2052_v23  ;;  %11503 = vst [vmem:[#allocation41_spill] sm:$0xff] %v10476_v30 }
 0x292   : > { %8205 = vmatprep.mubr.bf16.mxu0 %v7180_v15  ;;  %v5255_v12 = vrot.slane %v5254_v41, 4  ;;  %v5268_v32 = vor.u32 %v5267_v7, %v5264_v62  ;;  %v5277_v36 = vrot.slane %v5275_v56, 4  ;;  %v10468_v29 = vadd.f32 %v10376_v63, %v7868_v49  ;;  %v10470_v46 = vpop.f32.mrf.mxu1  ;;  %v4967_v62 = vld [vmem:[#allocation2 + $0xc0] sm:$0xf] }
 0x293   : > { %11500 = vst [vmem:[#allocation38_spill] sm:$0xff] %v10465_v44  ;;  %11502 = vst [vmem:[#allocation40_spill] sm:$0xff] %v10470_v46  ;;  %v5250_v53 = vsel %vm9040_vm7, %v5245_v55, %v5249_v33  ;;  %v5283_v5 = vrot.slane %v5281_v28, 5  ;;  %v5286_v39 = vshrl.u32 %v4964_v10, 16  ;;  %v10478_v4 = vpop.f32.mrf.mxu0  ;;  %v5289_v63 = vshll.u32 %v4964_v10, 16  ;;  %v8548_v55 = vld [vmem:[#allocation2 + $0x9c] sm:$0xff]  }
 0x294   : > { %11501 = vst [vmem:[#allocation39_spill] sm:$0xff] %v10468_v29  ;;  %v5260_v23 = vsel %vm9040_vm7, %v5255_v12, %v5259_v50  ;;  %v5269_v41 = vrot.slane %v5268_v32, 4  ;;  %v5278_v38 = vor.u32 %v5277_v36, %v5273_v14  ;;  %v5295_v7 = vshll.u32 %v10472_v9, 16  ;;  %v10489_v32 = vld [vmem:[#allocation2 + $0xc4] sm:$0xf]  ;;  %v8549_v10 = vld [vmem:[#allocation2 + $0xa8] sm:$0xff]  }
 0x295   : > { %v7181_v57 = vcombine.low %v5250_v53, %v5260_v23  ;;  %v5288_v15 = vrot.slane %v5286_v39, 4  ;;  %v5299_v56 = vshrl.u32 %v10472_v9, 16  ;;  %v10484_v28 = vpop.f32.mrf.mxu0  ;;  %v5291_v0 = vrot.slane %v5289_v63, 5  ;;  %v10494_v23 = vld [vmem:[#allocation2 + $0xc8] sm:$0x1] }
 0x296   : > { %v5274_v33 = vsel %vm9040_vm7, %v5269_v41, %v5273_v14  ;;  %v5279_v49 = vrot.slane %v5278_v38, 4  ;;  %v5305_v50 = vshll.u32 %v10476_v30, 16  ;;  %v7871_v12 = vpop.f32.mrf.mxu1  ;;  %v5297_v36 = vrot.slane %v5295_v7, 5 }
 0x297   : > { %8206 = vmatmul.mubr.bf16.gmra.mxu0 %v7181_v57  ;;  %v5301_v53 = vrot.slane %v5299_v56, 4  ;;  %v10492_v39 = vadd.f32 %v10398_v51, %v7871_v12  ;;  %8158 = vmatmul.mubr.bf16.gmra.mxu1 %v8548_v55  ;;  %v5310_v29 = vshrl.u32 %v4967_v62, 16  ;;  %v10496_v46 = vpop.f32.mrf.mxu0  ;;  %v5292_v41 = vor.u32 %v5291_v0, %v5288_v15 }
 0x298   : > { %v5284_v14 = vsel %vm9040_vm7, %v5279_v49, %v5283_v5  ;;  %v5307_v38 = vrot.slane %v5305_v50, 5  ;;  %v5313_v63 = vshll.u32 %v4967_v62, 16  ;;  %8161 = vmatprep.mubr.bf16.mxu1 %v8549_v10  ;;  %v2068_v44 = vpop.f32.mrf.mxu1  ;;  %v5319_v51 = vshll.u32 %v10489_v32, 16 }
 0x299   : > { %11504 = vst [vmem:[#allocation42_spill] sm:$0xff] %v10492_v39  ;;  %v7182_v57 = vcombine.low %v5274_v33, %v5284_v14  ;;  %v5302_v7 = vor.u32 %v5301_v53, %v5297_v36  ;;  %v5312_v56 = vrot.slane %v5310_v29, 4  ;;  %v10501_v12 = vpop.f32.mrf.mxu0  ;;  %v5293_v55 = vrot.slane %v5292_v41, 4  ;;  %v5678_v33 = vld [vmem:[#allocation2 + $0x18] sm:$0xe] }
 0x29a   : > { %11505 = vst [vmem:[#allocation43_spill] sm:$0xff] %v10501_v12  ;;  %v5315_v39 = vrot.slane %v5313_v63, 5  ;;  %v5323_v8 = vshrl.u32 %v10489_v32, 16  ;;  %v5329_v21 = vshll.u32 %v10494_v23, 16  ;;  %v7872_v30 = vpop.f32.mrf.mxu1  ;;  %v5321_v5 = vrot.slane %v5319_v51, 5 }
 0x29b   : > { %8209 = vmatprep.mubr.bf16.mxu0 %v7182_v57  ;;  %v5303_v0 = vrot.slane %v5302_v7, 4  ;;  %v10506_v62 = vadd.f32 %v10404_v18, %v2068_v44  ;;  %v10509_v15 = vadd.f32 %v10415_v6, %v7872_v30  ;;  %v10511_v29 = vpop.f32.mrf.mxu0  ;;  %v5298_v49 = vsel %vm9040_vm7, %v5293_v55, %v5297_v36  ;;  %v4970_v14 = vld [vmem:[#allocation2 + $0xcc] sm:$0xf]  ;;  %v8551_v18 = vld [vmem:[#allocation2 + $0xb4] sm:$0xff]   ;;  %v10522_v30 = vld [vmem:[#allocation2 + $0xd0] sm:$0xf] }
 0x29c   : > { %v5316_v50 = vor.u32 %v5315_v39, %v5312_v56  ;;  %v5325_v10 = vrot.slane %v5323_v8, 4  ;;  %v10515_v53 = vpop.f32.mrf.mxu1  ;;  %v5331_v63 = vrot.slane %v5329_v21, 5  ;;  %v5744_v6 = vrot.slane %v10207_v61, 5  ;;  %v8552_v39 = vld [vmem:[#allocation2 + $0xc0] sm:$0xff]  }
 0x29d   : > { %v5308_v41 = vsel %vm9040_vm7, %v5303_v0, %v5307_v38  ;;  %v10519_v44 = vpop.f32.mrf.mxu0  ;;  %v7194_v8 = vrot.slane %v5678_v33, 9  ;;  %v5747_v21 = vrot.slane %v10212_v42, 5  ;;  %v5334_v38 = vshrl.u32 %v4970_v14, 16  ;;  %v5679_v12 = vld [vmem:[#allocation2 + $0x24] sm:$0xe] }
 0x29e   : > { %v7183_v57 = vcombine.low %v5298_v49, %v5308_v41  ;;  %v5317_v7 = vrot.slane %v5316_v50, 4  ;;  %v5326_v51 = vor.u32 %v5325_v10, %v5321_v5  ;;  %v7875_v36 = vpop.f32.mrf.mxu1  ;;  %v5746_v55 = vrot.slane %v5744_v6, 4  ;;  %v10532_v10 = vld [vmem:[#allocation2 + $0xd4] sm:$0x1] }
 0x29f   : > { %v10525_v56 = vadd.f32 %v10436_v11, %v7875_v36  ;;  %8162 = vmatmul.mubr.bf16.gmra.mxu1 %v8551_v18  ;;  %v10528_v0 = vpop.f32.mrf.mxu0  ;;  %11507 = vst [vmem:[#allocation45_spill] sm:$0xff] %v10532_v10  ;;  %v5337_v33 = vshll.u32 %v4970_v14, 16  ;;  %v5343_v11 = vshll.u32 %v10522_v30, 16  ;;  %v5336_v18 = vrot.slane %v5334_v38, 4 }
 0x2a0   : > { %8210 = vmatmul.mubr.bf16.gmra.mxu0 %v7183_v57  ;;  %v5322_v61 = vsel %vm9040_vm7, %v5317_v7, %v5321_v5  ;;  %v5327_v49 = vrot.slane %v5326_v51, 4  ;;  %8165 = vmatprep.mubr.bf16.mxu1 %v8552_v39  ;;  %v2084_v50 = vpop.f32.mrf.mxu1  ;;  %v5748_v42 = vsel %vm9555_vm14, %v5746_v55, %v5747_v21  ;;  %v5347_v57 = vshrl.u32 %v10522_v30, 16  ;;  %v8554_v55 = vld [vmem:[#allocation2 + $0xcc] sm:$0xff]  }
 0x2a1   : > { %11506 = vst [vmem:[#allocation44_spill] sm:$0xff] %v10525_v56  ;;  %v10536_v41 = vadd.f32 %v10448_v3, %v2084_v50  ;;  %v10541_v36 = vpop.f32.mrf.mxu0  ;;  %v5745_v14 = vsel %vm9555_vm14, %v7194_v8, %v5744_v6  ;;  %v5339_v51 = vrot.slane %v5337_v33, 5  ;;  %v5345_v39 = vrot.slane %v5343_v11, 5 }
 0x2a2   : > { %11509 = vst [vmem:[#allocation47_spill] sm:$0xff] %v10541_v36  ;;  %v5332_v5 = vsel %vm9040_vm7, %v5327_v49, %v5331_v63  ;;  %v7876_v7 = vpop.f32.mrf.mxu1  ;;  %v5349_v21 = vrot.slane %v5347_v57, 4  ;;  %v5353_v38 = vshll.u32 %v10532_v10, 16  ;;  %v5680_v36 = vld [vmem:[#allocation2 + $0x30] sm:$0xe]  ;;  %v10555_v63 = vadd.f32 %v10195_v43, %v10287_v35 }
 0x2a3   : > { %11508 = vst [vmem:[#allocation46_spill] sm:$0xff] %v10536_v41  ;;  %v7184_v3 = vcombine.low %v5322_v61, %v5332_v5  ;;  %v10548_v50 = vadd.f32 %v10455_v17, %v7876_v7  ;;  %v10551_v41 = vpop.f32.mrf.mxu0  ;;  %v7210_v6 = vcombine.low %v5745_v14, %v5748_v42  ;;  %v5340_v8 = vor.u32 %v5339_v51, %v5336_v18  ;;  %v5681_v7 = vld [vmem:[#allocation2 + $0x3c] sm:$0xe] }
 0x2a4   : > { %v10557_v49 = vpop.f32.mrf.mxu1  ;;  %v5751_v61 = vrot.slane %v10229_v47, 5  ;;  %v5350_v17 = vor.u32 %v5349_v21, %v5345_v39  ;;  %v5355_v33 = vrot.slane %v5353_v38, 5  ;;  %v7195_v11 = vrot.slane %v5679_v12, 9 }
 0x2a5   : > { %11510 = vst [vmem:[#allocation48_spill] sm:$0xff] %v10548_v50  ;;  %8213 = vmatprep.mubr.bf16.mxu0 %v7184_v3  ;;  %v5754_v57 = vrot.slane %v10232_v16, 5  ;;  %v10561_v5 = vpop.f32.mrf.mxu0  ;;  %v5341_v56 = vrot.slane %v5340_v8, 4  ;;  %v7196_v43 = vrot.slane %v5680_v36, 9  ;;  %v5758_v35 = vrot.slane %v10251_v25, 5 }
 0x2a6   : > { %v7879_v50 = vpop.f32.mrf.mxu1  ;;  %v5753_v10 = vrot.slane %v5751_v61, 4  ;;  %v5351_v47 = vrot.slane %v5350_v17, 4  ;;  %v5752_v18 = vsel %vm9555_vm14, %v7195_v11, %v5751_v61  ;;  %v5761_v12 = vrot.slane %v10258_v2, 5  ;;  %v5682_v3 = vld [vmem:[#allocation2 + $0x48] sm:$0xe] }
 0x2a7   : > { %v10565_v42 = vadd.f32 %v10478_v4, %v7879_v50  ;;  %8166 = vmatmul.mubr.bf16.gmra.mxu1 %v8554_v55  ;;  %v10570_v16 = vpop.f32.mrf.mxu0  ;;  %v5346_v51 = vsel %vm9040_vm7, %v5341_v56, %v5345_v39  ;;  %v5760_v36 = vrot.slane %v5758_v35, 4  ;;  %v7197_v4 = vrot.slane %v5681_v7, 9  ;;  %v5683_v56 = vld [vmem:[#allocation2 + $0x54] sm:$0xe]  ;;  %v5684_v61 = vld [vmem:[#allocation2 + $0x60] sm:$0xe] }
 0x2a8   : > { %8233 = vmatprep.mubr.bf16.mxu1 %v7210_v6  ;;  %v2100_v14 = vpop.f32.mrf.mxu1  ;;  %v5755_v25 = vsel %vm9555_vm14, %v5753_v10, %v5754_v57  ;;  %v5356_v55 = vsel %vm9040_vm7, %v5351_v47, %v5355_v33  ;;  %v5759_v2 = vsel %vm9555_vm14, %v7196_v43, %v5758_v35  ;;  %v5765_v38 = vrot.slane %v10264_v60, 5 }
 0x2a9   : > { %v10577_v50 = vadd.f32 %v10484_v28, %v2100_v14  ;;  %v10583_v21 = vpop.f32.mrf.mxu0  ;;  %v7185_v39 = vcombine.low %v5346_v51, %v5356_v55  ;;  %v7211_v10 = vcombine.low %v5752_v18, %v5755_v25  ;;  %v5762_v8 = vsel %vm9555_vm14, %v5760_v36, %v5761_v12  ;;  %v5685_v51 = vld [vmem:[#allocation2 + $0x6c] sm:$0xe] }
 0x2aa   : > { %v7880_v6 = vpop.f32.mrf.mxu1  ;;  %v5768_v28 = vrot.slane %v10274_v22, 5  ;;  %v7212_v17 = vcombine.low %v5759_v2, %v5762_v8  ;;  %v5767_v11 = vrot.slane %v5765_v38, 4  ;;  %v7198_v57 = vrot.slane %v5682_v3, 9 }
 0x2ab   : > { %v10590_v45 = vadd.f32 %v10496_v46, %v7880_v6  ;;  %v10592_v33 = vpop.f32.mrf.mxu0  ;;  %8214 = vmatmul.mubr.bf16.gmra.mxu0 %v7185_v39  ;;  %v5766_v7 = vsel %vm9555_vm14, %v7197_v4, %v5765_v38  ;;  %v5772_v43 = vrot.slane %v10277_v34, 5  ;;  %v7199_v35 = vrot.slane %v5683_v56, 9 }
 0x2ac   : > { %v10594_v60 = vpop.f32.mrf.mxu1  ;;  %v5779_v22 = vrot.slane %v10301_v52, 5  ;;  %v5769_v46 = vsel %vm9555_vm14, %v5767_v11, %v5768_v28  ;;  %v5775_v18 = vrot.slane %v10285_v31, 5  ;;  %v5782_v12 = vrot.slane %v10308_v59, 5 }
 0x2ad   : > { %v10602_v47 = vpop.f32.mrf.mxu0  ;;  %v7200_v14 = vrot.slane %v5684_v61, 9  ;;  %v7213_v36 = vcombine.low %v5766_v7, %v5769_v46  ;;  %v5773_v4 = vsel %vm9555_vm14, %v7198_v57, %v5772_v43  ;;  %v5774_v34 = vrot.slane %v5772_v43, 4 }
 0x2ae   : > { %v7947_v25 = vpop.f32.mrf.mxu1  ;;  %v10610_v52 = vsel %vm9555_vm14, %v7199_v35, %v5779_v22  ;;  %v5781_v31 = vrot.slane %v5779_v22, 4  ;;  %v5786_v59 = vrot.slane %v10316_v48, 5  ;;  %v5789_v2 = vrot.slane %v10327_v26, 5 }
 0x2af   : > { %v10613_v3 = vadd.f32 %v7947_v25, %v10282_v24  ;;  %8234 = vmatmul.mubr.bf16.vlgmr.msra.gmra.mxu1 %v7211_v10  ;;  %v10615_v55 = vpop.f32.mrf.mxu0  ;;  %v5776_v56 = vsel %vm9555_vm14, %v5774_v34, %v5775_v18  ;;  %v7201_v39 = vrot.slane %v5685_v51, 9  ;;  %v5793_v6 = vrot.slane %v10339_v13, 5  ;;  %v5686_v24 = vld [vmem:[#allocation2 + $0x78] sm:$0xe] }
 0x2b0   : > { %8237 = vmatprep.mubr.bf16.mxu1 %v7212_v17  ;;  %v2745_v38 = vpop.f32.mrf.mxu1  ;;  %v5796_v8 = vrot.slane %v10351_v37, 5  ;;  %v7214_v28 = vcombine.low %v5773_v4, %v5776_v56  ;;  %v10630_v48 = vsel %vm9555_vm14, %v5781_v31, %v5782_v12  ;;  %v10634_v26 = vsel %vm9555_vm14, %v7200_v14, %v5786_v59  ;;  %v5687_v17 = vld [vmem:[#allocation2 + $0x84] sm:$0xe] }
 0x2b1   : > { %v10624_v10 = vadd.f32 %v2745_v38, %v10299_v54  ;;  %v10626_v61 = vpop.f32.mrf.mxu0  ;;  %v7215_v13 = vcombine.low %v10610_v52, %v10630_v48  ;;  %v5788_v37 = vrot.slane %v5786_v59, 4  ;;  %v10640_v54 = vsel %vm9555_vm14, %v7201_v39, %v5793_v6  ;;  %v5689_v59 = vld [vmem:[#allocation2 + $0x9c] sm:$0xe]  ;;  %v11511_v56 = vld [vmem:[#allocation25_spill] sm:$0xff] }
 0x2b2   : > { %v7948_v11 = vpop.f32.mrf.mxu1  ;;  %v5795_v57 = vrot.slane %v5793_v6, 4  ;;  %v7202_v35 = vrot.slane %v5686_v24, 9  ;;  %v5800_v22 = vrot.slane %v10356_v1, 5  ;;  %v5803_v46 = vrot.slane %v10367_v40, 5  ;;  %v11512_v6 = vld [vmem:[#allocation16_spill] sm:$0xff] }
 0x2b3   : > { %v10643_v7 = vadd.f32 %v7948_v11, %v10304_v19  ;;  %v10645_v43 = vpop.f32.mrf.mxu0  ;;  %v5790_v12 = vsel %vm9555_vm14, %v5788_v37, %v5789_v2  ;;  %v7203_v51 = vrot.slane %v5687_v17, 9  ;;  %v5807_v25 = vrot.slane %v10381_v58, 5  ;;  %v5688_v19 = vld [vmem:[#allocation2 + $0x90] sm:$0xe]  ;;  %v11513_v11 = vld [vmem:[#allocation26_spill] sm:$0xff] }
 0x2b4   : > { %v2748_v18 = vpop.f32.mrf.mxu1  ;;  %v10653_v14 = vsel %vm9555_vm14, %v5795_v57, %v5796_v8  ;;  %v7216_v1 = vcombine.low %v10634_v26, %v5790_v12  ;;  %v10666_v31 = vsel %vm9555_vm14, %v7202_v35, %v5800_v22  ;;  %v5802_v38 = vrot.slane %v5800_v22, 4  ;;  %v11514_v12 = vld [vmem:[#allocation30_spill] sm:$0xff] }
 0x2b5   : > { %v10657_v4 = vadd.f32 %v2748_v18, %v10555_v63  ;;  %v10659_v34 = vpop.f32.mrf.mxu0  ;;  %v7217_v40 = vcombine.low %v10640_v54, %v10653_v14  ;;  %v10670_v58 = vsel %vm9555_vm14, %v7203_v51, %v5807_v25  ;;  %v5809_v63 = vrot.slane %v5807_v25, 4  ;;  %v5690_v14 = vld [vmem:[#allocation2 + $0xa8] sm:$0xe] }
 0x2b6   : > { %v7951_v2 = vpop.f32.mrf.mxu1  ;;  %v5810_v39 = vrot.slane %v11511_v56, 5  ;;  %v7204_v26 = vrot.slane %v5688_v19, 9  ;;  %v5814_v17 = vrot.slane %v10402_v27, 5  ;;  %v5817_v37 = vrot.slane %v11513_v11, 5  ;;  %v11518_v11 = vld [vmem:[#allocation18_spill] sm:$0xff] }
 0x2b7   : > { %v2878_v8 = vadd.f32 %v7951_v2, %v11512_v6  ;;  %8238 = vmatmul.mubr.bf16.gmra.mxu1 %v7213_v36  ;;  %v10674_v24 = vpop.f32.mrf.mxu0  ;;  %v5804_v35 = vsel %vm9555_vm14, %v5802_v38, %v5803_v46  ;;  %v7205_v18 = vrot.slane %v5689_v59, 9  ;;  %v5821_v51 = vrot.slane %v11514_v12, 5  ;;  %v11515_v36 = vld [vmem:[#allocation17_spill] sm:$0xff]  ;;  %v5691_v46 = vld [vmem:[#allocation2 + $0xb4] sm:$0xe] }
 0x2b8   : > { %8241 = vmatprep.mubr.bf16.mxu1 %v7214_v28  ;;  %v2761_v57 = vpop.f32.mrf.mxu1  ;;  %v10682_v22 = vsel %vm9555_vm14, %v5809_v63, %v5810_v39  ;;  %v7218_v27 = vcombine.low %v10666_v31, %v5804_v35  ;;  %v10693_v19 = vsel %vm9555_vm14, %v7204_v26, %v5814_v17  ;;  %v5816_v63 = vrot.slane %v5814_v17, 4  ;;  %v11517_v39 = vld [vmem:[#allocation31_spill] sm:$0xff] }
 0x2b9   : > { %v2876_v25 = vadd.f32 %v2761_v57, %v11515_v36  ;;  %v10686_v2 = vpop.f32.mrf.mxu0  ;;  %v10697_v59 = vsel %vm9555_vm14, %v7205_v18, %v5821_v51  ;;  %v5823_v56 = vrot.slane %v5821_v51, 4  ;;  %v5824_v6 = vrot.slane %v11517_v39, 5  ;;  %v11519_v36 = vld [vmem:[#allocation19_spill] sm:$0xff] }
 0x2ba   : > { %11516 = vst [vmem:[#allocation25_spill] sm:$0xff] %v10686_v2  ;;  %v7952_v38 = vpop.f32.mrf.mxu1  ;;  %v10705_v12 = vsel %vm9555_vm14, %v5816_v63, %v5817_v37  ;;  %v7207_v17 = vrot.slane %v5691_v46, 9  ;;  %v5835_v18 = vrot.slane %v10472_v9, 5  ;;  %v11520_v46 = vld [vmem:[#allocation41_spill] sm:$0xff]  ;;  %v11521_v9 = vld [vmem:[#allocation20_spill] sm:$0xff]  ;;  %v10746_v48 = vadd.f32 %v10511_v29, %v10613_v3 }
 0x2bb   : > { %v2879_v57 = vadd.f32 %v7952_v38, %v11518_v11  ;;  %v10701_v31 = vpop.f32.mrf.mxu0  ;;  %v10709_v26 = vsel %vm9555_vm14, %v5823_v56, %v5824_v6  ;;  %v7220_v38 = vcombine.low %v10693_v19, %v10705_v12  ;;  %v5838_v6 = vrot.slane %v11520_v46, 5  ;;  %v11523_v46 = vld [vmem:[#allocation22_spill] sm:$0xff] }
 0x2bc   : > { %v2764_v35 = vpop.f32.mrf.mxu1  ;;  %v10723_v63 = vsel %vm9555_vm14, %v7207_v17, %v5835_v18  ;;  %v5837_v56 = vrot.slane %v5835_v18, 4  ;;  %v10765_v29 = vadd.f32 %v10561_v5, %v2876_v25 }
 0x2bd   : > { %v10713_v51 = vadd.f32 %v2764_v35, %v11519_v36  ;;  %v10715_v39 = vpop.f32.mrf.mxu0  ;;  %v11522_v36 = vld [vmem:[#allocation21_spill] sm:$0xff] }
 0x2be   : > { %v7955_v37 = vpop.f32.mrf.mxu1  ;;  %v10734_v12 = vsel %vm9555_vm14, %v5837_v56, %v5838_v6  ;;  %v10757_v6 = vadd.f32 %v10551_v41, %v2878_v8  ;;  %v11525_v41 = vld [vmem:[#allocation27_spill] sm:$0xff] }
 0x2bf   : > { %v2882_v28 = vadd.f32 %v7955_v37, %v11521_v9  ;;  %8242 = vmatmul.mubr.bf16.gmra.mxu1 %v7215_v13  ;;  %v10730_v35 = vpop.f32.mrf.mxu0  ;;  %v10750_v13 = vadd.f32 %v10519_v44, %v10624_v10  ;;  %v10768_v44 = vadd.f32 %v10570_v16, %v2879_v57 }
 0x2c0   : > { %8245 = vmatprep.mubr.bf16.mxu1 %v7216_v1  ;;  %v2777_v19 = vpop.f32.mrf.mxu1  ;;  %v10754_v1 = vadd.f32 %v10528_v0, %v10643_v7 }
 0x2c1   : > { %v2880_v17 = vadd.f32 %v2777_v19, %v11522_v36  ;;  %v10737_v11 = vpop.f32.mrf.mxu0  ;;  %v8555_v19 = vld [vmem:[#allocation9 + $0x38] sm:$0xff]   ;;  %v11524_v36 = vld [vmem:[#allocation24_spill] sm:$0xff]  ;;  %v10771_v0 = vadd.f32 %v10592_v33, %v2882_v28  ;;  %v11526_v33 = vld [vmem:[#allocation29_spill] sm:$0xff] }
 0x2c2   : > { %v7956_v37 = vpop.f32.mrf.mxu1  ;;  %8265 = vmatprep.subr.bf16.mxu0 %v8555_v19 }
 0x2c3   : > { %v2883_v9 = vadd.f32 %v7956_v37, %v11523_v46  ;;  %v10742_v52 = vpop.f32.mrf.mxu0  ;;  %v10774_v10 = vadd.f32 %v10602_v47, %v2880_v17  ;;  %8266 = vmatpush3.bf16.msra.mxu0 %v8555_v19  ;;  %v11527_v17 = vld [vmem:[#allocation32_spill] sm:$0xff] }
 0x2c4   : > { %v2780_v56 = vpop.f32.mrf.mxu1 }
 0x2c5   : > { %v10760_v37 = vadd.f32 %v2780_v56, %v11524_v36  ;;  %v10762_v46 = vpop.f32.mrf.mxu0  ;;  %v10783_v5 = vadd.f32 %v10615_v55, %v2883_v9  ;;  %v11529_v9 = vld [vmem:[#allocation33_spill] sm:$0xff] }
 0x2c6   : > { %v7959_v3 = vpop.f32.mrf.mxu1 }
 0x2c7   : > { %v2886_v7 = vadd.f32 %v7959_v3, %v11525_v41  ;;  %8246 = vmatmul.mubr.bf16.gmra.mxu1 %v7217_v40  ;;  %v10780_v8 = vpop.f32.mrf.mxu0  ;;  %v11528_v40 = vld [vmem:[#allocation34_spill] sm:$0xff] }
 0x2c8   : > { %8249 = vmatprep.mubr.bf16.mxu1 %v7218_v27  ;;  %v2793_v16 = vpop.f32.mrf.mxu1  ;;  %v5828_v36 = vrot.slane %v11528_v40, 5  ;;  %v8556_v41 = vld [vmem:[#allocation9 + $0x30] sm:$0xff]  }
 0x2c9   : > { %v2884_v25 = vadd.f32 %v2793_v16, %v11526_v33  ;;  %v10786_v28 = vpop.f32.mrf.mxu0  ;;  %v10789_v47 = vadd.f32 %v10645_v43, %v2886_v7  ;;  %v7206_v16 = vrot.slane %v5690_v14, 9  ;;  %v11530_v33 = vld [vmem:[#allocation35_spill] sm:$0xff]  ;;  %8267 = vmatprep.subr.bf16.mxu0 %v8556_v41 }
 0x2ca   : > { %v7960_v57 = vpop.f32.mrf.mxu1  ;;  %8268 = vmatpush3.bf16.msra.mxu0 %v8556_v41 }
 0x2cb   : > { %v2887_v56 = vadd.f32 %v7960_v57, %v11527_v17  ;;  %v10792_v54 = vpop.f32.mrf.mxu0  ;;  %v10796_v55 = vadd.f32 %v10659_v34, %v2884_v25  ;;  %v11531_v17 = vcombine.low %v10670_v58, %v10682_v22  ;;  %v5830_v34 = vrot.slane %v5828_v36, 4  ;;  %v11532_v25 = vld [vmem:[#allocation36_spill] sm:$0xff] }
 0x2cc   : > { %v2796_v27 = vpop.f32.mrf.mxu1  ;;  %v5831_v40 = vrot.slane %v11532_v25, 5  ;;  %v11537_v25 = vld [vmem:[#allocation39_spill] sm:$0xff] }
 0x2cd   : > { %v10799_v19 = vadd.f32 %v2796_v27, %v11529_v9  ;;  %v10801_v3 = vpop.f32.mrf.mxu0  ;;  %v10804_v43 = vadd.f32 %v10674_v24, %v2887_v56  ;;  %v11533_v24 = vld [vmem:[#allocation38_spill] sm:$0xff] }
 0x2ce   : > { %v7963_v7 = vpop.f32.mrf.mxu1 }
 0x2cf   : > { %v2890_v57 = vadd.f32 %v7963_v7, %v11530_v33  ;;  %8250 = vmatmul.mubr.bf16.gmra.mxu1 %v11531_v17  ;;  %v10811_v18 = vpop.f32.mrf.mxu0  ;;  %v11535_v7 = vld [vmem:[#allocation40_spill] sm:$0xff]  ;;  %v11536_v33 = vld [vmem:[#allocation23_spill] sm:$0xff]  ;;  %v5829_v17 = vsel %vm9555_vm14, %v7206_v16, %v5828_v36 }
 0x2d0   : > { %8253 = vmatprep.mubr.bf16.mxu1 %v7220_v38  ;;  %v2809_v27 = vpop.f32.mrf.mxu1  ;;  %v2361_v58 = vadd.f32 %v11536_v33, %v11535_v7  ;;  %v5832_v38 = vsel %vm9555_vm14, %v5830_v34, %v5831_v40  ;;  %v11539_v40 = vcombine.low %v10697_v59, %v10709_v26 }
 0x2d1   : > { %v2888_v56 = vadd.f32 %v2809_v27, %v11533_v24  ;;  %v10814_v9 = vpop.f32.mrf.mxu0  ;;  %v10817_v14 = vadd.f32 %v10701_v31, %v2890_v57  ;;  %v5692_v27 = vld [vmem:[#allocation2 + $0xc0] sm:$0xe]  ;;  %v5842_v24 = vrot.slane %v10489_v32, 5  ;;  %v7222_v16 = vcombine.low %v5829_v17, %v5832_v38 }
 0x2d2   : > { %v7964_v22 = vpop.f32.mrf.mxu1 }
 0x2d3   : > { %11534 = vst [vmem:[#allocation16_spill] sm:$0xff] %v10817_v14  ;;  %v2891_v2 = vadd.f32 %v7964_v22, %v11537_v25  ;;  %v10826_v41 = vpop.f32.mrf.mxu0  ;;  %v10830_v31 = vadd.f32 %v10715_v39, %v2888_v56  ;;  %v7208_v22 = vrot.slane %v5692_v27, 9  ;;  %v11538_v25 = vld [vmem:[#allocation42_spill] sm:$0xff]  ;;  %v5844_v32 = vrot.slane %v5842_v24, 4 }
 0x2d4   : > { %v2812_v57 = vpop.f32.mrf.mxu1  ;;  %v5845_v39 = vrot.slane %v10494_v23, 5  ;;  %v5693_v27 = vld [vmem:[#allocation2 + $0xcc] sm:$0xe]  ;;  %v11540_v23 = vld [vmem:[#allocation28_spill] sm:$0xff] }
 0x2d5   : > { %v2889_v14 = vadd.f32 %v2812_v57, %v2361_v58  ;;  %v10832_v7 = vpop.f32.mrf.mxu0  ;;  %v10835_v33 = vadd.f32 %v10730_v35, %v2891_v2  ;;  %v8557_v57 = vld [vmem:[#allocation9 + $0x28] sm:$0xff]   ;;  %v5849_v35 = vrot.slane %v10522_v30, 5  ;;  %v2377_v26 = vadd.f32 %v11540_v23, %v10515_v53  ;;  %v11542_v23 = vld [vmem:[#allocation44_spill] sm:$0xff] }
 0x2d6   : > { %v7967_v36 = vpop.f32.mrf.mxu1  ;;  %8269 = vmatprep.subr.bf16.mxu0 %v8557_v57 }
 0x2d7   : > { %v2894_v34 = vadd.f32 %v7967_v36, %v11538_v25  ;;  %8254 = vmatmul.mubr.bf16.gmra.mxu1 %v11539_v40  ;;  %v10842_v56 = vpop.f32.mrf.mxu0  ;;  %v10845_v58 = vadd.f32 %v10737_v11, %v2889_v14  ;;  %8270 = vmatpush3.bf16.msra.mxu0 %v8557_v57  ;;  %v5843_v14 = vsel %vm9555_vm14, %v7208_v22, %v5842_v24  ;;  %v7209_v25 = vrot.slane %v5693_v27, 9  ;;  %v11541_v40 = vld [vmem:[#allocation45_spill] sm:$0xff] }
 0x2d8   : > { %8257 = vmatprep.mubr.bf16.mxu1 %v7222_v16  ;;  %v2825_v2 = vpop.f32.mrf.mxu1  ;;  %v5852_v53 = vrot.slane %v11541_v40, 5  ;;  %v11546_v40 = vld [vmem:[#allocation48_spill] sm:$0xff] }
 0x2d9   : > { %v2892_v17 = vadd.f32 %v2825_v2, %v10506_v62  ;;  %v10849_v38 = vpop.f32.mrf.mxu0  ;;  %v10852_v59 = vadd.f32 %v10742_v52, %v2894_v34  ;;  %v5846_v62 = vsel %vm9555_vm14, %v5844_v32, %v5845_v39  ;;  %v5851_v34 = vrot.slane %v5849_v35, 4 }
 0x2da   : > { %v7968_v36 = vpop.f32.mrf.mxu1  ;;  %v7224_v22 = vcombine.low %v5843_v14, %v5846_v62  ;;  %v11543_v39 = vcombine.low %v10723_v63, %v10734_v12 }
 0x2db   : > { %v2895_v11 = vadd.f32 %v7968_v36, %v10509_v15  ;;  %v10861_v30 = vpop.f32.mrf.mxu0  ;;  %v10864_v16 = vadd.f32 %v10762_v46, %v2892_v17  ;;  %v8558_v36 = vld [vmem:[#allocation9 + $0x20] sm:$0xff]  }
 0x2dc   : > { %v2828_v52 = vpop.f32.mrf.mxu1  ;;  %8271 = vmatprep.subr.bf16.mxu0 %v8558_v36 }
 0x2dd   : > { %v2893_v2 = vadd.f32 %v2828_v52, %v2377_v26  ;;  %v10867_v57 = vpop.f32.mrf.mxu0  ;;  %v10870_v15 = vadd.f32 %v10780_v8, %v2895_v11  ;;  %v5850_v26 = vsel %vm9555_vm14, %v7209_v25, %v5849_v35  ;;  %v5853_v8 = vsel %vm9555_vm14, %v5851_v34, %v5852_v53  ;;  %v11544_v11 = vld [vmem:[#allocation46_spill] sm:$0xff]  ;;  %8272 = vmatpush3.bf16.msra.mxu0 %v8558_v36 }
 0x2df   : > { %v7971_v24 = vpop.f32.mrf.mxu1  ;;  %8258 = vmatmul.mubr.bf16.gmra.mxu1 %v11543_v39  ;;  %v10876_v46 = vpop.f32.mrf.mxu0  ;;  %v10879_v17 = vadd.f32 %v10786_v28, %v2893_v2  ;;  %v11545_v28 = vld [vmem:[#allocation37_spill] sm:$0xff] }
 0x2e0   : > { %v2898_v32 = vadd.f32 %v7971_v24, %v11542_v23  ;;  %8261 = vmatprep.mubr.bf16.mxu1 %v7224_v22  ;;  %v2393_v52 = vadd.f32 %v11545_v28, %v10557_v49  ;;  %v7225_v24 = vcombine.low %v5850_v26, %v5853_v8  ;;  %v8559_v23 = vld [vmem:[#allocation9 + $0x18] sm:$0xff]  }
 0x2e1   : > { %v2841_v27 = vpop.f32.mrf.mxu1  ;;  %v10886_v62 = vpop.f32.mrf.mxu0  ;;  %8273 = vmatprep.subr.bf16.mxu0 %v8559_v23 }
 0x2e2   : > { %v2896_v14 = vadd.f32 %v2841_v27, %v11544_v11  ;;  %v10889_v63 = vadd.f32 %v10792_v54, %v2898_v32  ;;  %v8560_v32 = vld [vmem:[#allocation9 + $0x10] sm:$0xff]   ;;  %8274 = vmatpush3.bf16.msra.mxu0 %v8559_v23 }
 0x2e3   : > { %v7972_v12 = vpop.f32.mrf.mxu1  ;;  %v8095_v35 = vpop.f32.mrf.mxu0  ;;  %8275 = vmatprep.subr.bf16.mxu0 %v8560_v32 }
 0x2e4   : > { %v2899_v2 = vadd.f32 %v7972_v12, %v11546_v40  ;;  %v10895_v20 = vadd.f32 %v10801_v3, %v2896_v14 }
 0x2e5   : > { %v2844_v25 = vpop.f32.mrf.mxu1  ;;  %v4396_v53 = vpop.f32.mrf.mxu0 }
 0x2e6   : > { %v2897_v34 = vadd.f32 %v2844_v25, %v2393_v52  ;;  %v10898_v22 = vadd.f32 %v10811_v18, %v2899_v2  ;;  %8276 = vmatpush3.bf16.msra.mxu0 %v8560_v32 }
 0x2e7   : > { %v7975_v54 = vpop.f32.mrf.mxu1  ;;  %8262 = vmatmul.mubr.bf16.gmra.mxu1 %v7225_v24  ;;  %v10901_v49 = vpop.f32.mrf.mxu0 }
 0x2e8   : > { %v2902_v39 = vadd.f32 %v7975_v54, %v10565_v42  ;;  %v10904_v27 = vadd.f32 %v10814_v9, %v2897_v34  ;;  %v11547_v42 = vld [vmem:[#allocation43_spill] sm:$0xff]  ;;  %v8561_v54 = vld [vmem:[#allocation9 + $0x8] sm:$0xff]  }
 0x2e9   : > { %v2857_v3 = vpop.f32.mrf.mxu1  ;;  %v10907_v8 = vpop.f32.mrf.mxu0  ;;  %v2409_v11 = vadd.f32 %v11547_v42, %v10594_v60  ;;  %8277 = vmatprep.subr.bf16.mxu0 %v8561_v54 }
 0x2ea   : > { %v2900_v26 = vadd.f32 %v2857_v3, %v10577_v50  ;;  %v10910_v18 = vadd.f32 %v10826_v41, %v2902_v39  ;;  %8278 = vmatpush3.bf16.msra.mxu0 %v8561_v54 }
 0x2eb   : > { %v7976_v36 = vpop.f32.mrf.mxu1  ;;  %v8099_v12 = vpop.f32.mrf.mxu0 }
 0x2ec   : > { %v2903_v14 = vadd.f32 %v7976_v36, %v10590_v45  ;;  %v10916_v9 = vadd.f32 %v10832_v7, %v2900_v26 }
 0x2ed   : > { %v2860_v28 = vpop.f32.mrf.mxu1  ;;  %v4412_v50 = vpop.f32.mrf.mxu0 }
 0x2ee   : > { %v2901_v52 = vadd.f32 %v2860_v28, %v2409_v11  ;;  %v10919_v40 = vadd.f32 %v10842_v56, %v2903_v14  ;;  %v8562_v28 = vld [vmem:[#allocation9] sm:$0xff]  }
 0x2ef   : > { %v8043_v41 = vpop.f32.mrf.mxu1  ;;  %v10922_v24 = vpop.f32.mrf.mxu0  ;;  %8279 = vmatprep.subr.bf16.mxu0 %v8562_v28 }
 0x2f0   : > { %v4012_v2 = vadd.f32 %v8043_v41, %v10746_v48  ;;  %v10925_v60 = vadd.f32 %v10849_v38, %v2901_v52  ;;  %v11548_v48 = vld [vmem:[#allocation47_spill] sm:$0xff]  ;;  %v3262_v41 = vadd.f32 %v10583_v21, %v10713_v51  ;;  %8280 = vmatpush3.bf16.msra.mxu0 %v8562_v28 }
 0x2f1   : > { %v3883_v45 = vpop.f32.mrf.mxu1  ;;  %v10928_v7 = vpop.f32.mrf.mxu0  ;;  %v3258_v32 = vadd.f32 %v11548_v48, %v10657_v4 }
 0x2f2   : > { %v4010_v25 = vadd.f32 %v3883_v45, %v10750_v13  ;;  %v10931_v34 = vadd.f32 %v10861_v30, %v4012_v2 }
 0x2f3   : > { %v8044_v56 = vpop.f32.mrf.mxu1  ;;  %v8103_v39 = vpop.f32.mrf.mxu0 }
 0x2f4   : > { %v10934_v23 = vadd.f32 %v8044_v56, %v10754_v1  ;;  %v10939_v38 = vadd.f32 %v10867_v57, %v4010_v25 }
 0x2f5   : > { %v3886_v3 = vpop.f32.mrf.mxu1  ;;  %v4428_v26 = vpop.f32.mrf.mxu0 }
 0x2f6   : > { %v10941_v13 = vadd.f32 %v3886_v3, %v3258_v32  ;;  %v3266_v3 = vadd.f32 %v10626_v61, %v10760_v37  ;;  %v11551_v37 = vld [vmem:[#allocation25_spill] sm:$0xff] }
 0x2f7   : > { %v8047_v30 = vpop.f32.mrf.mxu1  ;;  %v10944_v42 = vpop.f32.mrf.mxu0 }
 0x2f8   : > { %v4016_v36 = vadd.f32 %v8047_v30, %v10757_v6 }
 0x2f9   : > { %v3899_v1 = vpop.f32.mrf.mxu1  ;;  %v10947_v14 = vpop.f32.mrf.mxu0 }
 0x2fa   : > { %v4014_v11 = vadd.f32 %v3899_v1, %v10765_v29  ;;  %v10949_v4 = vadd.f32 %v8095_v35, %v4016_v36 }
 0x2fb   : > { %v8048_v57 = vpop.f32.mrf.mxu1  ;;  %v8107_v2 = vpop.f32.mrf.mxu0 }
 0x2fc   : > { %v10952_v52 = vadd.f32 %v8048_v57, %v10768_v44  ;;  %v10956_v45 = vadd.f32 %v4396_v53, %v4014_v11 }
 0x2fd   : > { %v3902_v6 = vpop.f32.mrf.mxu1  ;;  %v4444_v29 = vpop.f32.mrf.mxu0 }
 0x2fe   : > { %v10958_v25 = vadd.f32 %v3902_v6, %v3262_v41 }
 0x2ff   : > { %v8051_v54 = vpop.f32.mrf.mxu1  ;;  %v10961_v56 = vpop.f32.mrf.mxu0 }
 0x300   : > { %v4020_v35 = vadd.f32 %v8051_v54, %v10771_v0 }
 0x301   : > { %v3915_v48 = vpop.f32.mrf.mxu1  ;;  %v10964_v32 = vpop.f32.mrf.mxu0 }
 0x302   : > { %v4018_v44 = vadd.f32 %v3915_v48, %v10774_v10  ;;  %11549 = vst [vmem:[#allocation26_spill] sm:$0xff] %v10964_v32  ;;  %v10966_v21 = vadd.f32 %v8099_v12, %v4020_v35 }
 0x303   : > { %v8052_v51 = vpop.f32.mrf.mxu1  ;;  %v8111_v30 = vpop.f32.mrf.mxu0 }
 0x304   : > { %v10969_v53 = vadd.f32 %v8052_v51, %v10783_v5  ;;  %v10973_v36 = vadd.f32 %v4412_v50, %v4018_v44  ;;  %v3270_v50 = vadd.f32 %v11551_v37, %v10799_v19  ;;  %v11553_v51 = vld [vmem:[#allocation16_spill] sm:$0xff] }
 0x305   : > { %v3918_v0 = vpop.f32.mrf.mxu1  ;;  %v4460_v11 = vpop.f32.mrf.mxu0 }
 0x306   : > { %v10975_v1 = vadd.f32 %v3918_v0, %v3266_v3 }
 0x307   : > { %v8055_v57 = vpop.f32.mrf.mxu1  ;;  %v10978_v28 = vpop.f32.mrf.mxu0 }
 0x308   : > { %v4024_v10 = vadd.f32 %v8055_v57, %v10789_v47  ;;  %11550 = vst [vmem:[#allocation30_spill] sm:$0xff] %v10978_v28 }
 0x309   : > { %v3931_v12 = vpop.f32.mrf.mxu1  ;;  %v10988_v54 = vpop.f32.mrf.mxu0 }
 0x30a   : > { %v4022_v41 = vadd.f32 %v3931_v12, %v10796_v55  ;;  %v10981_v5 = vadd.f32 %v8103_v39, %v4024_v10  ;;  %11552 = vst [vmem:[#allocation17_spill] sm:$0xff] %v10988_v54 }
 0x30b   : > { %v8056_v6 = vpop.f32.mrf.mxu1  ;;  %v8115_v55 = vpop.f32.mrf.mxu0 }
 0x30c   : > { %v10984_v61 = vadd.f32 %v8056_v6, %v10804_v43  ;;  %v10990_v35 = vadd.f32 %v4428_v26, %v4022_v41 }
 0x30d   : > { %v3934_v48 = vpop.f32.mrf.mxu1  ;;  %v4476_v19 = vpop.f32.mrf.mxu0 }
 0x30e   : > { %v10992_v47 = vadd.f32 %v3934_v48, %v3270_v50 }
 0x30f   : > { %v8059_v44 = vpop.f32.mrf.mxu1  ;;  %v11007_v50 = vpop.f32.mrf.mxu0 }
 0x310   : > { %v4028_v3 = vadd.f32 %v8059_v44, %v11553_v51  ;;  %11554 = vst [vmem:[#allocation31_spill] sm:$0xff] %v11007_v50 }
 0x311   : > { %v3947_v39 = vpop.f32.mrf.mxu1 }
 0x312   : > { %v4026_v0 = vadd.f32 %v3947_v39, %v10830_v31  ;;  %v10996_v57 = vadd.f32 %v8107_v2, %v4028_v3 }
 0x313   : > { %v8060_v43 = vpop.f32.mrf.mxu1 }
 0x314   : > { %v10999_v10 = vadd.f32 %v8060_v43, %v10835_v33  ;;  %v11001_v12 = vadd.f32 %v4444_v29, %v4026_v0  ;;  %v11015_v29 = vpop.f32.mrf.mxu0 }
 0x315   : > { %v3950_v26 = vpop.f32.mrf.mxu1  ;;  %11556 = vst [vmem:[#allocation19_spill] sm:$0xff] %v11015_v29 }
 0x316   : > { %v11004_v41 = vadd.f32 %v3950_v26, %v10845_v58  ;;  %v8119_v39 = vpop.f32.mrf.mxu0 }
 0x317   : > { %v8063_v6 = vpop.f32.mrf.mxu1 }
 0x318   : > { %v4032_v37 = vadd.f32 %v8063_v6, %v10852_v59 }
 0x319   : > { %v3963_v48 = vpop.f32.mrf.mxu1 }
 0x31a   : > { %v4030_v31 = vadd.f32 %v3963_v48, %v10864_v16  ;;  %v11010_v2 = vadd.f32 %v8111_v30, %v4032_v37 }
 0x31b   : > { %v8064_v44 = vpop.f32.mrf.mxu1 }
 0x31c   : > { %v11013_v33 = vadd.f32 %v8064_v44, %v10870_v15  ;;  %v11017_v51 = vadd.f32 %v4460_v11, %v4030_v31  ;;  %v4492_v15 = vpop.f32.mrf.mxu0 }
 0x31d   : > { %v3966_v58 = vpop.f32.mrf.mxu1 }
 0x31e   : > { %11555 = vst [vmem:[#allocation18_spill] sm:$0xff] %v11013_v33  ;;  %v11020_v3 = vadd.f32 %v3966_v58, %v10879_v17  ;;  %v11034_v48 = vpop.f32.mrf.mxu0 }
 0x31f   : > { %v8067_v59 = vpop.f32.mrf.mxu1  ;;  %11560 = vst [vmem:[#allocation22_spill] sm:$0xff] %v11034_v48 }
 0x320   : > { %11557 = vst [vmem:[#allocation41_spill] sm:$0xff] %v11020_v3  ;;  %v4036_v0 = vadd.f32 %v8067_v59, %v10889_v63  ;;  %v11040_v58 = vpop.f32.mrf.mxu0 }
 0x321   : > { %v3979_v43 = vpop.f32.mrf.mxu1  ;;  %11561 = vst [vmem:[#allocation24_spill] sm:$0xff] %v11040_v58 }
 0x322   : > { %v4034_v16 = vadd.f32 %v3979_v43, %v10895_v20  ;;  %v11024_v30 = vadd.f32 %v8115_v55, %v4036_v0 }
 0x323   : > { %v8068_v26 = vpop.f32.mrf.mxu1 }
 0x324   : > { %v11027_v6 = vadd.f32 %v8068_v26, %v10898_v22  ;;  %v11029_v11 = vadd.f32 %v4476_v19, %v4034_v16  ;;  %v11050_v43 = vpop.f32.mrf.mxu0 }
 0x325   : > { %v3982_v37 = vpop.f32.mrf.mxu1 }
 0x326   : > { %11558 = vst [vmem:[#allocation20_spill] sm:$0xff] %v11027_v6  ;;  %v11032_v17 = vadd.f32 %v3982_v37, %v10904_v27  ;;  %v11058_v26 = vpop.f32.mrf.mxu0 }
 0x327   : > { %v8071_v31 = vpop.f32.mrf.mxu1 }
 0x328   : > { %11559 = vst [vmem:[#allocation21_spill] sm:$0xff] %v11032_v17  ;;  %v4040_v63 = vadd.f32 %v8071_v31, %v10910_v18 }
 0x329   : > { %v3995_v44 = vpop.f32.mrf.mxu1 }
 0x32a   : > { %v4038_v20 = vadd.f32 %v3995_v44, %v10916_v9  ;;  %v11038_v55 = vadd.f32 %v8119_v39, %v4040_v63 }
 0x32b   : > { %v8072_v22 = vpop.f32.mrf.mxu1 }
 0x32c   : > { %v11043_v19 = vadd.f32 %v8072_v22, %v10919_v40  ;;  %v11045_v59 = vadd.f32 %v4492_v15, %v4038_v20  ;;  %v11062_v15 = vpop.f32.mrf.mxu0 }
 0x32d   : > { %v3998_v27 = vpop.f32.mrf.mxu1 }
 0x32e   : > { %11562 = vst [vmem:[#allocation27_spill] sm:$0xff] %v11043_v19  ;;  %v11048_v0 = vadd.f32 %v3998_v27, %v10925_v60 }
 0x32f   : > { %v8139_v18 = vpop.f32.mrf.mxu1 }
 0x330   : > { %11563 = vst [vmem:[#allocation29_spill] sm:$0xff] %v11048_v0  ;;  %v11053_v16 = vadd.f32 %v8139_v18, %v10931_v34  ;;  %v11070_v34 = vpop.f32.mrf.mxu0 }
 0x331   : > { %v4766_v9 = vpop.f32.mrf.mxu1 }
 0x332   : > { %v11056_v39 = vadd.f32 %v4766_v9, %v10939_v38  ;;  %v11076_v22 = vpop.f32.mrf.mxu0 }
 0x333   : > { %v8140_v40 = vpop.f32.mrf.mxu1 }
 0x335   : > { %v11060_v37 = vpop.f32.mrf.mxu1 }
 0x337   : > { %v8143_v31 = vpop.f32.mrf.mxu1 }
 0x338   : > { %v11065_v60 = vadd.f32 %v8143_v31, %v10949_v4  ;;  %v11084_v31 = vpop.f32.mrf.mxu0 }
 0x339   : > { %v4782_v63 = vpop.f32.mrf.mxu1 }
 0x33a   : > { %v11068_v44 = vadd.f32 %v4782_v63, %v10956_v45  ;;  %v11090_v58 = vpop.f32.mrf.mxu0 }
 0x33b   : > { %v11072_v20 = vpop.f32.mrf.mxu1 }
 0x33d   : > { %v11074_v38 = vpop.f32.mrf.mxu1 }
 0x33f   : > { %v8147_v27 = vpop.f32.mrf.mxu1 }
 0x340   : > { %v11079_v18 = vadd.f32 %v8147_v27, %v10966_v21  ;;  %v11098_v27 = vpop.f32.mrf.mxu0 }
 0x341   : > { %v4798_v9 = vpop.f32.mrf.mxu1 }
 0x342   : > { %v11082_v4 = vadd.f32 %v4798_v9, %v10973_v36  ;;  %v11104_v29 = vpop.f32.mrf.mxu0 }
 0x343   : > { %v11086_v45 = vpop.f32.mrf.mxu1 }
 0x345   : > { %v11088_v63 = vpop.f32.mrf.mxu1 }
 0x347   : > { %v8151_v0 = vpop.f32.mrf.mxu1 }
 0x348   : > { %v11093_v48 = vadd.f32 %v8151_v0, %v10981_v5  ;;  %v11112_v0 = vpop.f32.mrf.mxu0 }
 0x349   : > { %v4814_v19 = vpop.f32.mrf.mxu1 }
 0x34a   : > { %v11096_v21 = vadd.f32 %v4814_v19, %v10990_v35  ;;  %v11118_v54 = vpop.f32.mrf.mxu0 }
 0x34b   : > { %v11100_v36 = vpop.f32.mrf.mxu1 }
 0x34d   : > { %v11102_v9 = vpop.f32.mrf.mxu1 }
 0x34f   : > { %v8155_v17 = vpop.f32.mrf.mxu1 }
 0x350   : > { %v11107_v50 = vadd.f32 %v8155_v17, %v10996_v57  ;;  %v11126_v17 = vpop.f32.mrf.mxu0 }
 0x351   : > { %v4830_v6 = vpop.f32.mrf.mxu1 }
 0x352   : > { %11564 = vst [vmem:[#allocation32_spill] sm:$0xff] %v11107_v50  ;;  %v11110_v5 = vadd.f32 %v4830_v6, %v11001_v12 }
 0x353   : > { %v11114_v35 = vpop.f32.mrf.mxu1 }
 0x354   : > { %11565 = vst [vmem:[#allocation34_spill] sm:$0xff] %v11110_v5  ;;  %v11132_v5 = vpop.f32.mrf.mxu0 }
 0x355   : > { %v11116_v19 = vpop.f32.mrf.mxu1 }
 0x356   : > { %11566 = vst [vmem:[#allocation33_spill] sm:$0xff] %v11116_v19 }
 0x357   : > { %v8159_v3 = vpop.f32.mrf.mxu1 }
 0x358   : > { %v11121_v28 = vadd.f32 %v8159_v3, %v11010_v2  ;;  %v11140_v3 = vpop.f32.mrf.mxu0 }
 0x359   : > { %v4846_v33 = vpop.f32.mrf.mxu1 }
 0x35a   : > { %11567 = vst [vmem:[#allocation35_spill] sm:$0xff] %v11121_v28  ;;  %v11124_v57 = vadd.f32 %v4846_v33, %v11017_v51 }
 0x35b   : > { %v11128_v12 = vpop.f32.mrf.mxu1 }
 0x35c   : > { %11568 = vst [vmem:[#allocation36_spill] sm:$0xff] %v11124_v57  ;;  %11569 = vst [vmem:[#allocation38_spill] sm:$0xff] %v11128_v12  ;;  %v11146_v57 = vpop.f32.mrf.mxu0 }
 0x35d   : > { %v11130_v6 = vpop.f32.mrf.mxu1 }
 0x35e   : > { %11570 = vst [vmem:[#allocation40_spill] sm:$0xff] %v11130_v6 }
 0x35f   : > { %v8163_v50 = vpop.f32.mrf.mxu1 }
 0x360   : > { %v11135_v19 = vadd.f32 %v8163_v50, %v11024_v30  ;;  %v11154_v30 = vpop.f32.mrf.mxu0 }
 0x361   : > { %v4862_v32 = vpop.f32.mrf.mxu1 }
 0x362   : > { %11571 = vst [vmem:[#allocation23_spill] sm:$0xff] %v11135_v19  ;;  %v11138_v2 = vadd.f32 %v4862_v32, %v11029_v11  ;;  %v4510_v11 = vadd.f32 %v10876_v46, %v10934_v23  ;;  %v4508_v19 = vadd.f32 %v10886_v62, %v10941_v13  ;;  %v11174_v46 = vld [vmem:[%s11427_s4] ss:$0 sm:$0xff]  ;;  %v4514_v13 = vadd.f32 %v10901_v49, %v10952_v52 }
 0x363   : > { %v11142_v33 = vpop.f32.mrf.mxu1  ;;  %v5652_v49 = vadd.f32 %v11076_v22, %v11065_v60 }
 0x364   : > { %11572 = vst [vmem:[#allocation39_spill] sm:$0xff] %v11138_v2 }
 0x365   : > { %v11144_v51 = vpop.f32.mrf.mxu1 }
 0x366   : > { %11573 = vst [vmem:[#allocation42_spill] sm:$0xff] %v11144_v51  ;;  %v4896_v51 = vadd.f32 %v8140_v40, %v4510_v11  ;;  %v4512_v11 = vadd.f32 %v10907_v8, %v10958_v25 }
 0x367   : > { %v8167_v28 = vpop.f32.mrf.mxu1 }
 0x368   : > { %v11149_v6 = vadd.f32 %v8167_v28, %v11038_v55  ;;  %v5648_v28 = vadd.f32 %v11050_v43, %v11053_v16  ;;  %v11166_v55 = vpop.f32.mrf.mxu0  ;;  %v5649_v62 = vadd.f32 %v11062_v15, %v4896_v51  ;;  %v4898_v52 = vadd.f32 %v11074_v38, %v4512_v11 }
 0x369   : > { %v4878_v12 = vpop.f32.mrf.mxu1  ;;  %v4518_v38 = vadd.f32 %v10922_v24, %v10969_v53  ;;  %v5656_v53 = vadd.f32 %v11104_v29, %v11079_v18 }
 0x36a   : > { %11574 = vst [vmem:[#allocation28_spill] sm:$0xff] %v11149_v6  ;;  %v11152_v50 = vadd.f32 %v4878_v12, %v11045_v59  ;;  %v4894_v12 = vadd.f32 %v11060_v37, %v4508_v19  ;;  %v5646_v6 = vadd.f32 %v11058_v26, %v11056_v39  ;;  %v11179_v43 = vpop.f32.mrf.mxu0  ;;  %v4900_v26 = vadd.f32 %v11072_v20, %v4514_v13 }
 0x36b   : > { %v11156_v32 = vpop.f32.mrf.mxu1  ;;  %v4904_v11 = vadd.f32 %v11086_v45, %v4518_v38  ;;  %v5654_v45 = vadd.f32 %v11112_v0, %v11082_v4 }
 0x36c   : > { %11575 = vst [vmem:[#allocation45_spill] sm:$0xff] %v11152_v50  ;;  %v5647_v39 = vadd.f32 %v11070_v34, %v4894_v12  ;;  %v5650_v34 = vadd.f32 %v11084_v31, %v11068_v44 }
 0x36d   : > { %v11160_v2 = vpop.f32.mrf.mxu1 }
 0x36f   : > { %v8235_v59 = vpop.f32.mrf.mxu1 }
 0x370   : > { %v6145_v50 = vadd.f32 %v8235_v59, %v5648_v28 }
 0x371   : > { %v6016_v23 = vpop.f32.mrf.mxu1 }
 0x372   : > { %v6143_v40 = vadd.f32 %v6016_v23, %v5646_v6  ;;  %v6184_v37 = vadd.f32 %v11174_v46, %v6145_v50  ;;  %v11191_v50 = vpop.f32.mrf.mxu0 }
 0x373   : > { %v8236_v16 = vpop.f32.mrf.mxu1 }
 0x374   : > { %v6146_v19 = vadd.f32 %v8236_v16, %v5649_v62  ;;  %v6182_v6 = vadd.f32 %v11174_v46, %v6143_v40  ;;  %v6216_v20 = vmax.f32 %v6184_v37, 0.0  ;;  %v5653_v40 = vadd.f32 %v11090_v58, %v4900_v26  ;;  %v11199_v22 = vpop.f32.mrf.mxu0 }
 0x375   : > { %v6019_v28 = vpop.f32.mrf.mxu1  ;;  %v5651_v37 = vadd.f32 %v11098_v27, %v4898_v52  ;;  %v4516_v58 = vadd.f32 %v10928_v7, %v10975_v1 }
 0x376   : > { %v6185_v15 = vadd.f32 %v11174_v46, %v6146_v19  ;;  %v6144_v51 = vadd.f32 %v6019_v28, %v5647_v39  ;;  %v6214_v62 = vmax.f32 %v6182_v6, 0.0 }
 0x377   : > { %v8239_v59 = vpop.f32.mrf.mxu1 }
 0x378   : > { %v6217_v12 = vmax.f32 %v6185_v15, 0.0  ;;  %v6183_v8 = vadd.f32 %v11174_v46, %v6144_v51  ;;  %v6149_v25 = vadd.f32 %v8239_v59, %v5652_v49  ;;  %v4902_v15 = vadd.f32 %v11088_v63, %v4516_v58  ;;  %v11211_v51 = vpop.f32.mrf.mxu0 }
 0x379   : > { %v6032_v23 = vpop.f32.mrf.mxu1  ;;  %v4522_v63 = vadd.f32 %v10944_v42, %v10984_v61  ;;  %v5660_v61 = vadd.f32 %v11132_v5, %v11093_v48 }
 0x37a   : > { %v6247_v13 = vpack.c.bf16 %v6217_v12, %v6216_v20  ;;  %v6215_v16 = vmax.f32 %v6183_v8, 0.0  ;;  %v6147_v60 = vadd.f32 %v6032_v23, %v5650_v34  ;;  %v6188_v44 = vadd.f32 %v11174_v46, %v6149_v25  ;;  %v11219_v8 = vpop.f32.mrf.mxu0 }
 0x37b   : > { %v8240_v19 = vpop.f32.mrf.mxu1  ;;  %v5657_v34 = vadd.f32 %v11118_v54, %v4904_v11  ;;  %v5655_v23 = vadd.f32 %v11126_v17, %v4902_v15  ;;  %v4520_v54 = vadd.f32 %v10947_v14, %v10992_v47 }
 0x37c   : > { %v6150_v31 = vadd.f32 %v8240_v19, %v5653_v40  ;;  %v6246_v39 = vpack.c.bf16 %v6215_v16, %v6214_v62  ;;  %v6186_v28 = vadd.f32 %v11174_v46, %v6147_v60  ;;  %v6220_v7 = vmax.f32 %v6188_v44, 0.0  ;;  %v11231_v19 = vpop.f32.mrf.mxu0 }
 0x37d   : > { %v6035_v26 = vpop.f32.mrf.mxu1  ;;  %v4908_v62 = vadd.f32 %v11100_v36, %v4522_v63  ;;  %v4906_v38 = vadd.f32 %v11102_v9, %v4520_v54  ;;  %v5658_v36 = vadd.f32 %v11140_v3, %v11096_v21  ;;  %v4526_v9 = vadd.f32 %v10961_v56, %v10999_v10  ;;  %v11577_v10 = vld [vmem:[#allocation32_spill] sm:$0xff] }
 0x37e   : > { %v6189_v6 = vadd.f32 %v11174_v46, %v6150_v31  ;;  %v6148_v24 = vadd.f32 %v6035_v26, %v5651_v37  ;;  %8281 = vmatprep.mubr.bf16.mxu0 %v6246_v39  ;;  %v6218_v20 = vmax.f32 %v6186_v28, 0.0  ;;  %v11239_v26 = vpop.f32.mrf.mxu0 }
 0x37f   : > { %v8243_v27 = vpop.f32.mrf.mxu1  ;;  %8282 = vmatmul.mubr.bf16.vlgmr.msra.gmra.mxu0 %v6247_v13  ;;  %v5661_v39 = vadd.f32 %v11146_v57, %v4908_v62  ;;  %v11576_v57 = vld [vmem:[#allocation26_spill] sm:$0xff] }
 0x380   : > { %v6221_v1 = vmax.f32 %v6189_v6, 0.0  ;;  %v6187_v49 = vadd.f32 %v11174_v46, %v6148_v24  ;;  %v6153_v52 = vadd.f32 %v8243_v27, %v5656_v53  ;;  %v5659_v6 = vadd.f32 %v11154_v30, %v4906_v38  ;;  %v11581_v62 = vld [vmem:[#allocation30_spill] sm:$0xff] }
 0x381   : > { %v6048_v59 = vpop.f32.mrf.mxu1  ;;  %v4912_v53 = vadd.f32 %v11114_v35, %v4526_v9  ;;  %v4524_v15 = vadd.f32 %v11576_v57, %v11004_v41 }
 0x382   : > { %v6249_v12 = vpack.c.bf16 %v6221_v1, %v6220_v7  ;;  %v6219_v29 = vmax.f32 %v6187_v49, 0.0  ;;  %v6151_v18 = vadd.f32 %v6048_v59, %v5654_v45  ;;  %v6192_v4 = vadd.f32 %v11174_v46, %v6153_v52  ;;  %v11578_v49 = vld [vmem:[#allocation33_spill] sm:$0xff]  ;;  %v8211_v59 = vpop.f32.mrf.mxu0 }
 0x383   : > { %v8244_v25 = vpop.f32.mrf.mxu1  ;;  %v5664_v1 = vadd.f32 %v11166_v55, %v11577_v10  ;;  %v4910_v52 = vadd.f32 %v11578_v49, %v4524_v15  ;;  %v5665_v63 = vadd.f32 %v11191_v50, %v4912_v53 }
 0x384   : > { %v6154_v0 = vadd.f32 %v8244_v25, %v5657_v34  ;;  %v6248_v40 = vpack.c.bf16 %v6219_v29, %v6218_v20  ;;  %v6190_v16 = vadd.f32 %v11174_v46, %v6151_v18  ;;  %v6224_v14 = vmax.f32 %v6192_v4, 0.0  ;;  %v11579_v34 = vld [vmem:[#allocation34_spill] sm:$0xff] }
 0x385   : > { %v6051_v13 = vpop.f32.mrf.mxu1  ;;  %v5662_v35 = vadd.f32 %v11179_v43, %v11579_v34 }
 0x386   : > { %v6193_v60 = vadd.f32 %v11174_v46, %v6154_v0  ;;  %v6152_v42 = vadd.f32 %v6051_v13, %v5655_v23  ;;  %8285 = vmatprep.mubr.bf16.mxu0 %v6248_v40  ;;  %v6222_v11 = vmax.f32 %v6190_v16, 0.0  ;;  %v5615_v23 = vpop.f32.mrf.mxu0  ;;  %v11580_v40 = vld [vmem:[#allocation18_spill] sm:$0xff] }
 0x387   : > { %v8247_v17 = vpop.f32.mrf.mxu1  ;;  %8286 = vmatmul.mubr.bf16.gmra.mxu0 %v6249_v12  ;;  %v4530_v54 = vadd.f32 %v11581_v62, %v11580_v40 }
 0x388   : > { %v6225_v47 = vmax.f32 %v6193_v60, 0.0  ;;  %v6191_v44 = vadd.f32 %v11174_v46, %v6152_v42  ;;  %v6157_v31 = vadd.f32 %v8247_v17, %v5660_v61  ;;  %v5663_v60 = vadd.f32 %v11199_v22, %v4910_v52  ;;  %v11582_v61 = vld [vmem:[#allocation38_spill] sm:$0xff]  ;;  %v11583_v17 = vld [vmem:[#allocation41_spill] sm:$0xff] }
 0x389   : > { %v6064_v37 = vpop.f32.mrf.mxu1  ;;  %v4916_v38 = vadd.f32 %v11582_v61, %v4530_v54 }
 0x38a   : > { %v6251_v58 = vpack.c.bf16 %v6225_v47, %v6224_v14  ;;  %v6223_v48 = vmax.f32 %v6191_v44, 0.0  ;;  %v6155_v5 = vadd.f32 %v6064_v37, %v5658_v36  ;;  %v6196_v21 = vadd.f32 %v11174_v46, %v6157_v31  ;;  %v11584_v36 = vld [vmem:[#allocation17_spill] sm:$0xff]  ;;  %v11585_v37 = vld [vmem:[#allocation35_spill] sm:$0xff] }
 0x38b   : > { %v8248_v28 = vpop.f32.mrf.mxu1  ;;  %v4528_v50 = vadd.f32 %v11584_v36, %v11583_v17  ;;  %v5669_v53 = vadd.f32 %v11231_v19, %v4916_v38 }
 0x38c   : > { %v6158_v3 = vadd.f32 %v8248_v28, %v5661_v39  ;;  %v6250_v24 = vpack.c.bf16 %v6223_v48, %v6222_v11  ;;  %v6194_v45 = vadd.f32 %v11174_v46, %v6155_v5  ;;  %v6228_v20 = vmax.f32 %v6196_v21, 0.0  ;;  %v8212_v11 = vpop.f32.mrf.mxu0  ;;  %v11587_v5 = vld [vmem:[#allocation36_spill] sm:$0xff] }
 0x38d   : > { %v6067_v27 = vpop.f32.mrf.mxu1  ;;  %v5668_v39 = vadd.f32 %v11211_v51, %v11585_v37  ;;  %v5666_v9 = vadd.f32 %v11219_v8, %v11587_v5 }
 0x38e   : > { %v6197_v7 = vadd.f32 %v11174_v46, %v6158_v3  ;;  %v6156_v56 = vadd.f32 %v6067_v27, %v5659_v6  ;;  %8289 = vmatprep.mubr.bf16.mxu0 %v6250_v24  ;;  %v6226_v25 = vmax.f32 %v6194_v45, 0.0  ;;  %v5618_v45 = vpop.f32.mrf.mxu0 }
 0x38f   : > { %v8251_v30 = vpop.f32.mrf.mxu1  ;;  %8290 = vmatmul.mubr.bf16.gmra.mxu0 %v6251_v58  ;;  %v11586_v58 = vld [vmem:[#allocation40_spill] sm:$0xff] }
 0x390   : > { %v6229_v41 = vmax.f32 %v6197_v7, 0.0  ;;  %v6195_v12 = vadd.f32 %v11174_v46, %v6156_v56  ;;  %v6161_v29 = vadd.f32 %v8251_v30, %v5664_v1  ;;  %v4914_v48 = vadd.f32 %v11586_v58, %v4528_v50  ;;  %v11588_v7 = vld [vmem:[#allocation20_spill] sm:$0xff]  ;;  %v11589_v56 = vld [vmem:[#allocation31_spill] sm:$0xff]  ;;  %v11597_v58 = vld [vmem:[#allocation29_spill] sm:$0xff] }
 0x391   : > { %v6080_v18 = vpop.f32.mrf.mxu1  ;;  %v4534_v10 = vadd.f32 %v11589_v56, %v11588_v7  ;;  %v11595_v50 = vld [vmem:[#allocation27_spill] sm:$0xff] }
 0x392   : > { %v6253_v4 = vpack.c.bf16 %v6229_v41, %v6228_v20  ;;  %v6227_v0 = vmax.f32 %v6195_v12, 0.0  ;;  %v6159_v55 = vadd.f32 %v6080_v18, %v5662_v35  ;;  %v6200_v16 = vadd.f32 %v11174_v46, %v6161_v29  ;;  %v11590_v35 = vld [vmem:[#allocation21_spill] sm:$0xff]  ;;  %v11591_v20 = vld [vmem:[#allocation19_spill] sm:$0xff]  ;;  %v8215_v41 = vpop.f32.mrf.mxu0 }
 0x393   : > { %v8252_v13 = vpop.f32.mrf.mxu1  ;;  %v5667_v52 = vadd.f32 %v11239_v26, %v4914_v48  ;;  %v4920_v34 = vadd.f32 %v11142_v33, %v4534_v10  ;;  %v4532_v19 = vadd.f32 %v11591_v20, %v11590_v35  ;;  %v11594_v26 = vld [vmem:[#allocation39_spill] sm:$0xff]  ;;  %v11598_v48 = vld [vmem:[#allocation24_spill] sm:$0xff] }
 0x394   : > { %v6162_v43 = vadd.f32 %v8252_v13, %v5665_v63  ;;  %v6252_v42 = vpack.c.bf16 %v6227_v0, %v6226_v25  ;;  %v6198_v47 = vadd.f32 %v11174_v46, %v6159_v55  ;;  %v6232_v28 = vmax.f32 %v6200_v16, 0.0  ;;  %v11592_v25 = vld [vmem:[#allocation23_spill] sm:$0xff]  ;;  %v11593_v0 = vld [vmem:[#allocation42_spill] sm:$0xff] }
 0x395   : > { %v6083_v14 = vpop.f32.mrf.mxu1  ;;  %v4918_v55 = vadd.f32 %v11593_v0, %v4532_v19  ;;  %v5670_v62 = vadd.f32 %v5615_v23, %v11594_v26  ;;  %v7491_v26 = vld [vmem:[%s8954_s12 + $0x8] sm:$0xff]  }
 0x396   : > { %v6201_v44 = vadd.f32 %v11174_v46, %v6162_v43  ;;  %v6160_v31 = vadd.f32 %v6083_v14, %v5663_v60  ;;  %8293 = vmatprep.mubr.bf16.mxu0 %v6252_v42  ;;  %v6230_v57 = vmax.f32 %v6198_v47, 0.0  ;;  %v5631_v43 = vpop.f32.mrf.mxu0  ;;  %v5673_v42 = vadd.f32 %v8212_v11, %v4920_v34 }
 0x397   : > { %v8255_v22 = vpop.f32.mrf.mxu1  ;;  %8294 = vmatmul.mubr.bf16.gmra.mxu0 %v6253_v4  ;;  %v5672_v4 = vadd.f32 %v8211_v59, %v11592_v25  ;;  %v11596_v59 = vld [vmem:[#allocation22_spill] sm:$0xff]  ;;  %v5671_v23 = vadd.f32 %v5618_v45, %v4918_v55 }
 0x398   : > { %v6233_v21 = vmax.f32 %v6201_v44, 0.0  ;;  %v6199_v3 = vadd.f32 %v11174_v46, %v6160_v31  ;;  %v6165_v6 = vadd.f32 %v8255_v22, %v5668_v39  ;;  %v4538_v14 = vadd.f32 %v11596_v59, %v11595_v50  ;;  %v8216_v5 = vpop.f32.mrf.mxu0  ;;  %v7493_v50 = vld [vmem:[%s8954_s12 + $0x18] sm:$0xff]  }
 0x399   : > { %v6096_v24 = vpop.f32.mrf.mxu1  ;;  %v4536_v22 = vadd.f32 %v11598_v48, %v11597_v58 }
 0x39a   : > { %v6255_v15 = vpack.c.bf16 %v6233_v21, %v6232_v28  ;;  %v6231_v27 = vmax.f32 %v6199_v3, 0.0  ;;  %v6163_v51 = vadd.f32 %v6096_v24, %v5666_v9  ;;  %v6204_v49 = vadd.f32 %v11174_v46, %v6165_v6  ;;  %v11599_v9 = vld [vmem:[#allocation28_spill] sm:$0xff]  ;;  %v11600_v24 = vld [vmem:[#allocation45_spill] sm:$0xff]  ;;  %v5634_v56 = vpop.f32.mrf.mxu0 }
 0x39b   : > { %v8256_v1 = vpop.f32.mrf.mxu1  ;;  %v4924_v39 = vadd.f32 %v11156_v32, %v4538_v14  ;;  %v5676_v28 = vadd.f32 %v8215_v41, %v11599_v9  ;;  %v7362_v9 = vunpack.c.h.bf16 %v7493_v50 }
 0x39c   : > { %v6166_v8 = vadd.f32 %v8256_v1, %v5669_v53  ;;  %v6254_v30 = vpack.c.bf16 %v6231_v27, %v6230_v57  ;;  %v6202_v29 = vadd.f32 %v11174_v46, %v6163_v51  ;;  %v6236_v33 = vmax.f32 %v6204_v49, 0.0 }
 0x39d   : > { %v6099_v12 = vpop.f32.mrf.mxu1  ;;  %v5674_v53 = vadd.f32 %v5631_v43, %v11600_v24  ;;  %v4922_v57 = vadd.f32 %v11160_v2, %v4536_v22  ;;  %v5677_v7 = vadd.f32 %v8216_v5, %v4924_v39 }
 0x39e   : > { %v6205_v18 = vadd.f32 %v11174_v46, %v6166_v8  ;;  %v6164_v63 = vadd.f32 %v6099_v12, %v5667_v52  ;;  %8297 = vmatprep.mubr.bf16.mxu0 %v6254_v30  ;;  %v6234_v61 = vmax.f32 %v6202_v29, 0.0 }
 0x39f   : > { %v8259_v40 = vpop.f32.mrf.mxu1  ;;  %8298 = vmatmul.mubr.bf16.gmra.mxu0 %v6255_v15  ;;  %v5675_v34 = vadd.f32 %v5634_v56, %v4922_v57 }
 0x3a0   : > { %v6237_v54 = vmax.f32 %v6205_v18, 0.0  ;;  %v6203_v13 = vadd.f32 %v11174_v46, %v6164_v63  ;;  %v6169_v16 = vadd.f32 %v8259_v40, %v5672_v4 }
 0x3a1   : > { %v6112_v60 = vpop.f32.mrf.mxu1 }
 0x3a2   : > { %v6257_v38 = vpack.c.bf16 %v6237_v54, %v6236_v33  ;;  %v6235_v17 = vmax.f32 %v6203_v13, 0.0  ;;  %v6167_v36 = vadd.f32 %v6112_v60, %v5670_v62  ;;  %v6208_v44 = vadd.f32 %v11174_v46, %v6169_v16  ;;  %v11304_v62 = vld [vmem:[%s11429_s6] ss:$0 sm:$0xff]  ;;  %v7348_v54 = vld [vmem:[%s8954_s12] sm:$0xff]  }
 0x3a3   : > { %v8260_v47 = vpop.f32.mrf.mxu1  ;;  %v7353_v13 = vunpack.c.l.bf16 %v7491_v26  ;;  %v7349_v43 = vunpack.c.l.bf16 %v7348_v54 }
 0x3a4   : > { %v6170_v31 = vadd.f32 %v8260_v47, %v5673_v42  ;;  %v6256_v37 = vpack.c.bf16 %v6235_v17, %v6234_v61  ;;  %v6206_v21 = vadd.f32 %v11174_v46, %v6167_v36  ;;  %v6240_v32 = vmax.f32 %v6208_v44, 0.0 }
 0x3a5   : > { %v6115_v11 = vpop.f32.mrf.mxu1  ;;  %v7354_v42 = vunpack.c.h.bf16 %v7491_v26  ;;  %v7350_v36 = vunpack.c.h.bf16 %v7348_v54 }
 0x3a6   : > { %v6209_v3 = vadd.f32 %v11174_v46, %v6170_v31  ;;  %v6168_v6 = vadd.f32 %v6115_v11, %v5671_v23  ;;  %8301 = vmatprep.mubr.bf16.mxu0 %v6256_v37  ;;  %v6238_v1 = vmax.f32 %v6206_v21, 0.0  ;;  %v7492_v31 = vld [vmem:[%s8954_s12 + $0x10] sm:$0xff]   ;;  %v7361_v23 = vunpack.c.l.bf16 %v7493_v50 }
 0x3a7   : > { %v8263_v15 = vpop.f32.mrf.mxu1  ;;  %8302 = vmatmul.mubr.bf16.gmra.mxu0 %v6257_v38  ;;  %v7357_v5 = vunpack.c.l.bf16 %v7492_v31 }
 0x3a8   : > { %v6241_v27 = vmax.f32 %v6209_v3, 0.0  ;;  %v6207_v51 = vadd.f32 %v11174_v46, %v6168_v6  ;;  %v6173_v45 = vadd.f32 %v8263_v15, %v5676_v28 }
 0x3a9   : > { %v6128_v10 = vpop.f32.mrf.mxu1 }
 0x3aa   : > { %v6259_v49 = vpack.c.bf16 %v6241_v27, %v6240_v32  ;;  %v6239_v8 = vmax.f32 %v6207_v51, 0.0  ;;  %v6171_v52 = vadd.f32 %v6128_v10, %v5674_v53  ;;  %v6212_v35 = vadd.f32 %v11174_v46, %v6173_v45  ;;  %v7495_v27 = vld [vmem:[%s8954_s12 + $0x28] sm:$0xff]   ;;  %v7494_v10 = vld [vmem:[%s8954_s12 + $0x20] sm:$0xff]  }
 0x3ab   : > { %v8264_v30 = vpop.f32.mrf.mxu1  ;;  %v7358_v32 = vunpack.c.h.bf16 %v7492_v31 }
 0x3ac   : > { %v6174_v20 = vadd.f32 %v8264_v30, %v5677_v7  ;;  %v6258_v2 = vpack.c.bf16 %v6239_v8, %v6238_v1  ;;  %v6210_v41 = vadd.f32 %v11174_v46, %v6171_v52  ;;  %v6244_v18 = vmax.f32 %v6212_v35, 0.0 }
 0x3ad   : > { %v6131_v19 = vpop.f32.mrf.mxu1  ;;  %v7369_v1 = vunpack.c.l.bf16 %v7495_v27  ;;  %v7365_v35 = vunpack.c.l.bf16 %v7494_v10 }
 0x3ae   : > { %v6213_v12 = vadd.f32 %v11174_v46, %v6174_v20  ;;  %v6172_v29 = vadd.f32 %v6131_v19, %v5675_v34  ;;  %8305 = vmatprep.mubr.bf16.mxu0 %v6258_v2  ;;  %v6242_v4 = vmax.f32 %v6210_v41, 0.0  ;;  %v7370_v2 = vunpack.c.h.bf16 %v7495_v27 }
 0x3af   : > { %8306 = vmatmul.mubr.bf16.gmra.mxu0 %v6259_v49 }
 0x3b0   : > { %v6245_v63 = vmax.f32 %v6213_v12, 0.0  ;;  %v6211_v25 = vadd.f32 %v11174_v46, %v6172_v29 }
 0x3b2   : > { %v6261_v0 = vpack.c.bf16 %v6245_v63, %v6244_v18  ;;  %v6243_v55 = vmax.f32 %v6211_v25, 0.0 }
 0x3b4   : > { %v6260_v40 = vpack.c.bf16 %v6243_v55, %v6242_v4  ;;  %v7497_v55 = vld [vmem:[%s8954_s12 + $0x38] sm:$0xff]  }
 0x3b6   : > { %8309 = vmatprep.mubr.bf16.mxu0 %v6260_v40 }
 0x3b7   : > { %8310 = vmatmul.mubr.bf16.gmra.mxu0 %v6261_v0  ;;  %v7366_v0 = vunpack.c.h.bf16 %v7494_v10 }
 0x43f   : > { %v8283_v33 = vpop.f32.mrf.mxu0 }
 0x440   : > { %v6440_v16 = vadd.f32 %v8283_v33, %v11304_v62 }
 0x441   : > { %v6431_v46 = vpop.f32.mrf.mxu0 }
 0x442   : > { %v6432_v60 = vadd.f32 %v11304_v62, %v6431_v46  ;;  %v6560_v38 = vadd.f32 %v7353_v13, %v6440_v16  ;;  %v7496_v13 = vld [vmem:[%s8954_s12 + $0x30] sm:$0xff]   ;;  %v7377_v16 = vunpack.c.l.bf16 %v7497_v55 }
 0x443   : > { %v8284_v61 = vpop.f32.mrf.mxu0 }
 0x444   : > { %v6443_v17 = vadd.f32 %v8284_v61, %v11304_v62  ;;  %v6558_v14 = vadd.f32 %v7349_v43, %v6432_v60  ;;  %v6592_v39 = vmax.f32 %v6560_v38, 0.0  ;;  %v7373_v38 = vunpack.c.l.bf16 %v7496_v13 }
 0x445   : > { %v6434_v59 = vpop.f32.mrf.mxu0 }
 0x446   : > { %v6561_v47 = vadd.f32 %v7354_v42, %v6443_v17  ;;  %v6435_v44 = vadd.f32 %v11304_v62, %v6434_v59  ;;  %v6590_v28 = vmax.f32 %v6558_v14, 0.0 }
 0x447   : > { %v8287_v37 = vpop.f32.mrf.mxu0 }
 0x448   : > { %v6593_v58 = vmax.f32 %v6561_v47, 0.0  ;;  %v6559_v48 = vadd.f32 %v7350_v36, %v6435_v44  ;;  %v6456_v22 = vadd.f32 %v8287_v37, %v11304_v62  ;;  %v7378_v36 = vunpack.c.h.bf16 %v7497_v55 }
 0x449   : > { %v6447_v11 = vpop.f32.mrf.mxu0 }
 0x44a   : > { %v7419_v21 = vpack.c.bf16 %v6593_v58, %v6592_v39  ;;  %v6591_v3 = vmax.f32 %v6559_v48, 0.0  ;;  %v6448_v6 = vadd.f32 %v11304_v62, %v6447_v11  ;;  %v6564_v57 = vadd.f32 %v7361_v23, %v6456_v22  ;;  %v7499_v58 = vld [vmem:[%s8954_s12 + $0x48] sm:$0xff]  }
 0x44b   : > { %v8288_v24 = vpop.f32.mrf.mxu0  ;;  %v7374_v39 = vunpack.c.h.bf16 %v7496_v13 }
 0x44c   : > { %7506 = vst [vmem:[%s11317_s22 + $0x8] sm:$0xff] %v7419_v21   ;;  %v7414_v53 = vpack.c.bf16 %v6591_v3, %v6590_v28  ;;  %v6459_v15 = vadd.f32 %v8288_v24, %v11304_v62  ;;  %v6562_v45 = vadd.f32 %v7357_v5, %v6448_v6  ;;  %v6596_v8 = vmax.f32 %v6564_v57, 0.0 }
 0x44d   : > { %v6450_v51 = vpop.f32.mrf.mxu0  ;;  %v7385_v28 = vunpack.c.l.bf16 %v7499_v58 }
 0x44e   : > { %7415 = vst [vmem:[%s11317_s22] sm:$0xff] %v7414_v53   ;;  %v6565_v7 = vadd.f32 %v7362_v9, %v6459_v15  ;;  %v6451_v56 = vadd.f32 %v11304_v62, %v6450_v51  ;;  %v6594_v19 = vmax.f32 %v6562_v45, 0.0  ;;  %v7498_v9 = vld [vmem:[%s8954_s12 + $0x40] sm:$0xff]  }
 0x44f   : > { %v8291_v49 = vpop.f32.mrf.mxu0  ;;  %v7381_v57 = vunpack.c.l.bf16 %v7498_v9 }
 0x450   : > { %v6597_v52 = vmax.f32 %v6565_v7, 0.0  ;;  %v6563_v30 = vadd.f32 %v7358_v32, %v6451_v56  ;;  %v6472_v34 = vadd.f32 %v8291_v49, %v11304_v62  ;;  %v7386_v32 = vunpack.c.h.bf16 %v7499_v58 }
 0x451   : > { %v6463_v20 = vpop.f32.mrf.mxu0 }
 0x452   : > { %v7429_v41 = vpack.c.bf16 %v6597_v52, %v6596_v8  ;;  %v6595_v12 = vmax.f32 %v6563_v30, 0.0  ;;  %v6464_v29 = vadd.f32 %v11304_v62, %v6463_v20  ;;  %v6568_v25 = vadd.f32 %v7369_v1, %v6472_v34  ;;  %v7501_v52 = vld [vmem:[%s8954_s12 + $0x58] sm:$0xff]  }
 0x453   : > { %v8292_v18 = vpop.f32.mrf.mxu0  ;;  %v7382_v8 = vunpack.c.h.bf16 %v7498_v9 }
 0x454   : > { %7508 = vst [vmem:[%s11317_s22 + $0x18] sm:$0xff] %v7429_v41   ;;  %v7424_v63 = vpack.c.bf16 %v6595_v12, %v6594_v19  ;;  %v6475_v4 = vadd.f32 %v8292_v18, %v11304_v62  ;;  %v6566_v26 = vadd.f32 %v7365_v35, %v6464_v29  ;;  %v6600_v43 = vmax.f32 %v6568_v25, 0.0 }
 0x455   : > { %v6466_v40 = vpop.f32.mrf.mxu0  ;;  %v7393_v19 = vunpack.c.l.bf16 %v7501_v52 }
 0x456   : > { %7507 = vst [vmem:[%s11317_s22 + $0x10] sm:$0xff] %v7424_v63   ;;  %v6569_v33 = vadd.f32 %v7370_v2, %v6475_v4  ;;  %v6467_v54 = vadd.f32 %v11304_v62, %v6466_v40  ;;  %v6598_v50 = vmax.f32 %v6566_v26, 0.0  ;;  %v7500_v2 = vld [vmem:[%s8954_s12 + $0x50] sm:$0xff]  }
 0x457   : > { %v8295_v46 = vpop.f32.mrf.mxu0  ;;  %v7389_v25 = vunpack.c.l.bf16 %v7500_v2 }
 0x458   : > { %v6601_v60 = vmax.f32 %v6569_v33, 0.0  ;;  %v6567_v42 = vadd.f32 %v7366_v0, %v6467_v54  ;;  %v6488_v61 = vadd.f32 %v8295_v46, %v11304_v62  ;;  %v7394_v0 = vunpack.c.h.bf16 %v7501_v52 }
 0x459   : > { %v6479_v17 = vpop.f32.mrf.mxu0 }
 0x45a   : > { %v7439_v59 = vpack.c.bf16 %v6601_v60, %v6600_v43  ;;  %v6599_v14 = vmax.f32 %v6567_v42, 0.0  ;;  %v6480_v47 = vadd.f32 %v11304_v62, %v6479_v17  ;;  %v6572_v23 = vadd.f32 %v7377_v16, %v6488_v61  ;;  %v7503_v60 = vld [vmem:[%s8954_s12 + $0x68] sm:$0xff]  }
 0x45b   : > { %v8296_v44 = vpop.f32.mrf.mxu0  ;;  %v7390_v43 = vunpack.c.h.bf16 %v7500_v2 }
 0x45c   : > { %7510 = vst [vmem:[%s11317_s22 + $0x28] sm:$0xff] %v7439_v59   ;;  %v7434_v31 = vpack.c.bf16 %v6599_v14, %v6598_v50  ;;  %v6491_v37 = vadd.f32 %v8296_v44, %v11304_v62  ;;  %v6570_v22 = vadd.f32 %v7373_v38, %v6480_v47  ;;  %v6604_v3 = vmax.f32 %v6572_v23, 0.0 }
 0x45d   : > { %v6482_v48 = vpop.f32.mrf.mxu0  ;;  %v7401_v50 = vunpack.c.l.bf16 %v7503_v60 }
 0x45e   : > { %7509 = vst [vmem:[%s11317_s22 + $0x20] sm:$0xff] %v7434_v31   ;;  %v6573_v5 = vadd.f32 %v7378_v36, %v6491_v37  ;;  %v6483_v11 = vadd.f32 %v11304_v62, %v6482_v48  ;;  %v6602_v27 = vmax.f32 %v6570_v22, 0.0  ;;  %v7502_v36 = vld [vmem:[%s8954_s12 + $0x60] sm:$0xff]  }
 0x45f   : > { %v8299_v21 = vpop.f32.mrf.mxu0  ;;  %v7397_v23 = vunpack.c.l.bf16 %v7502_v36 }
 0x460   : > { %v6605_v6 = vmax.f32 %v6573_v5, 0.0  ;;  %v6571_v24 = vadd.f32 %v7374_v39, %v6483_v11  ;;  %v6504_v53 = vadd.f32 %v8299_v21, %v11304_v62  ;;  %v7402_v39 = vunpack.c.h.bf16 %v7503_v60 }
 0x461   : > { %v6495_v15 = vpop.f32.mrf.mxu0 }
 0x462   : > { %v7449_v51 = vpack.c.bf16 %v6605_v6, %v6604_v3  ;;  %v6603_v45 = vmax.f32 %v6571_v24, 0.0  ;;  %v6496_v7 = vadd.f32 %v11304_v62, %v6495_v15  ;;  %v6576_v1 = vadd.f32 %v7385_v28, %v6504_v53  ;;  %v7505_v6 = vld [vmem:[%s8954_s12 + $0x78] sm:$0xff]  }
 0x463   : > { %v8300_v56 = vpop.f32.mrf.mxu0  ;;  %v7398_v3 = vunpack.c.h.bf16 %v7502_v36 }
 0x464   : > { %7512 = vst [vmem:[%s11317_s22 + $0x38] sm:$0xff] %v7449_v51   ;;  %v7444_v10 = vpack.c.bf16 %v6603_v45, %v6602_v27  ;;  %v6507_v49 = vadd.f32 %v8300_v56, %v11304_v62  ;;  %v6574_v34 = vadd.f32 %v7381_v57, %v6496_v7  ;;  %v6608_v12 = vmax.f32 %v6576_v1, 0.0 }
 0x465   : > { %v6498_v30 = vpop.f32.mrf.mxu0  ;;  %v7409_v27 = vunpack.c.l.bf16 %v7505_v6 }
 0x466   : > { %7511 = vst [vmem:[%s11317_s22 + $0x30] sm:$0xff] %v7444_v10   ;;  %v6577_v35 = vadd.f32 %v7386_v32, %v6507_v49  ;;  %v6499_v20 = vadd.f32 %v11304_v62, %v6498_v30  ;;  %v6606_v55 = vmax.f32 %v6574_v34, 0.0  ;;  %v7504_v32 = vld [vmem:[%s8954_s12 + $0x70] sm:$0xff]   ;;  %s11376_s12 = scalar_lea.hbm %s11430_s7, %s7346_s18 }
 0x467   : > { %v8303_v41 = vpop.f32.mrf.mxu0  ;;  %v7405_v1 = vunpack.c.l.bf16 %v7504_v32 }
 0x468   : > { %v6609_v29 = vmax.f32 %v6577_v35, 0.0  ;;  %v6575_v18 = vadd.f32 %v7382_v8, %v6499_v20  ;;  %v6520_v63 = vadd.f32 %v8303_v41, %v11304_v62  ;;  %v7410_v8 = vunpack.c.h.bf16 %v7505_v6 }
 0x469   : > { %v6511_v4 = vpop.f32.mrf.mxu0 }
 0x46a   : > { %v7459_v40 = vpack.c.bf16 %v6609_v29, %v6608_v12  ;;  %v6607_v26 = vmax.f32 %v6575_v18, 0.0  ;;  %v6512_v33 = vadd.f32 %v11304_v62, %v6511_v4  ;;  %v6580_v16 = vadd.f32 %v7393_v19, %v6520_v63 }
 0x46b   : > { %v8304_v54 = vpop.f32.mrf.mxu0  ;;  %v7406_v12 = vunpack.c.h.bf16 %v7504_v32 }
 0x46c   : > { %7514 = vst [vmem:[%s11317_s22 + $0x48] sm:$0xff] %v7459_v40   ;;  %v7454_v13 = vpack.c.bf16 %v6607_v26, %v6606_v55  ;;  %v6523_v46 = vadd.f32 %v8304_v54, %v11304_v62  ;;  %v6578_v61 = vadd.f32 %v7389_v25, %v6512_v33  ;;  %v6612_v14 = vmax.f32 %v6580_v16, 0.0 }
 0x46d   : > { %v6514_v42 = vpop.f32.mrf.mxu0 }
 0x46e   : > { %7513 = vst [vmem:[%s11317_s22 + $0x40] sm:$0xff] %v7454_v13   ;;  %v6581_v38 = vadd.f32 %v7394_v0, %v6523_v46  ;;  %v6515_v17 = vadd.f32 %v11304_v62, %v6514_v42  ;;  %v6610_v58 = vmax.f32 %v6578_v61, 0.0 }
 0x46f   : > { %v8307_v59 = vpop.f32.mrf.mxu0 }
 0x470   : > { %v6613_v47 = vmax.f32 %v6581_v38, 0.0  ;;  %v6579_v44 = vadd.f32 %v7390_v43, %v6515_v17  ;;  %v6536_v31 = vadd.f32 %v8307_v59, %v11304_v62 }
 0x471   : > { %v6527_v37 = vpop.f32.mrf.mxu0 }
 0x472   : > { %v7469_v48 = vpack.c.bf16 %v6613_v47, %v6612_v14  ;;  %v6611_v22 = vmax.f32 %v6579_v44, 0.0  ;;  %v6528_v5 = vadd.f32 %v11304_v62, %v6527_v37  ;;  %v6584_v28 = vadd.f32 %v7401_v50, %v6536_v31 }
 0x473   : > { %v8308_v11 = vpop.f32.mrf.mxu0 }
 0x474   : > { %7516 = vst [vmem:[%s11317_s22 + $0x58] sm:$0xff] %v7469_v48   ;;  %v7464_v9 = vpack.c.bf16 %v6611_v22, %v6610_v58  ;;  %v6539_v21 = vadd.f32 %v8308_v11, %v11304_v62  ;;  %v6582_v53 = vadd.f32 %v7397_v23, %v6528_v5  ;;  %v6616_v45 = vmax.f32 %v6584_v28, 0.0 }
 0x475   : > { %v6530_v24 = vpop.f32.mrf.mxu0 }
 0x476   : > { %7515 = vst [vmem:[%s11317_s22 + $0x50] sm:$0xff] %v7464_v9   ;;  %v6585_v57 = vadd.f32 %v7402_v39, %v6539_v21  ;;  %v6531_v15 = vadd.f32 %v11304_v62, %v6530_v24  ;;  %v6614_v52 = vmax.f32 %v6582_v53, 0.0 }
 0x477   : > { %v8311_v51 = vpop.f32.mrf.mxu0 }
 0x478   : > { %v6617_v7 = vmax.f32 %v6585_v57, 0.0  ;;  %v6583_v56 = vadd.f32 %v7398_v3, %v6531_v15  ;;  %v6552_v10 = vadd.f32 %v8311_v51, %v11304_v62 }
 0x479   : > { %v6543_v49 = vpop.f32.mrf.mxu0 }
 0x47a   : > { %v7479_v30 = vpack.c.bf16 %v6617_v7, %v6616_v45  ;;  %v6615_v34 = vmax.f32 %v6583_v56, 0.0  ;;  %v6544_v35 = vadd.f32 %v11304_v62, %v6543_v49  ;;  %v6588_v19 = vadd.f32 %v7409_v27, %v6552_v10 }
 0x47b   : > { %v8312_v20 = vpop.f32.mrf.mxu0 }
 0x47c   : > { %7518 = vst [vmem:[%s11317_s22 + $0x68] sm:$0xff] %v7479_v30   ;;  %v7474_v2 = vpack.c.bf16 %v6615_v34, %v6614_v52  ;;  %v6555_v41 = vadd.f32 %v8312_v20, %v11304_v62  ;;  %v6586_v18 = vadd.f32 %v7405_v1, %v6544_v35  ;;  %v6620_v4 = vmax.f32 %v6588_v19, 0.0 }
 0x47d   : > { %v6546_v29 = vpop.f32.mrf.mxu0 }
 0x47e   : > { %7517 = vst [vmem:[%s11317_s22 + $0x60] sm:$0xff] %v7474_v2   ;;  %v6589_v63 = vadd.f32 %v7410_v8, %v6555_v41  ;;  %v6547_v25 = vadd.f32 %v11304_v62, %v6546_v29  ;;  %v6618_v40 = vmax.f32 %v6586_v18, 0.0 }
 0x480   : > { %v6621_v0 = vmax.f32 %v6589_v63, 0.0  ;;  %v6587_v55 = vadd.f32 %v7406_v12, %v6547_v25 }
 0x482   : > { %v7489_v26 = vpack.c.bf16 %v6621_v0, %v6620_v4  ;;  %v6619_v33 = vmax.f32 %v6587_v55, 0.0 }
 0x484   : > { %7520 = vst [vmem:[%s11317_s22 + $0x78] sm:$0xff] %v7489_v26   ;;  %v7484_v62 = vpack.c.bf16 %v6619_v33, %v6618_v40 }
 0x486   : > { %7519 = vst [vmem:[%s11317_s22 + $0x70] sm:$0xff] %v7484_v62  }
 0x487   : > { %8690 = shalt.err (!%p8687_p10)
}
 0x488   : > { %s8691_s15 = scalar_lea.hbm %s11376_s12, 2048  ;;  %s8695_s21 = scalar_lea.hbm %s11430_s7, 4096 }
 0x489   : > { %p8692_p6 = scmp.ne.s32.totalorder %s11376_s12, %s8691_s15  ;;  %p8696_p3 = scmp.lt.s32.totalorder %s11376_s12, %s11430_s7 }
 0x48a   : > { %p8697_p11 = scmp.lt.s32.totalorder %s8695_s21, %s8691_s15 }
 0x48b   : > { %p8693_p4 = pnand %p8692_p6, %p11601_p1 }
 0x48c   : > { %p8698_p5 = por %p8697_p11, %p8696_p3 }
 0x48d   : > { %p8694_p8 = pneg %p8693_p4 }
 0x48f   : > { %p8699_p7 = pnand %p8698_p5, %p8694_p8 }
 0x491   : > { %8702 = shalt.err (!%p8699_p7)
}
 0x492   : > { %s8759_s1 = smov 64   ;;  %s8760_s16 = smov 4  }
 0x493   : > { %8343 = dma.vmem_to_hbm [thread:$0]  (%p11601_p1), %s11378_s23, 2048, %s11376_s12, %s6783_s30, %s8759_s1, %s8759_s1, %s8760_s16  }
 0x494 PF: > { %s6811_s9 = sand.u32 1, %s8737_s24   ;;  %p11602_p12 = scmp.ne.s32.totalorder %s11447_s8, 0 }
 0x495   : > { %p11603_p9 = scmp.ge.s32.totalorder %s8749_s27, 2  ;;  %s6812_s28 = scalar_lea.sflag [#allocation5], %s6811_s9 }
 0x497   : > { %p8360_p13 = pnand %p11603_p9, %p11602_p12 }
 0x499   : > { %p8361_p0 = pneg %p8360_p13 }
 0x49b   : > { %8732 = dma.done.wait (%p8361_p0), %s6812_s28, 2048  }
 0x49c   : > { %8734 = vsyncadd (%p8361_p0), %s6812_s28, 4294965248  ;;  %p22_p2 = scmp.ge.s32.totalorder %s8890_s14, 4   ;;  %s11604_s24 = smov %s8741_s25 }
 0x49d   : > { %s11605_s25 = smov %s8745_s26  ;;  %s11606_s26 = smov %s8900_s17 }
 0x49e   : > { %s11607_s27 = smov %s8890_s14  ;;  %24 = sbr.rel (!%p22_p2) target bundleno = 9 (0x9), region = 108 }
 0x4a3   :  { %6817 = vsyncpa [#allocation4], 1 }
 0x4a4   :  { %6819 = vsyncpa [#allocation4 + $0x1], 1 }
 0x4a5   :  { %6820 = vsyncpa [#allocation7], 1 }
 0x4a6   :  { %6821 = vsyncpa [#allocation10], 1 }
 0x4a7   :  { %6822 = vsyncpa [#allocation5], 1 }
 0x4a8   :  { %6824 = vsyncpa [#allocation5 + $0x1], 1 }

// kernel: tpu_custom_call.1
= control target key start
LH: loop header
LB: loop body
LE: loop exit
PB: predicated region body
PF: predicated region fallthrough
CT: control target
= control target key end

     0   :  { %s11423_s0 = inlined_call_operand.hbm [shape: bf16[2,16,16,128], index: 0, kind: input, shape index: {}]   ;;  %s11424_s1 = inlined_call_operand.hbm [shape: bf16[128,128], index: 1, kind: input, shape index: {}]   ;;  %s11425_s2 = inlined_call_operand.vmem [shape: f32[1,128], index: 2, kind: input, shape index: {}]   ;;  %s11426_s3 = inlined_call_operand.hbm [shape: bf16[1152,128], index: 3, kind: input, shape index: {}]   ;;  %s11427_s4 = inlined_call_operand.vmem [shape: f32[1,128], index: 4, kind: input, shape index: {}]   ;;  %s11428_s5 = inlined_call_operand.hbm [shape: bf16[128,128], index: 5, kind: input, shape index: {}]   ;;  %s11429_s6 = inlined_call_operand.vmem [shape: f32[1,128], index: 6, kind: input, shape index: {}]   ;;  %s11430_s7 = inlined_call_operand.hbm [shape: bf16[2,16,16,128], index: 7, kind: output, shape index: {}]  }
   0x1   :  { %11445 = sst [smem:[#allocation49_spill]] %s11424_s1 }
   0x2   :  { %12 = vsyncpa [#allocation4], 0 }
   0x3   :  { %14 = vsyncpa [#allocation4 + $0x1], 0 }
   0x4   :  { %15 = vsyncpa [#allocation7], 0 }
   0x5   :  { %16 = vsyncpa [#allocation10], 0 }
   0x6   :  { %17 = vsyncpa [#allocation5], 0 }
   0x7   :  { %19 = vsyncpa [#allocation5 + $0x1], 0  ;;  %s8801_s24 = smov 0   ;;  %s8803_s25 = smov 0  }
   0x8   :  { %s8805_s26 = smov 0   ;;  %s8807_s27 = smov 0  }
   0x9 LB: > { %s8822_s28 = sadd.s32 4294967295, %s8749_s27   ;;  %s6898_s29 = sadd.s32 4294967294, %s8749_s27   ;;  %s8749_s27 = sphi %s8807_s27, %s11607_s27   ;;  %s8745_s26 = sphi %s8805_s26, %s11606_s26   ;;  %s8741_s25 = sphi %s8803_s25, %s11605_s25   ;;  %s8737_s24 = sphi %s8801_s24, %s11604_s24  }
   0xa   : > { %p45_p0 = scmp.ne.s32.totalorder %s8741_s25, %s8737_s24  ;;  %p11431_p1 = scmp.eq.s32.totalorder %s8822_s28, 0 }
   0xb   : > { %p195_p2 = scmp.eq.s32.totalorder %s8822_s28, 1  ;;  %p201_p3 = scmp.eq.s32.totalorder %s6898_s29, 1 }
   0xc   : > { %p8831_p4 = por %p11431_p1, %p45_p0  ;;  %p6899_p5 = scmp.ge.s32.totalorder %s8749_s27, 1 }
   0xd   : > { %p8836_p6 = por %p201_p3, %p45_p0  ;;  %p208_p7 = scmp.lt.s32.totalorder %s8749_s27, 3 }
   0xe   : > { %s11446_s30 = scalar_select %p8831_p4, 1, 0 }
   0xf   : > { %s11447_s8 = scalar_select %p8836_p6, 1, 0 }
  0x10   : > { %p8841_p8 = pnand %p6899_p5, %p208_p7  ;;  %s8751_s10 = smov [#allocation6]  }
  0x11   : > { %s220_s11 = sshll.u32 %s8751_s10, 4  ;;  %s8752_s13 = smov [#allocation8]   ;;  %s221_s11 = int_to_ptr.vmem [resolvable:$true] %s220_s11 }
  0x12   : > { %s11448_s9 = scalar_select %p8841_p8, 1, 0 }
  0x13   : > { %p8345_p9 = pneg %p8841_p8  ;;  %s236_s14 = sshll.u32 %s8752_s13, 4  ;;  %s237_s14 = int_to_ptr.vmem [resolvable:$true] %s236_s14 }
  0x14   : > { %s8753_s15 = smov [#allocation9]   ;;  %s8582_s17 = scalar_lea.vmem %s221_s11, 1024 }
  0x15   : > { %p8850_p11 = pnand %p8345_p9, %p11431_p1  ;;  %s252_s16 = sshll.u32 %s8753_s15, 4  ;;  %s253_s16 = int_to_ptr.vmem [resolvable:$true] %s252_s16 }
  0x16   : > { %p8583_p13 = scmp.ne.s32.totalorder %s221_s11, %s8582_s17  ;;  %p8590_p5 = scmp.lt.s32.totalorder %s221_s11, %s221_s11 }
  0x17   : > { %p8573_p12 = pneg %p8850_p11  ;;  %p8591_p7 = scmp.lt.s32.totalorder %s8582_s17, %s8582_s17 }
  0x19   : > { %p8585_p0 = pnand %p8583_p13, %p8573_p12  ;;  %p8592_p9 = por %p8591_p7, %p8590_p5 }
  0x1b   : > { %p8586_p3 = pneg %p8585_p0 }
  0x1d   : > { %p8593_p10 = pnand %p8592_p9, %p8586_p3 }
  0x1f   : > { %8596 = shalt.err (!%p8593_p10)
}
  0x20   : > { %s11432_s18 = smov 64   ;;  %s11433_s19 = smov 4  }
  0x21   : > { %s11450_s1 = sld [smem:[#allocation49_spill]]  ;;  %s8608_s22 = scalar_lea.vmem %s237_s14, 9216 }
  0x22   : > { %p8609_p13 = scmp.ne.s32.totalorder %s237_s14, %s8608_s22  ;;  %p8616_p3 = scmp.lt.s32.totalorder %s237_s14, %s237_s14 }
  0x23   : > { %p8617_p10 = scmp.lt.s32.totalorder %s8608_s22, %s8608_s22 }
  0x24   : > { %p8611_p0 = pnand %p8609_p13, %p8573_p12 }
  0x25   : > { %p8618_p7 = por %p8617_p10, %p8616_p3 }
  0x26   : > { %p8612_p5 = pneg %p8611_p0 }
  0x27   : > { %8348 = dma.hbm_to_vmem [thread:$0]  (!%p8850_p11), %s11450_s1, 1024, %s221_s11, [#allocation7], %s11432_s18, %s11432_s18, %s11433_s19  }
  0x28   : > { %p8619_p9 = pnand %p8618_p7, %p8612_p5 }
  0x2a   : > { %8622 = shalt.err (!%p8619_p9)
}
  0x2b   : > { %8351 = dma.hbm_to_vmem [thread:$0]  (!%p8850_p11), %s11426_s3, 9216, %s237_s14, [#allocation7], %s11432_s18, %s11432_s18, %s11433_s19  }
  0x2c   : > { %s8634_s10 = scalar_lea.vmem %s253_s16, 1024  ;;  %p8642_p3 = scmp.lt.s32.totalorder %s253_s16, %s253_s16 }
  0x2d   : > { %p8635_p1 = scmp.ne.s32.totalorder %s253_s16, %s8634_s10  ;;  %p8643_p5 = scmp.lt.s32.totalorder %s8634_s10, %s8634_s10 }
  0x2f   : > { %p8637_p13 = pnand %p8635_p1, %p8573_p12  ;;  %p8644_p10 = por %p8643_p5, %p8642_p3 }
  0x31   : > { %p8638_p0 = pneg %p8637_p13 }
  0x33   : > { %p8645_p7 = pnand %p8644_p10, %p8638_p0 }
  0x35   : > { %8648 = shalt.err (!%p8645_p7)
}
  0x36   : > { %8354 = dma.hbm_to_vmem [thread:$0]  (!%p8850_p11), %s11428_s5, 1024, %s253_s16, [#allocation10], %s11432_s18, %s11432_s18, %s11433_s19  }
  0x37   : > { %s8890_s14 = sadd.s32 1, %s8749_s27   ;;  %s32_s15 = sadd.s32 1, %s8745_s26 }
  0x38   : > { %s29_s12 = ssub.s32 %s8749_s27, %s8890_s14  ;;  %p39_p12 = scmp.ne.s32.totalorder %s8745_s26, %s8741_s25 }
  0x39   : > { %p30_p1 = scmp.eq.s32.totalorder %s29_s12, 0  ;;  %p40_p9 = scmp.eq.s32.totalorder %s8749_s27, 0 }
  0x3a   : > { %p8366_p13 = scmp.lt.s32.totalorder %s8749_s27, 2  ;;  %p8904_p3 = por %p195_p2, %p39_p12 }
  0x3b   : > { %s8900_s17 = scalar_select %p30_p1, %s8745_s26, %s32_s15  }
  0x3c   : > { %p41_p0 = por %p40_p9, %p39_p12  ;;  %s269_s21 = sand.u32 1, %s8745_s26  }
  0x3d   : > { %s11451_s20 = scalar_select %p8904_p3, 1, 0 }
  0x3e   : > { %s7281_s22 = sshll.u32 %s8749_s27, 11  ;;  %s6904_s16 = sshll.u32 %s269_s21, 7 }
  0x3f   : > { %s8913_s10 = scalar_lea.hbm %s11423_s0, %s7281_s22  ;;  %s273_s11 = scalar_lea.vmem [#allocation3], %s6904_s16 }
  0x40   : > { %s280_s13 = sshll.u32 %s273_s11, 4  ;;  %p8915_p11 = pnand %p8366_p13, %p41_p0  ;;  %s8919_s13 = int_to_ptr.vmem [resolvable:$true] %s280_s13 }
  0x41   : > { %s8921_s15 = scalar_lea.sflag [#allocation4], %s269_s21  ;;  %s8649_s18 = scalar_lea.hbm %s8913_s10, 2048 }
  0x42   : > { %p8650_p2 = scmp.ne.s32.totalorder %s8913_s10, %s8649_s18  ;;  %p8651_p5 = pneg %p8915_p11 }
  0x43   : > { %s8654_s16 = scalar_lea.hbm %s11423_s0, 4096  ;;  %p8655_p1 = scmp.lt.s32.totalorder %s8913_s10, %s11423_s0 }
  0x44   : > { %p8652_p10 = pnand %p8651_p5, %p8650_p2  ;;  %p8656_p12 = scmp.lt.s32.totalorder %s8654_s16, %s8649_s18 }
  0x46   : > { %p8653_p7 = pneg %p8652_p10  ;;  %p8657_p9 = por %p8656_p12, %p8655_p1 }
  0x48   : > { %p8658_p13 = pnand %p8657_p9, %p8653_p7 }
  0x4a   : > { %8661 = shalt.err (!%p8658_p13)
}
  0x4b   : > { %s8662_s21 = scalar_lea.vmem %s8919_s13, 2048  ;;  %s8756_s19 = smov [#allocation3]  }
  0x4c   : > { %p8663_p0 = scmp.ne.s32.totalorder %s8919_s13, %s8662_s21  ;;  %s8667_s1 = sshll.u32 %s8756_s19, 4  ;;  %s8668_s1 = int_to_ptr.vmem [resolvable:$false] %s8667_s1 }
  0x4d   : > { %s8669_s22 = scalar_lea.vmem %s8668_s1, 4096  ;;  %p8670_p10 = scmp.lt.s32.totalorder %s8919_s13, %s8668_s1 }
  0x4e   : > { %p8665_p6 = pnand %p8663_p0, %p8651_p5  ;;  %p8671_p3 = scmp.lt.s32.totalorder %s8669_s22, %s8662_s21 }
  0x50   : > { %p8666_p2 = pneg %p8665_p6  ;;  %p8672_p4 = por %p8671_p3, %p8670_p10 }
  0x52   : > { %p8673_p8 = pnand %p8672_p4, %p8666_p2 }
  0x54   : > { %8676 = shalt.err (!%p8673_p8)
}
  0x55   : > { %s11453_s18 = smov 4   ;;  %s11454_s23 = smov 64  }
  0x56   : > { %8358 = dma.hbm_to_vmem [thread:$0]  (!%p8915_p11), %s8913_s10, 2048, %s8919_s13, %s8921_s15, %s11454_s23, %s11454_s23, %s11453_s18  }
  0x57   : > { %p11455_p6 = scmp.ne.s32.totalorder %s11448_s9, 0 }
  0x59   : > { %292 = sbr.rel (%p11455_p6) target bundleno = 1172 (0x494), region = 48 }
  0x5e   : > { %s8948_s19 = sand.u32 1, %s8741_s25   ;;  %p11456_p4 = scmp.ne.s32.totalorder %s11446_s30, 0 }
  0x5f   : > { %s6908_s1 = sshll.u32 %s8948_s19, 7  ;;  %s295_s16 = scalar_lea.sflag [#allocation4], %s8948_s19 }
  0x60   : > { %s8954_s12 = scalar_lea.vmem [#allocation3], %s6908_s1 }
  0x61   : > { %8720 = dma.done.wait (%p11456_p4), %s295_s16, 2048  }
  0x62   : > { %8722 = vsyncadd (%p11456_p4), %s295_s16, 4294965248  ;;  %p11457_p8 = scmp.eq.s32.totalorder %s8822_s28, 0 }
  0x64   : > { %8724 = dma.done.wait (%p11457_p8), [#allocation7], 10240   ;;  %p11458_p3 = pmov %p11457_p8 }
  0x66   : > { %8726 = vsyncadd (%p11458_p3), [#allocation7], 4294957056  ;;  %p11459_p11 = pmov %p11458_p3 }
  0x67   : > { %p11460_p5 = pmov %p11458_p3 }
  0x68   : > { %8728 = dma.done.wait (%p11459_p11), [#allocation10], 1024  }
  0x69   : > { %8730 = vsyncadd (%p11460_p5), [#allocation10], 4294966272  ;;  %v8411_v0 = vld [vmem:[#allocation6 + $0x38] sm:$0xff]   ;;  %v8412_v1 = vld [vmem:[#allocation6 + $0x30] sm:$0xff]   ;;  %vm742_vm0 = vcmask 1040384   ;;  %v8757_v61 = vmov 0  }
  0x6a   : > { %7785 = vmatprep.subr.bf16.mxu0 %v8411_v0  ;;  %8313 = vmatprep.subr.bf16.mxu1 %v8411_v0  ;;  %v8413_v2 = vld [vmem:[#allocation6 + $0x28] sm:$0xff]   ;;  %v8414_v3 = vld [vmem:[#allocation6 + $0x20] sm:$0xff]   ;;  %v8415_v5 = vld [vmem:[#allocation6 + $0x18] sm:$0xff]   ;;  %vm743_vm1 = vsmask.f32 256  ;;  %vm1261_vm8 = vcmask 1043456  }
  0x6b   : > { %7786 = vmatpush3.bf16.msra.mxu0 %v8411_v0  ;;  %8321 = vmatpush3.bf16.msra.mxu1 %v8411_v0  ;;  %v8419_v4 = vld [vmem:[%s8954_s12] sm:$0xff]   ;;  %v8416_v7 = vld [vmem:[#allocation6 + $0x10] sm:$0xff]   ;;  %v8417_v8 = vld [vmem:[#allocation6 + $0x8] sm:$0xff]   ;;  %vm793_vm3 = vsmask.f32 7938  ;;  %vm2468_vm12 = vcmask 1042432  }
  0x6c   : > { %7787 = vmatprep.subr.bf16.mxu0 %v8412_v1  ;;  %8314 = vmatprep.subr.bf16.mxu1 %v8412_v1  ;;  %v8425_v6 = vld [vmem:[%s8954_s12 + $0x40] sm:$0xff]   ;;  %v8435_v10 = vld [vmem:[#allocation8 + $0x38] sm:$0xff]   ;;  %v8420_v11 = vld [vmem:[%s8954_s12 + $0x8] sm:$0xff]   ;;  %734 = vst [vmem:[#allocation2] sm:$0xf] %v8757_v61  ;;  %vm2469_vm13 = vcmask 1046532  }
  0x6d   : > { %7801 = vmatprep.mubr.bf16.mxu0 %v8419_v4  ;;  %7817 = vmatprep.mubr.bf16.mxu1 %v8425_v6  ;;  %v8418_v9 = vld [vmem:[#allocation6] sm:$0xff]   ;;  %v8426_v12 = vld [vmem:[%s8954_s12 + $0x48] sm:$0xff]   ;;  %v8421_v13 = vld [vmem:[%s8954_s12 + $0x10] sm:$0xff]   ;;  %735 = vst [vmem:[#allocation2 + $0x4] sm:$0xf] %v8757_v61  ;;  %s11317_s22 = scalar_lea.vmem [#allocation11], %s6908_s1 }
  0x6e   : > { %v8429_v14 = vld [vmem:[%s8954_s12 + $0x50] sm:$0xff]   ;;  %v8422_v15 = vld [vmem:[%s8954_s12 + $0x18] sm:$0xff]   ;;  %v8423_v17 = vld [vmem:[%s8954_s12 + $0x20] sm:$0xff]   ;;  %736 = vst [vmem:[#allocation2 + $0x8] sm:$0x1] %v8757_v61  ;;  %s7346_s18 = sshll.u32 %s8822_s28, 11 }
  0x6f   : > { %7788 = vmatpush3.bf16.msra.mxu0 %v8412_v1  ;;  %8322 = vmatpush3.bf16.msra.mxu1 %v8412_v1  ;;  %v8430_v16 = vld [vmem:[%s8954_s12 + $0x58] sm:$0xff]   ;;  %v8431_v18 = vld [vmem:[%s8954_s12 + $0x60] sm:$0xff]   ;;  %v8424_v19 = vld [vmem:[%s8954_s12 + $0x28] sm:$0xff]   ;;  %738 = vst [vmem:[#allocation2 + $0xcc] sm:$0xf] %v8757_v61  ;;  %s6796_s23 = sshll.u32 %s11317_s22, 4  ;;  %s11378_s23 = int_to_ptr.vmem [resolvable:$true] %s6796_s23 }
  0x70   : > { %7789 = vmatprep.subr.bf16.mxu0 %v8413_v2  ;;  %8315 = vmatprep.subr.bf16.mxu1 %v8413_v2  ;;  %v8432_v20 = vld [vmem:[%s8954_s12 + $0x68] sm:$0xff]   ;;  %v8427_v21 = vld [vmem:[%s8954_s12 + $0x30] sm:$0xff]   ;;  %v8428_v23 = vld [vmem:[%s8954_s12 + $0x38] sm:$0xff]   ;;  %739 = vst [vmem:[#allocation2 + $0xd0] sm:$0xf] %v8757_v61  ;;  %s6783_s30 = scalar_lea.sflag [#allocation5], %s8948_s19 }
  0x71   : > { %v8433_v22 = vld [vmem:[%s8954_s12 + $0x70] sm:$0xff]   ;;  %v8434_v24 = vld [vmem:[%s8954_s12 + $0x78] sm:$0xff]   ;;  %vm8985_vm2 = vmand %vm742_vm0, %vm743_vm1  ;;  %740 = vst [vmem:[#allocation2 + $0xd4] sm:$0x1] %v8757_v61  ;;  %vm1439_vm5 = vsmask.f32 3328 }
  0x72   : > { %v8436_v25 = vld [vmem:[#allocation8 + $0x30] sm:$0xff]   ;;  %v748_v27 = vld [vmem:[#allocation2 + $0x18] sm:$0x1]  ;;  %vm8992_vm4 = vmand %vm742_vm0, %vm793_vm3  ;;  %vm1440_vm6 = vsmask.f32 7440  ;;  %s8677_s9 = scalar_lea.vmem %s11378_s23, 2048 }
  0x73   : > { %7790 = vmatpush3.bf16.msra.mxu0 %v8413_v2  ;;  %8323 = vmatpush3.bf16.msra.mxu1 %v8413_v2  ;;  %v749_v28 = vsel %vm8985_vm2, 0, %v748_v27  ;;  %v745_v30 = vld [vmem:[#allocation2 + $0xc] sm:$0x1]  ;;  %v8438_v31 = vld [vmem:[#allocation8 + $0x28] sm:$0xff]   ;;  %v8437_v33 = vld [vmem:[#allocation8 + $0x78] sm:$0xff]   ;;  %p8678_p7 = scmp.ne.s32.totalorder %s11378_s23, %s8677_s9  ;;  %p11601_p1 = scmp.ne.s32.totalorder %s11451_s20, 0 }
  0x74   : > { %7791 = vmatprep.subr.bf16.mxu0 %v8414_v3  ;;  %8316 = vmatprep.subr.bf16.mxu1 %v8414_v3  ;;  %750 = vst [vmem:[#allocation2 + $0x18] sm:$0x1] %v749_v28  ;;  %v746_v32 = vsel %vm8985_vm2, 0, %v745_v30  ;;  %v798_v34 = vld [vmem:[#allocation2 + $0x20] sm:$0x1]  ;;  %v8440_v37 = vld [vmem:[#allocation8 + $0x20] sm:$0xff]   ;;  %vm9040_vm7 = vmor %vm1439_vm5, %vm1440_vm6 }
  0x75   : > { %747 = vst [vmem:[#allocation2 + $0xc] sm:$0x1] %v746_v32  ;;  %v799_v35 = vsel %vm8992_vm4, 0, %v798_v34  ;;  %v795_v36 = vld [vmem:[#allocation2 + $0x14] sm:$0x1]  ;;  %v8439_v39 = vld [vmem:[#allocation8 + $0x70] sm:$0xff]   ;;  %vm9094_vm10 = vmand %vm1261_vm8, %vm793_vm3  ;;  %p8679_p12 = pnand %p8678_p7, %p11601_p1 }
  0x76   : > { %800 = vst [vmem:[#allocation2 + $0x20] sm:$0x1] %v799_v35  ;;  %v796_v38 = vsel %vm8992_vm4, 0, %v795_v36  ;;  %v754_v40 = vld [vmem:[#allocation2 + $0x30] sm:$0x1]  ;;  %v8441_v45 = vld [vmem:[#allocation8 + $0x68] sm:$0xff]   ;;  %vm9555_vm14 = vmor %vm2468_vm12, %vm2469_vm13 }
  0x77   : > { %7792 = vmatpush3.bf16.msra.mxu0 %v8414_v3  ;;  %8324 = vmatpush3.bf16.msra.mxu1 %v8414_v3  ;;  %797 = vst [vmem:[#allocation2 + $0x14] sm:$0x1] %v796_v38  ;;  %v755_v41 = vsel %vm8985_vm2, 0, %v754_v40  ;;  %v751_v42 = vld [vmem:[#allocation2 + $0x24] sm:$0x1]  ;;  %v8442_v44 = vld [vmem:[#allocation8 + $0x18] sm:$0xff]   ;;  %p8680_p9 = pneg %p8679_p12 }
  0x78   : > { %7793 = vmatprep.subr.bf16.mxu0 %v8415_v5  ;;  %8317 = vmatprep.subr.bf16.mxu1 %v8415_v5  ;;  %756 = vst [vmem:[#allocation2 + $0x30] sm:$0x1] %v755_v41  ;;  %v752_v43 = vsel %vm8985_vm2, 0, %v751_v42  ;;  %v804_v46 = vld [vmem:[#allocation2 + $0x38] sm:$0x1]  ;;  %v8444_v49 = vld [vmem:[#allocation8 + $0x10] sm:$0xff]  }
  0x79   : > { %753 = vst [vmem:[#allocation2 + $0x24] sm:$0x1] %v752_v43  ;;  %v805_v47 = vsel %vm8992_vm4, 0, %v804_v46  ;;  %v801_v48 = vld [vmem:[#allocation2 + $0x2c] sm:$0x1]  ;;  %v8443_v51 = vld [vmem:[#allocation8 + $0x60] sm:$0xff]  }
  0x7a   : > { %806 = vst [vmem:[#allocation2 + $0x38] sm:$0x1] %v805_v47  ;;  %v802_v50 = vsel %vm8992_vm4, 0, %v801_v48  ;;  %v760_v52 = vld [vmem:[#allocation2 + $0x48] sm:$0x1]  ;;  %v8446_v58 = vld [vmem:[#allocation8 + $0x8] sm:$0xff]  }
  0x7b   : > { %7794 = vmatpush3.bf16.msra.mxu0 %v8415_v5  ;;  %8325 = vmatpush3.bf16.msra.mxu1 %v8415_v5  ;;  %803 = vst [vmem:[#allocation2 + $0x2c] sm:$0x1] %v802_v50  ;;  %v761_v53 = vsel %vm8985_vm2, 0, %v760_v52  ;;  %v757_v54 = vld [vmem:[#allocation2 + $0x3c] sm:$0x1]  ;;  %v8445_v59 = vld [vmem:[#allocation8 + $0x58] sm:$0xff]  }
  0x7c   : > { %7795 = vmatprep.subr.bf16.mxu0 %v8416_v7  ;;  %8318 = vmatprep.subr.bf16.mxu1 %v8416_v7  ;;  %762 = vst [vmem:[#allocation2 + $0x48] sm:$0x1] %v761_v53  ;;  %v758_v55 = vsel %vm8985_vm2, 0, %v757_v54  ;;  %v810_v56 = vld [vmem:[#allocation2 + $0x50] sm:$0x1]  ;;  %v8448_v1 = vld [vmem:[#allocation8] sm:$0xff]  }
  0x7d   : > { %759 = vst [vmem:[#allocation2 + $0x3c] sm:$0x1] %v758_v55  ;;  %v811_v57 = vsel %vm8992_vm4, 0, %v810_v56  ;;  %v772_v60 = vld [vmem:[#allocation2 + $0x78] sm:$0x1]  ;;  %v8447_v2 = vld [vmem:[#allocation8 + $0x50] sm:$0xff]  }
  0x7e   : > { %812 = vst [vmem:[#allocation2 + $0x50] sm:$0x1] %v811_v57  ;;  %v773_v62 = vsel %vm8985_vm2, 0, %v772_v60  ;;  %v807_v63 = vld [vmem:[#allocation2 + $0x44] sm:$0x1]  ;;  %v8453_v41 = vld [vmem:[#allocation8 + $0x40] sm:$0xff]  }
  0x7f   : > { %7796 = vmatpush3.bf16.msra.mxu0 %v8416_v7  ;;  %8326 = vmatpush3.bf16.msra.mxu1 %v8416_v7  ;;  %774 = vst [vmem:[#allocation2 + $0x78] sm:$0x1] %v773_v62  ;;  %v808_v0 = vsel %vm8992_vm4, 0, %v807_v63  ;;  %v766_v3 = vld [vmem:[#allocation2 + $0x60] sm:$0x1]  ;;  %v9052_v54 = vld [vmem:[#allocation8 + $0xb8] sm:$0xff]  }
  0x80   : > { %7797 = vmatprep.subr.bf16.mxu0 %v8417_v8  ;;  %8319 = vmatprep.subr.bf16.mxu1 %v8417_v8  ;;  %809 = vst [vmem:[#allocation2 + $0x44] sm:$0x1] %v808_v0  ;;  %v769_v4 = vld [vmem:[#allocation2 + $0x6c] sm:$0x1]  ;;  %v767_v5 = vsel %vm8985_vm2, 0, %v766_v3  ;;  %s8758_s28 = smov [#allocation11]  }
  0x81   : > { %v770_v6 = vsel %vm8985_vm2, 0, %v769_v4  ;;  %768 = vst [vmem:[#allocation2 + $0x60] sm:$0x1] %v767_v5  ;;  %v763_v7 = vld [vmem:[#allocation2 + $0x54] sm:$0x1]  ;;  %s8681_s10 = sshll.u32 %s8758_s28, 4  ;;  %s8682_s10 = int_to_ptr.vmem [resolvable:$false] %s8681_s10 }
  0x82   : > { %771 = vst [vmem:[#allocation2 + $0x6c] sm:$0x1] %v770_v6  ;;  %v784_v50 = vld [vmem:[#allocation2 + $0xa8] sm:$0x1]  ;;  %v781_v53 = vld [vmem:[#allocation2 + $0x9c] sm:$0x1]  ;;  %p8684_p13 = scmp.lt.s32.totalorder %s11378_s23, %s8682_s10 }
  0x83   : > { %7798 = vmatpush3.bf16.msra.mxu0 %v8417_v8  ;;  %8327 = vmatpush3.bf16.msra.mxu1 %v8417_v8  ;;  %v764_v8 = vsel %vm8985_vm2, 0, %v763_v7  ;;  %v785_v52 = vsel %vm8985_vm2, 0, %v784_v50  ;;  %v782_v55 = vsel %vm8985_vm2, 0, %v781_v53  ;;  %v834_v56 = vld [vmem:[#allocation2 + $0xb0] sm:$0x1]  ;;  %s8683_s13 = scalar_lea.vmem %s8682_s10, 4096 }
  0x84   : > { %7799 = vmatprep.subr.bf16.mxu0 %v8418_v9  ;;  %8320 = vmatprep.subr.bf16.mxu1 %v8418_v9  ;;  %765 = vst [vmem:[#allocation2 + $0x54] sm:$0x1] %v764_v8  ;;  %786 = vst [vmem:[#allocation2 + $0xa8] sm:$0x1] %v785_v52  ;;  %v835_v57 = vsel %vm8992_vm4, 0, %v834_v56  ;;  %v9069_v4 = vld [vmem:[#allocation8 + $0xf8] sm:$0xff]   ;;  %p8685_p0 = scmp.lt.s32.totalorder %s8683_s13, %s8677_s9 }
  0x85   : > { %783 = vst [vmem:[#allocation2 + $0x9c] sm:$0x1] %v782_v55  ;;  %836 = vst [vmem:[#allocation2 + $0xb0] sm:$0x1] %v835_v57  ;;  %v790_v60 = vld [vmem:[#allocation2 + $0xc0] sm:$0x1] }
  0x86   : > { %v787_v61 = vld [vmem:[#allocation2 + $0xb4] sm:$0x1]  ;;  %v791_v62 = vsel %vm8985_vm2, 0, %v790_v60  ;;  %v840_v0 = vld [vmem:[#allocation2 + $0xc8] sm:$0x1]  ;;  %p8686_p2 = por %p8685_p0, %p8684_p13 }
  0x87   : > { %7800 = vmatpush3.bf16.msra.mxu0 %v8418_v9  ;;  %8328 = vmatpush3.bf16.msra.mxu1 %v8418_v9  ;;  %v1375_v9 = vld [vmem:[#allocation2] sm:$0xf]  ;;  %v788_v63 = vsel %vm8985_vm2, 0, %v787_v61  ;;  %792 = vst [vmem:[#allocation2 + $0xc0] sm:$0x1] %v791_v62 }
  0x88   : > { %7881 = vmatprep.subr.bf16.mxu0 %v8435_v10  ;;  %7833 = vmatprep.subr.bf16.mxu1 %v8437_v33  ;;  %v1446_v27 = vshll.u32 %v1375_v9, 16  ;;  %789 = vst [vmem:[#allocation2 + $0xb4] sm:$0x1] %v788_v63  ;;  %v9075_v5 = vld [vmem:[%s11425_s2] ss:$0 sm:$0xff]  ;;  %p8687_p10 = pnand %p8686_p2, %p8680_p9 }
  0x89   : > { %vm939_vm9 = vsmask.f32 4368  ;;  %v1274_v63 = vld [vmem:[#allocation2 + $0x20] sm:$0x1] }
  0x8a   : > { %7802 = vmatmul.mubr.bf16.vlgmr.msra.gmra.mxu0 %v8420_v11  ;;  %7818 = vmatmul.mubr.bf16.vlgmr.msra.gmra.mxu1 %v8426_v12  ;;  %v816_v12 = vld [vmem:[#allocation2 + $0x68] sm:$0x1]  ;;  %vm9107_vm11 = vmor %vm743_vm1, %vm939_vm9 }
  0x8b   : > { %7805 = vmatprep.mubr.bf16.mxu0 %v8421_v13  ;;  %7821 = vmatprep.mubr.bf16.mxu1 %v8429_v14  ;;  %v822_v13 = vld [vmem:[#allocation2 + $0x80] sm:$0x1]  ;;  %v819_v14 = vld [vmem:[#allocation2 + $0x74] sm:$0x1] }
  0x8c   : > { %7882 = vmatpush3.bf16.msra.mxu0 %v8435_v10  ;;  %7834 = vmatpush3.bf16.msra.mxu1 %v8437_v33  ;;  %v1376_v10 = vld [vmem:[#allocation2 + $0x4] sm:$0xf]  ;;  %v828_v33 = vld [vmem:[#allocation2 + $0x98] sm:$0x1] }
  0x8d   : > { %7883 = vmatprep.subr.bf16.mxu0 %v8436_v25  ;;  %7835 = vmatprep.subr.bf16.mxu1 %v8439_v39  ;;  %v6994_v11 = vcombine.low %v1375_v9, %v1376_v10  ;;  %v1456_v28 = vshrl.u32 %v1376_v10, 16  ;;  %v1452_v32 = vshll.u32 %v1376_v10, 16  ;;  %v829_v34 = vsel %vm8992_vm4, 0, %v828_v33 }
  0x8e   : > { %830 = vst [vmem:[#allocation2 + $0x98] sm:$0x1] %v829_v34 }
  0x8f   : > { %v1454_v35 = vrot.slane %v1452_v32, 5  ;;  %v1458_v36 = vrot.slane %v1456_v28, 4 }
  0x90   : > { %7884 = vmatpush3.bf16.msra.mxu0 %v8436_v25  ;;  %7836 = vmatpush3.bf16.msra.mxu1 %v8439_v39  ;;  %v1443_v25 = vshrl.u32 %v1375_v9, 16 }
  0x91   : > { %7885 = vmatprep.subr.bf16.mxu0 %v8438_v31  ;;  %7837 = vmatprep.subr.bf16.mxu1 %v8441_v45  ;;  %v1459_v39 = vor.u32 %v1458_v36, %v1454_v35 }
  0x92   : > { %7806 = vmatmul.mubr.bf16.gmra.mxu0 %v8422_v15  ;;  %7822 = vmatmul.mubr.bf16.gmra.mxu1 %v8430_v16  ;;  %v823_v15 = vsel %vm8992_vm4, 0, %v822_v13  ;;  %v820_v16 = vsel %vm8992_vm4, 0, %v819_v14  ;;  %v1445_v30 = vrot.slane %v1443_v25, 4 }
  0x93   : > { %7809 = vmatprep.mubr.bf16.mxu0 %v8423_v17  ;;  %7825 = vmatprep.mubr.bf16.mxu1 %v8431_v18  ;;  %v817_v17 = vsel %vm8992_vm4, 0, %v816_v12  ;;  %824 = vst [vmem:[#allocation2 + $0x80] sm:$0x1] %v823_v15  ;;  %821 = vst [vmem:[#allocation2 + $0x74] sm:$0x1] %v820_v16  ;;  %v8450_v18 = vld [vmem:[#allocation8 + $0x48] sm:$0xff]  }
  0x94   : > { %7886 = vmatpush3.bf16.msra.mxu0 %v8438_v31  ;;  %7838 = vmatpush3.bf16.msra.mxu1 %v8441_v45  ;;  %818 = vst [vmem:[#allocation2 + $0x68] sm:$0x1] %v817_v17  ;;  %v1448_v31 = vrot.slane %v1446_v27, 5  ;;  %v1460_v43 = vrot.slane %v1459_v39, 4 }
  0x95   : > { %7887 = vmatprep.subr.bf16.mxu0 %v8440_v37  ;;  %7839 = vmatprep.subr.bf16.mxu1 %v8443_v51 }
  0x96   : > { %v1449_v38 = vor.u32 %v1448_v31, %v1445_v30 }
  0x98   : > { %7888 = vmatpush3.bf16.msra.mxu0 %v8440_v37  ;;  %7840 = vmatpush3.bf16.msra.mxu1 %v8443_v51  ;;  %v1423_v37 = vld [vmem:[#allocation2 + $0x8] sm:$0x1]  ;;  %v1450_v42 = vrot.slane %v1449_v38, 4 }
  0x99   : > { %7889 = vmatprep.subr.bf16.mxu0 %v8442_v44  ;;  %7841 = vmatprep.subr.bf16.mxu1 %v8445_v59  ;;  %v1462_v40 = vshll.u32 %v1423_v37, 16 }
  0x9a   : > { %7810 = vmatmul.mubr.bf16.gmra.mxu0 %v8424_v19  ;;  %7826 = vmatmul.mubr.bf16.gmra.mxu1 %v8432_v20  ;;  %v813_v19 = vld [vmem:[#allocation2 + $0x5c] sm:$0x1]  ;;  %v1455_v46 = vsel %vm9040_vm7, %v1450_v42, %v1454_v35 }
  0x9b   : > { %7813 = vmatprep.mubr.bf16.mxu0 %v8427_v21  ;;  %7829 = vmatprep.mubr.bf16.mxu1 %v8433_v22  ;;  %v814_v20 = vsel %vm8992_vm4, 0, %v813_v19  ;;  %v778_v21 = vld [vmem:[#allocation2 + $0x90] sm:$0x1] }
  0x9c   : > { %7890 = vmatpush3.bf16.msra.mxu0 %v8442_v44  ;;  %7842 = vmatpush3.bf16.msra.mxu1 %v8445_v59  ;;  %815 = vst [vmem:[#allocation2 + $0x5c] sm:$0x1] %v814_v20  ;;  %v779_v22 = vsel %vm8985_vm2, 0, %v778_v21  ;;  %v1464_v44 = vrot.slane %v1462_v40, 5  ;;  %v1270_v40 = vld [vmem:[#allocation2 + $0x18] sm:$0xf] }
  0x9d   : > { %7891 = vmatprep.subr.bf16.mxu0 %v8444_v49  ;;  %7843 = vmatprep.subr.bf16.mxu1 %v8447_v2  ;;  %780 = vst [vmem:[#allocation2 + $0x90] sm:$0x1] %v779_v22 }
  0x9e   : > { %v1465_v47 = vsel %vm9040_vm7, %v1460_v43, %v1464_v44 }
  0x9f   : > { %v6970_v48 = vcombine.low %v1455_v46, %v1465_v47 }
  0xa0   : > { %7892 = vmatpush3.bf16.msra.mxu0 %v8444_v49  ;;  %7844 = vmatpush3.bf16.msra.mxu1 %v8447_v2  ;;  %v825_v49 = vld [vmem:[#allocation2 + $0x8c] sm:$0x1]  ;;  %v837_v2 = vld [vmem:[#allocation2 + $0xbc] sm:$0x1] }
  0xa1   : > { %7893 = vmatprep.subr.bf16.mxu0 %v8446_v58  ;;  %7845 = vmatprep.subr.bf16.mxu1 %v8450_v18  ;;  %v826_v51 = vsel %vm8992_vm4, 0, %v825_v49  ;;  %v838_v3 = vsel %vm8992_vm4, 0, %v837_v2 }
  0xa2   : > { %7814 = vmatmul.mubr.bf16.gmra.mxu0 %v8428_v23  ;;  %7830 = vmatmul.mubr.bf16.gmra.mxu1 %v8434_v24  ;;  %v775_v23 = vld [vmem:[#allocation2 + $0x84] sm:$0x1]  ;;  %827 = vst [vmem:[#allocation2 + $0x8c] sm:$0x1] %v826_v51  ;;  %839 = vst [vmem:[#allocation2 + $0xbc] sm:$0x1] %v838_v3 }
  0xa3   : > { %7897 = vmatprep.mubr.bf16.mxu0 %v6994_v11  ;;  %v776_v24 = vsel %vm8985_vm2, 0, %v775_v23  ;;  %7849 = vmatprep.mubr.bf16.mxu1 %v6970_v48  ;;  %v1263_v51 = vld [vmem:[#allocation2 + $0xc] sm:$0xf] }
  0xa4   : > { %7894 = vmatpush3.bf16.msra.mxu0 %v8446_v58  ;;  %7846 = vmatpush3.bf16.msra.mxu1 %v8450_v18  ;;  %777 = vst [vmem:[#allocation2 + $0x84] sm:$0x1] %v776_v24  ;;  %v831_v58 = vld [vmem:[#allocation2 + $0xa4] sm:$0x1] }
  0xa5   : > { %7895 = vmatprep.subr.bf16.mxu0 %v8448_v1  ;;  %7847 = vmatprep.subr.bf16.mxu1 %v8453_v41  ;;  %v832_v59 = vsel %vm8992_vm4, 0, %v831_v58 }
  0xa6   : > { %833 = vst [vmem:[#allocation2 + $0xa4] sm:$0x1] %v832_v59 }
  0xa8   : > { %7896 = vmatpush3.bf16.msra.mxu0 %v8448_v1  ;;  %7848 = vmatpush3.bf16.msra.mxu1 %v8453_v41  ;;  %v841_v1 = vsel %vm8992_vm4, 0, %v840_v0 }
  0xa9   : > { %7929 = vmatprep.subr.bf16.mxu1 %v9052_v54  ;;  %842 = vst [vmem:[#allocation2 + $0xc8] sm:$0x1] %v841_v1  ;;  %7977 = vmatprep.subr.bf16.mxu0 %v9069_v4 }
 0x14a   : > { %v7803_v6 = vpop.f32.mrf.mxu0  ;;  %v7819_v7 = vpop.f32.mrf.mxu1 }
 0x14b   : > { %v584_v8 = vadd.f32 %v7803_v6, %v9075_v5  ;;  %v648_v9 = vadd.f32 %v7819_v7, %v9075_v5 }
 0x14c   : > { %v575_v10 = vpop.f32.mrf.mxu0  ;;  %v639_v11 = vpop.f32.mrf.mxu1 }
 0x14d   : > { %v704_v29 = vmax.f32 %v584_v8, 0.0  ;;  %v576_v12 = vadd.f32 %v9075_v5, %v575_v10  ;;  %v720_v13 = vmax.f32 %v648_v9, 0.0  ;;  %v640_v14 = vadd.f32 %v9075_v5, %v639_v11 }
 0x14e   : > { %v7804_v15 = vpop.f32.mrf.mxu0  ;;  %v7820_v20 = vpop.f32.mrf.mxu1 }
 0x14f   : > { %v7284_v16 = vpack.c.bf16 %v704_v29, %v704_v29  ;;  %v702_v17 = vmax.f32 %v576_v12, 0.0  ;;  %v587_v18 = vadd.f32 %v7804_v15, %v9075_v5  ;;  %v9082_v19 = vpack.c.bf16 %v720_v13, %v720_v13 }
 0x150   : > { %v578_v21 = vpop.f32.mrf.mxu0  ;;  %v718_v22 = vmax.f32 %v640_v14, 0.0  ;;  %v9085_v23 = vadd.f32 %v7820_v20, %v9075_v5 }
 0x151   : > { %v959_v24 = vshrl.u32 %v7284_v16, 16  ;;  %v962_v25 = vshll.u32 %v7284_v16, 16  ;;  %v7282_v27 = vpack.c.bf16 %v702_v17, %v702_v17  ;;  %v705_v28 = vmax.f32 %v587_v18, 0.0  ;;  %v1267_v17 = vld [vmem:[#allocation2 + $0x14] sm:$0x1] }
 0x152   : > { %v579_v30 = vadd.f32 %v9075_v5, %v578_v21  ;;  %v7807_v31 = vpop.f32.mrf.mxu0  ;;  %v1095_v32 = vshrl.u32 %v9082_v19, 16  ;;  %v1098_v33 = vshll.u32 %v9082_v19, 16  ;;  %v9090_v34 = vpack.c.bf16 %v718_v22, %v718_v22 }
 0x153   : > { %v961_v35 = vrot.slane %v959_v24, 7  ;;  %v942_v36 = vshrl.u32 %v7282_v27, 16  ;;  %v945_v37 = vshll.u32 %v7282_v27, 16  ;;  %v7285_v38 = vpack.c.bf16 %v705_v28, %v705_v28  ;;  %v1284_v28 = vld [vmem:[#allocation2 + $0x30] sm:$0xf] }
 0x154   : > { %v703_v41 = vmax.f32 %v579_v30, 0.0  ;;  %v600_v42 = vadd.f32 %v7807_v31, %v9075_v5  ;;  %v591_v43 = vpop.f32.mrf.mxu0  ;;  %v9099_v44 = vrot.slane %v1095_v32, 7  ;;  %v1078_v46 = vshrl.u32 %v9090_v34, 16 }
 0x155   : > { %v964_v47 = vor.u32 %v962_v25, %v961_v35  ;;  %v965_v48 = vrot.slane %v961_v35, 4  ;;  %v944_v49 = vrot.slane %v942_v36, 7  ;;  %v967_v50 = vshrl.u32 %v7285_v38, 16 }
 0x156   : > { %v970_v52 = vshll.u32 %v7285_v38, 16  ;;  %v7283_v53 = vpack.c.bf16 %v703_v41, %v703_v41  ;;  %v708_v55 = vmax.f32 %v600_v42, 0.0  ;;  %v592_v56 = vadd.f32 %v9075_v5, %v591_v43  ;;  %v7808_v57 = vpop.f32.mrf.mxu0 }
 0x157   : > { %v1271_v58 = vsel %vm9094_vm10, %v964_v47, %v1270_v40  ;;  %v947_v59 = vor.u32 %v945_v37, %v944_v49  ;;  %v948_v60 = vrot.slane %v944_v49, 4  ;;  %v969_v61 = vrot.slane %v967_v50, 7  ;;  %v1277_v50 = vld [vmem:[#allocation2 + $0x24] sm:$0xf] }
 0x158   : > { %1272 = vst [vmem:[#allocation2 + $0x18] sm:$0xf] %v1271_v58  ;;  %v950_v0 = vshrl.u32 %v7283_v53, 16  ;;  %v953_v1 = vshll.u32 %v7283_v53, 16  ;;  %v7288_v2 = vpack.c.bf16 %v708_v55, %v708_v55  ;;  %v706_v3 = vmax.f32 %v592_v56, 0.0  ;;  %v594_v6 = vpop.f32.mrf.mxu0 }
 0x159   : > { %v1264_v7 = vsel %vm9094_vm10, %v947_v59, %v1263_v51  ;;  %v972_v8 = vor.u32 %v970_v52, %v969_v61  ;;  %v974_v9 = vrot.slane %v969_v61, 4  ;;  %v603_v10 = vadd.f32 %v7808_v57, %v9075_v5  ;;  %v1288_v59 = vld [vmem:[#allocation2 + $0x38] sm:$0x1] }
 0x15a   : > { %1265 = vst [vmem:[#allocation2 + $0xc] sm:$0xf] %v1264_v7  ;;  %v952_v11 = vrot.slane %v950_v0, 7  ;;  %v993_v29 = vshrl.u32 %v7288_v2, 16  ;;  %v996_v12 = vshll.u32 %v7288_v2, 16  ;;  %v7286_v13 = vpack.c.bf16 %v706_v3, %v706_v3  ;;  %v7811_v14 = vpop.f32.mrf.mxu0 }
 0x15b   : > { %v973_v15 = vsel %vm9107_vm11, %v965_v48, %v972_v8  ;;  %v1275_v16 = vsel %vm8985_vm2, %v974_v9, %v1274_v63  ;;  %v709_v18 = vmax.f32 %v603_v10, 0.0  ;;  %v595_v20 = vadd.f32 %v9075_v5, %v594_v6  ;;  %v1281_v9 = vld [vmem:[#allocation2 + $0x2c] sm:$0x1] }
 0x15c   : > { %1273 = vst [vmem:[#allocation2 + $0x1c] sm:$0xf] %v973_v15  ;;  %1276 = vst [vmem:[#allocation2 + $0x20] sm:$0x1] %v1275_v16  ;;  %v955_v21 = vor.u32 %v953_v1, %v952_v11  ;;  %v957_v22 = vrot.slane %v952_v11, 4  ;;  %v995_v24 = vrot.slane %v993_v29, 7  ;;  %v607_v27 = vpop.f32.mrf.mxu0  ;;  %v616_v35 = vadd.f32 %v7811_v14, %v9075_v5 }
 0x15d   : > { %v976_v25 = vshrl.u32 %v7286_v13, 16  ;;  %v979_v30 = vshll.u32 %v7286_v13, 16  ;;  %v7289_v31 = vpack.c.bf16 %v709_v18, %v709_v18  ;;  %v707_v32 = vmax.f32 %v595_v20, 0.0 }
 0x15e   : > { %v956_v36 = vsel %vm9107_vm11, %v948_v60, %v955_v21  ;;  %v1268_v37 = vsel %vm8985_vm2, %v957_v22, %v1267_v17  ;;  %v998_v38 = vor.u32 %v996_v12, %v995_v24  ;;  %v999_v40 = vrot.slane %v995_v24, 4  ;;  %v7812_v41 = vpop.f32.mrf.mxu0  ;;  %v1326_v22 = vld [vmem:[#allocation2 + $0x78] sm:$0xf] }
 0x15f   : > { %1266 = vst [vmem:[#allocation2 + $0x10] sm:$0xf] %v956_v36  ;;  %1269 = vst [vmem:[#allocation2 + $0x14] sm:$0x1] %v1268_v37  ;;  %v978_v42 = vrot.slane %v976_v25, 7  ;;  %v1001_v43 = vshrl.u32 %v7289_v31, 16  ;;  %v7287_v48 = vpack.c.bf16 %v707_v32, %v707_v32  ;;  %v608_v52 = vadd.f32 %v9075_v5, %v607_v27 }
 0x160   : > { %v1004_v47 = vshll.u32 %v7289_v31, 16  ;;  %v1285_v49 = vsel %vm9094_vm10, %v998_v38, %v1284_v28  ;;  %v712_v51 = vmax.f32 %v616_v35, 0.0  ;;  %v619_v53 = vadd.f32 %v7812_v41, %v9075_v5  ;;  %v610_v55 = vpop.f32.mrf.mxu0  ;;  %v1298_v27 = vld [vmem:[#allocation2 + $0x48] sm:$0xf]  ;;  %v1291_v38 = vld [vmem:[#allocation2 + $0x3c] sm:$0xf] }
 0x161   : > { %1286 = vst [vmem:[#allocation2 + $0x30] sm:$0xf] %v1285_v49  ;;  %v981_v56 = vor.u32 %v979_v30, %v978_v42  ;;  %v982_v57 = vrot.slane %v978_v42, 4  ;;  %v1003_v58 = vrot.slane %v1001_v43, 7  ;;  %v984_v60 = vshrl.u32 %v7287_v48, 16 }
 0x162   : > { %v987_v61 = vshll.u32 %v7287_v48, 16  ;;  %v7292_v63 = vpack.c.bf16 %v712_v51, %v712_v51  ;;  %v710_v0 = vmax.f32 %v608_v52, 0.0  ;;  %v713_v1 = vmax.f32 %v619_v53, 0.0  ;;  %v7815_v8 = vpop.f32.mrf.mxu0  ;;  %v1302_v49 = vld [vmem:[#allocation2 + $0x50] sm:$0x1] }
 0x163   : > { %v1278_v2 = vsel %vm9094_vm10, %v981_v56, %v1277_v50  ;;  %v1006_v3 = vor.u32 %v1004_v47, %v1003_v58  ;;  %v1008_v6 = vrot.slane %v1003_v58, 4  ;;  %v986_v7 = vrot.slane %v984_v60, 7  ;;  %v1319_v58 = vld [vmem:[#allocation2 + $0x6c] sm:$0xf] }
 0x164   : > { %1279 = vst [vmem:[#allocation2 + $0x24] sm:$0xf] %v1278_v2  ;;  %v1027_v10 = vshrl.u32 %v7292_v63, 16  ;;  %v1030_v11 = vshll.u32 %v7292_v63, 16  ;;  %v7290_v29 = vpack.c.bf16 %v710_v0, %v710_v0  ;;  %v7293_v12 = vpack.c.bf16 %v713_v1, %v713_v1  ;;  %v623_v31 = vpop.f32.mrf.mxu0 }
 0x165   : > { %v1007_v13 = vsel %vm9107_vm11, %v999_v40, %v1006_v3  ;;  %v1289_v14 = vsel %vm8985_vm2, %v1008_v6, %v1288_v59  ;;  %v989_v15 = vor.u32 %v987_v61, %v986_v7  ;;  %v991_v16 = vrot.slane %v986_v7, 4 }
 0x166   : > { %1287 = vst [vmem:[#allocation2 + $0x34] sm:$0xf] %v1007_v13  ;;  %1290 = vst [vmem:[#allocation2 + $0x38] sm:$0x1] %v1289_v14  ;;  %v1029_v17 = vrot.slane %v1027_v10, 7  ;;  %v1010_v18 = vshrl.u32 %v7290_v29, 16  ;;  %v1100_v30 = vor.u32 %v1098_v33, %v9099_v44  ;;  %v611_v42 = vadd.f32 %v9075_v5, %v610_v55  ;;  %v642_v55 = vpop.f32.mrf.mxu1 }
 0x167   : > { %v1013_v20 = vshll.u32 %v7290_v29, 16  ;;  %v1035_v21 = vshrl.u32 %v7293_v12, 16  ;;  %v990_v24 = vsel %vm9107_vm11, %v982_v57, %v989_v15  ;;  %v1282_v25 = vsel %vm8985_vm2, %v991_v16, %v1281_v9  ;;  %v1295_v15 = vld [vmem:[#allocation2 + $0x44] sm:$0x1] }
 0x168   : > { %v1038_v28 = vshll.u32 %v7293_v12, 16  ;;  %1280 = vst [vmem:[#allocation2 + $0x28] sm:$0xf] %v990_v24  ;;  %1283 = vst [vmem:[#allocation2 + $0x2c] sm:$0x1] %v1282_v25  ;;  %v1032_v32 = vor.u32 %v1030_v11, %v1029_v17  ;;  %v1033_v35 = vrot.slane %v1029_v17, 4  ;;  %v1327_v41 = vsel %vm9094_vm10, %v1100_v30, %v1326_v22  ;;  %v7823_v13 = vpop.f32.mrf.mxu1 }
 0x169   : > { %v9141_v36 = vrot.slane %v1010_v18, 7  ;;  %v1037_v37 = vrot.slane %v1035_v21, 7  ;;  %v1101_v40 = vrot.slane %v9099_v44, 4  ;;  %v9149_v19 = vrot.slane %v1078_v46, 7  ;;  %1328 = vst [vmem:[#allocation2 + $0x78] sm:$0xf] %v1327_v41  ;;  %v7816_v46 = vpop.f32.mrf.mxu0 }
 0x16a   : > { %v1299_v33 = vsel %vm9094_vm10, %v1032_v32, %v1298_v27  ;;  %v711_v51 = vmax.f32 %v611_v42, 0.0  ;;  %v1081_v52 = vshll.u32 %v9090_v34, 16  ;;  %v632_v59 = vadd.f32 %v7815_v8, %v9075_v5  ;;  %v1330_v24 = vld [vmem:[#allocation2 + $0x80] sm:$0x1] }
 0x16b   : > { %v1015_v43 = vor.u32 %v1013_v20, %v9141_v36  ;;  %v1016_v47 = vrot.slane %v9141_v36, 4  ;;  %v1040_v48 = vor.u32 %v1038_v28, %v1037_v37  ;;  %1300 = vst [vmem:[#allocation2 + $0x48] sm:$0xf] %v1299_v33  ;;  %v1042_v50 = vrot.slane %v1037_v37, 4  ;;  %v1312_v33 = vld [vmem:[#allocation2 + $0x60] sm:$0xf] }
 0x16c   : > { %v1084_v53 = vrot.slane %v9149_v19, 4  ;;  %v721_v60 = vmax.f32 %v9085_v23, 0.0  ;;  %v7291_v61 = vpack.c.bf16 %v711_v51, %v711_v51  ;;  %v1083_v63 = vor.u32 %v1081_v52, %v9149_v19 }
 0x16d   : > { %v1292_v56 = vsel %vm9094_vm10, %v1015_v43, %v1291_v38  ;;  %v1041_v57 = vsel %vm9107_vm11, %v1033_v35, %v1040_v48  ;;  %v1303_v34 = vsel %vm8985_vm2, %v1042_v50, %v1302_v49  ;;  %v624_v0 = vadd.f32 %v9075_v5, %v623_v31  ;;  %v655_v38 = vpop.f32.mrf.mxu1  ;;  %v1305_v48 = vld [vmem:[#allocation2 + $0x54] sm:$0xf]  ;;  %v626_v50 = vpop.f32.mrf.mxu0 }
 0x16e   : > { %1293 = vst [vmem:[#allocation2 + $0x3c] sm:$0xf] %v1292_v56  ;;  %1301 = vst [vmem:[#allocation2 + $0x4c] sm:$0xf] %v1041_v57  ;;  %v716_v1 = vmax.f32 %v632_v59, 0.0  ;;  %v7301_v2 = vpack.c.bf16 %v721_v60, %v721_v60  ;;  %v643_v3 = vadd.f32 %v9075_v5, %v642_v55  ;;  %v635_v6 = vadd.f32 %v7816_v46, %v9075_v5 }
 0x16f   : > { %1304 = vst [vmem:[#allocation2 + $0x50] sm:$0x1] %v1303_v34  ;;  %v1018_v7 = vshrl.u32 %v7291_v61, 16  ;;  %v1021_v8 = vshll.u32 %v7291_v61, 16  ;;  %v1320_v23 = vsel %vm9094_vm10, %v1083_v63, %v1319_v58  ;;  %v714_v9 = vmax.f32 %v624_v0, 0.0  ;;  %v9194_v63 = vpop.f32.mrf.mxu1 }
 0x170   : > { %1321 = vst [vmem:[#allocation2 + $0x6c] sm:$0xf] %v1320_v23  ;;  %v7296_v10 = vpack.c.bf16 %v716_v1, %v716_v1  ;;  %v1103_v11 = vshrl.u32 %v7301_v2, 16  ;;  %v1106_v29 = vshll.u32 %v7301_v2, 16  ;;  %v719_v12 = vmax.f32 %v643_v3, 0.0 }
 0x171   : > { %v1020_v14 = vrot.slane %v1018_v7, 7  ;;  %v7294_v16 = vpack.c.bf16 %v714_v9, %v714_v9  ;;  %v717_v17 = vmax.f32 %v635_v6, 0.0  ;;  %v664_v18 = vadd.f32 %v7823_v13, %v9075_v5  ;;  %v1323_v58 = vld [vmem:[#allocation2 + $0x74] sm:$0x1]  ;;  %v1377_v61 = vld [vmem:[#allocation2 + $0xc] sm:$0xf] }
 0x172   : > { %v1061_v20 = vshrl.u32 %v7296_v10, 16  ;;  %v1064_v21 = vshll.u32 %v7296_v10, 16  ;;  %v1105_v22 = vrot.slane %v1103_v11, 7  ;;  %v7299_v25 = vpack.c.bf16 %v719_v12, %v719_v12  ;;  %v1316_v12 = vld [vmem:[#allocation2 + $0x68] sm:$0x1] }
 0x173   : > { %v1023_v27 = vor.u32 %v1021_v8, %v1020_v14  ;;  %v1025_v28 = vrot.slane %v1020_v14, 4  ;;  %v1044_v30 = vshrl.u32 %v7294_v16, 16  ;;  %v1047_v31 = vshll.u32 %v7294_v16, 16 }
 0x174   : > { %v9172_v32 = vrot.slane %v1061_v20, 7  ;;  %v1108_v35 = vor.u32 %v1106_v29, %v1105_v22  ;;  %v1110_v36 = vrot.slane %v1105_v22, 4  ;;  %v1086_v37 = vshrl.u32 %v7299_v25, 16  ;;  %v1379_v22 = vld [vmem:[#allocation2 + $0x18] sm:$0xf] }
 0x175   : > { %v1024_v41 = vsel %vm9107_vm11, %v1016_v47, %v1023_v27  ;;  %v1296_v42 = vsel %vm8985_vm2, %v1025_v28, %v1295_v15  ;;  %v9178_v43 = vrot.slane %v1044_v30, 7  ;;  %v1089_v49 = vshll.u32 %v7299_v25, 16  ;;  %v9208_v28 = vld [vmem:[#allocation2 + $0x10] sm:$0xf] }
 0x176   : > { %1294 = vst [vmem:[#allocation2 + $0x40] sm:$0xf] %v1024_v41  ;;  %1297 = vst [vmem:[#allocation2 + $0x44] sm:$0x1] %v1296_v42  ;;  %v1066_v51 = vor.u32 %v1064_v21, %v9172_v32  ;;  %v1067_v52 = vrot.slane %v9172_v32, 4  ;;  %v1109_v47 = vsel %vm9107_vm11, %v1101_v40, %v1108_v35  ;;  %v1331_v55 = vsel %vm8985_vm2, %v1110_v36, %v1330_v24 }
 0x177   : > { %1329 = vst [vmem:[#allocation2 + $0x7c] sm:$0xf] %v1109_v47  ;;  %1332 = vst [vmem:[#allocation2 + $0x80] sm:$0x1] %v1331_v55  ;;  %v1049_v46 = vor.u32 %v1047_v31, %v9178_v43  ;;  %v1050_v56 = vrot.slane %v9178_v43, 4  ;;  %v1088_v57 = vrot.slane %v1086_v37, 7  ;;  %v7297_v59 = vpack.c.bf16 %v717_v17, %v717_v17  ;;  %v658_v17 = vpop.f32.mrf.mxu1 }
 0x178   : > { %v1313_v60 = vsel %vm9094_vm10, %v1066_v51, %v1312_v33  ;;  %v724_v34 = vmax.f32 %v664_v18, 0.0  ;;  %v627_v44 = vadd.f32 %v9075_v5, %v626_v50  ;;  %v656_v40 = vadd.f32 %v9075_v5, %v655_v38  ;;  %v1340_v32 = vld [vmem:[#allocation2 + $0x90] sm:$0xf]  ;;  %v1309_v35 = vld [vmem:[#allocation2 + $0x5c] sm:$0x1] }
 0x179   : > { %1314 = vst [vmem:[#allocation2 + $0x60] sm:$0xf] %v1313_v60  ;;  %v1306_v0 = vsel %vm9094_vm10, %v1049_v46, %v1305_v48  ;;  %v1091_v1 = vor.u32 %v1089_v49, %v1088_v57  ;;  %v1093_v2 = vrot.slane %v1088_v57, 4  ;;  %v1069_v3 = vshrl.u32 %v7297_v59, 16  ;;  %v1333_v37 = vld [vmem:[#allocation2 + $0x84] sm:$0xf]  ;;  %v7827_v50 = vpop.f32.mrf.mxu1 }
 0x17a   : > { %1307 = vst [vmem:[#allocation2 + $0x54] sm:$0xf] %v1306_v0  ;;  %v1072_v6 = vshll.u32 %v7297_v59, 16  ;;  %v7304_v7 = vpack.c.bf16 %v724_v34, %v724_v34  ;;  %v715_v8 = vmax.f32 %v627_v44, 0.0  ;;  %v722_v23 = vmax.f32 %v656_v40, 0.0  ;;  %v8467_v57 = vld [vmem:[#allocation8 + $0xf0] sm:$0xff]  }
 0x17b   : > { %v1092_v9 = vsel %vm9107_vm11, %v1084_v53, %v1091_v1  ;;  %v1324_v10 = vsel %vm8985_vm2, %v1093_v2, %v1323_v58  ;;  %v1071_v11 = vrot.slane %v1069_v3, 7  ;;  %v1467_v29 = vshrl.u32 %v1377_v61, 16  ;;  %v9218_v49 = vld [vmem:[#allocation2 + $0x1c] sm:$0xf]  ;;  %v1381_v46 = vld [vmem:[#allocation2 + $0x24] sm:$0xf] }
 0x17c   : > { %1322 = vst [vmem:[#allocation2 + $0x70] sm:$0xf] %v1092_v9  ;;  %1325 = vst [vmem:[#allocation2 + $0x74] sm:$0x1] %v1324_v10  ;;  %v1129_v13 = vshrl.u32 %v7304_v7, 16  ;;  %v1132_v14 = vshll.u32 %v7304_v7, 16  ;;  %v7295_v15 = vpack.c.bf16 %v715_v8, %v715_v8  ;;  %v7302_v16 = vpack.c.bf16 %v722_v23, %v722_v23  ;;  %v671_v8 = vpop.f32.mrf.mxu1 }
 0x17d   : > { %v1074_v18 = vor.u32 %v1072_v6, %v1071_v11  ;;  %v1076_v20 = vrot.slane %v1071_v11, 4  ;;  %v9204_v21 = vrot.slane %v1467_v29, 4  ;;  %v1470_v19 = vshll.u32 %v1377_v61, 16  ;;  %v9231_v1 = vld [vmem:[#allocation2 + $0x28] sm:$0xf]  ;;  %v8470_v10 = vld [vmem:[#allocation8 + $0xe8] sm:$0xff]  }
 0x17e   : > { %v9206_v53 = vrot.slane %v1129_v13, 7  ;;  %v1052_v24 = vshrl.u32 %v7295_v15, 16  ;;  %v1055_v25 = vshll.u32 %v7295_v15, 16  ;;  %v1112_v27 = vshrl.u32 %v7302_v16, 16 }
 0x17f   : > { %v1075_v30 = vsel %vm9107_vm11, %v1067_v52, %v1074_v18  ;;  %v1317_v31 = vsel %vm8985_vm2, %v1076_v20, %v1316_v12  ;;  %v1115_v36 = vshll.u32 %v7302_v16, 16  ;;  %v1472_v38 = vrot.slane %v1470_v19, 5 }
 0x180   : > { %1315 = vst [vmem:[#allocation2 + $0x64] sm:$0xf] %v1075_v30  ;;  %1318 = vst [vmem:[#allocation2 + $0x68] sm:$0x1] %v1317_v31  ;;  %v1134_v41 = vor.u32 %v1132_v14, %v9206_v53  ;;  %v1135_v42 = vrot.slane %v9206_v53, 4  ;;  %v1054_v33 = vrot.slane %v1052_v24, 7  ;;  %v6995_v52 = vcombine.low %v1377_v61, %v9208_v28 }
 0x181   : > { %v9216_v48 = vrot.slane %v1112_v27, 7  ;;  %v1480_v51 = vshrl.u32 %v9208_v28, 16  ;;  %v1491_v47 = vshrl.u32 %v1379_v22, 16  ;;  %v1494_v55 = vshll.u32 %v1379_v22, 16  ;;  %v8472_v30 = vld [vmem:[#allocation8 + $0xe0] sm:$0xff]  }
 0x182   : > { %v1341_v58 = vsel %vm9094_vm10, %v1134_v41, %v1340_v32  ;;  %v1057_v59 = vor.u32 %v1055_v25, %v1054_v33  ;;  %v1059_v60 = vrot.slane %v1054_v33, 4  ;;  %7898 = vmatmul.mubr.bf16.vlgmr.msra.gmra.mxu0 %v6995_v52  ;;  %v1504_v61 = vshrl.u32 %v9218_v49, 16  ;;  %v7828_v41 = vpop.f32.mrf.mxu1  ;;  %v1337_v52 = vld [vmem:[#allocation2 + $0x8c] sm:$0x1] }
 0x183   : > { %v1117_v34 = vor.u32 %v1115_v36, %v9216_v48  ;;  %1342 = vst [vmem:[#allocation2 + $0x90] sm:$0xf] %v1341_v58  ;;  %v1118_v44 = vrot.slane %v9216_v48, 4  ;;  %v9226_v40 = vrot.slane %v1491_v47, 4  ;;  %v9228_v0 = vrot.slane %v1494_v55, 5  ;;  %7978 = vmatpush3.bf16.msra.mxu0 %v9069_v4 }
 0x184   : > { %v1058_v2 = vsel %vm9107_vm11, %v1050_v56, %v1057_v59  ;;  %v1310_v3 = vsel %vm8985_vm2, %v1059_v60, %v1309_v35  ;;  %v6996_v7 = vcombine.low %v1379_v22, %v9218_v49  ;;  %v667_v43 = vadd.f32 %v9194_v63, %v9075_v5  ;;  %7979 = vmatprep.subr.bf16.mxu0 %v8467_v57  ;;  %v1424_v63 = vld [vmem:[#allocation2 + $0x14] sm:$0x1]  ;;  %v1354_v60 = vld [vmem:[#allocation2 + $0xa8] sm:$0xf] }
 0x185   : > { %v1334_v6 = vsel %vm9094_vm10, %v1117_v34, %v1333_v37  ;;  %1308 = vst [vmem:[#allocation2 + $0x58] sm:$0xf] %v1058_v2  ;;  %1311 = vst [vmem:[#allocation2 + $0x5c] sm:$0x1] %v1310_v3  ;;  %v659_v23 = vadd.f32 %v9075_v5, %v658_v17  ;;  %v680_v56 = vadd.f32 %v7827_v50, %v9075_v5  ;;  %v1515_v11 = vshrl.u32 %v1381_v46, 16  ;;  %v8475_v2 = vld [vmem:[#allocation8 + $0xd8] sm:$0xff]  }
 0x186   : > { %1335 = vst [vmem:[#allocation2 + $0x84] sm:$0xf] %v1334_v6  ;;  %v672_v9 = vadd.f32 %v9075_v5, %v671_v8  ;;  %7901 = vmatprep.mubr.bf16.mxu0 %v6996_v7  ;;  %v1518_v29 = vshll.u32 %v1381_v46, 16  ;;  %v1528_v12 = vshrl.u32 %v9231_v1, 16  ;;  %v6997_v4 = vcombine.low %v1381_v46, %v9231_v1  ;;  %v9260_v37 = vld [vmem:[#allocation2 + $0x30] sm:$0xf] }
 0x187   : > { %v725_v13 = vmax.f32 %v667_v43, 0.0  ;;  %v723_v14 = vmax.f32 %v659_v23, 0.0  ;;  %v728_v15 = vmax.f32 %v680_v56, 0.0  ;;  %v9250_v18 = vrot.slane %v1515_v11, 4  ;;  %7980 = vmatpush3.bf16.msra.mxu0 %v8467_v57  ;;  %v1344_v50 = vld [vmem:[#allocation2 + $0x98] sm:$0x1]  ;;  %v674_v43 = vpop.f32.mrf.mxu1 }
 0x188   : > { %v726_v16 = vmax.f32 %v672_v9, 0.0  ;;  %v9252_v17 = vrot.slane %v1518_v29, 5  ;;  %v1473_v20 = vor.u32 %v1472_v38, %v9204_v21  ;;  %v1476_v19 = vshll.u32 %v9208_v28, 16  ;;  %7981 = vmatprep.subr.bf16.mxu0 %v8470_v10  ;;  %v1347_v11 = vld [vmem:[#allocation2 + $0x9c] sm:$0xf] }
 0x189   : > { %v7305_v22 = vpack.c.bf16 %v725_v13, %v725_v13  ;;  %v7303_v24 = vpack.c.bf16 %v723_v14, %v723_v14  ;;  %v7308_v25 = vpack.c.bf16 %v728_v15, %v728_v15  ;;  %v1482_v35 = vrot.slane %v1480_v51, 4  ;;  %v9276_v15 = vld [vmem:[#allocation2 + $0x34] sm:$0xf] }
 0x18a   : > { %v7306_v27 = vpack.c.bf16 %v726_v16, %v726_v16  ;;  %v9256_v31 = vrot.slane %v1473_v20, 4  ;;  %v9258_v32 = vrot.slane %v1476_v19, 5  ;;  %v1486_v36 = vshll.u32 %v1424_v63, 16  ;;  %7902 = vmatmul.mubr.bf16.gmra.mxu0 %v6997_v4 }
 0x18b   : > { %v1137_v33 = vshrl.u32 %v7305_v22, 16  ;;  %v1140_v21 = vshll.u32 %v7305_v22, 16  ;;  %v1120_v38 = vshrl.u32 %v7303_v24, 16  ;;  %v1123_v28 = vshll.u32 %v7303_v24, 16  ;;  %7982 = vmatpush3.bf16.msra.mxu0 %v8470_v10  ;;  %v8477_v22 = vld [vmem:[#allocation8 + $0xd0] sm:$0xff]  }
 0x18c   : > { %v1163_v47 = vshrl.u32 %v7308_v25, 16  ;;  %v1166_v55 = vshll.u32 %v7308_v25, 16  ;;  %v1146_v46 = vshrl.u32 %v7306_v27, 16  ;;  %v1149_v57 = vshll.u32 %v7306_v27, 16  ;;  %7983 = vmatprep.subr.bf16.mxu0 %v8472_v30  ;;  %v9296_v25 = vld [vmem:[#allocation2 + $0x20] sm:$0x1] }
 0x18d   : > { %v1139_v58 = vrot.slane %v1137_v33, 7  ;;  %v1122_v59 = vrot.slane %v1120_v38, 7  ;;  %v1479_v51 = vsel %vm9040_vm7, %v9256_v31, %v9258_v32  ;;  %v1483_v34 = vor.u32 %v1482_v35, %v9258_v32  ;;  %v9310_v38 = vld [vmem:[#allocation2 + $0x3c] sm:$0xf] }
 0x18e   : > { %v9267_v3 = vrot.slane %v1163_v47, 7  ;;  %v9269_v6 = vrot.slane %v1146_v46, 7  ;;  %v1488_v7 = vrot.slane %v1486_v36, 5  ;;  %v1539_v8 = vshrl.u32 %v9260_v37, 16  ;;  %v8480_v47 = vld [vmem:[#allocation8 + $0xc8] sm:$0xff]  }
 0x18f   : > { %v1142_v23 = vor.u32 %v1140_v21, %v1139_v58  ;;  %v1144_v56 = vrot.slane %v1139_v58, 4  ;;  %v1125_v9 = vor.u32 %v1123_v28, %v1122_v59  ;;  %v1127_v10 = vrot.slane %v1122_v59, 4  ;;  %7984 = vmatpush3.bf16.msra.mxu0 %v8472_v30 }
 0x190   : > { %v1168_v29 = vor.u32 %v1166_v55, %v9267_v3  ;;  %v1169_v4 = vrot.slane %v9267_v3, 4  ;;  %v1151_v13 = vor.u32 %v1149_v57, %v9269_v6  ;;  %v1152_v14 = vrot.slane %v9269_v6, 4  ;;  %7985 = vmatprep.subr.bf16.mxu0 %v8475_v2 }
 0x191   : > { %v1143_v16 = vsel %vm9107_vm11, %v1135_v42, %v1142_v23  ;;  %v1345_v63 = vsel %vm8985_vm2, %v1144_v56, %v1344_v50  ;;  %v1126_v20 = vsel %vm9107_vm11, %v1118_v44, %v1125_v9  ;;  %v1338_v19 = vsel %vm8985_vm2, %v1127_v10, %v1337_v52  ;;  %v7831_v44 = vpop.f32.mrf.mxu1  ;;  %v8458_v52 = vld [vmem:[#allocation8 + $0xb0] sm:$0xff]  }
 0x192   : > { %1343 = vst [vmem:[#allocation2 + $0x94] sm:$0xf] %v1143_v16  ;;  %1346 = vst [vmem:[#allocation2 + $0x98] sm:$0x1] %v1345_v63  ;;  %v1355_v53 = vsel %vm9094_vm10, %v1168_v29, %v1354_v60  ;;  %v1348_v42 = vsel %vm9094_vm10, %v1151_v13, %v1347_v11  ;;  %v1484_v24 = vrot.slane %v1483_v34, 4  ;;  %v9294_v48 = vrot.slane %v1539_v8, 4 }
 0x193   : > { %1336 = vst [vmem:[#allocation2 + $0x88] sm:$0xf] %v1126_v20  ;;  %1339 = vst [vmem:[#allocation2 + $0x8c] sm:$0x1] %v1338_v19  ;;  %v1542_v27 = vshll.u32 %v9260_v37, 16  ;;  %v1552_v30 = vshrl.u32 %v9276_v15, 16  ;;  %v6998_v31 = vcombine.low %v9260_v37, %v9276_v15  ;;  %v683_v32 = vadd.f32 %v7828_v41, %v9075_v5  ;;  %7986 = vmatpush3.bf16.msra.mxu0 %v8475_v2 }
 0x194   : > { %1356 = vst [vmem:[#allocation2 + $0xa8] sm:$0xf] %v1355_v53  ;;  %1349 = vst [vmem:[#allocation2 + $0x9c] sm:$0xf] %v1348_v42  ;;  %v1489_v35 = vsel %vm9040_vm7, %v1484_v24, %v1488_v7  ;;  %v1497_v36 = vor.u32 %v9228_v0, %v9226_v40  ;;  %v1500_v33 = vshll.u32 %v9218_v49, 16  ;;  %v1506_v21 = vrot.slane %v1504_v61, 4  ;;  %7987 = vmatprep.subr.bf16.mxu0 %v8477_v22  ;;  %v687_v61 = vpop.f32.mrf.mxu1 }
 0x195   : > { %v6971_v28 = vcombine.low %v1479_v51, %v1489_v35  ;;  %v9312_v50 = vrot.slane %v1542_v27, 5  ;;  %7905 = vmatprep.mubr.bf16.mxu0 %v6998_v31  ;;  %v729_v37 = vmax.f32 %v683_v32, 0.0  ;;  %v1510_v41 = vshll.u32 %v9296_v25, 16  ;;  %v9322_v7 = vld [vmem:[#allocation2 + $0x40] sm:$0xf]  ;;  %v8482_v29 = vld [vmem:[#allocation8 + $0xc0] sm:$0xff]  }
 0x196   : > { %v1498_v55 = vrot.slane %v1497_v36, 4  ;;  %v1502_v40 = vrot.slane %v1500_v33, 5  ;;  %v675_v0 = vadd.f32 %v9075_v5, %v674_v43  ;;  %v696_v49 = vadd.f32 %v7831_v44, %v9075_v5  ;;  %v1358_v16 = vld [vmem:[#allocation2 + $0xb0] sm:$0x1]  ;;  %v8464_v44 = vld [vmem:[#allocation8 + $0xa0] sm:$0xff]  }
 0x197   : > { %7850 = vmatmul.mubr.bf16.vlgmr.msra.gmra.mxu1 %v6971_v28  ;;  %v7309_v46 = vpack.c.bf16 %v729_v37, %v729_v37  ;;  %v1512_v57 = vrot.slane %v1510_v41, 5  ;;  %v688_v58 = vadd.f32 %v9075_v5, %v687_v61  ;;  %v1563_v59 = vshrl.u32 %v9310_v38, 16  ;;  %7988 = vmatpush3.bf16.msra.mxu0 %v8477_v22  ;;  %v8461_v5 = vld [vmem:[#allocation8 + $0xa8] sm:$0xff]   ;;  %v9332_v27 = vld [vmem:[#allocation8 + $0x178] sm:$0xff]  }
 0x198   : > { %7930 = vmatpush3.bf16.msra.mxu1 %v9052_v54  ;;  %v1503_v60 = vsel %vm9040_vm7, %v1498_v55, %v1502_v40  ;;  %v1507_v51 = vor.u32 %v1506_v21, %v1502_v40  ;;  %v727_v34 = vmax.f32 %v675_v0, 0.0  ;;  %v732_v2 = vmax.f32 %v696_v49, 0.0  ;;  %7989 = vmatprep.subr.bf16.mxu0 %v8480_v47  ;;  %v1351_v36 = vld [vmem:[#allocation2 + $0xa4] sm:$0x1]  ;;  %v1368_v21 = vld [vmem:[#allocation2 + $0xc0] sm:$0xf] }
 0x199   : > { %v1171_v8 = vshrl.u32 %v7309_v46, 16  ;;  %v1174_v43 = vshll.u32 %v7309_v46, 16  ;;  %v730_v23 = vmax.f32 %v688_v58, 0.0  ;;  %v9324_v56 = vrot.slane %v1563_v59, 4  ;;  %7931 = vmatprep.subr.bf16.mxu1 %v8458_v52  ;;  %v9336_v55 = vld [vmem:[#allocation2 + $0x2c] sm:$0x1]  ;;  %v7832_v58 = vpop.f32.mrf.mxu1 }
 0x19a   : > { %v1508_v9 = vrot.slane %v1507_v51, 4  ;;  %v7307_v10 = vpack.c.bf16 %v727_v34, %v727_v34  ;;  %v7312_v54 = vpack.c.bf16 %v732_v2, %v732_v2  ;;  %v1566_v11 = vshll.u32 %v9310_v38, 16 }
 0x19b   : > { %v1173_v13 = vrot.slane %v1171_v8, 7  ;;  %v7310_v63 = vpack.c.bf16 %v730_v23, %v730_v23  ;;  %v1576_v20 = vshrl.u32 %v9322_v7, 16  ;;  %v6999_v19 = vcombine.low %v9310_v38, %v9322_v7  ;;  %7990 = vmatpush3.bf16.msra.mxu0 %v8480_v47 }
 0x19c   : > { %v1513_v22 = vsel %vm9040_vm7, %v1508_v9, %v1512_v57  ;;  %v1154_v53 = vshrl.u32 %v7307_v10, 16  ;;  %v1157_v42 = vshll.u32 %v7307_v10, 16  ;;  %v1197_v24 = vshrl.u32 %v7312_v54, 16  ;;  %7932 = vmatpush3.bf16.msra.mxu1 %v8458_v52  ;;  %7991 = vmatprep.subr.bf16.mxu0 %v8482_v29  ;;  %v1387_v57 = vld [vmem:[#allocation2 + $0x48] sm:$0xf] }
 0x19d   : > { %v1176_v31 = vor.u32 %v1174_v43, %v1173_v13  ;;  %v1178_v32 = vrot.slane %v1173_v13, 4  ;;  %v6972_v35 = vcombine.low %v1503_v60, %v1513_v22  ;;  %v1200_v33 = vshll.u32 %v7312_v54, 16  ;;  %7906 = vmatmul.mubr.bf16.gmra.mxu0 %v6999_v19  ;;  %7933 = vmatprep.subr.bf16.mxu1 %v8461_v5  ;;  %v1361_v43 = vld [vmem:[#allocation2 + $0xb4] sm:$0xf] }
 0x19e   : > { %v1156_v38 = vrot.slane %v1154_v53, 7  ;;  %v9334_v28 = vrot.slane %v1197_v24, 7  ;;  %v1180_v37 = vshrl.u32 %v7310_v63, 16  ;;  %v1183_v41 = vshll.u32 %v7310_v63, 16  ;;  %v1389_v22 = vld [vmem:[#allocation2 + $0x54] sm:$0xf] }
 0x19f   : > { %v1177_v52 = vsel %vm9107_vm11, %v1169_v4, %v1176_v31  ;;  %v1359_v47 = vsel %vm8985_vm2, %v1178_v32, %v1358_v16  ;;  %7853 = vmatprep.mubr.bf16.mxu1 %v6972_v35  ;;  %v9344_v40 = vrot.slane %v1566_v11, 5  ;;  %v1521_v0 = vor.u32 %v9252_v17, %v9250_v18  ;;  %v8469_v4 = vld [vmem:[#allocation8 + $0x98] sm:$0xff]   ;;  %7992 = vmatpush3.bf16.msra.mxu0 %v8482_v29  ;;  %v9355_v17 = vld [vmem:[#allocation2 + $0x4c] sm:$0xf]  ;;  %v9371_v11 = vld [vmem:[#allocation2 + $0x38] sm:$0x1]  ;;  %v690_v29 = vpop.f32.mrf.mxu1 }
 0x1a0   : > { %1357 = vst [vmem:[#allocation2 + $0xac] sm:$0xf] %v1177_v52  ;;  %1360 = vst [vmem:[#allocation2 + $0xb0] sm:$0x1] %v1359_v47  ;;  %v1159_v49 = vor.u32 %v1157_v42, %v1156_v38  ;;  %v1161_v61 = vrot.slane %v1156_v38, 4  ;;  %v1202_v46 = vor.u32 %v1200_v33, %v9334_v28  ;;  %v1203_v3 = vrot.slane %v9334_v28, 4  ;;  %7934 = vmatpush3.bf16.msra.mxu1 %v8461_v5 }
 0x1a1   : > { %v9350_v59 = vrot.slane %v1180_v37, 7  ;;  %v1522_v60 = vrot.slane %v1521_v0, 4  ;;  %v1524_v51 = vshll.u32 %v9231_v1, 16  ;;  %v1530_v18 = vrot.slane %v1528_v12, 4  ;;  %7935 = vmatprep.subr.bf16.mxu1 %v8464_v44  ;;  %8073 = vmatprep.subr.bf16.mxu0 %v9332_v27  ;;  %v8474_v53 = vld [vmem:[#allocation8 + $0x90] sm:$0xff]  }
 0x1a2   : > { %v1160_v34 = vsel %vm9107_vm11, %v1152_v14, %v1159_v49  ;;  %v1352_v2 = vsel %vm8985_vm2, %v1161_v61, %v1351_v36  ;;  %v1369_v8 = vsel %vm9094_vm10, %v1202_v46, %v1368_v21  ;;  %v1534_v1 = vshll.u32 %v9336_v55, 16  ;;  %v8563_v24 = vld [vmem:[%s11425_s2] ss:$0 sm:$0xff]  ;;  %v9396_v46 = vld [vmem:[#allocation2 + $0x44] sm:$0x1] }
 0x1a3   : > { %1350 = vst [vmem:[#allocation2 + $0xa0] sm:$0xf] %v1160_v34  ;;  %1353 = vst [vmem:[#allocation2 + $0xa4] sm:$0x1] %v1352_v2  ;;  %v1185_v12 = vor.u32 %v1183_v41, %v9350_v59  ;;  %v1186_v23 = vrot.slane %v9350_v59, 4  ;;  %v1526_v6 = vrot.slane %v1524_v51, 5  ;;  %v7000_v54 = vcombine.low %v1387_v57, %v9355_v17 }
 0x1a4   : > { %1370 = vst [vmem:[#allocation2 + $0xc0] sm:$0xf] %v1369_v8  ;;  %v1587_v5 = vshrl.u32 %v1387_v57, 16  ;;  %v1536_v9 = vrot.slane %v1534_v1, 5  ;;  %v1590_v14 = vshll.u32 %v1387_v57, 16  ;;  %v1600_v10 = vshrl.u32 %v9355_v17, 16  ;;  %7936 = vmatpush3.bf16.msra.mxu1 %v8464_v44 }
 0x1a5   : > { %v1362_v13 = vsel %vm9094_vm10, %v1185_v12, %v1361_v43  ;;  %v1527_v16 = vsel %vm9040_vm7, %v1522_v60, %v1526_v6  ;;  %v1531_v63 = vor.u32 %v1530_v18, %v1526_v6  ;;  %7937 = vmatprep.subr.bf16.mxu1 %v8469_v4  ;;  %7909 = vmatprep.mubr.bf16.mxu0 %v7000_v54  ;;  %v1548_v31 = vshll.u32 %v9276_v15, 16  ;;  %v9390_v41 = vld [vmem:[#allocation2 + $0x58] sm:$0xf]  ;;  %v8479_v57 = vld [vmem:[#allocation8 + $0x88] sm:$0xff]   ;;  %v1372_v43 = vld [vmem:[#allocation2 + $0xc8] sm:$0x1] }
 0x1a6   : > { %v9377_v19 = vrot.slane %v1587_v5, 4  ;;  %1363 = vst [vmem:[#allocation2 + $0xb4] sm:$0xf] %v1362_v13  ;;  %v9379_v42 = vrot.slane %v1590_v14, 5  ;;  %v699_v44 = vadd.f32 %v8563_v24, %v7832_v58  ;;  %v1545_v39 = vor.u32 %v9312_v50, %v9294_v48  ;;  %v9439_v59 = vld [vmem:[#allocation2 + $0x70] sm:$0xf] }
 0x1a7   : > { %v1532_v32 = vrot.slane %v1531_v63, 4  ;;  %v1554_v35 = vrot.slane %v1552_v30, 4  ;;  %v1558_v36 = vshll.u32 %v9371_v11, 16  ;;  %v691_v33 = vadd.f32 %v8563_v24, %v690_v29  ;;  %v1365_v24 = vld [vmem:[#allocation2 + $0xbc] sm:$0x1] }
 0x1a8   : > { %v733_v21 = vmax.f32 %v699_v44, 0.0  ;;  %v1546_v38 = vrot.slane %v1545_v39, 4  ;;  %v1550_v37 = vrot.slane %v1548_v31, 5  ;;  %v1611_v52 = vshrl.u32 %v1389_v22, 16  ;;  %7938 = vmatpush3.bf16.msra.mxu1 %v8469_v4  ;;  %v9412_v31 = vld [vmem:[#allocation2 + $0x64] sm:$0xf] }
 0x1a9   : > { %v1537_v47 = vsel %vm9040_vm7, %v1532_v32, %v1536_v9  ;;  %v1560_v48 = vrot.slane %v1558_v36, 5  ;;  %v731_v50 = vmax.f32 %v691_v33, 0.0  ;;  %v1614_v0 = vshll.u32 %v1389_v22, 16  ;;  %7939 = vmatprep.subr.bf16.mxu1 %v8474_v53  ;;  %v1391_v9 = vld [vmem:[#allocation2 + $0x60] sm:$0xf] }
 0x1aa   : > { %v6973_v49 = vcombine.low %v1527_v16, %v1537_v47  ;;  %v7313_v15 = vpack.c.bf16 %v733_v21, %v733_v21  ;;  %v1551_v30 = vsel %vm9040_vm7, %v1546_v38, %v1550_v37  ;;  %v1555_v61 = vor.u32 %v1554_v35, %v1550_v37  ;;  %v8483_v16 = vld [vmem:[#allocation8 + $0x80] sm:$0xff]   ;;  %v9416_v21 = vld [vmem:[#allocation8 + $0x138] sm:$0xff]  }
 0x1ab   : > { %v7311_v58 = vpack.c.bf16 %v731_v50, %v731_v50  ;;  %v9398_v60 = vrot.slane %v1611_v52, 4  ;;  %v9400_v4 = vrot.slane %v1614_v0, 5  ;;  %v1624_v51 = vshrl.u32 %v9390_v41, 16  ;;  %v1393_v50 = vld [vmem:[#allocation2 + $0x6c] sm:$0xf] }
 0x1ac   : > { %7854 = vmatmul.mubr.bf16.gmra.mxu1 %v6973_v49  ;;  %v1205_v18 = vshrl.u32 %v7313_v15, 16  ;;  %v1208_v34 = vshll.u32 %v7313_v15, 16  ;;  %v1556_v2 = vrot.slane %v1555_v61, 4  ;;  %v7001_v8 = vcombine.low %v1389_v22, %v9390_v41 }
 0x1ad   : > { %v1188_v1 = vshrl.u32 %v7311_v58, 16  ;;  %v1191_v12 = vshll.u32 %v7311_v58, 16  ;;  %v1569_v6 = vor.u32 %v9344_v40, %v9324_v56  ;;  %v1572_v5 = vshll.u32 %v9322_v7, 16  ;;  %7940 = vmatpush3.bf16.msra.mxu1 %v8474_v53 }
 0x1ae   : > { %v1207_v14 = vrot.slane %v1205_v18, 7  ;;  %v1561_v54 = vsel %vm9040_vm7, %v1556_v2, %v1560_v48  ;;  %7910 = vmatmul.mubr.bf16.gmra.mxu0 %v7001_v8  ;;  %v1578_v29 = vrot.slane %v1576_v20, 4  ;;  %v1582_v13 = vshll.u32 %v9396_v46, 16  ;;  %7941 = vmatprep.subr.bf16.mxu1 %v8479_v57  ;;  %v9426_v48 = vld [vmem:[#allocation2 + $0x50] sm:$0x1] }
 0x1af   : > { %v6974_v63 = vcombine.low %v1551_v30, %v1561_v54  ;;  %v1190_v22 = vrot.slane %v1188_v1, 7  ;;  %v1570_v56 = vrot.slane %v1569_v6, 4  ;;  %v1574_v40 = vrot.slane %v1572_v5, 5  ;;  %v1395_v18 = vld [vmem:[#allocation2 + $0x78] sm:$0xf] }
 0x1b0   : > { %v1210_v44 = vor.u32 %v1208_v34, %v1207_v14  ;;  %v1212_v39 = vrot.slane %v1207_v14, 4  ;;  %v1584_v53 = vrot.slane %v1582_v13, 5  ;;  %v1635_v32 = vshrl.u32 %v1391_v9, 16  ;;  %v9451_v6 = vld [vmem:[#allocation2 + $0x7c] sm:$0xf] }
 0x1b1   : > { %7857 = vmatprep.mubr.bf16.mxu1 %v6974_v63  ;;  %v1193_v35 = vor.u32 %v1191_v12, %v1190_v22  ;;  %v1195_v36 = vrot.slane %v1190_v22, 4  ;;  %v1575_v20 = vsel %vm9040_vm7, %v1570_v56, %v1574_v40  ;;  %v1579_v33 = vor.u32 %v1578_v29, %v1574_v40  ;;  %7942 = vmatpush3.bf16.msra.mxu1 %v8479_v57  ;;  %v9461_v22 = vld [vmem:[#allocation2 + $0x68] sm:$0x1] }
 0x1b2   : > { %v1211_v38 = vsel %vm9107_vm11, %v1203_v3, %v1210_v44  ;;  %v1373_v37 = vsel %vm8985_vm2, %v1212_v39, %v1372_v43  ;;  %v9424_v52 = vrot.slane %v1635_v32, 4  ;;  %v1638_v47 = vshll.u32 %v1391_v9, 16  ;;  %7943 = vmatprep.subr.bf16.mxu1 %v8483_v16 }
 0x1b3   : > { %1371 = vst [vmem:[#allocation2 + $0xc4] sm:$0xf] %v1211_v38  ;;  %1374 = vst [vmem:[#allocation2 + $0xc8] sm:$0x1] %v1373_v37  ;;  %v1194_v28 = vsel %vm9107_vm11, %v1186_v23, %v1193_v35  ;;  %v1366_v3 = vsel %vm8985_vm2, %v1195_v36, %v1365_v24  ;;  %v1580_v0 = vrot.slane %v1579_v33, 4  ;;  %v1648_v49 = vshrl.u32 %v9412_v31, 16 }
 0x1b4   : > { %1364 = vst [vmem:[#allocation2 + $0xb8] sm:$0xf] %v1194_v28  ;;  %1367 = vst [vmem:[#allocation2 + $0xbc] sm:$0x1] %v1366_v3  ;;  %v1640_v15 = vrot.slane %v1638_v47, 5  ;;  %v7002_v30 = vcombine.low %v1391_v9, %v9412_v31  ;;  %v1593_v61 = vor.u32 %v9379_v42, %v9377_v19  ;;  %v1596_v57 = vshll.u32 %v9355_v17, 16 }
 0x1b5   : > { %v1585_v62 = vsel %vm9040_vm7, %v1580_v0, %v1584_v53  ;;  %v1602_v26 = vrot.slane %v1600_v10, 4  ;;  %v1606_v23 = vshll.u32 %v9426_v48, 16  ;;  %v1659_v58 = vshrl.u32 %v1393_v50, 16  ;;  %7944 = vmatpush3.bf16.msra.mxu1 %v8483_v16  ;;  %v9446_v42 = vld [vmem:[#allocation2 + $0x5c] sm:$0x1] }
 0x1b6   : > { %v6975_v34 = vcombine.low %v1575_v20, %v1585_v62  ;;  %7913 = vmatprep.mubr.bf16.mxu0 %v7002_v30  ;;  %v1594_v2 = vrot.slane %v1593_v61, 4  ;;  %v1598_v8 = vrot.slane %v1596_v57, 5  ;;  %v1662_v19 = vshll.u32 %v1393_v50, 16  ;;  %8025 = vmatprep.subr.bf16.mxu1 %v9416_v21  ;;  %v9471_v33 = vld [vmem:[#allocation2 + $0x88] sm:$0xf] }
 0x1b7   : > { %v1608_v43 = vrot.slane %v1606_v23, 5  ;;  %v1661_v1 = vrot.slane %v1659_v58, 4  ;;  %v1672_v12 = vshrl.u32 %v9439_v59, 16  ;;  %v7003_v10 = vcombine.low %v1393_v50, %v9439_v59  ;;  %v9478_v62 = vld [vmem:[#allocation2 + $0x74] sm:$0x1] }
 0x1b8   : > { %7858 = vmatmul.mubr.bf16.gmra.mxu1 %v6975_v34  ;;  %v1599_v5 = vsel %vm9040_vm7, %v1594_v2, %v1598_v8  ;;  %v1603_v9 = vor.u32 %v1602_v26, %v1598_v8  ;;  %v1664_v14 = vrot.slane %v1662_v19, 5  ;;  %v1617_v54 = vor.u32 %v9400_v4, %v9398_v60  ;;  %v1397_v4 = vld [vmem:[#allocation2 + $0x84] sm:$0xf] }
 0x1b9   : > { %7914 = vmatmul.mubr.bf16.gmra.mxu0 %v7003_v10  ;;  %v1620_v29 = vshll.u32 %v9390_v41, 16  ;;  %v1626_v13 = vrot.slane %v1624_v51, 4  ;;  %v1630_v16 = vshll.u32 %v9446_v42, 16  ;;  %v1683_v63 = vshrl.u32 %v1395_v18, 16 }
 0x1ba   : > { %v1604_v24 = vrot.slane %v1603_v9, 4  ;;  %v1618_v56 = vrot.slane %v1617_v54, 4  ;;  %v1686_v40 = vshll.u32 %v1395_v18, 16  ;;  %v1696_v44 = vshrl.u32 %v9451_v6, 16 }
 0x1bb   : > { %v1622_v39 = vrot.slane %v1620_v29, 5  ;;  %v1632_v53 = vrot.slane %v1630_v16, 5  ;;  %v9464_v32 = vrot.slane %v1683_v63, 4  ;;  %v7004_v60 = vcombine.low %v1395_v18, %v9451_v6  ;;  %v1399_v18 = vld [vmem:[#allocation2 + $0x90] sm:$0xf] }
 0x1bc   : > { %v1609_v51 = vsel %vm9040_vm7, %v1604_v24, %v1608_v43  ;;  %v1688_v35 = vrot.slane %v1686_v40, 5  ;;  %v1641_v36 = vor.u32 %v1640_v15, %v9424_v52  ;;  %v1644_v20 = vshll.u32 %v9412_v31, 16  ;;  %v9485_v43 = vld [vmem:[#allocation2 + $0x94] sm:$0xf]  ;;  %v9488_v24 = vld [vmem:[#allocation2 + $0x80] sm:$0x1] }
 0x1bd   : > { %v6976_v38 = vcombine.low %v1599_v5, %v1609_v51  ;;  %v1623_v37 = vsel %vm9040_vm7, %v1618_v56, %v1622_v39  ;;  %v1627_v47 = vor.u32 %v1626_v13, %v1622_v39  ;;  %7917 = vmatprep.mubr.bf16.mxu0 %v7004_v60  ;;  %v1650_v50 = vrot.slane %v1648_v49, 4  ;;  %v1401_v39 = vld [vmem:[#allocation2 + $0x9c] sm:$0xf] }
 0x1be   : > { %v1642_v28 = vrot.slane %v1641_v36, 4  ;;  %v1646_v3 = vrot.slane %v1644_v20, 5  ;;  %v1654_v0 = vshll.u32 %v9461_v22, 16  ;;  %v1707_v30 = vshrl.u32 %v1397_v4, 16 }
 0x1bf   : > { %7861 = vmatprep.mubr.bf16.mxu1 %v6976_v38  ;;  %v1628_v61 = vrot.slane %v1627_v47, 4  ;;  %v1710_v57 = vshll.u32 %v1397_v4, 16  ;;  %v1720_v52 = vshrl.u32 %v9471_v33, 16  ;;  %v7005_v15 = vcombine.low %v1397_v4, %v9471_v33 }
 0x1c0   : > { %v1647_v26 = vsel %vm9040_vm7, %v1642_v28, %v1646_v3  ;;  %v1651_v23 = vor.u32 %v1650_v50, %v1646_v3  ;;  %v1656_v58 = vrot.slane %v1654_v0, 5  ;;  %v1709_v49 = vrot.slane %v1707_v30, 4  ;;  %v9501_v0 = vld [vmem:[#allocation2 + $0x8c] sm:$0x1] }
 0x1c1   : > { %v1633_v34 = vsel %vm9040_vm7, %v1628_v61, %v1632_v53  ;;  %v1712_v2 = vrot.slane %v1710_v57, 5  ;;  %7918 = vmatmul.mubr.bf16.gmra.mxu0 %v7005_v15  ;;  %v1665_v8 = vor.u32 %v1664_v14, %v1661_v1  ;;  %v1668_v19 = vshll.u32 %v9439_v59, 16  ;;  %v9494_v53 = vld [vmem:[#allocation2 + $0xa0] sm:$0xf] }
 0x1c2   : > { %v6977_v10 = vcombine.low %v1623_v37, %v1633_v34  ;;  %v1652_v5 = vrot.slane %v1651_v23, 4  ;;  %v1674_v9 = vrot.slane %v1672_v12, 4  ;;  %v1678_v54 = vshll.u32 %v9478_v62, 16 }
 0x1c3   : > { %v1666_v29 = vrot.slane %v1665_v8, 4  ;;  %v1670_v13 = vrot.slane %v1668_v19, 5  ;;  %v1731_v16 = vshrl.u32 %v1399_v18, 16  ;;  %v1734_v63 = vshll.u32 %v1399_v18, 16 }
 0x1c4   : > { %7862 = vmatmul.mubr.bf16.gmra.mxu1 %v6977_v10  ;;  %v1657_v56 = vsel %vm9040_vm7, %v1652_v5, %v1656_v58  ;;  %v1680_v1 = vrot.slane %v1678_v54, 5  ;;  %v1744_v14 = vshrl.u32 %v9485_v43, 16  ;;  %v7006_v40 = vcombine.low %v1399_v18, %v9485_v43  ;;  %v9507_v58 = vld [vmem:[#allocation2 + $0xac] sm:$0xf] }
 0x1c5   : > { %v6978_v12 = vcombine.low %v1647_v26, %v1657_v56  ;;  %v1671_v60 = vsel %vm9040_vm7, %v1666_v29, %v1670_v13  ;;  %v1675_v4 = vor.u32 %v1674_v9, %v1670_v13  ;;  %v1733_v51 = vrot.slane %v1731_v16, 4  ;;  %v1403_v26 = vld [vmem:[#allocation2 + $0xa8] sm:$0xf]  ;;  %v9513_v29 = vld [vmem:[#allocation2 + $0x98] sm:$0x1] }
 0x1c6   : > { %v1736_v36 = vrot.slane %v1734_v63, 5  ;;  %7921 = vmatprep.mubr.bf16.mxu0 %v7006_v40  ;;  %v1689_v20 = vor.u32 %v1688_v35, %v9464_v32  ;;  %v1692_v38 = vshll.u32 %v9451_v6, 16  ;;  %v1698_v37 = vrot.slane %v1696_v44, 4  ;;  %v1405_v13 = vld [vmem:[#allocation2 + $0xb4] sm:$0xf] }
 0x1c7   : > { %7865 = vmatprep.mubr.bf16.mxu1 %v6978_v12  ;;  %v1676_v47 = vrot.slane %v1675_v4, 4  ;;  %v1702_v50 = vshll.u32 %v9488_v24, 16  ;;  %v1755_v28 = vshrl.u32 %v1401_v39, 16  ;;  %v1758_v3 = vshll.u32 %v1401_v39, 16  ;;  %v9516_v40 = vld [vmem:[#allocation2 + $0xb8] sm:$0xf] }
 0x1c8   : > { %v1690_v30 = vrot.slane %v1689_v20, 4  ;;  %v1694_v61 = vrot.slane %v1692_v38, 5  ;;  %v1768_v57 = vshrl.u32 %v9494_v53, 16  ;;  %v7007_v15 = vcombine.low %v1401_v39, %v9494_v53 }
 0x1c9   : > { %v1681_v32 = vsel %vm9040_vm7, %v1676_v47, %v1680_v1  ;;  %v1704_v35 = vrot.slane %v1702_v50, 5  ;;  %v1757_v44 = vrot.slane %v1755_v28, 4  ;;  %v1760_v23 = vrot.slane %v1758_v3, 5 }
 0x1ca   : > { %v6979_v18 = vcombine.low %v1671_v60, %v1681_v32  ;;  %v1695_v34 = vsel %vm9040_vm7, %v1690_v30, %v1694_v61  ;;  %v1699_v8 = vor.u32 %v1698_v37, %v1694_v61  ;;  %7922 = vmatmul.mubr.bf16.gmra.mxu0 %v7007_v15  ;;  %v1713_v19 = vor.u32 %v1712_v2, %v1709_v49 }
 0x1cb   : > { %v1716_v10 = vshll.u32 %v9471_v33, 16  ;;  %v1722_v5 = vrot.slane %v1720_v52, 4  ;;  %v1726_v9 = vshll.u32 %v9501_v0, 16  ;;  %v1779_v54 = vshrl.u32 %v1403_v26, 16 }
 0x1cc   : > { %7866 = vmatmul.mubr.bf16.gmra.mxu1 %v6979_v18  ;;  %v1700_v16 = vrot.slane %v1699_v8, 4  ;;  %v1714_v63 = vrot.slane %v1713_v19, 4  ;;  %v1782_v56 = vshll.u32 %v1403_v26, 16  ;;  %v1792_v1 = vshrl.u32 %v9507_v58, 16 }
 0x1cd   : > { %v1718_v39 = vrot.slane %v1716_v10, 5  ;;  %v1728_v12 = vrot.slane %v1726_v9, 5  ;;  %v1781_v49 = vrot.slane %v1779_v54, 4  ;;  %v7008_v2 = vcombine.low %v1403_v26, %v9507_v58  ;;  %v9534_v54 = vld [vmem:[#allocation2 + $0xb0] sm:$0x1] }
 0x1ce   : > { %v1705_v52 = vsel %vm9040_vm7, %v1700_v16, %v1704_v35  ;;  %v1784_v60 = vrot.slane %v1782_v56, 5  ;;  %v1737_v4 = vor.u32 %v1736_v36, %v1733_v51  ;;  %v1740_v20 = vshll.u32 %v9485_v43, 16  ;;  %v9527_v36 = vld [vmem:[#allocation2 + $0xa4] sm:$0x1]  ;;  %v8481_v35 = vld [vmem:[#allocation2 + $0xc] sm:$0xff]  }
 0x1cf   : > { %v6980_v38 = vcombine.low %v1695_v34, %v1705_v52  ;;  %v1719_v37 = vsel %vm9040_vm7, %v1714_v63, %v1718_v39  ;;  %v1723_v47 = vor.u32 %v1722_v5, %v1718_v39  ;;  %7925 = vmatprep.mubr.bf16.mxu0 %v7008_v2  ;;  %v1746_v50 = vrot.slane %v1744_v14, 4 }
 0x1d0   : > { %v1738_v28 = vrot.slane %v1737_v4, 4  ;;  %v1742_v3 = vrot.slane %v1740_v20, 5  ;;  %v1750_v30 = vshll.u32 %v9513_v29, 16  ;;  %v1803_v61 = vshrl.u32 %v1405_v13, 16  ;;  %v2420_v20 = vld [vmem:[#allocation2] sm:$0xe] }
 0x1d1   : > { %7869 = vmatprep.mubr.bf16.mxu1 %v6980_v38  ;;  %v1724_v15 = vrot.slane %v1723_v47, 4  ;;  %v1806_v26 = vshll.u32 %v1405_v13, 16  ;;  %v1816_v32 = vshrl.u32 %v9516_v40, 16  ;;  %v7009_v51 = vcombine.low %v1405_v13, %v9516_v40 }
 0x1d2   : > { %v1743_v14 = vsel %vm9040_vm7, %v1738_v28, %v1742_v3  ;;  %v1747_v18 = vor.u32 %v1746_v50, %v1742_v3  ;;  %v1752_v34 = vrot.slane %v1750_v30, 5  ;;  %v1805_v8 = vrot.slane %v1803_v61, 4  ;;  %v8484_v3 = vld [vmem:[#allocation2 + $0x18] sm:$0xff]  }
 0x1d3   : > { %v1729_v19 = vsel %vm9040_vm7, %v1724_v15, %v1728_v12  ;;  %v1808_v10 = vrot.slane %v1806_v26, 5  ;;  %7926 = vmatmul.mubr.bf16.gmra.mxu0 %v7009_v51  ;;  %v1761_v5 = vor.u32 %v1760_v23, %v1757_v44  ;;  %v1764_v9 = vshll.u32 %v9494_v53, 16  ;;  %v8499_v15 = vld [vmem:[#allocation8 + $0x170] sm:$0xff]  }
 0x1d4   : > { %v6981_v13 = vcombine.low %v1719_v37, %v1729_v19  ;;  %v1748_v16 = vrot.slane %v1747_v18, 4  ;;  %v1770_v63 = vrot.slane %v1768_v57, 4  ;;  %v1774_v56 = vshll.u32 %v9527_v36, 16  ;;  %7993 = vmatprep.mubr.bf16.mxu0 %v8481_v35  ;;  %v9541_v37 = vld [vmem:[#allocation2 + $0xbc] sm:$0x1] }
 0x1d5   : > { %v1762_v39 = vrot.slane %v1761_v5, 4  ;;  %v1766_v2 = vrot.slane %v1764_v9, 5  ;;  %v1785_v52 = vor.u32 %v1784_v60, %v1781_v49  ;;  %v1788_v4 = vshll.u32 %v9507_v58, 16  ;;  %v2422_v18 = vld [vmem:[#allocation2 + $0x18] sm:$0xe]  ;;  %v8485_v9 = vld [vmem:[#allocation2 + $0x24] sm:$0xff]  }
 0x1d6   : > { %7870 = vmatmul.mubr.bf16.gmra.mxu1 %v6981_v13  ;;  %v1753_v44 = vsel %vm9040_vm7, %v1748_v16, %v1752_v34  ;;  %v1776_v23 = vrot.slane %v1774_v56, 5  ;;  %v1794_v12 = vrot.slane %v1792_v1, 4  ;;  %v1798_v38 = vshll.u32 %v9534_v54, 16  ;;  %v2421_v13 = vld [vmem:[#allocation2 + $0xc] sm:$0xe] }
 0x1d7   : > { %v6982_v57 = vcombine.low %v1743_v14, %v1753_v44  ;;  %v1767_v47 = vsel %vm9040_vm7, %v1762_v39, %v1766_v2  ;;  %v1771_v50 = vor.u32 %v1770_v63, %v1766_v2  ;;  %v1786_v28 = vrot.slane %v1785_v52, 4  ;;  %v8564_v16 = vld [vmem:[#allocation2 + $0x4] sm:$0xf] }
 0x1d8   : > { %v1790_v49 = vrot.slane %v1788_v4, 5  ;;  %v1800_v60 = vrot.slane %v1798_v38, 5  ;;  %v1809_v30 = vor.u32 %v1808_v10, %v1805_v8  ;;  %v1812_v61 = vshll.u32 %v9516_v40, 16  ;;  %v8566_v38 = vld [vmem:[#allocation2 + $0x10] sm:$0xf] }
 0x1d9   : > { %7873 = vmatprep.mubr.bf16.mxu1 %v6982_v57  ;;  %v1772_v26 = vrot.slane %v1771_v50, 4  ;;  %v1818_v1 = vrot.slane %v1816_v32, 4  ;;  %v1822_v51 = vshll.u32 %v9541_v37, 16  ;;  %v7018_v35 = vrot.slane %v2420_v20, 9  ;;  %v8565_v32 = vld [vmem:[#allocation2 + $0x8] sm:$0x1] }
 0x1da   : > { %v1791_v14 = vsel %vm9040_vm7, %v1786_v28, %v1790_v49  ;;  %v1795_v34 = vor.u32 %v1794_v12, %v1790_v49  ;;  %v1810_v19 = vrot.slane %v1809_v30, 4  ;;  %v1814_v5 = vrot.slane %v1812_v61, 5  ;;  %v8567_v49 = vld [vmem:[#allocation2 + $0x14] sm:$0x1]  ;;  %v2423_v61 = vld [vmem:[#allocation2 + $0x24] sm:$0xe] }
 0x1db   : > { %v1777_v8 = vsel %vm9040_vm7, %v1772_v26, %v1776_v23  ;;  %7994 = vmatmul.mubr.bf16.vlgmr.msra.gmra.mxu0 %v8484_v3  ;;  %v1824_v10 = vrot.slane %v1822_v51, 5  ;;  %v2473_v63 = vrot.slane %v8564_v16, 5  ;;  %v2476_v56 = vrot.slane %v8565_v32, 5  ;;  %v8486_v51 = vld [vmem:[#allocation2 + $0x30] sm:$0xff]  }
 0x1dc   : > { %v6983_v39 = vcombine.low %v1767_v47, %v1777_v8  ;;  %v1796_v2 = vrot.slane %v1795_v34, 4  ;;  %v1815_v52 = vsel %vm9040_vm7, %v1810_v19, %v1814_v5  ;;  %v1819_v4 = vor.u32 %v1818_v1, %v1814_v5  ;;  %7997 = vmatprep.mubr.bf16.mxu0 %v8485_v9  ;;  %8074 = vmatpush3.bf16.msra.mxu0 %v9332_v27  ;;  %v8502_v47 = vld [vmem:[#allocation8 + $0x168] sm:$0xff]   ;;  %v2424_v27 = vld [vmem:[#allocation2 + $0x30] sm:$0xe]  ;;  %v2425_v19 = vld [vmem:[#allocation2 + $0x3c] sm:$0xe] }
 0x1dd   : > { %v9562_v44 = vsel %vm9555_vm14, %v7018_v35, %v2473_v63  ;;  %v2475_v23 = vrot.slane %v2473_v63, 4  ;;  %v7019_v12 = vrot.slane %v2421_v13, 9  ;;  %v2480_v57 = vrot.slane %v8566_v38, 5  ;;  %8075 = vmatprep.subr.bf16.mxu0 %v8499_v15  ;;  %v8488_v9 = vld [vmem:[#allocation2 + $0x3c] sm:$0xff]  }
 0x1de   : > { %7874 = vmatmul.mubr.bf16.gmra.mxu1 %v6983_v39  ;;  %v1801_v50 = vsel %vm9040_vm7, %v1796_v2, %v1800_v60  ;;  %v1820_v28 = vrot.slane %v1819_v4, 4  ;;  %v2483_v3 = vrot.slane %v8567_v49, 5  ;;  %v7020_v30 = vrot.slane %v2422_v18, 9  ;;  %v8568_v18 = vld [vmem:[#allocation2 + $0x1c] sm:$0xf] }
 0x1df   : > { %v6984_v26 = vcombine.low %v1791_v14, %v1801_v50  ;;  %v2477_v1 = vsel %vm9555_vm14, %v2475_v23, %v2476_v56  ;;  %v9570_v35 = vsel %vm9555_vm14, %v7019_v12, %v2480_v57  ;;  %v2482_v34 = vrot.slane %v2480_v57, 4  ;;  %v8504_v8 = vld [vmem:[#allocation8 + $0x160] sm:$0xff]   ;;  %v8569_v56 = vld [vmem:[#allocation2 + $0x28] sm:$0xf]  ;;  %v8570_v12 = vld [vmem:[#allocation2 + $0x34] sm:$0xf] }
 0x1e0   : > { %v1825_v60 = vsel %vm9040_vm7, %v1820_v28, %v1824_v10  ;;  %v7034_v5 = vcombine.low %v9562_v44, %v2477_v1  ;;  %v2487_v13 = vrot.slane %v8568_v18, 5  ;;  %v2490_v14 = vrot.slane %v9296_v25, 5  ;;  %8076 = vmatpush3.bf16.msra.mxu0 %v8499_v15  ;;  %v2426_v4 = vld [vmem:[#allocation2 + $0x48] sm:$0xe]  ;;  %v2427_v49 = vld [vmem:[#allocation2 + $0x54] sm:$0xe] }
 0x1e1   : > { %7877 = vmatprep.mubr.bf16.mxu1 %v6984_v26  ;;  %v6985_v16 = vcombine.low %v1815_v52, %v1825_v60  ;;  %v9578_v63 = vsel %vm9555_vm14, %v2482_v34, %v2483_v3  ;;  %v7021_v32 = vrot.slane %v2423_v61, 9  ;;  %v2494_v39 = vrot.slane %v8569_v56, 5  ;;  %8077 = vmatprep.subr.bf16.mxu0 %v8502_v47  ;;  %v8507_v26 = vld [vmem:[#allocation8 + $0x158] sm:$0xff]   ;;  %v2428_v18 = vld [vmem:[#allocation2 + $0x60] sm:$0xe] }
 0x1e2   : > { %v7035_v10 = vcombine.low %v9570_v35, %v9578_v63  ;;  %v9584_v2 = vsel %vm9555_vm14, %v7020_v30, %v2487_v13  ;;  %v2489_v25 = vrot.slane %v2487_v13, 4  ;;  %v2497_v15 = vrot.slane %v9336_v55, 5 }
 0x1e3   : > { %7998 = vmatmul.mubr.bf16.gmra.mxu0 %v8486_v51  ;;  %v9589_v52 = vsel %vm9555_vm14, %v7021_v32, %v2494_v39  ;;  %v2496_v44 = vrot.slane %v2494_v39, 4  ;;  %v7022_v23 = vrot.slane %v2424_v27, 9  ;;  %v2501_v38 = vrot.slane %v8570_v12, 5  ;;  %v2429_v51 = vld [vmem:[#allocation2 + $0x6c] sm:$0xe] }
 0x1e4   : > { %8001 = vmatprep.mubr.bf16.mxu0 %v8488_v9  ;;  %v9593_v57 = vsel %vm9555_vm14, %v2489_v25, %v2490_v14  ;;  %v2504_v50 = vrot.slane %v9371_v11, 5  ;;  %v7023_v28 = vrot.slane %v2425_v19, 9  ;;  %v2508_v55 = vrot.slane %v9322_v7, 5  ;;  %8078 = vmatpush3.bf16.msra.mxu0 %v8502_v47  ;;  %v8509_v39 = vld [vmem:[#allocation8 + $0x150] sm:$0xff]   ;;  %v2430_v12 = vld [vmem:[#allocation2 + $0x78] sm:$0xe] }
 0x1e5   : > { %v7036_v3 = vcombine.low %v9584_v2, %v9593_v57  ;;  %v9601_v30 = vsel %vm9555_vm14, %v2496_v44, %v2497_v15  ;;  %v9605_v61 = vsel %vm9555_vm14, %v7022_v23, %v2501_v38  ;;  %v2503_v27 = vrot.slane %v2501_v38, 4  ;;  %8079 = vmatprep.subr.bf16.mxu0 %v8504_v8  ;;  %v8491_v2 = vld [vmem:[#allocation2 + $0x54] sm:$0xff]   ;;  %v8490_v38 = vld [vmem:[#allocation8 + $0x130] sm:$0xff]  }
 0x1e6   : > { %7878 = vmatmul.mubr.bf16.gmra.mxu1 %v6985_v16  ;;  %v7037_v7 = vcombine.low %v9589_v52, %v9601_v30  ;;  %v9611_v11 = vsel %vm9555_vm14, %v7023_v28, %v2508_v55  ;;  %v2510_v47 = vrot.slane %v2508_v55, 4  ;;  %v2511_v1 = vrot.slane %v9396_v46, 5  ;;  %v8489_v16 = vld [vmem:[#allocation2 + $0x48] sm:$0xff]   ;;  %v2431_v55 = vld [vmem:[#allocation2 + $0x84] sm:$0xe] }
 0x1e7   : > { %7945 = vmatprep.mubr.bf16.mxu1 %v7034_v5  ;;  %v9616_v34 = vsel %vm9555_vm14, %v2503_v27, %v2504_v50  ;;  %v7024_v19 = vrot.slane %v2426_v4, 9  ;;  %v2515_v60 = vrot.slane %v9355_v17, 5  ;;  %v2518_v9 = vrot.slane %v9426_v48, 5 }
 0x1e8   : > { %v7038_v13 = vcombine.low %v9605_v61, %v9616_v34  ;;  %v9624_v14 = vsel %vm9555_vm14, %v2510_v47, %v2511_v1  ;;  %v7025_v46 = vrot.slane %v2427_v49, 9  ;;  %v2522_v5 = vrot.slane %v9390_v41, 5  ;;  %8080 = vmatpush3.bf16.msra.mxu0 %v8504_v8  ;;  %v2432_v47 = vld [vmem:[#allocation2 + $0x90] sm:$0xe]  ;;  %v8512_v1 = vld [vmem:[#allocation8 + $0x148] sm:$0xff]  }
 0x1e9   : > { %v7039_v32 = vcombine.low %v9611_v11, %v9624_v14  ;;  %v9631_v17 = vsel %vm9555_vm14, %v7024_v19, %v2515_v60  ;;  %v2517_v48 = vrot.slane %v2515_v60, 4  ;;  %v2525_v56 = vrot.slane %v9446_v42, 5  ;;  %8081 = vmatprep.subr.bf16.mxu0 %v8507_v26 }
 0x1ea   : > { %v9636_v25 = vsel %vm9555_vm14, %v7025_v46, %v2522_v5  ;;  %v2524_v41 = vrot.slane %v2522_v5, 4  ;;  %v7026_v8 = vrot.slane %v2428_v18, 9  ;;  %v2529_v15 = vrot.slane %v9412_v31, 5  ;;  %v8493_v18 = vld [vmem:[#allocation8 + $0x128] sm:$0xff]   ;;  %v9686_v46 = vld [vmem:[#allocation2 + $0x10] sm:$0xf] }
 0x1eb   : > { %8002 = vmatmul.mubr.bf16.gmra.mxu0 %v8489_v16  ;;  %v9641_v4 = vsel %vm9555_vm14, %v2517_v48, %v2518_v9  ;;  %v2532_v44 = vrot.slane %v9461_v22, 5  ;;  %v7027_v23 = vrot.slane %v2429_v51, 9  ;;  %v2536_v42 = vrot.slane %v9439_v59, 5  ;;  %v4042_v5 = vld [vmem:[#allocation2 + $0xc] sm:$0xe]  ;;  %v8492_v16 = vld [vmem:[#allocation2 + $0x60] sm:$0xff]  }
 0x1ec   : > { %8005 = vmatprep.mubr.bf16.mxu0 %v8491_v2  ;;  %v7040_v57 = vcombine.low %v9631_v17, %v9641_v4  ;;  %v9649_v50 = vsel %vm9555_vm14, %v2524_v41, %v2525_v56  ;;  %v9653_v31 = vsel %vm9555_vm14, %v7026_v8, %v2529_v15  ;;  %v2531_v28 = vrot.slane %v2529_v15, 4  ;;  %8082 = vmatpush3.bf16.msra.mxu0 %v8507_v26  ;;  %v9693_v41 = vld [vmem:[#allocation2 + $0x14] sm:$0x1]  ;;  %v8494_v8 = vld [vmem:[#allocation2 + $0x6c] sm:$0xff]  }
 0x1ed   : > { %v7041_v59 = vcombine.low %v9636_v25, %v9649_v50  ;;  %v9659_v22 = vsel %vm9555_vm14, %v7027_v23, %v2536_v42  ;;  %v2538_v49 = vrot.slane %v2536_v42, 4  ;;  %v2539_v27 = vrot.slane %v9478_v62, 5  ;;  %8083 = vmatprep.subr.bf16.mxu0 %v8509_v39  ;;  %v8513_v23 = vld [vmem:[#allocation8 + $0x140] sm:$0xff]   ;;  %v8500_v17 = vld [vmem:[#allocation2 + $0x90] sm:$0xff]  }
 0x1ee   : > { %7946 = vmatmul.mubr.bf16.vlgmr.msra.gmra.mxu1 %v7035_v10  ;;  %v9667_v26 = vsel %vm9555_vm14, %v2531_v28, %v2532_v44  ;;  %v7028_v51 = vrot.slane %v2430_v12, 9  ;;  %v2543_v19 = vrot.slane %v9451_v6, 5  ;;  %v2546_v60 = vrot.slane %v9488_v24, 5  ;;  %v2433_v10 = vld [vmem:[#allocation2 + $0x9c] sm:$0xe]  ;;  %v9853_v50 = vld [vmem:[#allocation8 + $0x1b8] sm:$0xff]  }
 0x1ef   : > { %8026 = vmatpush3.bf16.msra.mxu1 %v9416_v21  ;;  %7949 = vmatprep.mubr.bf16.mxu1 %v7036_v3  ;;  %v7042_v62 = vcombine.low %v9653_v31, %v9667_v26  ;;  %v9676_v9 = vsel %vm9555_vm14, %v2538_v49, %v2539_v27  ;;  %v7029_v35 = vrot.slane %v2431_v55, 9  ;;  %v2550_v63 = vrot.slane %v9471_v33, 5  ;;  %v2434_v55 = vld [vmem:[#allocation2 + $0xa8] sm:$0xe] }
 0x1f0   : > { %8027 = vmatprep.subr.bf16.mxu1 %v8490_v38  ;;  %v7043_v6 = vcombine.low %v9659_v22, %v9676_v9  ;;  %v9683_v21 = vsel %vm9555_vm14, %v7028_v51, %v2543_v19  ;;  %v2545_v24 = vrot.slane %v2543_v19, 4  ;;  %v2553_v3 = vrot.slane %v9501_v0, 5  ;;  %8084 = vmatpush3.bf16.msra.mxu0 %v8509_v39  ;;  %v9720_v51 = vld [vmem:[#allocation2 + $0x20] sm:$0x1]  ;;  %v8505_v31 = vld [vmem:[#allocation2 + $0xa8] sm:$0xff]  }
 0x1f1   : > { %v9690_v33 = vsel %vm9555_vm14, %v7029_v35, %v2550_v63  ;;  %v2552_v48 = vrot.slane %v2550_v63, 4  ;;  %v7030_v56 = vrot.slane %v2432_v47, 9  ;;  %v2557_v2 = vrot.slane %v9485_v43, 5  ;;  %8085 = vmatprep.subr.bf16.mxu0 %v8512_v1  ;;  %v4048_v9 = vld [vmem:[#allocation2 + $0x54] sm:$0xe] }
 0x1f2   : > { %v9697_v0 = vsel %vm9555_vm14, %v2545_v24, %v2546_v60  ;;  %v2560_v39 = vrot.slane %v9513_v29, 5  ;;  %v7031_v15 = vrot.slane %v2433_v10, 9  ;;  %v2564_v44 = vrot.slane %v9494_v53, 5  ;;  %v9711_v29 = vld [vmem:[#allocation2 + $0x1c] sm:$0xf] }
 0x1f3   : > { %8028 = vmatpush3.bf16.msra.mxu1 %v8490_v38  ;;  %8006 = vmatmul.mubr.bf16.gmra.mxu0 %v8492_v16  ;;  %v7044_v42 = vcombine.low %v9683_v21, %v9697_v0  ;;  %v9705_v43 = vsel %vm9555_vm14, %v2552_v48, %v2553_v3  ;;  %v9709_v12 = vsel %vm9555_vm14, %v7030_v56, %v2557_v2  ;;  %v2559_v28 = vrot.slane %v2557_v2, 4  ;;  %v8496_v53 = vld [vmem:[#allocation8 + $0x120] sm:$0xff]   ;;  %v9738_v16 = vld [vmem:[#allocation8 + $0x1f8] sm:$0xff]   ;;  %v8510_v21 = vld [vmem:[#allocation2 + $0xc0] sm:$0xff]  }
 0x1f4   : > { %8029 = vmatprep.subr.bf16.mxu1 %v8493_v18  ;;  %8009 = vmatprep.mubr.bf16.mxu0 %v8494_v8  ;;  %v7045_v38 = vcombine.low %v9690_v33, %v9705_v43  ;;  %v9717_v49 = vsel %vm9555_vm14, %v7031_v15, %v2564_v44  ;;  %v2566_v27 = vrot.slane %v2564_v44, 4  ;;  %v2567_v47 = vrot.slane %v9527_v36, 5  ;;  %v4043_v10 = vld [vmem:[#allocation2 + $0x18] sm:$0xe]  ;;  %v8501_v56 = vld [vmem:[#allocation8 + $0x118] sm:$0xff]  }
 0x1f5   : > { %v9724_v19 = vsel %vm9555_vm14, %v2559_v28, %v2560_v39  ;;  %8086 = vmatpush3.bf16.msra.mxu0 %v8512_v1  ;;  %v7106_v60 = vrot.slane %v4042_v5, 9  ;;  %v4108_v35 = vrot.slane %v9686_v46, 5  ;;  %v4111_v63 = vrot.slane %v9693_v41, 5  ;;  %v2435_v5 = vld [vmem:[#allocation2 + $0xb4] sm:$0xe]  ;;  %v8495_v8 = vld [vmem:[#allocation2 + $0x78] sm:$0xff]  }
 0x1f6   : > { %7950 = vmatmul.mubr.bf16.gmra.mxu1 %v7037_v7  ;;  %v7046_v36 = vcombine.low %v9709_v12, %v9724_v19  ;;  %v9735_v24 = vsel %vm9555_vm14, %v2566_v27, %v2567_v47  ;;  %v7032_v3 = vrot.slane %v2434_v55, 9  ;;  %v2571_v1 = vrot.slane %v9507_v58, 5  ;;  %8087 = vmatprep.subr.bf16.mxu0 %v8513_v23  ;;  %v9750_v58 = vld [vmem:[#allocation2 + $0x28] sm:$0xf]  ;;  %v4044_v28 = vld [vmem:[#allocation2 + $0x24] sm:$0xe] }
 0x1f7   : > { %7953 = vmatprep.mubr.bf16.mxu1 %v7038_v13  ;;  %8030 = vmatpush3.bf16.msra.mxu1 %v8493_v18  ;;  %v9747_v30 = vsel %vm9555_vm14, %v7106_v60, %v4108_v35  ;;  %v4110_v7 = vrot.slane %v4108_v35, 4  ;;  %v2574_v48 = vrot.slane %v9534_v54, 5  ;;  %v7107_v34 = vrot.slane %v4043_v10, 9  ;;  %v9757_v18 = vld [vmem:[#allocation2 + $0x2c] sm:$0x1]  ;;  %v8498_v55 = vld [vmem:[#allocation2 + $0x84] sm:$0xff]  }
 0x1f8   : > { %8031 = vmatprep.subr.bf16.mxu1 %v8496_v53  ;;  %v9754_v2 = vsel %vm9555_vm14, %v7032_v3, %v2571_v1  ;;  %v2573_v61 = vrot.slane %v2571_v1, 4  ;;  %v4115_v13 = vrot.slane %v9711_v29, 5  ;;  %v4118_v54 = vrot.slane %v9720_v51, 5  ;;  %v8506_v1 = vld [vmem:[#allocation8 + $0x110] sm:$0xff]  }
 0x1f9   : > { %v9761_v39 = vsel %vm9555_vm14, %v4110_v7, %v4111_v63  ;;  %8088 = vmatpush3.bf16.msra.mxu0 %v8513_v23  ;;  %v7033_v15 = vrot.slane %v2435_v5, 9  ;;  %v2578_v44 = vrot.slane %v9516_v40, 5  ;;  %v3289_v23 = vld [vmem:[#allocation2 + $0xc] sm:$0xf]  ;;  %v2581_v3 = vrot.slane %v9541_v37, 5 }
 0x1fa   : > { %v7122_v27 = vcombine.low %v9747_v30, %v9761_v39  ;;  %v9769_v47 = vsel %vm9555_vm14, %v2573_v61, %v2574_v48  ;;  %v9773_v60 = vsel %vm9555_vm14, %v7107_v34, %v4115_v13  ;;  %v4117_v35 = vrot.slane %v4115_v13, 4  ;;  %8169 = vmatprep.subr.bf16.mxu0 %v9738_v16  ;;  %v9936_v43 = vld [vmem:[#allocation2 + $0x68] sm:$0x1] }
 0x1fb   : > { %8010 = vmatmul.mubr.bf16.gmra.mxu0 %v8495_v8  ;;  %8032 = vmatpush3.bf16.msra.mxu1 %v8496_v53  ;;  %v9780_v63 = vsel %vm9555_vm14, %v7033_v15, %v2578_v44  ;;  %v2580_v10 = vrot.slane %v2578_v44, 4  ;;  %v7108_v7 = vrot.slane %v4044_v28, 9  ;;  %v4122_v53 = vrot.slane %v9750_v58, 5  ;;  %v9795_v8 = vld [vmem:[#allocation2 + $0x34] sm:$0xf] }
 0x1fc   : > { %8013 = vmatprep.mubr.bf16.mxu0 %v8498_v55  ;;  %8033 = vmatprep.subr.bf16.mxu1 %v8501_v56  ;;  %v9785_v5 = vsel %vm9555_vm14, %v4117_v35, %v4118_v54  ;;  %v4125_v48 = vrot.slane %v9757_v18, 5  ;;  %v3338_v37 = vshrl.u32 %v3289_v23, 16  ;;  %v3341_v13 = vshll.u32 %v3289_v23, 16  ;;  %v4045_v15 = vld [vmem:[#allocation2 + $0x30] sm:$0xe] }
 0x1fd   : > { %v9793_v34 = vsel %vm9555_vm14, %v2580_v10, %v2581_v3  ;;  %v9804_v44 = vsel %vm9555_vm14, %v7108_v7, %v4122_v53  ;;  %v4124_v28 = vrot.slane %v4122_v53, 4  ;;  %v3347_v55 = vshll.u32 %v9686_v46, 16  ;;  %v9807_v35 = vld [vmem:[#allocation2 + $0x38] sm:$0x1]  ;;  %v8511_v3 = vld [vmem:[#allocation8 + $0x108] sm:$0xff]  }
 0x1fe   : > { %7954 = vmatmul.mubr.bf16.gmra.mxu1 %v7039_v32  ;;  %v3340_v23 = vrot.slane %v3338_v37, 4  ;;  %v3343_v11 = vrot.slane %v3341_v13, 5  ;;  %v3351_v14 = vshrl.u32 %v9686_v46, 16  ;;  %v3357_v32 = vshll.u32 %v9693_v41, 16  ;;  %v3292_v10 = vld [vmem:[#allocation2 + $0x18] sm:$0xf] }
 0x1ff   : > { %7957 = vmatprep.mubr.bf16.mxu1 %v7040_v57  ;;  %8034 = vmatpush3.bf16.msra.mxu1 %v8501_v56  ;;  %v9816_v7 = vsel %vm9555_vm14, %v4124_v28, %v4125_v48  ;;  %v3349_v53 = vrot.slane %v3347_v55, 5  ;;  %v7109_v54 = vrot.slane %v4045_v15, 9  ;;  %v4129_v40 = vrot.slane %v9795_v8, 5  ;;  %v8503_v37 = vld [vmem:[#allocation2 + $0x9c] sm:$0xff]  }
 0x200   : > { %8035 = vmatprep.subr.bf16.mxu1 %v8506_v1  ;;  %v3344_v57 = vor.u32 %v3343_v11, %v3340_v23  ;;  %v3353_v56 = vrot.slane %v3351_v14, 4  ;;  %v3359_v46 = vrot.slane %v3357_v32, 5  ;;  %v4132_v48 = vrot.slane %v9807_v35, 5  ;;  %v4046_v55 = vld [vmem:[#allocation2 + $0x3c] sm:$0xe] }
 0x201   : > { %v9823_v41 = vsel %vm9555_vm14, %v7109_v54, %v4129_v40  ;;  %v4131_v13 = vrot.slane %v4129_v40, 4  ;;  %v3362_v28 = vshrl.u32 %v3292_v10, 16  ;;  %v3365_v61 = vshll.u32 %v3292_v10, 16  ;;  %v9827_v23 = vld [vmem:[#allocation2 + $0x40] sm:$0xf]  ;;  %v8514_v11 = vld [vmem:[#allocation8 + $0x100] sm:$0xff]  }
 0x202   : > { %v3345_v15 = vrot.slane %v3344_v57, 4  ;;  %v3354_v52 = vor.u32 %v3353_v56, %v3349_v53  ;;  %v3371_v4 = vshll.u32 %v9711_v29, 16  ;;  %v3375_v14 = vshrl.u32 %v9711_v29, 16 }
 0x203   : > { %8014 = vmatmul.mubr.bf16.gmra.mxu0 %v8500_v17  ;;  %8036 = vmatpush3.bf16.msra.mxu1 %v8506_v1  ;;  %v9831_v54 = vsel %vm9555_vm14, %v4131_v13, %v4132_v48  ;;  %v3364_v40 = vrot.slane %v3362_v28, 4  ;;  %v3381_v32 = vshll.u32 %v9720_v51, 16  ;;  %v9835_v1 = vld [vmem:[#allocation2 + $0x44] sm:$0x1]  ;;  %v3367_v56 = vrot.slane %v3365_v61, 5 }
 0x204   : > { %8017 = vmatprep.mubr.bf16.mxu0 %v8503_v37  ;;  %8037 = vmatprep.subr.bf16.mxu1 %v8511_v3  ;;  %v3350_v10 = vsel %vm9040_vm7, %v3345_v15, %v3349_v53  ;;  %v3355_v17 = vrot.slane %v3354_v52, 4  ;;  %v7125_v57 = vcombine.low %v9823_v41, %v9831_v54  ;;  %v3295_v37 = vld [vmem:[#allocation2 + $0x24] sm:$0xf]  ;;  %v3373_v13 = vrot.slane %v3371_v4, 5  ;;  %v9855_v15 = vld [vmem:[#allocation2 + $0x4c] sm:$0xf] }
 0x205   : > { %v3377_v48 = vrot.slane %v3375_v14, 4  ;;  %v3383_v29 = vrot.slane %v3381_v32, 5  ;;  %v7110_v28 = vrot.slane %v4046_v55, 9  ;;  %v3368_v52 = vor.u32 %v3367_v56, %v3364_v40  ;;  %v4047_v40 = vld [vmem:[#allocation2 + $0x48] sm:$0xe]  ;;  %v8508_v14 = vld [vmem:[#allocation2 + $0xb4] sm:$0xff]  }
 0x206   : > { %7958 = vmatmul.mubr.bf16.gmra.mxu1 %v7041_v59  ;;  %v3360_v51 = vsel %vm9040_vm7, %v3355_v17, %v3359_v46  ;;  %v4136_v61 = vrot.slane %v9827_v23, 5  ;;  %v4139_v53 = vrot.slane %v9835_v1, 5  ;;  %v3386_v4 = vshrl.u32 %v3295_v37, 16 }
 0x207   : > { %7961 = vmatprep.mubr.bf16.mxu1 %v7042_v62  ;;  %8038 = vmatpush3.bf16.msra.mxu1 %v8511_v3  ;;  %v9851_v25 = vcombine.low %v3350_v10, %v3360_v51  ;;  %v3378_v59 = vor.u32 %v3377_v48, %v3373_v13  ;;  %v3389_v55 = vshll.u32 %v3295_v37, 16  ;;  %v3369_v26 = vrot.slane %v3368_v52, 4  ;;  %v9870_v52 = vld [vmem:[#allocation2 + $0x50] sm:$0x1] }
 0x208   : > { %8039 = vmatprep.subr.bf16.mxu1 %v8514_v11  ;;  %v9859_v62 = vsel %vm9555_vm14, %v7110_v28, %v4136_v61  ;;  %v4138_v3 = vrot.slane %v4136_v61, 4  ;;  %v3395_v46 = vshll.u32 %v9750_v58, 16  ;;  %v3388_v10 = vrot.slane %v3386_v4, 4  ;;  %v3298_v61 = vld [vmem:[#allocation2 + $0x30] sm:$0xf] }
 0x209   : > { %v3379_v32 = vrot.slane %v3378_v59, 4  ;;  %v3391_v17 = vrot.slane %v3389_v55, 5  ;;  %v3399_v56 = vshrl.u32 %v9750_v58, 16  ;;  %v3374_v37 = vsel %vm9040_vm7, %v3369_v26, %v3373_v13 }
 0x20a   : > { %v9867_v48 = vsel %vm9555_vm14, %v4138_v3, %v4139_v53  ;;  %v3397_v28 = vrot.slane %v3395_v46, 5  ;;  %v3405_v51 = vshll.u32 %v9757_v18, 16  ;;  %v7111_v55 = vrot.slane %v4047_v40, 9  ;;  %v9884_v46 = vld [vmem:[#allocation2 + $0x58] sm:$0xf] }
 0x20b   : > { %8018 = vmatmul.mubr.bf16.gmra.mxu0 %v8505_v31  ;;  %8040 = vmatpush3.bf16.msra.mxu1 %v8514_v11  ;;  %v3384_v58 = vsel %vm9040_vm7, %v3379_v32, %v3383_v29  ;;  %v7126_v11 = vcombine.low %v9859_v62, %v9867_v48  ;;  %v3392_v13 = vor.u32 %v3391_v17, %v3388_v10  ;;  %v3401_v59 = vrot.slane %v3399_v56, 4  ;;  %v8525_v62 = vld [vmem:[#allocation8 + $0x1d8] sm:$0xff]  }
 0x20c   : > { %8021 = vmatprep.mubr.bf16.mxu0 %v8508_v14  ;;  %8121 = vmatprep.subr.bf16.mxu1 %v9853_v50  ;;  %v9877_v4 = vcombine.low %v3374_v37, %v3384_v58  ;;  %v3407_v53 = vrot.slane %v3405_v51, 5  ;;  %v4143_v18 = vrot.slane %v9855_v15, 5  ;;  %v4146_v3 = vrot.slane %v9870_v52, 5  ;;  %v9897_v37 = vld [vmem:[#allocation2 + $0x5c] sm:$0x1] }
 0x20d   : > { %v3393_v31 = vrot.slane %v3392_v13, 4  ;;  %v3402_v26 = vor.u32 %v3401_v59, %v3397_v28  ;;  %v3410_v29 = vshrl.u32 %v3298_v61, 16  ;;  %v3413_v32 = vshll.u32 %v3298_v61, 16  ;;  %v3301_v58 = vld [vmem:[#allocation2 + $0x3c] sm:$0xf] }
 0x20e   : > { %7962 = vmatmul.mubr.bf16.gmra.mxu1 %v7043_v6  ;;  %v9891_v40 = vsel %vm9555_vm14, %v7111_v55, %v4143_v18  ;;  %v4145_v14 = vrot.slane %v4143_v18, 4  ;;  %v3419_v22 = vshll.u32 %v9795_v8, 16  ;;  %v3423_v56 = vshrl.u32 %v9795_v8, 16 }
 0x20f   : > { %7965 = vmatprep.mubr.bf16.mxu1 %v7044_v42  ;;  %v3398_v6 = vsel %vm9040_vm7, %v3393_v31, %v3397_v28  ;;  %v3403_v10 = vrot.slane %v3402_v26, 4  ;;  %v3412_v17 = vrot.slane %v3410_v29, 4  ;;  %v3415_v42 = vrot.slane %v3413_v32, 5 }
 0x210   : > { %v9901_v0 = vsel %vm9555_vm14, %v4145_v14, %v4146_v3  ;;  %v3421_v51 = vrot.slane %v3419_v22, 5  ;;  %v3429_v61 = vshll.u32 %v9807_v35, 16  ;;  %v3425_v59 = vrot.slane %v3423_v56, 4 }
 0x211   : > { %v3408_v13 = vsel %vm9040_vm7, %v3403_v10, %v3407_v53  ;;  %v7127_v28 = vcombine.low %v9891_v40, %v9901_v0  ;;  %v7112_v8 = vrot.slane %v4048_v9, 9  ;;  %v3416_v18 = vor.u32 %v3415_v42, %v3412_v17  ;;  %v4049_v17 = vld [vmem:[#allocation2 + $0x60] sm:$0xe] }
 0x212   : > { %v9908_v55 = vcombine.low %v3398_v6, %v3408_v13  ;;  %v3431_v31 = vrot.slane %v3429_v61, 5  ;;  %v4150_v26 = vrot.slane %v9884_v46, 5  ;;  %v3426_v35 = vor.u32 %v3425_v59, %v3421_v51  ;;  %v9920_v6 = vld [vmem:[#allocation2 + $0x64] sm:$0xf]  ;;  %v8520_v59 = vld [vmem:[#allocation8 + $0x1f0] sm:$0xff]  }
 0x213   : > { %8022 = vmatmul.mubr.bf16.gmra.mxu0 %v8510_v21  ;;  %v4153_v3 = vrot.slane %v9897_v37, 5  ;;  %v3434_v53 = vshrl.u32 %v3301_v58, 16  ;;  %v3437_v29 = vshll.u32 %v3301_v58, 16  ;;  %v3417_v14 = vrot.slane %v3416_v18, 4 }
 0x214   : > { %8089 = vmatprep.mubr.bf16.mxu0 %v7122_v27  ;;  %v9917_v32 = vsel %vm9555_vm14, %v7112_v8, %v4150_v26  ;;  %v4152_v22 = vrot.slane %v4150_v26, 4  ;;  %v3443_v9 = vshll.u32 %v9827_v23, 16  ;;  %v3427_v30 = vrot.slane %v3426_v35, 4 }
 0x215   : > { %v3436_v39 = vrot.slane %v3434_v53, 4  ;;  %v3439_v27 = vrot.slane %v3437_v29, 5  ;;  %v3447_v10 = vshrl.u32 %v9827_v23, 16  ;;  %v3422_v56 = vsel %vm9040_vm7, %v3417_v14, %v3421_v51  ;;  %v4050_v14 = vld [vmem:[#allocation2 + $0x6c] sm:$0xe] }
 0x216   : > { %7966 = vmatmul.mubr.bf16.gmra.mxu1 %v7045_v38  ;;  %v9933_v21 = vsel %vm9555_vm14, %v4152_v22, %v4153_v3  ;;  %v3445_v42 = vrot.slane %v3443_v9, 5  ;;  %v3453_v33 = vshll.u32 %v9835_v1, 16  ;;  %v3304_v38 = vld [vmem:[#allocation2 + $0x48] sm:$0xf]  ;;  %v3432_v23 = vsel %vm9040_vm7, %v3427_v30, %v3431_v31 }
 0x217   : > { %7969 = vmatprep.mubr.bf16.mxu1 %v7046_v36  ;;  %v7128_v12 = vcombine.low %v9917_v32, %v9933_v21  ;;  %v3440_v19 = vor.u32 %v3439_v27, %v3436_v39  ;;  %v3449_v36 = vrot.slane %v3447_v10, 4  ;;  %v9942_v61 = vcombine.low %v3422_v56, %v3432_v23  ;;  %v8522_v56 = vld [vmem:[#allocation8 + $0x1e8] sm:$0xff]  }
 0x218   : > { %v3455_v51 = vrot.slane %v3453_v33, 5  ;;  %v7113_v58 = vrot.slane %v4049_v17, 9  ;;  %v4157_v13 = vrot.slane %v9920_v6, 5  ;;  %v4160_v18 = vrot.slane %v9936_v43, 5 }
 0x219   : > { %v3441_v8 = vrot.slane %v3440_v19, 4  ;;  %v3450_v1 = vor.u32 %v3449_v36, %v3445_v42  ;;  %v3458_v26 = vshrl.u32 %v3304_v38, 16  ;;  %v11473_v31 = vcombine.low %v9773_v60, %v9785_v5  ;;  %v9960_v5 = vld [vmem:[#allocation2 + $0x74] sm:$0x1] }
 0x21a   : > { %v9951_v35 = vsel %vm9555_vm14, %v7113_v58, %v4157_v13  ;;  %v4159_v3 = vrot.slane %v4157_v13, 4  ;;  %v3461_v53 = vshll.u32 %v3304_v38, 16  ;;  %v3467_v29 = vshll.u32 %v9855_v15, 16  ;;  %v9975_v38 = vld [vmem:[#allocation2 + $0x70] sm:$0xf] }
 0x21b   : > { %8090 = vmatmul.mubr.bf16.vlgmr.msra.gmra.mxu0 %v11473_v31  ;;  %v11474_v22 = vcombine.low %v9804_v44, %v9816_v7  ;;  %v3446_v9 = vsel %vm9040_vm7, %v3441_v8, %v3445_v42  ;;  %v3451_v30 = vrot.slane %v3450_v1, 4  ;;  %v3460_v39 = vrot.slane %v3458_v26, 4  ;;  %v3307_v7 = vld [vmem:[#allocation2 + $0x54] sm:$0xf] }
 0x21c   : > { %v3471_v60 = vshrl.u32 %v9855_v15, 16  ;;  %8170 = vmatpush3.bf16.msra.mxu0 %v9738_v16  ;;  %v9965_v27 = vsel %vm9555_vm14, %v4159_v3, %v4160_v18  ;;  %v3463_v10 = vrot.slane %v3461_v53, 5  ;;  %v3469_v17 = vrot.slane %v3467_v29, 5 }
 0x21d   : > { %8093 = vmatprep.mubr.bf16.mxu0 %v11474_v22  ;;  %v3477_v44 = vshll.u32 %v9870_v52, 16  ;;  %8171 = vmatprep.subr.bf16.mxu0 %v8520_v59  ;;  %v11475_v42 = vcombine.low %v9717_v49, %v9735_v24  ;;  %v3456_v15 = vsel %vm9040_vm7, %v3451_v30, %v3455_v51  ;;  %v7129_v16 = vcombine.low %v9951_v35, %v9965_v27 }
 0x21e   : > { %v3473_v33 = vrot.slane %v3471_v60, 4  ;;  %v7114_v23 = vrot.slane %v4050_v14, 9  ;;  %v11476_v52 = vcombine.low %v9754_v2, %v9769_v47  ;;  %v9980_v19 = vcombine.low %v3446_v9, %v3456_v15  ;;  %v8523_v47 = vld [vmem:[#allocation8 + $0x1e0] sm:$0xff]   ;;  %v3310_v60 = vld [vmem:[#allocation2 + $0x60] sm:$0xf] }
 0x21f   : > { %7970 = vmatmul.mubr.bf16.gmra.mxu1 %v11475_v42  ;;  %v3464_v36 = vor.u32 %v3463_v10, %v3460_v39  ;;  %v3479_v58 = vrot.slane %v3477_v44, 5  ;;  %v4164_v49 = vrot.slane %v9975_v38, 5  ;;  %v4167_v51 = vrot.slane %v9960_v5, 5  ;;  %v4051_v14 = vld [vmem:[#allocation2 + $0x78] sm:$0xe] }
 0x220   : > { %7973 = vmatprep.mubr.bf16.mxu1 %v11476_v52  ;;  %v3474_v24 = vor.u32 %v3473_v33, %v3469_v17  ;;  %v3482_v13 = vshrl.u32 %v3307_v7, 16  ;;  %v3485_v8 = vshll.u32 %v3307_v7, 16  ;;  %8172 = vmatpush3.bf16.msra.mxu0 %v8520_v59  ;;  %v3491_v2 = vshll.u32 %v9884_v46, 16  ;;  %v10000_v39 = vld [vmem:[#allocation2 + $0x80] sm:$0x1] }
 0x221   : > { %v3465_v1 = vrot.slane %v3464_v36, 4  ;;  %v9986_v18 = vsel %vm9555_vm14, %v7114_v23, %v4164_v49  ;;  %v4166_v26 = vrot.slane %v4164_v49, 4  ;;  %8173 = vmatprep.subr.bf16.mxu0 %v8522_v56  ;;  %v3495_v29 = vshrl.u32 %v9884_v46, 16  ;;  %v10009_v10 = vld [vmem:[#allocation2 + $0x7c] sm:$0xf] }
 0x222   : > { %v3475_v31 = vrot.slane %v3474_v24, 4  ;;  %v3484_v3 = vrot.slane %v3482_v13, 4  ;;  %v3487_v53 = vrot.slane %v3485_v8, 5  ;;  %v3493_v9 = vrot.slane %v3491_v2, 5  ;;  %v8526_v2 = vld [vmem:[#allocation8 + $0x1d0] sm:$0xff]  }
 0x223   : > { %8094 = vmatmul.mubr.bf16.gmra.mxu0 %v7125_v57  ;;  %v3470_v59 = vsel %vm9040_vm7, %v3465_v1, %v3469_v17  ;;  %v9997_v22 = vsel %vm9555_vm14, %v4166_v26, %v4167_v51  ;;  %v3501_v30 = vshll.u32 %v9897_v37, 16  ;;  %v3497_v46 = vrot.slane %v3495_v29, 4  ;;  %v10027_v51 = vld [vmem:[#allocation2 + $0x8c] sm:$0x1] }
 0x224   : > { %8097 = vmatprep.mubr.bf16.mxu0 %v7126_v11  ;;  %v3480_v41 = vsel %vm9040_vm7, %v3475_v31, %v3479_v58  ;;  %v7130_v54 = vcombine.low %v9986_v18, %v9997_v22  ;;  %v3488_v57 = vor.u32 %v3487_v53, %v3484_v3  ;;  %8174 = vmatpush3.bf16.msra.mxu0 %v8522_v56  ;;  %v7115_v44 = vrot.slane %v4051_v14, 9  ;;  %v4052_v58 = vld [vmem:[#allocation2 + $0x84] sm:$0xe]  ;;  %v3313_v26 = vld [vmem:[#allocation2 + $0x6c] sm:$0xf] }
 0x225   : > { %v10011_v17 = vcombine.low %v3470_v59, %v3480_v41  ;;  %v3503_v37 = vrot.slane %v3501_v30, 5  ;;  %v4171_v7 = vrot.slane %v10009_v10, 5  ;;  %8175 = vmatprep.subr.bf16.mxu0 %v8523_v47  ;;  %v11477_v48 = vcombine.low %v9780_v63, %v9793_v34  ;;  %v10038_v53 = vld [vmem:[#allocation2 + $0x88] sm:$0xf] }
 0x226   : > { %v3489_v11 = vrot.slane %v3488_v57, 4  ;;  %v3498_v42 = vor.u32 %v3497_v46, %v3493_v9  ;;  %v4174_v15 = vrot.slane %v10000_v39, 5  ;;  %v3506_v33 = vshrl.u32 %v3310_v60, 16 }
 0x227   : > { %7974 = vmatmul.mubr.bf16.gmra.mxu1 %v11477_v48  ;;  %v10021_v56 = vsel %vm9555_vm14, %v7115_v44, %v4171_v7  ;;  %v4173_v23 = vrot.slane %v4171_v7, 4  ;;  %v3509_v52 = vshll.u32 %v3310_v60, 16  ;;  %v3515_v36 = vshll.u32 %v9920_v6, 16  ;;  %v4053_v7 = vld [vmem:[#allocation2 + $0x90] sm:$0xe] }
 0x228   : > { %8041 = vmatprep.mubr.bf16.mxu1 %v9851_v25  ;;  %v3494_v63 = vsel %vm9040_vm7, %v3489_v11, %v3493_v9  ;;  %v3499_v34 = vrot.slane %v3498_v42, 4  ;;  %v3508_v49 = vrot.slane %v3506_v33, 4  ;;  %v3519_v24 = vshrl.u32 %v9920_v6, 16  ;;  %8176 = vmatpush3.bf16.msra.mxu0 %v8523_v47  ;;  %v8516_v9 = vld [vmem:[#allocation8 + $0x1b0] sm:$0xff]   ;;  %v10066_v42 = vld [vmem:[#allocation2 + $0x98] sm:$0x1] }
 0x229   : > { %v10031_v25 = vsel %vm9555_vm14, %v4173_v23, %v4174_v15  ;;  %v3511_v13 = vrot.slane %v3509_v52, 5  ;;  %v3517_v8 = vrot.slane %v3515_v36, 5  ;;  %v3525_v1 = vshll.u32 %v9936_v43, 16  ;;  %8177 = vmatprep.subr.bf16.mxu0 %v8525_v62  ;;  %v3316_v15 = vld [vmem:[#allocation2 + $0x78] sm:$0xf] }
 0x22a   : > { %v3504_v31 = vsel %vm9040_vm7, %v3499_v34, %v3503_v37  ;;  %v7131_v6 = vcombine.low %v10021_v56, %v10031_v25  ;;  %v3521_v3 = vrot.slane %v3519_v24, 4  ;;  %v7116_v47 = vrot.slane %v4052_v58, 9  ;;  %v8528_v37 = vld [vmem:[#allocation8 + $0x1c8] sm:$0xff]   ;;  %v10072_v52 = vld [vmem:[#allocation2 + $0x94] sm:$0xf] }
 0x22b   : > { %8098 = vmatmul.mubr.bf16.gmra.mxu0 %v7127_v28  ;;  %v10043_v29 = vcombine.low %v3494_v63, %v3504_v31  ;;  %v3512_v43 = vor.u32 %v3511_v13, %v3508_v49  ;;  %v3527_v14 = vrot.slane %v3525_v1, 5  ;;  %v4178_v59 = vrot.slane %v10038_v53, 5 }
 0x22c   : > { %8101 = vmatprep.mubr.bf16.mxu0 %v7128_v12  ;;  %v3522_v30 = vor.u32 %v3521_v3, %v3517_v8  ;;  %v4181_v60 = vrot.slane %v10027_v51, 5  ;;  %v3530_v41 = vshrl.u32 %v3313_v26, 16  ;;  %v3533_v57 = vshll.u32 %v3313_v26, 16  ;;  %8178 = vmatpush3.bf16.msra.mxu0 %v8525_v62  ;;  %v4054_v3 = vld [vmem:[#allocation2 + $0x9c] sm:$0xe] }
 0x22d   : > { %v3513_v46 = vrot.slane %v3512_v43, 4  ;;  %v10052_v40 = vsel %vm9555_vm14, %v7116_v47, %v4178_v59  ;;  %v4180_v0 = vrot.slane %v4178_v59, 4  ;;  %v3539_v28 = vshll.u32 %v9975_v38, 16  ;;  %8179 = vmatprep.subr.bf16.mxu0 %v8526_v2  ;;  %v8518_v47 = vld [vmem:[#allocation8 + $0x1a0] sm:$0xff]  }
 0x22e   : > { %v3523_v32 = vrot.slane %v3522_v30, 4  ;;  %v3532_v21 = vrot.slane %v3530_v41, 4  ;;  %v3535_v12 = vrot.slane %v3533_v57, 5  ;;  %v3543_v44 = vshrl.u32 %v9975_v38, 16  ;;  %v8517_v38 = vld [vmem:[#allocation8 + $0x1a8] sm:$0xff]  }
 0x22f   : > { %8042 = vmatmul.mubr.bf16.vlgmr.msra.gmra.mxu1 %v9877_v4  ;;  %v3518_v62 = vsel %vm9040_vm7, %v3513_v46, %v3517_v8  ;;  %v10063_v48 = vsel %vm9555_vm14, %v4180_v0, %v4181_v60  ;;  %v3541_v11 = vrot.slane %v3539_v28, 5  ;;  %v3549_v4 = vshll.u32 %v9960_v5, 16  ;;  %v8529_v8 = vld [vmem:[#allocation8 + $0x1c0] sm:$0xff]   ;;  %v10097_v41 = vld [vmem:[#allocation2 + $0xa4] sm:$0x1]  ;;  %v8521_v28 = vld [vmem:[#allocation8 + $0x198] sm:$0xff]  }
 0x230   : > { %8122 = vmatpush3.bf16.msra.mxu1 %v9853_v50  ;;  %8045 = vmatprep.mubr.bf16.mxu1 %v9908_v55  ;;  %v3528_v50 = vsel %vm9040_vm7, %v3523_v32, %v3527_v14  ;;  %v7132_v55 = vcombine.low %v10052_v40, %v10063_v48  ;;  %v3536_v33 = vor.u32 %v3535_v12, %v3532_v21  ;;  %v3545_v23 = vrot.slane %v3543_v44, 4  ;;  %v3319_v14 = vld [vmem:[#allocation2 + $0x84] sm:$0xf] }
 0x231   : > { %8123 = vmatprep.subr.bf16.mxu1 %v8516_v9  ;;  %8180 = vmatpush3.bf16.msra.mxu0 %v8526_v2  ;;  %v10074_v36 = vcombine.low %v3518_v62, %v3528_v50  ;;  %v3551_v58 = vrot.slane %v3549_v4, 5  ;;  %v7117_v5 = vrot.slane %v4053_v7, 9  ;;  %v4185_v63 = vrot.slane %v10072_v52, 5  ;;  %v4055_v50 = vld [vmem:[#allocation2 + $0xa8] sm:$0xe] }
 0x232   : > { %8181 = vmatprep.subr.bf16.mxu0 %v8528_v37  ;;  %v3537_v34 = vrot.slane %v3536_v33, 4  ;;  %v3546_v49 = vor.u32 %v3545_v23, %v3541_v11  ;;  %v4188_v24 = vrot.slane %v10066_v42, 5  ;;  %v3554_v13 = vshrl.u32 %v3316_v15, 16 }
 0x233   : > { %8102 = vmatmul.mubr.bf16.gmra.mxu0 %v7129_v16  ;;  %v10083_v1 = vsel %vm9555_vm14, %v7117_v5, %v4185_v63  ;;  %v4187_v26 = vrot.slane %v4185_v63, 4  ;;  %v3557_v2 = vshll.u32 %v3316_v15, 16  ;;  %v3563_v31 = vshll.u32 %v10009_v10, 16  ;;  %v10125_v63 = vld [vmem:[#allocation2 + $0xb0] sm:$0x1] }
 0x234   : > { %8124 = vmatpush3.bf16.msra.mxu1 %v8516_v9  ;;  %8105 = vmatprep.mubr.bf16.mxu0 %v7130_v54  ;;  %v3542_v43 = vsel %vm9040_vm7, %v3537_v34, %v3541_v11  ;;  %v3547_v35 = vrot.slane %v3546_v49, 4  ;;  %v3556_v27 = vrot.slane %v3554_v13, 4  ;;  %v3567_v16 = vshrl.u32 %v10009_v10, 16  ;;  %v10104_v10 = vld [vmem:[#allocation2 + $0xa0] sm:$0xf] }
 0x235   : > { %8125 = vmatprep.subr.bf16.mxu1 %v8517_v38  ;;  %v10094_v59 = vsel %vm9555_vm14, %v4187_v26, %v4188_v24  ;;  %v3559_v9 = vrot.slane %v3557_v2, 5  ;;  %v3565_v30 = vrot.slane %v3563_v31, 5  ;;  %v3573_v60 = vshll.u32 %v10000_v39, 16  ;;  %8182 = vmatpush3.bf16.msra.mxu0 %v8528_v37  ;;  %v3322_v34 = vld [vmem:[#allocation2 + $0x90] sm:$0xf]  ;;  %v8524_v24 = vld [vmem:[#allocation8 + $0x190] sm:$0xff]  }
 0x236   : > { %v3552_v18 = vsel %vm9040_vm7, %v3547_v35, %v3551_v58  ;;  %v7133_v22 = vcombine.low %v10083_v1, %v10094_v59  ;;  %v3569_v54 = vrot.slane %v3567_v16, 4  ;;  %v7118_v57 = vrot.slane %v4054_v3, 9  ;;  %8183 = vmatprep.subr.bf16.mxu0 %v8529_v8  ;;  %v10133_v49 = vld [vmem:[#allocation2 + $0xac] sm:$0xf]  ;;  %v4056_v35 = vld [vmem:[#allocation2 + $0xb4] sm:$0xe] }
 0x237   : > { %8046 = vmatmul.mubr.bf16.gmra.mxu1 %v9942_v61  ;;  %v10107_v39 = vcombine.low %v3542_v43, %v3552_v18  ;;  %v3560_v46 = vor.u32 %v3559_v9, %v3556_v27  ;;  %v3575_v0 = vrot.slane %v3573_v60, 5  ;;  %v4192_v61 = vrot.slane %v10104_v10, 5  ;;  %v3325_v9 = vld [vmem:[#allocation2 + $0x9c] sm:$0xf] }
 0x238   : > { %8049 = vmatprep.mubr.bf16.mxu1 %v9980_v19  ;;  %8126 = vmatpush3.bf16.msra.mxu1 %v8517_v38  ;;  %v3570_v37 = vor.u32 %v3569_v54, %v3565_v30  ;;  %v4195_v32 = vrot.slane %v10097_v41, 5  ;;  %v3578_v21 = vshrl.u32 %v3319_v14, 16  ;;  %v3581_v12 = vshll.u32 %v3319_v14, 16 }
 0x239   : > { %8127 = vmatprep.subr.bf16.mxu1 %v8518_v47  ;;  %v3561_v44 = vrot.slane %v3560_v46, 4  ;;  %v10113_v7 = vsel %vm9555_vm14, %v7118_v57, %v4192_v61  ;;  %v4194_v19 = vrot.slane %v4192_v61, 4  ;;  %v3587_v62 = vshll.u32 %v10038_v53, 16  ;;  %8184 = vmatpush3.bf16.msra.mxu0 %v8529_v8  ;;  %v10152_v57 = vld [vmem:[#allocation2 + $0xbc] sm:$0x1] }
 0x23a   : > { %v3571_v11 = vrot.slane %v3570_v37, 4  ;;  %v3580_v4 = vrot.slane %v3578_v21, 4  ;;  %v3583_v15 = vrot.slane %v3581_v12, 5  ;;  %v3591_v38 = vshrl.u32 %v10038_v53, 16 }
 0x23b   : > { %8106 = vmatmul.mubr.bf16.gmra.mxu0 %v7131_v6  ;;  %v3566_v33 = vsel %vm9040_vm7, %v3561_v44, %v3565_v30  ;;  %v4196_v23 = vsel %vm9555_vm14, %v4194_v19, %v4195_v32  ;;  %v3589_v58 = vrot.slane %v3587_v62, 5  ;;  %v3597_v5 = vshll.u32 %v10027_v51, 16 }
 0x23c   : > { %8128 = vmatpush3.bf16.msra.mxu1 %v8518_v47  ;;  %8109 = vmatprep.mubr.bf16.mxu0 %v7132_v55  ;;  %v3576_v56 = vsel %vm9040_vm7, %v3571_v11, %v3575_v0  ;;  %v7134_v25 = vcombine.low %v10113_v7, %v4196_v23  ;;  %v3584_v6 = vor.u32 %v3583_v15, %v3580_v4  ;;  %v3593_v53 = vrot.slane %v3591_v38, 4  ;;  %v8530_v11 = vld [vmem:[#allocation8 + $0x180] sm:$0xff]  }
 0x23d   : > { %8129 = vmatprep.subr.bf16.mxu1 %v8521_v28  ;;  %v10135_v13 = vcombine.low %v3566_v33, %v3576_v56  ;;  %v3599_v51 = vrot.slane %v3597_v5, 5  ;;  %v7119_v8 = vrot.slane %v4055_v50, 9  ;;  %v4199_v26 = vrot.slane %v10133_v49, 5 }
 0x23e   : > { %v3585_v40 = vrot.slane %v3584_v6, 4  ;;  %v3594_v48 = vor.u32 %v3593_v53, %v3589_v58  ;;  %v4202_v55 = vrot.slane %v10125_v63, 5  ;;  %v3602_v2 = vshrl.u32 %v3322_v34, 16  ;;  %v10181_v6 = vld [vmem:[#allocation2 + $0xc8] sm:$0x1] }
 0x23f   : > { %8050 = vmatmul.mubr.bf16.gmra.mxu1 %v10011_v17  ;;  %v10143_v31 = vsel %vm9555_vm14, %v7119_v8, %v4199_v26  ;;  %v4201_v3 = vrot.slane %v4199_v26, 4  ;;  %v3605_v47 = vshll.u32 %v3322_v34, 16  ;;  %v3611_v43 = vshll.u32 %v10072_v52, 16  ;;  %v10187_v8 = vld [vmem:[#allocation2 + $0xc4] sm:$0xf]  ;;  %v10189_v26 = vld [vmem:[#allocation8 + $0x238] sm:$0xff]  }
 0x240   : > { %8053 = vmatprep.mubr.bf16.mxu1 %v10043_v29  ;;  %8130 = vmatpush3.bf16.msra.mxu1 %v8521_v28  ;;  %v3590_v17 = vsel %vm9040_vm7, %v3585_v40, %v3589_v58  ;;  %v3595_v27 = vrot.slane %v3594_v48, 4  ;;  %v3604_v16 = vrot.slane %v3602_v2, 4  ;;  %v3615_v14 = vshrl.u32 %v10072_v52, 16  ;;  %v8527_v29 = vld [vmem:[#allocation8 + $0x188] sm:$0xff]   ;;  %v10157_v28 = vld [vmem:[#allocation2 + $0xb8] sm:$0xf] }
 0x241   : > { %8131 = vmatprep.subr.bf16.mxu1 %v8524_v24  ;;  %v4203_v30 = vsel %vm9555_vm14, %v4201_v3, %v4202_v55  ;;  %v3607_v60 = vrot.slane %v3605_v47, 5  ;;  %v3613_v18 = vrot.slane %v3611_v43, 5  ;;  %v3621_v54 = vshll.u32 %v10066_v42, 16  ;;  %v4057_v58 = vld [vmem:[#allocation2 + $0xc0] sm:$0xe] }
 0x242   : > { %v3600_v46 = vsel %vm9040_vm7, %v3595_v27, %v3599_v51  ;;  %v7135_v0 = vcombine.low %v10143_v31, %v4203_v30  ;;  %v3617_v61 = vrot.slane %v3615_v14, 4  ;;  %v7120_v52 = vrot.slane %v4056_v35, 9  ;;  %v10165_v12 = vpop.f32.mrf.mxu0  ;;  %v4925_v14 = vld [vmem:[#allocation2 + $0x18] sm:$0xf] }
 0x243   : > { %8110 = vmatmul.mubr.bf16.gmra.mxu0 %v7133_v22  ;;  %v10162_v37 = vcombine.low %v3590_v17, %v3600_v46  ;;  %v3608_v32 = vor.u32 %v3607_v60, %v3604_v16  ;;  %v3623_v21 = vrot.slane %v3621_v54, 5  ;;  %v4206_v42 = vrot.slane %v10157_v28, 5 }
 0x244   : > { %8132 = vmatpush3.bf16.msra.mxu1 %v8524_v24  ;;  %8113 = vmatprep.mubr.bf16.mxu0 %v7134_v25  ;;  %v3618_v44 = vor.u32 %v3617_v61, %v3613_v18  ;;  %v4209_v7 = vrot.slane %v10152_v57, 5  ;;  %v3626_v19 = vshrl.u32 %v3325_v9, 16  ;;  %v3629_v62 = vshll.u32 %v3325_v9, 16  ;;  %v10171_v15 = vpop.f32.mrf.mxu0  ;;  %v10207_v61 = vld [vmem:[#allocation2 + $0x1c] sm:$0xf] }
 0x245   : > { %8133 = vmatprep.subr.bf16.mxu1 %v8527_v29  ;;  %v3609_v4 = vrot.slane %v3608_v32, 4  ;;  %v4207_v1 = vsel %vm9555_vm14, %v7120_v52, %v4206_v42  ;;  %v4208_v59 = vrot.slane %v4206_v42, 4  ;;  %v3635_v22 = vshll.u32 %v10104_v10, 16  ;;  %v10212_v42 = vld [vmem:[#allocation2 + $0x20] sm:$0x1] }
 0x246   : > { %v3619_v38 = vrot.slane %v3618_v44, 4  ;;  %v3628_v50 = vrot.slane %v3626_v19, 4  ;;  %v3631_v33 = vrot.slane %v3629_v62, 5  ;;  %v3639_v23 = vshrl.u32 %v10104_v10, 16  ;;  %v10183_v53 = vpop.f32.mrf.mxu0  ;;  %v3331_v44 = vld [vmem:[#allocation2 + $0xb4] sm:$0xf] }
 0x247   : > { %8054 = vmatmul.mubr.bf16.gmra.mxu1 %v10074_v36  ;;  %v3614_v5 = vsel %vm9040_vm7, %v3609_v4, %v3613_v18  ;;  %v4210_v34 = vsel %vm9555_vm14, %v4208_v59, %v4209_v7  ;;  %v3637_v56 = vrot.slane %v3635_v22, 5  ;;  %v3645_v25 = vshll.u32 %v10097_v41, 16  ;;  %v3328_v36 = vld [vmem:[#allocation2 + $0xa8] sm:$0xf] }
 0x248   : > { %8057 = vmatprep.mubr.bf16.mxu1 %v10107_v39  ;;  %8134 = vmatpush3.bf16.msra.mxu1 %v8527_v29  ;;  %v3624_v10 = vsel %vm9040_vm7, %v3619_v38, %v3623_v21  ;;  %v7136_v24 = vcombine.low %v4207_v1, %v4210_v34  ;;  %v3632_v39 = vor.u32 %v3631_v33, %v3628_v50  ;;  %v3641_v51 = vrot.slane %v3639_v23, 4  ;;  %v10195_v43 = vpop.f32.mrf.mxu0 }
 0x249   : > { %8135 = vmatprep.subr.bf16.mxu1 %v8530_v11  ;;  %v10191_v40 = vcombine.low %v3614_v5, %v3624_v10  ;;  %v3647_v41 = vrot.slane %v3645_v25, 5  ;;  %v7121_v48 = vrot.slane %v4057_v58, 9  ;;  %v4213_v55 = vrot.slane %v10187_v8, 5 }
 0x24a   : > { %v3633_v2 = vrot.slane %v3632_v39, 4  ;;  %v3642_v31 = vor.u32 %v3641_v51, %v3637_v56  ;;  %v4216_v3 = vrot.slane %v10181_v6, 5  ;;  %v3650_v47 = vshrl.u32 %v3328_v36, 16  ;;  %v10214_v7 = vpop.f32.mrf.mxu0 }
 0x24b   : > { %8114 = vmatmul.mubr.bf16.gmra.mxu0 %v7135_v0  ;;  %v4214_v35 = vsel %vm9555_vm14, %v7121_v48, %v4213_v55  ;;  %v4215_v17 = vrot.slane %v4213_v55, 4  ;;  %v3653_v27 = vshll.u32 %v3328_v36, 16  ;;  %v3659_v16 = vshll.u32 %v10133_v49, 16 }
 0x24c   : > { %8136 = vmatpush3.bf16.msra.mxu1 %v8530_v11  ;;  %8117 = vmatprep.mubr.bf16.mxu0 %v7136_v24  ;;  %v3638_v9 = vsel %vm9040_vm7, %v3633_v2, %v3637_v56  ;;  %v3643_v29 = vrot.slane %v3642_v31, 4  ;;  %v3652_v30 = vrot.slane %v3650_v47, 4  ;;  %v3663_v60 = vshrl.u32 %v10133_v49, 16  ;;  %v4928_v24 = vld [vmem:[#allocation2 + $0x24] sm:$0xf] }
 0x24d   : > { %8217 = vmatprep.subr.bf16.mxu1 %v10189_v26  ;;  %v4217_v18 = vsel %vm9555_vm14, %v4215_v17, %v4216_v3  ;;  %v3655_v54 = vrot.slane %v3653_v27, 5  ;;  %v3661_v46 = vrot.slane %v3659_v16, 5  ;;  %v3669_v0 = vshll.u32 %v10125_v63, 16  ;;  %v10229_v47 = vld [vmem:[#allocation2 + $0x28] sm:$0xf] }
 0x24e   : > { %v3648_v52 = vsel %vm9040_vm7, %v3643_v29, %v3647_v41  ;;  %v7137_v32 = vcombine.low %v4214_v35, %v4217_v18  ;;  %v3665_v21 = vrot.slane %v3663_v60, 4  ;;  %v4974_v49 = vshrl.u32 %v4925_v14, 16  ;;  %v10232_v16 = vld [vmem:[#allocation2 + $0x2c] sm:$0x1] }
 0x24f   : > { %8058 = vmatmul.mubr.bf16.gmra.mxu1 %v10135_v13  ;;  %v7094_v19 = vcombine.low %v3638_v9, %v3648_v52  ;;  %v3656_v62 = vor.u32 %v3655_v54, %v3652_v30  ;;  %v3671_v63 = vrot.slane %v3669_v0, 5  ;;  %v4977_v11 = vshll.u32 %v4925_v14, 16 }
 0x250   : > { %8061 = vmatprep.mubr.bf16.mxu1 %v10162_v37  ;;  %v3666_v4 = vor.u32 %v3665_v21, %v3661_v46  ;;  %v4976_v1 = vrot.slane %v4974_v49, 4  ;;  %v4983_v13 = vshll.u32 %v10207_v61, 16  ;;  %v4987_v59 = vshrl.u32 %v10207_v61, 16  ;;  %v10220_v37 = vpop.f32.mrf.mxu0 }
 0x251   : > { %v3657_v22 = vrot.slane %v3656_v62, 4  ;;  %v4979_v38 = vrot.slane %v4977_v11, 5  ;;  %v4993_v50 = vshll.u32 %v10212_v42, 16  ;;  %v3674_v33 = vshrl.u32 %v3331_v44, 16 }
 0x252   : > { %v3667_v23 = vrot.slane %v3666_v4, 4  ;;  %v4985_v58 = vrot.slane %v4983_v13, 5  ;;  %v4989_v5 = vrot.slane %v4987_v59, 4  ;;  %v3677_v34 = vshll.u32 %v3331_v44, 16  ;;  %v10234_v9 = vpop.f32.mrf.mxu0 }
 0x253   : > { %8118 = vmatmul.mubr.bf16.gmra.mxu0 %v7137_v32  ;;  %v3662_v56 = vsel %vm9040_vm7, %v3657_v22, %v3661_v46  ;;  %v4980_v25 = vor.u32 %v4979_v38, %v4976_v1  ;;  %v4995_v36 = vrot.slane %v4993_v50, 5  ;;  %v3676_v10 = vrot.slane %v3674_v33, 4  ;;  %v4931_v33 = vld [vmem:[#allocation2 + $0x30] sm:$0xf] }
 0x254   : > { %v3672_v39 = vsel %vm9040_vm7, %v3667_v23, %v3671_v63  ;;  %v4990_v51 = vor.u32 %v4989_v5, %v4985_v58  ;;  %v3679_v41 = vrot.slane %v3677_v34, 5  ;;  %v3683_v48 = vshll.u32 %v10157_v28, 16  ;;  %v10245_v63 = vpop.f32.mrf.mxu0 }
 0x255   : > { %v7095_v55 = vcombine.low %v3662_v56, %v3672_v39  ;;  %v4981_v2 = vrot.slane %v4980_v25, 4  ;;  %v3687_v31 = vshrl.u32 %v10157_v28, 16  ;;  %v3693_v3 = vshll.u32 %v10152_v57, 16  ;;  %v3334_v57 = vld [vmem:[#allocation2 + $0xc0] sm:$0xf] }
 0x256   : > { %v4991_v35 = vrot.slane %v4990_v51, 4  ;;  %v3680_v17 = vor.u32 %v3679_v41, %v3676_v10  ;;  %v3685_v27 = vrot.slane %v3683_v48, 5  ;;  %v4998_v14 = vshrl.u32 %v4928_v24, 16  ;;  %v10251_v25 = vld [vmem:[#allocation2 + $0x34] sm:$0xf] }
 0x257   : > { %8062 = vmatmul.mubr.bf16.gmra.mxu1 %v10191_v40  ;;  %v4986_v29 = vsel %vm9040_vm7, %v4981_v2, %v4985_v58  ;;  %v3689_v30 = vrot.slane %v3687_v31, 4  ;;  %v3695_v28 = vrot.slane %v3693_v3, 5  ;;  %v5001_v60 = vshll.u32 %v4928_v24, 16  ;;  %v7851_v23 = vpop.f32.mrf.mxu1  ;;  %v10258_v2 = vld [vmem:[#allocation2 + $0x38] sm:$0x1] }
 0x258   : > { %8065 = vmatprep.mubr.bf16.mxu1 %v7094_v19  ;;  %v4996_v18 = vsel %vm9040_vm7, %v4991_v35, %v4995_v36  ;;  %v3681_v40 = vrot.slane %v3680_v17, 4  ;;  %v5000_v54 = vrot.slane %v4998_v14, 4  ;;  %v5007_v46 = vshll.u32 %v10229_v47, 16 }
 0x259   : > { %v7170_v0 = vcombine.low %v4986_v29, %v4996_v18  ;;  %v3690_v52 = vor.u32 %v3689_v30, %v3685_v27  ;;  %v5003_v32 = vrot.slane %v5001_v60, 5  ;;  %v5011_v21 = vshrl.u32 %v10229_v47, 16  ;;  %v1988_v14 = vpop.f32.mrf.mxu1  ;;  %v10264_v60 = vld [vmem:[#allocation2 + $0x40] sm:$0xf] }
 0x25a   : > { %v3686_v49 = vsel %vm9040_vm7, %v3681_v40, %v3685_v27  ;;  %v5009_v44 = vrot.slane %v5007_v46, 5  ;;  %v5017_v19 = vshll.u32 %v10232_v16, 16  ;;  %v3698_v62 = vshrl.u32 %v3334_v57, 16  ;;  %v4934_v27 = vld [vmem:[#allocation2 + $0x3c] sm:$0xf] }
 0x25b   : > { %8185 = vmatprep.mubr.bf16.mxu0 %v7170_v0  ;;  %v3691_v11 = vrot.slane %v3690_v52, 4  ;;  %v5004_v4 = vor.u32 %v5003_v32, %v5000_v54  ;;  %v5013_v1 = vrot.slane %v5011_v21, 4  ;;  %v3701_v13 = vshll.u32 %v3334_v57, 16 }
 0x25c   : > { %v5019_v59 = vrot.slane %v5017_v19, 5  ;;  %v3700_v22 = vrot.slane %v3698_v62, 4  ;;  %v3707_v38 = vshll.u32 %v10187_v8, 16  ;;  %v3711_v50 = vshrl.u32 %v10187_v8, 16 }
 0x25d   : > { %v3696_v58 = vsel %vm9040_vm7, %v3691_v11, %v3695_v28  ;;  %v5005_v5 = vrot.slane %v5004_v4, 4  ;;  %v5014_v34 = vor.u32 %v5013_v1, %v5009_v44  ;;  %v3703_v56 = vrot.slane %v3701_v13, 5  ;;  %v10254_v51 = vpop.f32.mrf.mxu0  ;;  %v4937_v11 = vld [vmem:[#allocation2 + $0x48] sm:$0xf]  ;;  %v7852_v4 = vpop.f32.mrf.mxu1 }
 0x25e   : > { %v7096_v36 = vcombine.low %v3686_v49, %v3696_v58  ;;  %v3709_v10 = vrot.slane %v3707_v38, 5  ;;  %v3713_v24 = vrot.slane %v3711_v50, 4  ;;  %v3717_v39 = vshll.u32 %v10181_v6, 16 }
 0x25f   : > { %8066 = vmatmul.mubr.bf16.gmra.mxu1 %v7095_v55  ;;  %v5010_v8 = vsel %vm9040_vm7, %v5005_v5, %v5009_v44  ;;  %v5015_v41 = vrot.slane %v5014_v34, 4  ;;  %v3704_v48 = vor.u32 %v3703_v56, %v3700_v22  ;;  %v5022_v31 = vshrl.u32 %v4931_v33, 16  ;;  %v10266_v46 = vpop.f32.mrf.mxu0  ;;  %v10274_v22 = vld [vmem:[#allocation2 + $0x44] sm:$0x1]  ;;  %v10277_v34 = vld [vmem:[#allocation2 + $0x4c] sm:$0xf] }
 0x260   : > { %8069 = vmatprep.mubr.bf16.mxu1 %v7096_v36  ;;  %v3714_v3 = vor.u32 %v3713_v24, %v3709_v10  ;;  %v3719_v35 = vrot.slane %v3717_v39, 5  ;;  %v5025_v17 = vshll.u32 %v4931_v33, 16  ;;  %v5031_v55 = vshll.u32 %v10251_v25, 16 }
 0x261   : > { %v5020_v6 = vsel %vm9040_vm7, %v5015_v41, %v5019_v59  ;;  %v3705_v29 = vrot.slane %v3704_v48, 4  ;;  %v5024_v30 = vrot.slane %v5022_v31, 4  ;;  %v5035_v28 = vshrl.u32 %v10251_v25, 16  ;;  %v8531_v59 = vld [vmem:[#allocation2 + $0x18] sm:$0xff]   ;;  %v10279_v56 = vpop.f32.mrf.mxu0  ;;  %v10285_v31 = vld [vmem:[#allocation2 + $0x50] sm:$0x1] }
 0x262   : > { %v7171_v57 = vcombine.low %v5010_v8, %v5020_v6  ;;  %v3715_v18 = vrot.slane %v3714_v3, 4  ;;  %v5027_v40 = vrot.slane %v5025_v17, 5  ;;  %v5033_v54 = vrot.slane %v5031_v55, 5 }
 0x263   : > { %v3710_v0 = vsel %vm9040_vm7, %v3705_v29, %v3709_v10  ;;  %v5037_v52 = vrot.slane %v5035_v28, 4  ;;  %v5041_v32 = vshll.u32 %v10258_v2, 16  ;;  %v5046_v21 = vshrl.u32 %v4934_v27, 16  ;;  %v4940_v28 = vld [vmem:[#allocation2 + $0x54] sm:$0xf] }
 0x264   : > { %8186 = vmatmul.mubr.bf16.vlgmr.msra.gmra.mxu0 %v7171_v57  ;;  %v3720_v49 = vsel %vm9040_vm7, %v3715_v18, %v3719_v35  ;;  %v5028_v44 = vor.u32 %v5027_v40, %v5024_v30  ;;  %v5049_v19 = vshll.u32 %v4934_v27, 16  ;;  %v5055_v62 = vshll.u32 %v10264_v60, 16  ;;  %v10287_v35 = vpop.f32.mrf.mxu1  ;;  %v10294_v57 = vpop.f32.mrf.mxu0 }
 0x265   : > { %v7097_v1 = vcombine.low %v3710_v0, %v3720_v49  ;;  %v5038_v13 = vor.u32 %v5037_v52, %v5033_v54  ;;  %v5048_v38 = vrot.slane %v5046_v21, 4  ;;  %v5059_v5 = vshrl.u32 %v10264_v60, 16  ;;  %v10301_v52 = vld [vmem:[#allocation2 + $0x58] sm:$0xf]  ;;  %v8533_v49 = vld [vmem:[#allocation2 + $0x24] sm:$0xff]  }
 0x266   : > { %v5029_v50 = vrot.slane %v5028_v44, 4  ;;  %v5051_v33 = vrot.slane %v5049_v19, 5  ;;  %v5057_v58 = vrot.slane %v5055_v62, 5  ;;  %v5043_v10 = vrot.slane %v5041_v32, 5 }
 0x267   : > { %8070 = vmatmul.mubr.bf16.gmra.mxu1 %v7097_v1  ;;  %v5039_v36 = vrot.slane %v5038_v13, 4  ;;  %v10282_v24 = vadd.f32 %v10165_v12, %v7851_v23  ;;  %v5070_v39 = vshrl.u32 %v4937_v11, 16  ;;  %v5061_v41 = vrot.slane %v5059_v5, 4 }
 0x268   : > { %8137 = vmatprep.mubr.bf16.mxu1 %v8531_v59  ;;  %v5052_v8 = vor.u32 %v5051_v33, %v5048_v38  ;;  %v5065_v48 = vshll.u32 %v10274_v22, 16  ;;  %v5073_v3 = vshll.u32 %v4937_v11, 16  ;;  %v5034_v17 = vsel %vm9040_vm7, %v5029_v50, %v5033_v54  ;;  %v10308_v59 = vld [vmem:[#allocation2 + $0x5c] sm:$0x1]  ;;  %v8534_v33 = vld [vmem:[#allocation2 + $0x30] sm:$0xff]  }
 0x269   : > { %v5044_v55 = vsel %vm9040_vm7, %v5039_v36, %v5043_v10  ;;  %v5072_v27 = vrot.slane %v5070_v39, 4  ;;  %v5079_v12 = vshll.u32 %v10277_v34, 16  ;;  %v5062_v29 = vor.u32 %v5061_v41, %v5057_v58 }
 0x26a   : > { %v7172_v23 = vcombine.low %v5034_v17, %v5044_v55  ;;  %v5053_v6 = vrot.slane %v5052_v8, 4  ;;  %v5075_v30 = vrot.slane %v5073_v3, 5  ;;  %v5083_v40 = vshrl.u32 %v10277_v34, 16 }
 0x26b   : > { %v5081_v18 = vrot.slane %v5079_v12, 5  ;;  %v5089_v0 = vshll.u32 %v10285_v31, 16  ;;  %v10299_v54 = vadd.f32 %v10171_v15, %v1988_v14  ;;  %v5063_v32 = vrot.slane %v5062_v29, 4  ;;  %v8535_v14 = vld [vmem:[#allocation8 + $0x230] sm:$0xff]  }
 0x26c   : > { %8189 = vmatprep.mubr.bf16.mxu0 %v7172_v23  ;;  %v5067_v21 = vrot.slane %v5065_v48, 5  ;;  %v5076_v44 = vor.u32 %v5075_v30, %v5072_v27  ;;  %v10304_v19 = vadd.f32 %v10183_v53, %v7852_v4  ;;  %v7855_v62 = vpop.f32.mrf.mxu1  ;;  %v5058_v11 = vsel %vm9040_vm7, %v5053_v6, %v5057_v58  ;;  %v4943_v53 = vld [vmem:[#allocation2 + $0x60] sm:$0xf]  ;;  %v10316_v48 = vld [vmem:[#allocation2 + $0x64] sm:$0xf] }
 0x26d   : > { %v5085_v1 = vrot.slane %v5083_v40, 4  ;;  %v5091_v13 = vrot.slane %v5089_v0, 5  ;;  %v5094_v15 = vshrl.u32 %v4940_v28, 16  ;;  %v5097_v5 = vshll.u32 %v4940_v28, 16  ;;  %v8538_v40 = vld [vmem:[#allocation8 + $0x228] sm:$0xff]  }
 0x26e   : > { %v5068_v38 = vsel %vm9040_vm7, %v5063_v32, %v5067_v21  ;;  %v5077_v50 = vrot.slane %v5076_v44, 4  ;;  %v5103_v36 = vshll.u32 %v10301_v52, 16  ;;  %v2004_v4 = vpop.f32.mrf.mxu1  ;;  %v10313_v10 = vpop.f32.mrf.mxu0  ;;  %v5107_v41 = vshrl.u32 %v10301_v52, 16 }
 0x26f   : > { %v7173_v39 = vcombine.low %v5058_v11, %v5068_v38  ;;  %8138 = vmatmul.mubr.bf16.vlgmr.msra.gmra.mxu1 %v8533_v49  ;;  %v5086_v58 = vor.u32 %v5085_v1, %v5081_v18  ;;  %v5096_v8 = vrot.slane %v5094_v15, 4  ;;  %v5099_v17 = vrot.slane %v5097_v5, 5 }
 0x270   : > { %v5082_v3 = vsel %vm9040_vm7, %v5077_v50, %v5081_v18  ;;  %8218 = vmatpush3.bf16.msra.mxu1 %v10189_v26  ;;  %8141 = vmatprep.mubr.bf16.mxu1 %v8534_v33  ;;  %v5105_v55 = vrot.slane %v5103_v36, 5  ;;  %v5113_v27 = vshll.u32 %v10308_v59, 16  ;;  %v7856_v12 = vpop.f32.mrf.mxu1  ;;  %v10322_v23 = vpop.f32.mrf.mxu0  ;;  %v5109_v29 = vrot.slane %v5107_v41, 4  ;;  %v10327_v26 = vld [vmem:[#allocation2 + $0x68] sm:$0x1]  ;;  %v8536_v50 = vld [vmem:[#allocation2 + $0x3c] sm:$0xff]  }
 0x271   : > { %8190 = vmatmul.mubr.bf16.gmra.mxu0 %v7173_v39  ;;  %v5087_v6 = vrot.slane %v5086_v58, 4  ;;  %8219 = vmatprep.subr.bf16.mxu1 %v8535_v14  ;;  %v10325_v30 = vadd.f32 %v10214_v7, %v7855_v62  ;;  %v5118_v28 = vshrl.u32 %v4943_v53, 16  ;;  %v5100_v18 = vor.u32 %v5099_v17, %v5096_v8  ;;  %v4946_v36 = vld [vmem:[#allocation2 + $0x6c] sm:$0xf]  ;;  %v8541_v17 = vld [vmem:[#allocation8 + $0x220] sm:$0xff]  }
 0x272   : > { %v5115_v0 = vrot.slane %v5113_v27, 5  ;;  %v5121_v32 = vshll.u32 %v4943_v53, 16  ;;  %v5127_v21 = vshll.u32 %v10316_v48, 16  ;;  %v10330_v49 = vpop.f32.mrf.mxu0  ;;  %v5110_v11 = vor.u32 %v5109_v29, %v5105_v55  ;;  %v2007_v7 = vpop.f32.mrf.mxu1 }
 0x273   : > { %11478 = vst [vmem:[#allocation16_spill] sm:$0xff] %v10325_v30  ;;  %v5092_v44 = vsel %vm9040_vm7, %v5087_v6, %v5091_v13  ;;  %v5120_v1 = vrot.slane %v5118_v28, 4  ;;  %v5131_v15 = vshrl.u32 %v10316_v48, 16  ;;  %v5101_v38 = vrot.slane %v5100_v18, 4  ;;  %v10339_v13 = vld [vmem:[#allocation2 + $0x70] sm:$0xf] }
 0x274   : > { %v7174_v62 = vcombine.low %v5082_v3, %v5092_v44  ;;  %v5123_v33 = vrot.slane %v5121_v32, 5  ;;  %v5129_v5 = vrot.slane %v5127_v21, 5  ;;  %8220 = vmatpush3.bf16.msra.mxu1 %v8535_v14  ;;  %v5111_v53 = vrot.slane %v5110_v11, 4  ;;  %v10341_v41 = vpop.f32.mrf.mxu0  ;;  %v8537_v14 = vld [vmem:[#allocation2 + $0x48] sm:$0xff]   ;;  %v4949_v21 = vld [vmem:[#allocation2 + $0x78] sm:$0xf] }
 0x275   : > { %v5133_v39 = vrot.slane %v5131_v15, 4  ;;  %v5137_v58 = vshll.u32 %v10327_v26, 16  ;;  %v10337_v8 = vadd.f32 %v10220_v37, %v2004_v4  ;;  %8221 = vmatprep.subr.bf16.mxu1 %v8538_v40  ;;  %v5106_v3 = vsel %vm9040_vm7, %v5101_v38, %v5105_v55  ;;  %v10351_v37 = vld [vmem:[#allocation2 + $0x74] sm:$0x1]  ;;  %v8543_v30 = vld [vmem:[#allocation2 + $0x78] sm:$0xff]  }
 0x276   : > { %8193 = vmatprep.mubr.bf16.mxu0 %v7174_v62  ;;  %v5124_v27 = vor.u32 %v5123_v33, %v5120_v1  ;;  %v10346_v6 = vadd.f32 %v10234_v9, %v7856_v12  ;;  %v10349_v29 = vadd.f32 %v10245_v63, %v2007_v7  ;;  %v5116_v4 = vsel %vm9040_vm7, %v5111_v53, %v5115_v0  ;;  %v10356_v1 = vld [vmem:[#allocation2 + $0x7c] sm:$0xf]  ;;  %v8544_v38 = vld [vmem:[#allocation8 + $0x218] sm:$0xff]  }
 0x277   : > { %11479 = vst [vmem:[#allocation17_spill] sm:$0xff] %v10337_v8  ;;  %8142 = vmatmul.mubr.bf16.gmra.mxu1 %v8536_v50  ;;  %v5134_v28 = vor.u32 %v5133_v39, %v5129_v5  ;;  %v5139_v18 = vrot.slane %v5137_v58, 5  ;;  %v5142_v32 = vshrl.u32 %v4946_v36, 16  ;;  %v7175_v44 = vcombine.low %v5106_v3, %v5116_v4 }
 0x278   : > { %11480 = vst [vmem:[#allocation18_spill] sm:$0xff] %v10346_v6  ;;  %11481 = vst [vmem:[#allocation19_spill] sm:$0xff] %v10349_v29  ;;  %v5125_v55 = vrot.slane %v5124_v27, 4  ;;  %8145 = vmatprep.mubr.bf16.mxu1 %v8537_v14  ;;  %v5145_v11 = vshll.u32 %v4946_v36, 16  ;;  %v5151_v9 = vshll.u32 %v10339_v13, 16  ;;  %v7859_v12 = vpop.f32.mrf.mxu1  ;;  %8222 = vmatpush3.bf16.msra.mxu1 %v8538_v40  ;;  %v5155_v7 = vshrl.u32 %v10339_v13, 16 }
 0x279   : > { %v5135_v63 = vrot.slane %v5134_v28, 4  ;;  %v5144_v15 = vrot.slane %v5142_v32, 4  ;;  %v5161_v0 = vshll.u32 %v10351_v37, 16  ;;  %v10360_v62 = vpop.f32.mrf.mxu0  ;;  %8223 = vmatprep.subr.bf16.mxu1 %v8541_v17  ;;  %8194 = vmatmul.mubr.bf16.gmra.mxu0 %v7175_v44  ;;  %v10365_v53 = vadd.f32 %v10254_v51, %v7859_v12  ;;  %v10367_v40 = vld [vmem:[#allocation2 + $0x80] sm:$0x1]  ;;  %v8539_v44 = vld [vmem:[#allocation2 + $0x54] sm:$0xff]  }
 0x27a   : > { %v5130_v50 = vsel %vm9040_vm7, %v5125_v55, %v5129_v5  ;;  %v5147_v33 = vrot.slane %v5145_v11, 5  ;;  %v5153_v36 = vrot.slane %v5151_v9, 5  ;;  %v2020_v39 = vpop.f32.mrf.mxu1  ;;  %v5157_v3 = vrot.slane %v5155_v7, 4  ;;  %v8547_v7 = vld [vmem:[#allocation8 + $0x210] sm:$0xff]  }
 0x27b   : > { %11482 = vst [vmem:[#allocation20_spill] sm:$0xff] %v10365_v53  ;;  %v5140_v58 = vsel %vm9040_vm7, %v5135_v63, %v5139_v18  ;;  %v5163_v27 = vrot.slane %v5161_v0, 5  ;;  %v5166_v14 = vshrl.u32 %v4949_v21, 16  ;;  %v10371_v4 = vpop.f32.mrf.mxu0  ;;  %v5169_v5 = vshll.u32 %v4949_v21, 16  ;;  %v4952_v18 = vld [vmem:[#allocation2 + $0x84] sm:$0xf] }
 0x27c   : > { %v7176_v28 = vcombine.low %v5130_v50, %v5140_v58  ;;  %v5148_v32 = vor.u32 %v5147_v33, %v5144_v15  ;;  %v5175_v55 = vshll.u32 %v10356_v1, 16  ;;  %v7860_v11 = vpop.f32.mrf.mxu1  ;;  %8224 = vmatpush3.bf16.msra.mxu1 %v8541_v17  ;;  %v5158_v51 = vor.u32 %v5157_v3, %v5153_v36  ;;  %v8540_v21 = vld [vmem:[#allocation2 + $0x60] sm:$0xff]   ;;  %v10381_v58 = vld [vmem:[#allocation2 + $0x88] sm:$0xf] }
 0x27d   : > { %v5168_v9 = vrot.slane %v5166_v14, 4  ;;  %v5179_v12 = vshrl.u32 %v10356_v1, 16  ;;  %v5185_v53 = vshll.u32 %v10367_v40, 16  ;;  %v10376_v63 = vpop.f32.mrf.mxu0  ;;  %8225 = vmatprep.subr.bf16.mxu1 %v8544_v38  ;;  %v5171_v15 = vrot.slane %v5169_v5, 5 }
 0x27e   : > { %8197 = vmatprep.mubr.bf16.mxu0 %v7176_v28  ;;  %v5149_v0 = vrot.slane %v5148_v32, 4  ;;  %v5177_v50 = vrot.slane %v5175_v55, 5  ;;  %v10379_v33 = vadd.f32 %v10266_v46, %v2020_v39  ;;  %v2023_v17 = vpop.f32.mrf.mxu1  ;;  %v5159_v3 = vrot.slane %v5158_v51, 4  ;;  %v10393_v39 = vld [vmem:[#allocation2 + $0x8c] sm:$0x1] }
 0x27f   : > { %8146 = vmatmul.mubr.bf16.gmra.mxu1 %v8539_v44  ;;  %v5181_v14 = vrot.slane %v5179_v12, 4  ;;  %v5187_v29 = vrot.slane %v5185_v53, 5  ;;  %v10384_v6 = vadd.f32 %v10279_v56, %v7860_v11  ;;  %v10386_v8 = vpop.f32.mrf.mxu0  ;;  %v5172_v32 = vor.u32 %v5171_v15, %v5168_v9  ;;  %11487 = vst [vmem:[#allocation25_spill] sm:$0xff] %v10393_v39  ;;  %v4955_v11 = vld [vmem:[#allocation2 + $0x90] sm:$0xf] }
 0x280   : > { %11483 = vst [vmem:[#allocation21_spill] sm:$0xff] %v10379_v33  ;;  %11485 = vst [vmem:[#allocation23_spill] sm:$0xff] %v10386_v8  ;;  %v5154_v28 = vsel %vm9040_vm7, %v5149_v0, %v5153_v36  ;;  %8149 = vmatprep.mubr.bf16.mxu1 %v8540_v21  ;;  %v10391_v46 = vadd.f32 %v10294_v57, %v2023_v17  ;;  %v5190_v5 = vshrl.u32 %v4952_v18, 16  ;;  %8226 = vmatpush3.bf16.msra.mxu1 %v8544_v38  ;;  %v8550_v36 = vld [vmem:[#allocation8 + $0x208] sm:$0xff]  }
 0x281   : > { %11484 = vst [vmem:[#allocation22_spill] sm:$0xff] %v10384_v6  ;;  %v5164_v53 = vsel %vm9040_vm7, %v5159_v3, %v5163_v27  ;;  %v5182_v44 = vor.u32 %v5181_v14, %v5177_v50  ;;  %v5193_v56 = vshll.u32 %v4952_v18, 16  ;;  %v5199_v55 = vshll.u32 %v10381_v58, 16  ;;  %v10398_v51 = vpop.f32.mrf.mxu0  ;;  %8227 = vmatprep.subr.bf16.mxu1 %v8547_v7  ;;  %v10402_v27 = vld [vmem:[#allocation2 + $0x94] sm:$0xf] }
 0x282   : > { %11486 = vst [vmem:[#allocation24_spill] sm:$0xff] %v10391_v46  ;;  %v7177_v9 = vcombine.low %v5154_v28, %v5164_v53  ;;  %v5173_v12 = vrot.slane %v5172_v32, 4  ;;  %v5192_v57 = vrot.slane %v5190_v5, 4  ;;  %v5203_v0 = vshrl.u32 %v10381_v58, 16  ;;  %v10408_v28 = vld [vmem:[#allocation2 + $0x98] sm:$0x1] }
 0x283   : > { %v5183_v15 = vrot.slane %v5182_v44, 4  ;;  %v5195_v21 = vrot.slane %v5193_v56, 5  ;;  %v5201_v38 = vrot.slane %v5199_v55, 5  ;;  %v5209_v17 = vshll.u32 %v10393_v39, 16  ;;  %v10404_v18 = vpop.f32.mrf.mxu0  ;;  %11488 = vst [vmem:[#allocation26_spill] sm:$0xff] %v10408_v28  ;;  %v8542_v46 = vld [vmem:[#allocation2 + $0x6c] sm:$0xff]  }
 0x284   : > { %8198 = vmatmul.mubr.bf16.gmra.mxu0 %v7177_v9  ;;  %v5178_v3 = vsel %vm9040_vm7, %v5173_v12, %v5177_v50  ;;  %v5205_v14 = vrot.slane %v5203_v0, 4  ;;  %v7863_v8 = vpop.f32.mrf.mxu1  ;;  %v5214_v32 = vshrl.u32 %v4955_v11, 16  ;;  %v5217_v5 = vshll.u32 %v4955_v11, 16  ;;  %8228 = vmatpush3.bf16.msra.mxu1 %v8547_v7  ;;  %v4958_v9 = vld [vmem:[#allocation2 + $0x9c] sm:$0xf] }
 0x285   : > { %v5188_v53 = vsel %vm9040_vm7, %v5183_v15, %v5187_v29  ;;  %v5196_v44 = vor.u32 %v5195_v21, %v5192_v57  ;;  %v5211_v56 = vrot.slane %v5209_v17, 5  ;;  %v10413_v55 = vadd.f32 %v10313_v10, %v7863_v8  ;;  %v10415_v6 = vpop.f32.mrf.mxu0  ;;  %8229 = vmatprep.subr.bf16.mxu1 %v8550_v36  ;;  %v8553_v7 = vld [vmem:[#allocation8 + $0x200] sm:$0xff]  }
 0x286   : > { %v7178_v50 = vcombine.low %v5178_v3, %v5188_v53  ;;  %v5206_v12 = vor.u32 %v5205_v14, %v5201_v38  ;;  %v5216_v0 = vrot.slane %v5214_v32, 4  ;;  %v5219_v33 = vrot.slane %v5217_v5, 5  ;;  %v2036_v11 = vpop.f32.mrf.mxu1  ;;  %v10425_v14 = vld [vmem:[#allocation2 + $0xa0] sm:$0xf] }
 0x287   : > { %11489 = vst [vmem:[#allocation27_spill] sm:$0xff] %v10413_v55  ;;  %v5197_v39 = vrot.slane %v5196_v44, 4  ;;  %8150 = vmatmul.mubr.bf16.gmra.mxu1 %v8542_v46  ;;  %v5223_v29 = vshll.u32 %v10402_v27, 16  ;;  %v5227_v57 = vshrl.u32 %v10402_v27, 16  ;;  %v5233_v10 = vshll.u32 %v10408_v28, 16  ;;  %v10420_v8 = vpop.f32.mrf.mxu0  ;;  %11492 = vst [vmem:[#allocation30_spill] sm:$0xff] %v10425_v14 }
 0x288   : > { %11490 = vst [vmem:[#allocation28_spill] sm:$0xff] %v10420_v8  ;;  %8201 = vmatprep.mubr.bf16.mxu0 %v7178_v50  ;;  %v5207_v15 = vrot.slane %v5206_v12, 4  ;;  %v5220_v21 = vor.u32 %v5219_v33, %v5216_v0  ;;  %8153 = vmatprep.mubr.bf16.mxu1 %v8543_v30  ;;  %v10423_v17 = vadd.f32 %v10322_v23, %v2036_v11  ;;  %v7864_v3 = vpop.f32.mrf.mxu1  ;;  %v5238_v32 = vshrl.u32 %v4958_v9, 16  ;;  %v10429_v55 = vld [vmem:[#allocation2 + $0xa4] sm:$0x1] }
 0x289   : > { %v5202_v46 = vsel %vm9040_vm7, %v5197_v39, %v5201_v38  ;;  %v5225_v5 = vrot.slane %v5223_v29, 5  ;;  %v5229_v53 = vrot.slane %v5227_v57, 4  ;;  %v5235_v44 = vrot.slane %v5233_v10, 5  ;;  %11493 = vst [vmem:[#allocation31_spill] sm:$0xff] %v10429_v55  ;;  %8230 = vmatpush3.bf16.msra.mxu1 %v8550_v36  ;;  %v4961_v0 = vld [vmem:[#allocation2 + $0xa8] sm:$0xf] }
 0x28a   : > { %11491 = vst [vmem:[#allocation29_spill] sm:$0xff] %v10423_v17  ;;  %v5212_v33 = vsel %vm9040_vm7, %v5207_v15, %v5211_v56  ;;  %v5221_v30 = vrot.slane %v5220_v21, 4  ;;  %v10434_v23 = vadd.f32 %v10330_v49, %v7864_v3  ;;  %v2039_v50 = vpop.f32.mrf.mxu1  ;;  %v5240_v12 = vrot.slane %v5238_v32, 4  ;;  %v10436_v11 = vpop.f32.mrf.mxu0  ;;  %8231 = vmatprep.subr.bf16.mxu1 %v8553_v7  ;;  %v10446_v21 = vld [vmem:[#allocation2 + $0xac] sm:$0xf] }
 0x28b   : > { %v7179_v39 = vcombine.low %v5202_v46, %v5212_v33  ;;  %v5230_v38 = vor.u32 %v5229_v53, %v5225_v5  ;;  %v10439_v29 = vadd.f32 %v10341_v41, %v2039_v50  ;;  %v5241_v57 = vshll.u32 %v4958_v9, 16  ;;  %11496 = vst [vmem:[#allocation34_spill] sm:$0xff] %v10446_v21  ;;  %v8545_v9 = vld [vmem:[#allocation2 + $0x84] sm:$0xff]   ;;  %v10453_v8 = vld [vmem:[#allocation2 + $0xb0] sm:$0x1] }
 0x28c   : > { %11494 = vst [vmem:[#allocation32_spill] sm:$0xff] %v10434_v23  ;;  %v5226_v36 = vsel %vm9040_vm7, %v5221_v30, %v5225_v5  ;;  %v5247_v56 = vshll.u32 %v10425_v14, 16  ;;  %v5251_v49 = vshrl.u32 %v10425_v14, 16  ;;  %v5257_v10 = vshll.u32 %v10429_v55, 16  ;;  %v7867_v15 = vpop.f32.mrf.mxu1  ;;  %v10448_v3 = vpop.f32.mrf.mxu0  ;;  %v8546_v5 = vld [vmem:[#allocation2 + $0x90] sm:$0xff]   ;;  %11498 = vst [vmem:[#allocation36_spill] sm:$0xff] %v10453_v8 }
 0x28d   : > { %11495 = vst [vmem:[#allocation33_spill] sm:$0xff] %v10439_v29  ;;  %8202 = vmatmul.mubr.bf16.gmra.mxu0 %v7179_v39  ;;  %v5231_v32 = vrot.slane %v5230_v38, 4  ;;  %v5243_v46 = vrot.slane %v5241_v57, 5  ;;  %v10451_v41 = vadd.f32 %v10360_v62, %v7867_v15  ;;  %v5262_v53 = vshrl.u32 %v4961_v0, 16  ;;  %8232 = vmatpush3.bf16.msra.mxu1 %v8553_v7 }
 0x28e   : > { %v5249_v33 = vrot.slane %v5247_v56, 5  ;;  %v5253_v30 = vrot.slane %v5251_v49, 4  ;;  %v5259_v50 = vrot.slane %v5257_v10, 5  ;;  %v5265_v29 = vshll.u32 %v4961_v0, 16  ;;  %v2052_v23 = vpop.f32.mrf.mxu1  ;;  %v10455_v17 = vpop.f32.mrf.mxu0  ;;  %v4964_v10 = vld [vmem:[#allocation2 + $0xb4] sm:$0xf] }
 0x28f   : > { %11497 = vst [vmem:[#allocation35_spill] sm:$0xff] %v10451_v41  ;;  %v5236_v39 = vsel %vm9040_vm7, %v5231_v32, %v5235_v44  ;;  %v5244_v38 = vor.u32 %v5243_v46, %v5240_v12  ;;  %8154 = vmatmul.mubr.bf16.gmra.mxu1 %v8545_v9  ;;  %v5264_v62 = vrot.slane %v5262_v53, 4  ;;  %v5271_v57 = vshll.u32 %v10446_v21, 16  ;;  %v10472_v9 = vld [vmem:[#allocation2 + $0xb8] sm:$0xf] }
 0x290   : > { %v7180_v15 = vcombine.low %v5226_v36, %v5236_v39  ;;  %v5254_v41 = vor.u32 %v5253_v30, %v5249_v33  ;;  %v5267_v7 = vrot.slane %v5265_v29, 5  ;;  %v5275_v56 = vshrl.u32 %v10446_v21, 16  ;;  %8157 = vmatprep.mubr.bf16.mxu1 %v8546_v5  ;;  %v7868_v49 = vpop.f32.mrf.mxu1  ;;  %v10461_v0 = vpop.f32.mrf.mxu0  ;;  %v10476_v30 = vld [vmem:[#allocation2 + $0xbc] sm:$0x1] }
 0x291   : > { %11499 = vst [vmem:[#allocation37_spill] sm:$0xff] %v10461_v0  ;;  %v5245_v55 = vrot.slane %v5244_v38, 4  ;;  %v5273_v14 = vrot.slane %v5271_v57, 5  ;;  %v5281_v28 = vshll.u32 %v10453_v8, 16  ;;  %v10465_v44 = vadd.f32 %v10371_v4, %v2052_v23  ;;  %11503 = vst [vmem:[#allocation41_spill] sm:$0xff] %v10476_v30 }
 0x292   : > { %8205 = vmatprep.mubr.bf16.mxu0 %v7180_v15  ;;  %v5255_v12 = vrot.slane %v5254_v41, 4  ;;  %v5268_v32 = vor.u32 %v5267_v7, %v5264_v62  ;;  %v5277_v36 = vrot.slane %v5275_v56, 4  ;;  %v10468_v29 = vadd.f32 %v10376_v63, %v7868_v49  ;;  %v10470_v46 = vpop.f32.mrf.mxu1  ;;  %v4967_v62 = vld [vmem:[#allocation2 + $0xc0] sm:$0xf] }
 0x293   : > { %11500 = vst [vmem:[#allocation38_spill] sm:$0xff] %v10465_v44  ;;  %11502 = vst [vmem:[#allocation40_spill] sm:$0xff] %v10470_v46  ;;  %v5250_v53 = vsel %vm9040_vm7, %v5245_v55, %v5249_v33  ;;  %v5283_v5 = vrot.slane %v5281_v28, 5  ;;  %v5286_v39 = vshrl.u32 %v4964_v10, 16  ;;  %v10478_v4 = vpop.f32.mrf.mxu0  ;;  %v5289_v63 = vshll.u32 %v4964_v10, 16  ;;  %v8548_v55 = vld [vmem:[#allocation2 + $0x9c] sm:$0xff]  }
 0x294   : > { %11501 = vst [vmem:[#allocation39_spill] sm:$0xff] %v10468_v29  ;;  %v5260_v23 = vsel %vm9040_vm7, %v5255_v12, %v5259_v50  ;;  %v5269_v41 = vrot.slane %v5268_v32, 4  ;;  %v5278_v38 = vor.u32 %v5277_v36, %v5273_v14  ;;  %v5295_v7 = vshll.u32 %v10472_v9, 16  ;;  %v10489_v32 = vld [vmem:[#allocation2 + $0xc4] sm:$0xf]  ;;  %v8549_v10 = vld [vmem:[#allocation2 + $0xa8] sm:$0xff]  }
 0x295   : > { %v7181_v57 = vcombine.low %v5250_v53, %v5260_v23  ;;  %v5288_v15 = vrot.slane %v5286_v39, 4  ;;  %v5299_v56 = vshrl.u32 %v10472_v9, 16  ;;  %v10484_v28 = vpop.f32.mrf.mxu0  ;;  %v5291_v0 = vrot.slane %v5289_v63, 5  ;;  %v10494_v23 = vld [vmem:[#allocation2 + $0xc8] sm:$0x1] }
 0x296   : > { %v5274_v33 = vsel %vm9040_vm7, %v5269_v41, %v5273_v14  ;;  %v5279_v49 = vrot.slane %v5278_v38, 4  ;;  %v5305_v50 = vshll.u32 %v10476_v30, 16  ;;  %v7871_v12 = vpop.f32.mrf.mxu1  ;;  %v5297_v36 = vrot.slane %v5295_v7, 5 }
 0x297   : > { %8206 = vmatmul.mubr.bf16.gmra.mxu0 %v7181_v57  ;;  %v5301_v53 = vrot.slane %v5299_v56, 4  ;;  %v10492_v39 = vadd.f32 %v10398_v51, %v7871_v12  ;;  %8158 = vmatmul.mubr.bf16.gmra.mxu1 %v8548_v55  ;;  %v5310_v29 = vshrl.u32 %v4967_v62, 16  ;;  %v10496_v46 = vpop.f32.mrf.mxu0  ;;  %v5292_v41 = vor.u32 %v5291_v0, %v5288_v15 }
 0x298   : > { %v5284_v14 = vsel %vm9040_vm7, %v5279_v49, %v5283_v5  ;;  %v5307_v38 = vrot.slane %v5305_v50, 5  ;;  %v5313_v63 = vshll.u32 %v4967_v62, 16  ;;  %8161 = vmatprep.mubr.bf16.mxu1 %v8549_v10  ;;  %v2068_v44 = vpop.f32.mrf.mxu1  ;;  %v5319_v51 = vshll.u32 %v10489_v32, 16 }
 0x299   : > { %11504 = vst [vmem:[#allocation42_spill] sm:$0xff] %v10492_v39  ;;  %v7182_v57 = vcombine.low %v5274_v33, %v5284_v14  ;;  %v5302_v7 = vor.u32 %v5301_v53, %v5297_v36  ;;  %v5312_v56 = vrot.slane %v5310_v29, 4  ;;  %v10501_v12 = vpop.f32.mrf.mxu0  ;;  %v5293_v55 = vrot.slane %v5292_v41, 4  ;;  %v5678_v33 = vld [vmem:[#allocation2 + $0x18] sm:$0xe] }
 0x29a   : > { %11505 = vst [vmem:[#allocation43_spill] sm:$0xff] %v10501_v12  ;;  %v5315_v39 = vrot.slane %v5313_v63, 5  ;;  %v5323_v8 = vshrl.u32 %v10489_v32, 16  ;;  %v5329_v21 = vshll.u32 %v10494_v23, 16  ;;  %v7872_v30 = vpop.f32.mrf.mxu1  ;;  %v5321_v5 = vrot.slane %v5319_v51, 5 }
 0x29b   : > { %8209 = vmatprep.mubr.bf16.mxu0 %v7182_v57  ;;  %v5303_v0 = vrot.slane %v5302_v7, 4  ;;  %v10506_v62 = vadd.f32 %v10404_v18, %v2068_v44  ;;  %v10509_v15 = vadd.f32 %v10415_v6, %v7872_v30  ;;  %v10511_v29 = vpop.f32.mrf.mxu0  ;;  %v5298_v49 = vsel %vm9040_vm7, %v5293_v55, %v5297_v36  ;;  %v4970_v14 = vld [vmem:[#allocation2 + $0xcc] sm:$0xf]  ;;  %v8551_v18 = vld [vmem:[#allocation2 + $0xb4] sm:$0xff]   ;;  %v10522_v30 = vld [vmem:[#allocation2 + $0xd0] sm:$0xf] }
 0x29c   : > { %v5316_v50 = vor.u32 %v5315_v39, %v5312_v56  ;;  %v5325_v10 = vrot.slane %v5323_v8, 4  ;;  %v10515_v53 = vpop.f32.mrf.mxu1  ;;  %v5331_v63 = vrot.slane %v5329_v21, 5  ;;  %v5744_v6 = vrot.slane %v10207_v61, 5  ;;  %v8552_v39 = vld [vmem:[#allocation2 + $0xc0] sm:$0xff]  }
 0x29d   : > { %v5308_v41 = vsel %vm9040_vm7, %v5303_v0, %v5307_v38  ;;  %v10519_v44 = vpop.f32.mrf.mxu0  ;;  %v7194_v8 = vrot.slane %v5678_v33, 9  ;;  %v5747_v21 = vrot.slane %v10212_v42, 5  ;;  %v5334_v38 = vshrl.u32 %v4970_v14, 16  ;;  %v5679_v12 = vld [vmem:[#allocation2 + $0x24] sm:$0xe] }
 0x29e   : > { %v7183_v57 = vcombine.low %v5298_v49, %v5308_v41  ;;  %v5317_v7 = vrot.slane %v5316_v50, 4  ;;  %v5326_v51 = vor.u32 %v5325_v10, %v5321_v5  ;;  %v7875_v36 = vpop.f32.mrf.mxu1  ;;  %v5746_v55 = vrot.slane %v5744_v6, 4  ;;  %v10532_v10 = vld [vmem:[#allocation2 + $0xd4] sm:$0x1] }
 0x29f   : > { %v10525_v56 = vadd.f32 %v10436_v11, %v7875_v36  ;;  %8162 = vmatmul.mubr.bf16.gmra.mxu1 %v8551_v18  ;;  %v10528_v0 = vpop.f32.mrf.mxu0  ;;  %11507 = vst [vmem:[#allocation45_spill] sm:$0xff] %v10532_v10  ;;  %v5337_v33 = vshll.u32 %v4970_v14, 16  ;;  %v5343_v11 = vshll.u32 %v10522_v30, 16  ;;  %v5336_v18 = vrot.slane %v5334_v38, 4 }
 0x2a0   : > { %8210 = vmatmul.mubr.bf16.gmra.mxu0 %v7183_v57  ;;  %v5322_v61 = vsel %vm9040_vm7, %v5317_v7, %v5321_v5  ;;  %v5327_v49 = vrot.slane %v5326_v51, 4  ;;  %8165 = vmatprep.mubr.bf16.mxu1 %v8552_v39  ;;  %v2084_v50 = vpop.f32.mrf.mxu1  ;;  %v5748_v42 = vsel %vm9555_vm14, %v5746_v55, %v5747_v21  ;;  %v5347_v57 = vshrl.u32 %v10522_v30, 16  ;;  %v8554_v55 = vld [vmem:[#allocation2 + $0xcc] sm:$0xff]  }
 0x2a1   : > { %11506 = vst [vmem:[#allocation44_spill] sm:$0xff] %v10525_v56  ;;  %v10536_v41 = vadd.f32 %v10448_v3, %v2084_v50  ;;  %v10541_v36 = vpop.f32.mrf.mxu0  ;;  %v5745_v14 = vsel %vm9555_vm14, %v7194_v8, %v5744_v6  ;;  %v5339_v51 = vrot.slane %v5337_v33, 5  ;;  %v5345_v39 = vrot.slane %v5343_v11, 5 }
 0x2a2   : > { %11509 = vst [vmem:[#allocation47_spill] sm:$0xff] %v10541_v36  ;;  %v5332_v5 = vsel %vm9040_vm7, %v5327_v49, %v5331_v63  ;;  %v7876_v7 = vpop.f32.mrf.mxu1  ;;  %v5349_v21 = vrot.slane %v5347_v57, 4  ;;  %v5353_v38 = vshll.u32 %v10532_v10, 16  ;;  %v5680_v36 = vld [vmem:[#allocation2 + $0x30] sm:$0xe]  ;;  %v10555_v63 = vadd.f32 %v10195_v43, %v10287_v35 }
 0x2a3   : > { %11508 = vst [vmem:[#allocation46_spill] sm:$0xff] %v10536_v41  ;;  %v7184_v3 = vcombine.low %v5322_v61, %v5332_v5  ;;  %v10548_v50 = vadd.f32 %v10455_v17, %v7876_v7  ;;  %v10551_v41 = vpop.f32.mrf.mxu0  ;;  %v7210_v6 = vcombine.low %v5745_v14, %v5748_v42  ;;  %v5340_v8 = vor.u32 %v5339_v51, %v5336_v18  ;;  %v5681_v7 = vld [vmem:[#allocation2 + $0x3c] sm:$0xe] }
 0x2a4   : > { %v10557_v49 = vpop.f32.mrf.mxu1  ;;  %v5751_v61 = vrot.slane %v10229_v47, 5  ;;  %v5350_v17 = vor.u32 %v5349_v21, %v5345_v39  ;;  %v5355_v33 = vrot.slane %v5353_v38, 5  ;;  %v7195_v11 = vrot.slane %v5679_v12, 9 }
 0x2a5   : > { %11510 = vst [vmem:[#allocation48_spill] sm:$0xff] %v10548_v50  ;;  %8213 = vmatprep.mubr.bf16.mxu0 %v7184_v3  ;;  %v5754_v57 = vrot.slane %v10232_v16, 5  ;;  %v10561_v5 = vpop.f32.mrf.mxu0  ;;  %v5341_v56 = vrot.slane %v5340_v8, 4  ;;  %v7196_v43 = vrot.slane %v5680_v36, 9  ;;  %v5758_v35 = vrot.slane %v10251_v25, 5 }
 0x2a6   : > { %v7879_v50 = vpop.f32.mrf.mxu1  ;;  %v5753_v10 = vrot.slane %v5751_v61, 4  ;;  %v5351_v47 = vrot.slane %v5350_v17, 4  ;;  %v5752_v18 = vsel %vm9555_vm14, %v7195_v11, %v5751_v61  ;;  %v5761_v12 = vrot.slane %v10258_v2, 5  ;;  %v5682_v3 = vld [vmem:[#allocation2 + $0x48] sm:$0xe] }
 0x2a7   : > { %v10565_v42 = vadd.f32 %v10478_v4, %v7879_v50  ;;  %8166 = vmatmul.mubr.bf16.gmra.mxu1 %v8554_v55  ;;  %v10570_v16 = vpop.f32.mrf.mxu0  ;;  %v5346_v51 = vsel %vm9040_vm7, %v5341_v56, %v5345_v39  ;;  %v5760_v36 = vrot.slane %v5758_v35, 4  ;;  %v7197_v4 = vrot.slane %v5681_v7, 9  ;;  %v5683_v56 = vld [vmem:[#allocation2 + $0x54] sm:$0xe]  ;;  %v5684_v61 = vld [vmem:[#allocation2 + $0x60] sm:$0xe] }
 0x2a8   : > { %8233 = vmatprep.mubr.bf16.mxu1 %v7210_v6  ;;  %v2100_v14 = vpop.f32.mrf.mxu1  ;;  %v5755_v25 = vsel %vm9555_vm14, %v5753_v10, %v5754_v57  ;;  %v5356_v55 = vsel %vm9040_vm7, %v5351_v47, %v5355_v33  ;;  %v5759_v2 = vsel %vm9555_vm14, %v7196_v43, %v5758_v35  ;;  %v5765_v38 = vrot.slane %v10264_v60, 5 }
 0x2a9   : > { %v10577_v50 = vadd.f32 %v10484_v28, %v2100_v14  ;;  %v10583_v21 = vpop.f32.mrf.mxu0  ;;  %v7185_v39 = vcombine.low %v5346_v51, %v5356_v55  ;;  %v7211_v10 = vcombine.low %v5752_v18, %v5755_v25  ;;  %v5762_v8 = vsel %vm9555_vm14, %v5760_v36, %v5761_v12  ;;  %v5685_v51 = vld [vmem:[#allocation2 + $0x6c] sm:$0xe] }
 0x2aa   : > { %v7880_v6 = vpop.f32.mrf.mxu1  ;;  %v5768_v28 = vrot.slane %v10274_v22, 5  ;;  %v7212_v17 = vcombine.low %v5759_v2, %v5762_v8  ;;  %v5767_v11 = vrot.slane %v5765_v38, 4  ;;  %v7198_v57 = vrot.slane %v5682_v3, 9 }
 0x2ab   : > { %v10590_v45 = vadd.f32 %v10496_v46, %v7880_v6  ;;  %v10592_v33 = vpop.f32.mrf.mxu0  ;;  %8214 = vmatmul.mubr.bf16.gmra.mxu0 %v7185_v39  ;;  %v5766_v7 = vsel %vm9555_vm14, %v7197_v4, %v5765_v38  ;;  %v5772_v43 = vrot.slane %v10277_v34, 5  ;;  %v7199_v35 = vrot.slane %v5683_v56, 9 }
 0x2ac   : > { %v10594_v60 = vpop.f32.mrf.mxu1  ;;  %v5779_v22 = vrot.slane %v10301_v52, 5  ;;  %v5769_v46 = vsel %vm9555_vm14, %v5767_v11, %v5768_v28  ;;  %v5775_v18 = vrot.slane %v10285_v31, 5  ;;  %v5782_v12 = vrot.slane %v10308_v59, 5 }
 0x2ad   : > { %v10602_v47 = vpop.f32.mrf.mxu0  ;;  %v7200_v14 = vrot.slane %v5684_v61, 9  ;;  %v7213_v36 = vcombine.low %v5766_v7, %v5769_v46  ;;  %v5773_v4 = vsel %vm9555_vm14, %v7198_v57, %v5772_v43  ;;  %v5774_v34 = vrot.slane %v5772_v43, 4 }
 0x2ae   : > { %v7947_v25 = vpop.f32.mrf.mxu1  ;;  %v10610_v52 = vsel %vm9555_vm14, %v7199_v35, %v5779_v22  ;;  %v5781_v31 = vrot.slane %v5779_v22, 4  ;;  %v5786_v59 = vrot.slane %v10316_v48, 5  ;;  %v5789_v2 = vrot.slane %v10327_v26, 5 }
 0x2af   : > { %v10613_v3 = vadd.f32 %v7947_v25, %v10282_v24  ;;  %8234 = vmatmul.mubr.bf16.vlgmr.msra.gmra.mxu1 %v7211_v10  ;;  %v10615_v55 = vpop.f32.mrf.mxu0  ;;  %v5776_v56 = vsel %vm9555_vm14, %v5774_v34, %v5775_v18  ;;  %v7201_v39 = vrot.slane %v5685_v51, 9  ;;  %v5793_v6 = vrot.slane %v10339_v13, 5  ;;  %v5686_v24 = vld [vmem:[#allocation2 + $0x78] sm:$0xe] }
 0x2b0   : > { %8237 = vmatprep.mubr.bf16.mxu1 %v7212_v17  ;;  %v2745_v38 = vpop.f32.mrf.mxu1  ;;  %v5796_v8 = vrot.slane %v10351_v37, 5  ;;  %v7214_v28 = vcombine.low %v5773_v4, %v5776_v56  ;;  %v10630_v48 = vsel %vm9555_vm14, %v5781_v31, %v5782_v12  ;;  %v10634_v26 = vsel %vm9555_vm14, %v7200_v14, %v5786_v59  ;;  %v5687_v17 = vld [vmem:[#allocation2 + $0x84] sm:$0xe] }
 0x2b1   : > { %v10624_v10 = vadd.f32 %v2745_v38, %v10299_v54  ;;  %v10626_v61 = vpop.f32.mrf.mxu0  ;;  %v7215_v13 = vcombine.low %v10610_v52, %v10630_v48  ;;  %v5788_v37 = vrot.slane %v5786_v59, 4  ;;  %v10640_v54 = vsel %vm9555_vm14, %v7201_v39, %v5793_v6  ;;  %v5689_v59 = vld [vmem:[#allocation2 + $0x9c] sm:$0xe]  ;;  %v11511_v56 = vld [vmem:[#allocation25_spill] sm:$0xff] }
 0x2b2   : > { %v7948_v11 = vpop.f32.mrf.mxu1  ;;  %v5795_v57 = vrot.slane %v5793_v6, 4  ;;  %v7202_v35 = vrot.slane %v5686_v24, 9  ;;  %v5800_v22 = vrot.slane %v10356_v1, 5  ;;  %v5803_v46 = vrot.slane %v10367_v40, 5  ;;  %v11512_v6 = vld [vmem:[#allocation16_spill] sm:$0xff] }
 0x2b3   : > { %v10643_v7 = vadd.f32 %v7948_v11, %v10304_v19  ;;  %v10645_v43 = vpop.f32.mrf.mxu0  ;;  %v5790_v12 = vsel %vm9555_vm14, %v5788_v37, %v5789_v2  ;;  %v7203_v51 = vrot.slane %v5687_v17, 9  ;;  %v5807_v25 = vrot.slane %v10381_v58, 5  ;;  %v5688_v19 = vld [vmem:[#allocation2 + $0x90] sm:$0xe]  ;;  %v11513_v11 = vld [vmem:[#allocation26_spill] sm:$0xff] }
 0x2b4   : > { %v2748_v18 = vpop.f32.mrf.mxu1  ;;  %v10653_v14 = vsel %vm9555_vm14, %v5795_v57, %v5796_v8  ;;  %v7216_v1 = vcombine.low %v10634_v26, %v5790_v12  ;;  %v10666_v31 = vsel %vm9555_vm14, %v7202_v35, %v5800_v22  ;;  %v5802_v38 = vrot.slane %v5800_v22, 4  ;;  %v11514_v12 = vld [vmem:[#allocation30_spill] sm:$0xff] }
 0x2b5   : > { %v10657_v4 = vadd.f32 %v2748_v18, %v10555_v63  ;;  %v10659_v34 = vpop.f32.mrf.mxu0  ;;  %v7217_v40 = vcombine.low %v10640_v54, %v10653_v14  ;;  %v10670_v58 = vsel %vm9555_vm14, %v7203_v51, %v5807_v25  ;;  %v5809_v63 = vrot.slane %v5807_v25, 4  ;;  %v5690_v14 = vld [vmem:[#allocation2 + $0xa8] sm:$0xe] }
 0x2b6   : > { %v7951_v2 = vpop.f32.mrf.mxu1  ;;  %v5810_v39 = vrot.slane %v11511_v56, 5  ;;  %v7204_v26 = vrot.slane %v5688_v19, 9  ;;  %v5814_v17 = vrot.slane %v10402_v27, 5  ;;  %v5817_v37 = vrot.slane %v11513_v11, 5  ;;  %v11518_v11 = vld [vmem:[#allocation18_spill] sm:$0xff] }
 0x2b7   : > { %v2878_v8 = vadd.f32 %v7951_v2, %v11512_v6  ;;  %8238 = vmatmul.mubr.bf16.gmra.mxu1 %v7213_v36  ;;  %v10674_v24 = vpop.f32.mrf.mxu0  ;;  %v5804_v35 = vsel %vm9555_vm14, %v5802_v38, %v5803_v46  ;;  %v7205_v18 = vrot.slane %v5689_v59, 9  ;;  %v5821_v51 = vrot.slane %v11514_v12, 5  ;;  %v11515_v36 = vld [vmem:[#allocation17_spill] sm:$0xff]  ;;  %v5691_v46 = vld [vmem:[#allocation2 + $0xb4] sm:$0xe] }
 0x2b8   : > { %8241 = vmatprep.mubr.bf16.mxu1 %v7214_v28  ;;  %v2761_v57 = vpop.f32.mrf.mxu1  ;;  %v10682_v22 = vsel %vm9555_vm14, %v5809_v63, %v5810_v39  ;;  %v7218_v27 = vcombine.low %v10666_v31, %v5804_v35  ;;  %v10693_v19 = vsel %vm9555_vm14, %v7204_v26, %v5814_v17  ;;  %v5816_v63 = vrot.slane %v5814_v17, 4  ;;  %v11517_v39 = vld [vmem:[#allocation31_spill] sm:$0xff] }
 0x2b9   : > { %v2876_v25 = vadd.f32 %v2761_v57, %v11515_v36  ;;  %v10686_v2 = vpop.f32.mrf.mxu0  ;;  %v10697_v59 = vsel %vm9555_vm14, %v7205_v18, %v5821_v51  ;;  %v5823_v56 = vrot.slane %v5821_v51, 4  ;;  %v5824_v6 = vrot.slane %v11517_v39, 5  ;;  %v11519_v36 = vld [vmem:[#allocation19_spill] sm:$0xff] }
 0x2ba   : > { %11516 = vst [vmem:[#allocation25_spill] sm:$0xff] %v10686_v2  ;;  %v7952_v38 = vpop.f32.mrf.mxu1  ;;  %v10705_v12 = vsel %vm9555_vm14, %v5816_v63, %v5817_v37  ;;  %v7207_v17 = vrot.slane %v5691_v46, 9  ;;  %v5835_v18 = vrot.slane %v10472_v9, 5  ;;  %v11520_v46 = vld [vmem:[#allocation41_spill] sm:$0xff]  ;;  %v11521_v9 = vld [vmem:[#allocation20_spill] sm:$0xff]  ;;  %v10746_v48 = vadd.f32 %v10511_v29, %v10613_v3 }
 0x2bb   : > { %v2879_v57 = vadd.f32 %v7952_v38, %v11518_v11  ;;  %v10701_v31 = vpop.f32.mrf.mxu0  ;;  %v10709_v26 = vsel %vm9555_vm14, %v5823_v56, %v5824_v6  ;;  %v7220_v38 = vcombine.low %v10693_v19, %v10705_v12  ;;  %v5838_v6 = vrot.slane %v11520_v46, 5  ;;  %v11523_v46 = vld [vmem:[#allocation22_spill] sm:$0xff] }
 0x2bc   : > { %v2764_v35 = vpop.f32.mrf.mxu1  ;;  %v10723_v63 = vsel %vm9555_vm14, %v7207_v17, %v5835_v18  ;;  %v5837_v56 = vrot.slane %v5835_v18, 4  ;;  %v10765_v29 = vadd.f32 %v10561_v5, %v2876_v25 }
 0x2bd   : > { %v10713_v51 = vadd.f32 %v2764_v35, %v11519_v36  ;;  %v10715_v39 = vpop.f32.mrf.mxu0  ;;  %v11522_v36 = vld [vmem:[#allocation21_spill] sm:$0xff] }
 0x2be   : > { %v7955_v37 = vpop.f32.mrf.mxu1  ;;  %v10734_v12 = vsel %vm9555_vm14, %v5837_v56, %v5838_v6  ;;  %v10757_v6 = vadd.f32 %v10551_v41, %v2878_v8  ;;  %v11525_v41 = vld [vmem:[#allocation27_spill] sm:$0xff] }
 0x2bf   : > { %v2882_v28 = vadd.f32 %v7955_v37, %v11521_v9  ;;  %8242 = vmatmul.mubr.bf16.gmra.mxu1 %v7215_v13  ;;  %v10730_v35 = vpop.f32.mrf.mxu0  ;;  %v10750_v13 = vadd.f32 %v10519_v44, %v10624_v10  ;;  %v10768_v44 = vadd.f32 %v10570_v16, %v2879_v57 }
 0x2c0   : > { %8245 = vmatprep.mubr.bf16.mxu1 %v7216_v1  ;;  %v2777_v19 = vpop.f32.mrf.mxu1  ;;  %v10754_v1 = vadd.f32 %v10528_v0, %v10643_v7 }
 0x2c1   : > { %v2880_v17 = vadd.f32 %v2777_v19, %v11522_v36  ;;  %v10737_v11 = vpop.f32.mrf.mxu0  ;;  %v8555_v19 = vld [vmem:[#allocation9 + $0x38] sm:$0xff]   ;;  %v11524_v36 = vld [vmem:[#allocation24_spill] sm:$0xff]  ;;  %v10771_v0 = vadd.f32 %v10592_v33, %v2882_v28  ;;  %v11526_v33 = vld [vmem:[#allocation29_spill] sm:$0xff] }
 0x2c2   : > { %v7956_v37 = vpop.f32.mrf.mxu1  ;;  %8265 = vmatprep.subr.bf16.mxu0 %v8555_v19 }
 0x2c3   : > { %v2883_v9 = vadd.f32 %v7956_v37, %v11523_v46  ;;  %v10742_v52 = vpop.f32.mrf.mxu0  ;;  %v10774_v10 = vadd.f32 %v10602_v47, %v2880_v17  ;;  %8266 = vmatpush3.bf16.msra.mxu0 %v8555_v19  ;;  %v11527_v17 = vld [vmem:[#allocation32_spill] sm:$0xff] }
 0x2c4   : > { %v2780_v56 = vpop.f32.mrf.mxu1 }
 0x2c5   : > { %v10760_v37 = vadd.f32 %v2780_v56, %v11524_v36  ;;  %v10762_v46 = vpop.f32.mrf.mxu0  ;;  %v10783_v5 = vadd.f32 %v10615_v55, %v2883_v9  ;;  %v11529_v9 = vld [vmem:[#allocation33_spill] sm:$0xff] }
 0x2c6   : > { %v7959_v3 = vpop.f32.mrf.mxu1 }
 0x2c7   : > { %v2886_v7 = vadd.f32 %v7959_v3, %v11525_v41  ;;  %8246 = vmatmul.mubr.bf16.gmra.mxu1 %v7217_v40  ;;  %v10780_v8 = vpop.f32.mrf.mxu0  ;;  %v11528_v40 = vld [vmem:[#allocation34_spill] sm:$0xff] }
 0x2c8   : > { %8249 = vmatprep.mubr.bf16.mxu1 %v7218_v27  ;;  %v2793_v16 = vpop.f32.mrf.mxu1  ;;  %v5828_v36 = vrot.slane %v11528_v40, 5  ;;  %v8556_v41 = vld [vmem:[#allocation9 + $0x30] sm:$0xff]  }
 0x2c9   : > { %v2884_v25 = vadd.f32 %v2793_v16, %v11526_v33  ;;  %v10786_v28 = vpop.f32.mrf.mxu0  ;;  %v10789_v47 = vadd.f32 %v10645_v43, %v2886_v7  ;;  %v7206_v16 = vrot.slane %v5690_v14, 9  ;;  %v11530_v33 = vld [vmem:[#allocation35_spill] sm:$0xff]  ;;  %8267 = vmatprep.subr.bf16.mxu0 %v8556_v41 }
 0x2ca   : > { %v7960_v57 = vpop.f32.mrf.mxu1  ;;  %8268 = vmatpush3.bf16.msra.mxu0 %v8556_v41 }
 0x2cb   : > { %v2887_v56 = vadd.f32 %v7960_v57, %v11527_v17  ;;  %v10792_v54 = vpop.f32.mrf.mxu0  ;;  %v10796_v55 = vadd.f32 %v10659_v34, %v2884_v25  ;;  %v11531_v17 = vcombine.low %v10670_v58, %v10682_v22  ;;  %v5830_v34 = vrot.slane %v5828_v36, 4  ;;  %v11532_v25 = vld [vmem:[#allocation36_spill] sm:$0xff] }
 0x2cc   : > { %v2796_v27 = vpop.f32.mrf.mxu1  ;;  %v5831_v40 = vrot.slane %v11532_v25, 5  ;;  %v11537_v25 = vld [vmem:[#allocation39_spill] sm:$0xff] }
 0x2cd   : > { %v10799_v19 = vadd.f32 %v2796_v27, %v11529_v9  ;;  %v10801_v3 = vpop.f32.mrf.mxu0  ;;  %v10804_v43 = vadd.f32 %v10674_v24, %v2887_v56  ;;  %v11533_v24 = vld [vmem:[#allocation38_spill] sm:$0xff] }
 0x2ce   : > { %v7963_v7 = vpop.f32.mrf.mxu1 }
 0x2cf   : > { %v2890_v57 = vadd.f32 %v7963_v7, %v11530_v33  ;;  %8250 = vmatmul.mubr.bf16.gmra.mxu1 %v11531_v17  ;;  %v10811_v18 = vpop.f32.mrf.mxu0  ;;  %v11535_v7 = vld [vmem:[#allocation40_spill] sm:$0xff]  ;;  %v11536_v33 = vld [vmem:[#allocation23_spill] sm:$0xff]  ;;  %v5829_v17 = vsel %vm9555_vm14, %v7206_v16, %v5828_v36 }
 0x2d0   : > { %8253 = vmatprep.mubr.bf16.mxu1 %v7220_v38  ;;  %v2809_v27 = vpop.f32.mrf.mxu1  ;;  %v2361_v58 = vadd.f32 %v11536_v33, %v11535_v7  ;;  %v5832_v38 = vsel %vm9555_vm14, %v5830_v34, %v5831_v40  ;;  %v11539_v40 = vcombine.low %v10697_v59, %v10709_v26 }
 0x2d1   : > { %v2888_v56 = vadd.f32 %v2809_v27, %v11533_v24  ;;  %v10814_v9 = vpop.f32.mrf.mxu0  ;;  %v10817_v14 = vadd.f32 %v10701_v31, %v2890_v57  ;;  %v5692_v27 = vld [vmem:[#allocation2 + $0xc0] sm:$0xe]  ;;  %v5842_v24 = vrot.slane %v10489_v32, 5  ;;  %v7222_v16 = vcombine.low %v5829_v17, %v5832_v38 }
 0x2d2   : > { %v7964_v22 = vpop.f32.mrf.mxu1 }
 0x2d3   : > { %11534 = vst [vmem:[#allocation16_spill] sm:$0xff] %v10817_v14  ;;  %v2891_v2 = vadd.f32 %v7964_v22, %v11537_v25  ;;  %v10826_v41 = vpop.f32.mrf.mxu0  ;;  %v10830_v31 = vadd.f32 %v10715_v39, %v2888_v56  ;;  %v7208_v22 = vrot.slane %v5692_v27, 9  ;;  %v11538_v25 = vld [vmem:[#allocation42_spill] sm:$0xff]  ;;  %v5844_v32 = vrot.slane %v5842_v24, 4 }
 0x2d4   : > { %v2812_v57 = vpop.f32.mrf.mxu1  ;;  %v5845_v39 = vrot.slane %v10494_v23, 5  ;;  %v5693_v27 = vld [vmem:[#allocation2 + $0xcc] sm:$0xe]  ;;  %v11540_v23 = vld [vmem:[#allocation28_spill] sm:$0xff] }
 0x2d5   : > { %v2889_v14 = vadd.f32 %v2812_v57, %v2361_v58  ;;  %v10832_v7 = vpop.f32.mrf.mxu0  ;;  %v10835_v33 = vadd.f32 %v10730_v35, %v2891_v2  ;;  %v8557_v57 = vld [vmem:[#allocation9 + $0x28] sm:$0xff]   ;;  %v5849_v35 = vrot.slane %v10522_v30, 5  ;;  %v2377_v26 = vadd.f32 %v11540_v23, %v10515_v53  ;;  %v11542_v23 = vld [vmem:[#allocation44_spill] sm:$0xff] }
 0x2d6   : > { %v7967_v36 = vpop.f32.mrf.mxu1  ;;  %8269 = vmatprep.subr.bf16.mxu0 %v8557_v57 }
 0x2d7   : > { %v2894_v34 = vadd.f32 %v7967_v36, %v11538_v25  ;;  %8254 = vmatmul.mubr.bf16.gmra.mxu1 %v11539_v40  ;;  %v10842_v56 = vpop.f32.mrf.mxu0  ;;  %v10845_v58 = vadd.f32 %v10737_v11, %v2889_v14  ;;  %8270 = vmatpush3.bf16.msra.mxu0 %v8557_v57  ;;  %v5843_v14 = vsel %vm9555_vm14, %v7208_v22, %v5842_v24  ;;  %v7209_v25 = vrot.slane %v5693_v27, 9  ;;  %v11541_v40 = vld [vmem:[#allocation45_spill] sm:$0xff] }
 0x2d8   : > { %8257 = vmatprep.mubr.bf16.mxu1 %v7222_v16  ;;  %v2825_v2 = vpop.f32.mrf.mxu1  ;;  %v5852_v53 = vrot.slane %v11541_v40, 5  ;;  %v11546_v40 = vld [vmem:[#allocation48_spill] sm:$0xff] }
 0x2d9   : > { %v2892_v17 = vadd.f32 %v2825_v2, %v10506_v62  ;;  %v10849_v38 = vpop.f32.mrf.mxu0  ;;  %v10852_v59 = vadd.f32 %v10742_v52, %v2894_v34  ;;  %v5846_v62 = vsel %vm9555_vm14, %v5844_v32, %v5845_v39  ;;  %v5851_v34 = vrot.slane %v5849_v35, 4 }
 0x2da   : > { %v7968_v36 = vpop.f32.mrf.mxu1  ;;  %v7224_v22 = vcombine.low %v5843_v14, %v5846_v62  ;;  %v11543_v39 = vcombine.low %v10723_v63, %v10734_v12 }
 0x2db   : > { %v2895_v11 = vadd.f32 %v7968_v36, %v10509_v15  ;;  %v10861_v30 = vpop.f32.mrf.mxu0  ;;  %v10864_v16 = vadd.f32 %v10762_v46, %v2892_v17  ;;  %v8558_v36 = vld [vmem:[#allocation9 + $0x20] sm:$0xff]  }
 0x2dc   : > { %v2828_v52 = vpop.f32.mrf.mxu1  ;;  %8271 = vmatprep.subr.bf16.mxu0 %v8558_v36 }
 0x2dd   : > { %v2893_v2 = vadd.f32 %v2828_v52, %v2377_v26  ;;  %v10867_v57 = vpop.f32.mrf.mxu0  ;;  %v10870_v15 = vadd.f32 %v10780_v8, %v2895_v11  ;;  %v5850_v26 = vsel %vm9555_vm14, %v7209_v25, %v5849_v35  ;;  %v5853_v8 = vsel %vm9555_vm14, %v5851_v34, %v5852_v53  ;;  %v11544_v11 = vld [vmem:[#allocation46_spill] sm:$0xff]  ;;  %8272 = vmatpush3.bf16.msra.mxu0 %v8558_v36 }
 0x2df   : > { %v7971_v24 = vpop.f32.mrf.mxu1  ;;  %8258 = vmatmul.mubr.bf16.gmra.mxu1 %v11543_v39  ;;  %v10876_v46 = vpop.f32.mrf.mxu0  ;;  %v10879_v17 = vadd.f32 %v10786_v28, %v2893_v2  ;;  %v11545_v28 = vld [vmem:[#allocation37_spill] sm:$0xff] }
 0x2e0   : > { %v2898_v32 = vadd.f32 %v7971_v24, %v11542_v23  ;;  %8261 = vmatprep.mubr.bf16.mxu1 %v7224_v22  ;;  %v2393_v52 = vadd.f32 %v11545_v28, %v10557_v49  ;;  %v7225_v24 = vcombine.low %v5850_v26, %v5853_v8  ;;  %v8559_v23 = vld [vmem:[#allocation9 + $0x18] sm:$0xff]  }
 0x2e1   : > { %v2841_v27 = vpop.f32.mrf.mxu1  ;;  %v10886_v62 = vpop.f32.mrf.mxu0  ;;  %8273 = vmatprep.subr.bf16.mxu0 %v8559_v23 }
 0x2e2   : > { %v2896_v14 = vadd.f32 %v2841_v27, %v11544_v11  ;;  %v10889_v63 = vadd.f32 %v10792_v54, %v2898_v32  ;;  %v8560_v32 = vld [vmem:[#allocation9 + $0x10] sm:$0xff]   ;;  %8274 = vmatpush3.bf16.msra.mxu0 %v8559_v23 }
 0x2e3   : > { %v7972_v12 = vpop.f32.mrf.mxu1  ;;  %v8095_v35 = vpop.f32.mrf.mxu0  ;;  %8275 = vmatprep.subr.bf16.mxu0 %v8560_v32 }
 0x2e4   : > { %v2899_v2 = vadd.f32 %v7972_v12, %v11546_v40  ;;  %v10895_v20 = vadd.f32 %v10801_v3, %v2896_v14 }
 0x2e5   : > { %v2844_v25 = vpop.f32.mrf.mxu1  ;;  %v4396_v53 = vpop.f32.mrf.mxu0 }
 0x2e6   : > { %v2897_v34 = vadd.f32 %v2844_v25, %v2393_v52  ;;  %v10898_v22 = vadd.f32 %v10811_v18, %v2899_v2  ;;  %8276 = vmatpush3.bf16.msra.mxu0 %v8560_v32 }
 0x2e7   : > { %v7975_v54 = vpop.f32.mrf.mxu1  ;;  %8262 = vmatmul.mubr.bf16.gmra.mxu1 %v7225_v24  ;;  %v10901_v49 = vpop.f32.mrf.mxu0 }
 0x2e8   : > { %v2902_v39 = vadd.f32 %v7975_v54, %v10565_v42  ;;  %v10904_v27 = vadd.f32 %v10814_v9, %v2897_v34  ;;  %v11547_v42 = vld [vmem:[#allocation43_spill] sm:$0xff]  ;;  %v8561_v54 = vld [vmem:[#allocation9 + $0x8] sm:$0xff]  }
 0x2e9   : > { %v2857_v3 = vpop.f32.mrf.mxu1  ;;  %v10907_v8 = vpop.f32.mrf.mxu0  ;;  %v2409_v11 = vadd.f32 %v11547_v42, %v10594_v60  ;;  %8277 = vmatprep.subr.bf16.mxu0 %v8561_v54 }
 0x2ea   : > { %v2900_v26 = vadd.f32 %v2857_v3, %v10577_v50  ;;  %v10910_v18 = vadd.f32 %v10826_v41, %v2902_v39  ;;  %8278 = vmatpush3.bf16.msra.mxu0 %v8561_v54 }
 0x2eb   : > { %v7976_v36 = vpop.f32.mrf.mxu1  ;;  %v8099_v12 = vpop.f32.mrf.mxu0 }
 0x2ec   : > { %v2903_v14 = vadd.f32 %v7976_v36, %v10590_v45  ;;  %v10916_v9 = vadd.f32 %v10832_v7, %v2900_v26 }
 0x2ed   : > { %v2860_v28 = vpop.f32.mrf.mxu1  ;;  %v4412_v50 = vpop.f32.mrf.mxu0 }
 0x2ee   : > { %v2901_v52 = vadd.f32 %v2860_v28, %v2409_v11  ;;  %v10919_v40 = vadd.f32 %v10842_v56, %v2903_v14  ;;  %v8562_v28 = vld [vmem:[#allocation9] sm:$0xff]  }
 0x2ef   : > { %v8043_v41 = vpop.f32.mrf.mxu1  ;;  %v10922_v24 = vpop.f32.mrf.mxu0  ;;  %8279 = vmatprep.subr.bf16.mxu0 %v8562_v28 }
 0x2f0   : > { %v4012_v2 = vadd.f32 %v8043_v41, %v10746_v48  ;;  %v10925_v60 = vadd.f32 %v10849_v38, %v2901_v52  ;;  %v11548_v48 = vld [vmem:[#allocation47_spill] sm:$0xff]  ;;  %v3262_v41 = vadd.f32 %v10583_v21, %v10713_v51  ;;  %8280 = vmatpush3.bf16.msra.mxu0 %v8562_v28 }
 0x2f1   : > { %v3883_v45 = vpop.f32.mrf.mxu1  ;;  %v10928_v7 = vpop.f32.mrf.mxu0  ;;  %v3258_v32 = vadd.f32 %v11548_v48, %v10657_v4 }
 0x2f2   : > { %v4010_v25 = vadd.f32 %v3883_v45, %v10750_v13  ;;  %v10931_v34 = vadd.f32 %v10861_v30, %v4012_v2 }
 0x2f3   : > { %v8044_v56 = vpop.f32.mrf.mxu1  ;;  %v8103_v39 = vpop.f32.mrf.mxu0 }
 0x2f4   : > { %v10934_v23 = vadd.f32 %v8044_v56, %v10754_v1  ;;  %v10939_v38 = vadd.f32 %v10867_v57, %v4010_v25 }
 0x2f5   : > { %v3886_v3 = vpop.f32.mrf.mxu1  ;;  %v4428_v26 = vpop.f32.mrf.mxu0 }
 0x2f6   : > { %v10941_v13 = vadd.f32 %v3886_v3, %v3258_v32  ;;  %v3266_v3 = vadd.f32 %v10626_v61, %v10760_v37  ;;  %v11551_v37 = vld [vmem:[#allocation25_spill] sm:$0xff] }
 0x2f7   : > { %v8047_v30 = vpop.f32.mrf.mxu1  ;;  %v10944_v42 = vpop.f32.mrf.mxu0 }
 0x2f8   : > { %v4016_v36 = vadd.f32 %v8047_v30, %v10757_v6 }
 0x2f9   : > { %v3899_v1 = vpop.f32.mrf.mxu1  ;;  %v10947_v14 = vpop.f32.mrf.mxu0 }
 0x2fa   : > { %v4014_v11 = vadd.f32 %v3899_v1, %v10765_v29  ;;  %v10949_v4 = vadd.f32 %v8095_v35, %v4016_v36 }
 0x2fb   : > { %v8048_v57 = vpop.f32.mrf.mxu1  ;;  %v8107_v2 = vpop.f32.mrf.mxu0 }
 0x2fc   : > { %v10952_v52 = vadd.f32 %v8048_v57, %v10768_v44  ;;  %v10956_v45 = vadd.f32 %v4396_v53, %v4014_v11 }
 0x2fd   : > { %v3902_v6 = vpop.f32.mrf.mxu1  ;;  %v4444_v29 = vpop.f32.mrf.mxu0 }
 0x2fe   : > { %v10958_v25 = vadd.f32 %v3902_v6, %v3262_v41 }
 0x2ff   : > { %v8051_v54 = vpop.f32.mrf.mxu1  ;;  %v10961_v56 = vpop.f32.mrf.mxu0 }
 0x300   : > { %v4020_v35 = vadd.f32 %v8051_v54, %v10771_v0 }
 0x301   : > { %v3915_v48 = vpop.f32.mrf.mxu1  ;;  %v10964_v32 = vpop.f32.mrf.mxu0 }
 0x302   : > { %v4018_v44 = vadd.f32 %v3915_v48, %v10774_v10  ;;  %11549 = vst [vmem:[#allocation26_spill] sm:$0xff] %v10964_v32  ;;  %v10966_v21 = vadd.f32 %v8099_v12, %v4020_v35 }
 0x303   : > { %v8052_v51 = vpop.f32.mrf.mxu1  ;;  %v8111_v30 = vpop.f32.mrf.mxu0 }
 0x304   : > { %v10969_v53 = vadd.f32 %v8052_v51, %v10783_v5  ;;  %v10973_v36 = vadd.f32 %v4412_v50, %v4018_v44  ;;  %v3270_v50 = vadd.f32 %v11551_v37, %v10799_v19  ;;  %v11553_v51 = vld [vmem:[#allocation16_spill] sm:$0xff] }
 0x305   : > { %v3918_v0 = vpop.f32.mrf.mxu1  ;;  %v4460_v11 = vpop.f32.mrf.mxu0 }
 0x306   : > { %v10975_v1 = vadd.f32 %v3918_v0, %v3266_v3 }
 0x307   : > { %v8055_v57 = vpop.f32.mrf.mxu1  ;;  %v10978_v28 = vpop.f32.mrf.mxu0 }
 0x308   : > { %v4024_v10 = vadd.f32 %v8055_v57, %v10789_v47  ;;  %11550 = vst [vmem:[#allocation30_spill] sm:$0xff] %v10978_v28 }
 0x309   : > { %v3931_v12 = vpop.f32.mrf.mxu1  ;;  %v10988_v54 = vpop.f32.mrf.mxu0 }
 0x30a   : > { %v4022_v41 = vadd.f32 %v3931_v12, %v10796_v55  ;;  %v10981_v5 = vadd.f32 %v8103_v39, %v4024_v10  ;;  %11552 = vst [vmem:[#allocation17_spill] sm:$0xff] %v10988_v54 }
 0x30b   : > { %v8056_v6 = vpop.f32.mrf.mxu1  ;;  %v8115_v55 = vpop.f32.mrf.mxu0 }
 0x30c   : > { %v10984_v61 = vadd.f32 %v8056_v6, %v10804_v43  ;;  %v10990_v35 = vadd.f32 %v4428_v26, %v4022_v41 }
 0x30d   : > { %v3934_v48 = vpop.f32.mrf.mxu1  ;;  %v4476_v19 = vpop.f32.mrf.mxu0 }
 0x30e   : > { %v10992_v47 = vadd.f32 %v3934_v48, %v3270_v50 }
 0x30f   : > { %v8059_v44 = vpop.f32.mrf.mxu1  ;;  %v11007_v50 = vpop.f32.mrf.mxu0 }
 0x310   : > { %v4028_v3 = vadd.f32 %v8059_v44, %v11553_v51  ;;  %11554 = vst [vmem:[#allocation31_spill] sm:$0xff] %v11007_v50 }
 0x311   : > { %v3947_v39 = vpop.f32.mrf.mxu1 }
 0x312   : > { %v4026_v0 = vadd.f32 %v3947_v39, %v10830_v31  ;;  %v10996_v57 = vadd.f32 %v8107_v2, %v4028_v3 }
 0x313   : > { %v8060_v43 = vpop.f32.mrf.mxu1 }
 0x314   : > { %v10999_v10 = vadd.f32 %v8060_v43, %v10835_v33  ;;  %v11001_v12 = vadd.f32 %v4444_v29, %v4026_v0  ;;  %v11015_v29 = vpop.f32.mrf.mxu0 }
 0x315   : > { %v3950_v26 = vpop.f32.mrf.mxu1  ;;  %11556 = vst [vmem:[#allocation19_spill] sm:$0xff] %v11015_v29 }
 0x316   : > { %v11004_v41 = vadd.f32 %v3950_v26, %v10845_v58  ;;  %v8119_v39 = vpop.f32.mrf.mxu0 }
 0x317   : > { %v8063_v6 = vpop.f32.mrf.mxu1 }
 0x318   : > { %v4032_v37 = vadd.f32 %v8063_v6, %v10852_v59 }
 0x319   : > { %v3963_v48 = vpop.f32.mrf.mxu1 }
 0x31a   : > { %v4030_v31 = vadd.f32 %v3963_v48, %v10864_v16  ;;  %v11010_v2 = vadd.f32 %v8111_v30, %v4032_v37 }
 0x31b   : > { %v8064_v44 = vpop.f32.mrf.mxu1 }
 0x31c   : > { %v11013_v33 = vadd.f32 %v8064_v44, %v10870_v15  ;;  %v11017_v51 = vadd.f32 %v4460_v11, %v4030_v31  ;;  %v4492_v15 = vpop.f32.mrf.mxu0 }
 0x31d   : > { %v3966_v58 = vpop.f32.mrf.mxu1 }
 0x31e   : > { %11555 = vst [vmem:[#allocation18_spill] sm:$0xff] %v11013_v33  ;;  %v11020_v3 = vadd.f32 %v3966_v58, %v10879_v17  ;;  %v11034_v48 = vpop.f32.mrf.mxu0 }
 0x31f   : > { %v8067_v59 = vpop.f32.mrf.mxu1  ;;  %11560 = vst [vmem:[#allocation22_spill] sm:$0xff] %v11034_v48 }
 0x320   : > { %11557 = vst [vmem:[#allocation41_spill] sm:$0xff] %v11020_v3  ;;  %v4036_v0 = vadd.f32 %v8067_v59, %v10889_v63  ;;  %v11040_v58 = vpop.f32.mrf.mxu0 }
 0x321   : > { %v3979_v43 = vpop.f32.mrf.mxu1  ;;  %11561 = vst [vmem:[#allocation24_spill] sm:$0xff] %v11040_v58 }
 0x322   : > { %v4034_v16 = vadd.f32 %v3979_v43, %v10895_v20  ;;  %v11024_v30 = vadd.f32 %v8115_v55, %v4036_v0 }
 0x323   : > { %v8068_v26 = vpop.f32.mrf.mxu1 }
 0x324   : > { %v11027_v6 = vadd.f32 %v8068_v26, %v10898_v22  ;;  %v11029_v11 = vadd.f32 %v4476_v19, %v4034_v16  ;;  %v11050_v43 = vpop.f32.mrf.mxu0 }
 0x325   : > { %v3982_v37 = vpop.f32.mrf.mxu1 }
 0x326   : > { %11558 = vst [vmem:[#allocation20_spill] sm:$0xff] %v11027_v6  ;;  %v11032_v17 = vadd.f32 %v3982_v37, %v10904_v27  ;;  %v11058_v26 = vpop.f32.mrf.mxu0 }
 0x327   : > { %v8071_v31 = vpop.f32.mrf.mxu1 }
 0x328   : > { %11559 = vst [vmem:[#allocation21_spill] sm:$0xff] %v11032_v17  ;;  %v4040_v63 = vadd.f32 %v8071_v31, %v10910_v18 }
 0x329   : > { %v3995_v44 = vpop.f32.mrf.mxu1 }
 0x32a   : > { %v4038_v20 = vadd.f32 %v3995_v44, %v10916_v9  ;;  %v11038_v55 = vadd.f32 %v8119_v39, %v4040_v63 }
 0x32b   : > { %v8072_v22 = vpop.f32.mrf.mxu1 }
 0x32c   : > { %v11043_v19 = vadd.f32 %v8072_v22, %v10919_v40  ;;  %v11045_v59 = vadd.f32 %v4492_v15, %v4038_v20  ;;  %v11062_v15 = vpop.f32.mrf.mxu0 }
 0x32d   : > { %v3998_v27 = vpop.f32.mrf.mxu1 }
 0x32e   : > { %11562 = vst [vmem:[#allocation27_spill] sm:$0xff] %v11043_v19  ;;  %v11048_v0 = vadd.f32 %v3998_v27, %v10925_v60 }
 0x32f   : > { %v8139_v18 = vpop.f32.mrf.mxu1 }
 0x330   : > { %11563 = vst [vmem:[#allocation29_spill] sm:$0xff] %v11048_v0  ;;  %v11053_v16 = vadd.f32 %v8139_v18, %v10931_v34  ;;  %v11070_v34 = vpop.f32.mrf.mxu0 }
 0x331   : > { %v4766_v9 = vpop.f32.mrf.mxu1 }
 0x332   : > { %v11056_v39 = vadd.f32 %v4766_v9, %v10939_v38  ;;  %v11076_v22 = vpop.f32.mrf.mxu0 }
 0x333   : > { %v8140_v40 = vpop.f32.mrf.mxu1 }
 0x335   : > { %v11060_v37 = vpop.f32.mrf.mxu1 }
 0x337   : > { %v8143_v31 = vpop.f32.mrf.mxu1 }
 0x338   : > { %v11065_v60 = vadd.f32 %v8143_v31, %v10949_v4  ;;  %v11084_v31 = vpop.f32.mrf.mxu0 }
 0x339   : > { %v4782_v63 = vpop.f32.mrf.mxu1 }
 0x33a   : > { %v11068_v44 = vadd.f32 %v4782_v63, %v10956_v45  ;;  %v11090_v58 = vpop.f32.mrf.mxu0 }
 0x33b   : > { %v11072_v20 = vpop.f32.mrf.mxu1 }
 0x33d   : > { %v11074_v38 = vpop.f32.mrf.mxu1 }
 0x33f   : > { %v8147_v27 = vpop.f32.mrf.mxu1 }
 0x340   : > { %v11079_v18 = vadd.f32 %v8147_v27, %v10966_v21  ;;  %v11098_v27 = vpop.f32.mrf.mxu0 }
 0x341   : > { %v4798_v9 = vpop.f32.mrf.mxu1 }
 0x342   : > { %v11082_v4 = vadd.f32 %v4798_v9, %v10973_v36  ;;  %v11104_v29 = vpop.f32.mrf.mxu0 }
 0x343   : > { %v11086_v45 = vpop.f32.mrf.mxu1 }
 0x345   : > { %v11088_v63 = vpop.f32.mrf.mxu1 }
 0x347   : > { %v8151_v0 = vpop.f32.mrf.mxu1 }
 0x348   : > { %v11093_v48 = vadd.f32 %v8151_v0, %v10981_v5  ;;  %v11112_v0 = vpop.f32.mrf.mxu0 }
 0x349   : > { %v4814_v19 = vpop.f32.mrf.mxu1 }
 0x34a   : > { %v11096_v21 = vadd.f32 %v4814_v19, %v10990_v35  ;;  %v11118_v54 = vpop.f32.mrf.mxu0 }
 0x34b   : > { %v11100_v36 = vpop.f32.mrf.mxu1 }
 0x34d   : > { %v11102_v9 = vpop.f32.mrf.mxu1 }
 0x34f   : > { %v8155_v17 = vpop.f32.mrf.mxu1 }
 0x350   : > { %v11107_v50 = vadd.f32 %v8155_v17, %v10996_v57  ;;  %v11126_v17 = vpop.f32.mrf.mxu0 }
 0x351   : > { %v4830_v6 = vpop.f32.mrf.mxu1 }
 0x352   : > { %11564 = vst [vmem:[#allocation32_spill] sm:$0xff] %v11107_v50  ;;  %v11110_v5 = vadd.f32 %v4830_v6, %v11001_v12 }
 0x353   : > { %v11114_v35 = vpop.f32.mrf.mxu1 }
 0x354   : > { %11565 = vst [vmem:[#allocation34_spill] sm:$0xff] %v11110_v5  ;;  %v11132_v5 = vpop.f32.mrf.mxu0 }
 0x355   : > { %v11116_v19 = vpop.f32.mrf.mxu1 }
 0x356   : > { %11566 = vst [vmem:[#allocation33_spill] sm:$0xff] %v11116_v19 }
 0x357   : > { %v8159_v3 = vpop.f32.mrf.mxu1 }
 0x358   : > { %v11121_v28 = vadd.f32 %v8159_v3, %v11010_v2  ;;  %v11140_v3 = vpop.f32.mrf.mxu0 }
 0x359   : > { %v4846_v33 = vpop.f32.mrf.mxu1 }
 0x35a   : > { %11567 = vst [vmem:[#allocation35_spill] sm:$0xff] %v11121_v28  ;;  %v11124_v57 = vadd.f32 %v4846_v33, %v11017_v51 }
 0x35b   : > { %v11128_v12 = vpop.f32.mrf.mxu1 }
 0x35c   : > { %11568 = vst [vmem:[#allocation36_spill] sm:$0xff] %v11124_v57  ;;  %11569 = vst [vmem:[#allocation38_spill] sm:$0xff] %v11128_v12  ;;  %v11146_v57 = vpop.f32.mrf.mxu0 }
 0x35d   : > { %v11130_v6 = vpop.f32.mrf.mxu1 }
 0x35e   : > { %11570 = vst [vmem:[#allocation40_spill] sm:$0xff] %v11130_v6 }
 0x35f   : > { %v8163_v50 = vpop.f32.mrf.mxu1 }
 0x360   : > { %v11135_v19 = vadd.f32 %v8163_v50, %v11024_v30  ;;  %v11154_v30 = vpop.f32.mrf.mxu0 }
 0x361   : > { %v4862_v32 = vpop.f32.mrf.mxu1 }
 0x362   : > { %11571 = vst [vmem:[#allocation23_spill] sm:$0xff] %v11135_v19  ;;  %v11138_v2 = vadd.f32 %v4862_v32, %v11029_v11  ;;  %v4510_v11 = vadd.f32 %v10876_v46, %v10934_v23  ;;  %v4508_v19 = vadd.f32 %v10886_v62, %v10941_v13  ;;  %v11174_v46 = vld [vmem:[%s11427_s4] ss:$0 sm:$0xff]  ;;  %v4514_v13 = vadd.f32 %v10901_v49, %v10952_v52 }
 0x363   : > { %v11142_v33 = vpop.f32.mrf.mxu1  ;;  %v5652_v49 = vadd.f32 %v11076_v22, %v11065_v60 }
 0x364   : > { %11572 = vst [vmem:[#allocation39_spill] sm:$0xff] %v11138_v2 }
 0x365   : > { %v11144_v51 = vpop.f32.mrf.mxu1 }
 0x366   : > { %11573 = vst [vmem:[#allocation42_spill] sm:$0xff] %v11144_v51  ;;  %v4896_v51 = vadd.f32 %v8140_v40, %v4510_v11  ;;  %v4512_v11 = vadd.f32 %v10907_v8, %v10958_v25 }
 0x367   : > { %v8167_v28 = vpop.f32.mrf.mxu1 }
 0x368   : > { %v11149_v6 = vadd.f32 %v8167_v28, %v11038_v55  ;;  %v5648_v28 = vadd.f32 %v11050_v43, %v11053_v16  ;;  %v11166_v55 = vpop.f32.mrf.mxu0  ;;  %v5649_v62 = vadd.f32 %v11062_v15, %v4896_v51  ;;  %v4898_v52 = vadd.f32 %v11074_v38, %v4512_v11 }
 0x369   : > { %v4878_v12 = vpop.f32.mrf.mxu1  ;;  %v4518_v38 = vadd.f32 %v10922_v24, %v10969_v53  ;;  %v5656_v53 = vadd.f32 %v11104_v29, %v11079_v18 }
 0x36a   : > { %11574 = vst [vmem:[#allocation28_spill] sm:$0xff] %v11149_v6  ;;  %v11152_v50 = vadd.f32 %v4878_v12, %v11045_v59  ;;  %v4894_v12 = vadd.f32 %v11060_v37, %v4508_v19  ;;  %v5646_v6 = vadd.f32 %v11058_v26, %v11056_v39  ;;  %v11179_v43 = vpop.f32.mrf.mxu0  ;;  %v4900_v26 = vadd.f32 %v11072_v20, %v4514_v13 }
 0x36b   : > { %v11156_v32 = vpop.f32.mrf.mxu1  ;;  %v4904_v11 = vadd.f32 %v11086_v45, %v4518_v38  ;;  %v5654_v45 = vadd.f32 %v11112_v0, %v11082_v4 }
 0x36c   : > { %11575 = vst [vmem:[#allocation45_spill] sm:$0xff] %v11152_v50  ;;  %v5647_v39 = vadd.f32 %v11070_v34, %v4894_v12  ;;  %v5650_v34 = vadd.f32 %v11084_v31, %v11068_v44 }
 0x36d   : > { %v11160_v2 = vpop.f32.mrf.mxu1 }
 0x36f   : > { %v8235_v59 = vpop.f32.mrf.mxu1 }
 0x370   : > { %v6145_v50 = vadd.f32 %v8235_v59, %v5648_v28 }
 0x371   : > { %v6016_v23 = vpop.f32.mrf.mxu1 }
 0x372   : > { %v6143_v40 = vadd.f32 %v6016_v23, %v5646_v6  ;;  %v6184_v37 = vadd.f32 %v11174_v46, %v6145_v50  ;;  %v11191_v50 = vpop.f32.mrf.mxu0 }
 0x373   : > { %v8236_v16 = vpop.f32.mrf.mxu1 }
 0x374   : > { %v6146_v19 = vadd.f32 %v8236_v16, %v5649_v62  ;;  %v6182_v6 = vadd.f32 %v11174_v46, %v6143_v40  ;;  %v6216_v20 = vmax.f32 %v6184_v37, 0.0  ;;  %v5653_v40 = vadd.f32 %v11090_v58, %v4900_v26  ;;  %v11199_v22 = vpop.f32.mrf.mxu0 }
 0x375   : > { %v6019_v28 = vpop.f32.mrf.mxu1  ;;  %v5651_v37 = vadd.f32 %v11098_v27, %v4898_v52  ;;  %v4516_v58 = vadd.f32 %v10928_v7, %v10975_v1 }
 0x376   : > { %v6185_v15 = vadd.f32 %v11174_v46, %v6146_v19  ;;  %v6144_v51 = vadd.f32 %v6019_v28, %v5647_v39  ;;  %v6214_v62 = vmax.f32 %v6182_v6, 0.0 }
 0x377   : > { %v8239_v59 = vpop.f32.mrf.mxu1 }
 0x378   : > { %v6217_v12 = vmax.f32 %v6185_v15, 0.0  ;;  %v6183_v8 = vadd.f32 %v11174_v46, %v6144_v51  ;;  %v6149_v25 = vadd.f32 %v8239_v59, %v5652_v49  ;;  %v4902_v15 = vadd.f32 %v11088_v63, %v4516_v58  ;;  %v11211_v51 = vpop.f32.mrf.mxu0 }
 0x379   : > { %v6032_v23 = vpop.f32.mrf.mxu1  ;;  %v4522_v63 = vadd.f32 %v10944_v42, %v10984_v61  ;;  %v5660_v61 = vadd.f32 %v11132_v5, %v11093_v48 }
 0x37a   : > { %v6247_v13 = vpack.c.bf16 %v6217_v12, %v6216_v20  ;;  %v6215_v16 = vmax.f32 %v6183_v8, 0.0  ;;  %v6147_v60 = vadd.f32 %v6032_v23, %v5650_v34  ;;  %v6188_v44 = vadd.f32 %v11174_v46, %v6149_v25  ;;  %v11219_v8 = vpop.f32.mrf.mxu0 }
 0x37b   : > { %v8240_v19 = vpop.f32.mrf.mxu1  ;;  %v5657_v34 = vadd.f32 %v11118_v54, %v4904_v11  ;;  %v5655_v23 = vadd.f32 %v11126_v17, %v4902_v15  ;;  %v4520_v54 = vadd.f32 %v10947_v14, %v10992_v47 }
 0x37c   : > { %v6150_v31 = vadd.f32 %v8240_v19, %v5653_v40  ;;  %v6246_v39 = vpack.c.bf16 %v6215_v16, %v6214_v62  ;;  %v6186_v28 = vadd.f32 %v11174_v46, %v6147_v60  ;;  %v6220_v7 = vmax.f32 %v6188_v44, 0.0  ;;  %v11231_v19 = vpop.f32.mrf.mxu0 }
 0x37d   : > { %v6035_v26 = vpop.f32.mrf.mxu1  ;;  %v4908_v62 = vadd.f32 %v11100_v36, %v4522_v63  ;;  %v4906_v38 = vadd.f32 %v11102_v9, %v4520_v54  ;;  %v5658_v36 = vadd.f32 %v11140_v3, %v11096_v21  ;;  %v4526_v9 = vadd.f32 %v10961_v56, %v10999_v10  ;;  %v11577_v10 = vld [vmem:[#allocation32_spill] sm:$0xff] }
 0x37e   : > { %v6189_v6 = vadd.f32 %v11174_v46, %v6150_v31  ;;  %v6148_v24 = vadd.f32 %v6035_v26, %v5651_v37  ;;  %8281 = vmatprep.mubr.bf16.mxu0 %v6246_v39  ;;  %v6218_v20 = vmax.f32 %v6186_v28, 0.0  ;;  %v11239_v26 = vpop.f32.mrf.mxu0 }
 0x37f   : > { %v8243_v27 = vpop.f32.mrf.mxu1  ;;  %8282 = vmatmul.mubr.bf16.vlgmr.msra.gmra.mxu0 %v6247_v13  ;;  %v5661_v39 = vadd.f32 %v11146_v57, %v4908_v62  ;;  %v11576_v57 = vld [vmem:[#allocation26_spill] sm:$0xff] }
 0x380   : > { %v6221_v1 = vmax.f32 %v6189_v6, 0.0  ;;  %v6187_v49 = vadd.f32 %v11174_v46, %v6148_v24  ;;  %v6153_v52 = vadd.f32 %v8243_v27, %v5656_v53  ;;  %v5659_v6 = vadd.f32 %v11154_v30, %v4906_v38  ;;  %v11581_v62 = vld [vmem:[#allocation30_spill] sm:$0xff] }
 0x381   : > { %v6048_v59 = vpop.f32.mrf.mxu1  ;;  %v4912_v53 = vadd.f32 %v11114_v35, %v4526_v9  ;;  %v4524_v15 = vadd.f32 %v11576_v57, %v11004_v41 }
 0x382   : > { %v6249_v12 = vpack.c.bf16 %v6221_v1, %v6220_v7  ;;  %v6219_v29 = vmax.f32 %v6187_v49, 0.0  ;;  %v6151_v18 = vadd.f32 %v6048_v59, %v5654_v45  ;;  %v6192_v4 = vadd.f32 %v11174_v46, %v6153_v52  ;;  %v11578_v49 = vld [vmem:[#allocation33_spill] sm:$0xff]  ;;  %v8211_v59 = vpop.f32.mrf.mxu0 }
 0x383   : > { %v8244_v25 = vpop.f32.mrf.mxu1  ;;  %v5664_v1 = vadd.f32 %v11166_v55, %v11577_v10  ;;  %v4910_v52 = vadd.f32 %v11578_v49, %v4524_v15  ;;  %v5665_v63 = vadd.f32 %v11191_v50, %v4912_v53 }
 0x384   : > { %v6154_v0 = vadd.f32 %v8244_v25, %v5657_v34  ;;  %v6248_v40 = vpack.c.bf16 %v6219_v29, %v6218_v20  ;;  %v6190_v16 = vadd.f32 %v11174_v46, %v6151_v18  ;;  %v6224_v14 = vmax.f32 %v6192_v4, 0.0  ;;  %v11579_v34 = vld [vmem:[#allocation34_spill] sm:$0xff] }
 0x385   : > { %v6051_v13 = vpop.f32.mrf.mxu1  ;;  %v5662_v35 = vadd.f32 %v11179_v43, %v11579_v34 }
 0x386   : > { %v6193_v60 = vadd.f32 %v11174_v46, %v6154_v0  ;;  %v6152_v42 = vadd.f32 %v6051_v13, %v5655_v23  ;;  %8285 = vmatprep.mubr.bf16.mxu0 %v6248_v40  ;;  %v6222_v11 = vmax.f32 %v6190_v16, 0.0  ;;  %v5615_v23 = vpop.f32.mrf.mxu0  ;;  %v11580_v40 = vld [vmem:[#allocation18_spill] sm:$0xff] }
 0x387   : > { %v8247_v17 = vpop.f32.mrf.mxu1  ;;  %8286 = vmatmul.mubr.bf16.gmra.mxu0 %v6249_v12  ;;  %v4530_v54 = vadd.f32 %v11581_v62, %v11580_v40 }
 0x388   : > { %v6225_v47 = vmax.f32 %v6193_v60, 0.0  ;;  %v6191_v44 = vadd.f32 %v11174_v46, %v6152_v42  ;;  %v6157_v31 = vadd.f32 %v8247_v17, %v5660_v61  ;;  %v5663_v60 = vadd.f32 %v11199_v22, %v4910_v52  ;;  %v11582_v61 = vld [vmem:[#allocation38_spill] sm:$0xff]  ;;  %v11583_v17 = vld [vmem:[#allocation41_spill] sm:$0xff] }
 0x389   : > { %v6064_v37 = vpop.f32.mrf.mxu1  ;;  %v4916_v38 = vadd.f32 %v11582_v61, %v4530_v54 }
 0x38a   : > { %v6251_v58 = vpack.c.bf16 %v6225_v47, %v6224_v14  ;;  %v6223_v48 = vmax.f32 %v6191_v44, 0.0  ;;  %v6155_v5 = vadd.f32 %v6064_v37, %v5658_v36  ;;  %v6196_v21 = vadd.f32 %v11174_v46, %v6157_v31  ;;  %v11584_v36 = vld [vmem:[#allocation17_spill] sm:$0xff]  ;;  %v11585_v37 = vld [vmem:[#allocation35_spill] sm:$0xff] }
 0x38b   : > { %v8248_v28 = vpop.f32.mrf.mxu1  ;;  %v4528_v50 = vadd.f32 %v11584_v36, %v11583_v17  ;;  %v5669_v53 = vadd.f32 %v11231_v19, %v4916_v38 }
 0x38c   : > { %v6158_v3 = vadd.f32 %v8248_v28, %v5661_v39  ;;  %v6250_v24 = vpack.c.bf16 %v6223_v48, %v6222_v11  ;;  %v6194_v45 = vadd.f32 %v11174_v46, %v6155_v5  ;;  %v6228_v20 = vmax.f32 %v6196_v21, 0.0  ;;  %v8212_v11 = vpop.f32.mrf.mxu0  ;;  %v11587_v5 = vld [vmem:[#allocation36_spill] sm:$0xff] }
 0x38d   : > { %v6067_v27 = vpop.f32.mrf.mxu1  ;;  %v5668_v39 = vadd.f32 %v11211_v51, %v11585_v37  ;;  %v5666_v9 = vadd.f32 %v11219_v8, %v11587_v5 }
 0x38e   : > { %v6197_v7 = vadd.f32 %v11174_v46, %v6158_v3  ;;  %v6156_v56 = vadd.f32 %v6067_v27, %v5659_v6  ;;  %8289 = vmatprep.mubr.bf16.mxu0 %v6250_v24  ;;  %v6226_v25 = vmax.f32 %v6194_v45, 0.0  ;;  %v5618_v45 = vpop.f32.mrf.mxu0 }
 0x38f   : > { %v8251_v30 = vpop.f32.mrf.mxu1  ;;  %8290 = vmatmul.mubr.bf16.gmra.mxu0 %v6251_v58  ;;  %v11586_v58 = vld [vmem:[#allocation40_spill] sm:$0xff] }
 0x390   : > { %v6229_v41 = vmax.f32 %v6197_v7, 0.0  ;;  %v6195_v12 = vadd.f32 %v11174_v46, %v6156_v56  ;;  %v6161_v29 = vadd.f32 %v8251_v30, %v5664_v1  ;;  %v4914_v48 = vadd.f32 %v11586_v58, %v4528_v50  ;;  %v11588_v7 = vld [vmem:[#allocation20_spill] sm:$0xff]  ;;  %v11589_v56 = vld [vmem:[#allocation31_spill] sm:$0xff]  ;;  %v11597_v58 = vld [vmem:[#allocation29_spill] sm:$0xff] }
 0x391   : > { %v6080_v18 = vpop.f32.mrf.mxu1  ;;  %v4534_v10 = vadd.f32 %v11589_v56, %v11588_v7  ;;  %v11595_v50 = vld [vmem:[#allocation27_spill] sm:$0xff] }
 0x392   : > { %v6253_v4 = vpack.c.bf16 %v6229_v41, %v6228_v20  ;;  %v6227_v0 = vmax.f32 %v6195_v12, 0.0  ;;  %v6159_v55 = vadd.f32 %v6080_v18, %v5662_v35  ;;  %v6200_v16 = vadd.f32 %v11174_v46, %v6161_v29  ;;  %v11590_v35 = vld [vmem:[#allocation21_spill] sm:$0xff]  ;;  %v11591_v20 = vld [vmem:[#allocation19_spill] sm:$0xff]  ;;  %v8215_v41 = vpop.f32.mrf.mxu0 }
 0x393   : > { %v8252_v13 = vpop.f32.mrf.mxu1  ;;  %v5667_v52 = vadd.f32 %v11239_v26, %v4914_v48  ;;  %v4920_v34 = vadd.f32 %v11142_v33, %v4534_v10  ;;  %v4532_v19 = vadd.f32 %v11591_v20, %v11590_v35  ;;  %v11594_v26 = vld [vmem:[#allocation39_spill] sm:$0xff]  ;;  %v11598_v48 = vld [vmem:[#allocation24_spill] sm:$0xff] }
 0x394   : > { %v6162_v43 = vadd.f32 %v8252_v13, %v5665_v63  ;;  %v6252_v42 = vpack.c.bf16 %v6227_v0, %v6226_v25  ;;  %v6198_v47 = vadd.f32 %v11174_v46, %v6159_v55  ;;  %v6232_v28 = vmax.f32 %v6200_v16, 0.0  ;;  %v11592_v25 = vld [vmem:[#allocation23_spill] sm:$0xff]  ;;  %v11593_v0 = vld [vmem:[#allocation42_spill] sm:$0xff] }
 0x395   : > { %v6083_v14 = vpop.f32.mrf.mxu1  ;;  %v4918_v55 = vadd.f32 %v11593_v0, %v4532_v19  ;;  %v5670_v62 = vadd.f32 %v5615_v23, %v11594_v26  ;;  %v7491_v26 = vld [vmem:[%s8954_s12 + $0x8] sm:$0xff]  }
 0x396   : > { %v6201_v44 = vadd.f32 %v11174_v46, %v6162_v43  ;;  %v6160_v31 = vadd.f32 %v6083_v14, %v5663_v60  ;;  %8293 = vmatprep.mubr.bf16.mxu0 %v6252_v42  ;;  %v6230_v57 = vmax.f32 %v6198_v47, 0.0  ;;  %v5631_v43 = vpop.f32.mrf.mxu0  ;;  %v5673_v42 = vadd.f32 %v8212_v11, %v4920_v34 }
 0x397   : > { %v8255_v22 = vpop.f32.mrf.mxu1  ;;  %8294 = vmatmul.mubr.bf16.gmra.mxu0 %v6253_v4  ;;  %v5672_v4 = vadd.f32 %v8211_v59, %v11592_v25  ;;  %v11596_v59 = vld [vmem:[#allocation22_spill] sm:$0xff]  ;;  %v5671_v23 = vadd.f32 %v5618_v45, %v4918_v55 }
 0x398   : > { %v6233_v21 = vmax.f32 %v6201_v44, 0.0  ;;  %v6199_v3 = vadd.f32 %v11174_v46, %v6160_v31  ;;  %v6165_v6 = vadd.f32 %v8255_v22, %v5668_v39  ;;  %v4538_v14 = vadd.f32 %v11596_v59, %v11595_v50  ;;  %v8216_v5 = vpop.f32.mrf.mxu0  ;;  %v7493_v50 = vld [vmem:[%s8954_s12 + $0x18] sm:$0xff]  }
 0x399   : > { %v6096_v24 = vpop.f32.mrf.mxu1  ;;  %v4536_v22 = vadd.f32 %v11598_v48, %v11597_v58 }
 0x39a   : > { %v6255_v15 = vpack.c.bf16 %v6233_v21, %v6232_v28  ;;  %v6231_v27 = vmax.f32 %v6199_v3, 0.0  ;;  %v6163_v51 = vadd.f32 %v6096_v24, %v5666_v9  ;;  %v6204_v49 = vadd.f32 %v11174_v46, %v6165_v6  ;;  %v11599_v9 = vld [vmem:[#allocation28_spill] sm:$0xff]  ;;  %v11600_v24 = vld [vmem:[#allocation45_spill] sm:$0xff]  ;;  %v5634_v56 = vpop.f32.mrf.mxu0 }
 0x39b   : > { %v8256_v1 = vpop.f32.mrf.mxu1  ;;  %v4924_v39 = vadd.f32 %v11156_v32, %v4538_v14  ;;  %v5676_v28 = vadd.f32 %v8215_v41, %v11599_v9  ;;  %v7362_v9 = vunpack.c.h.bf16 %v7493_v50 }
 0x39c   : > { %v6166_v8 = vadd.f32 %v8256_v1, %v5669_v53  ;;  %v6254_v30 = vpack.c.bf16 %v6231_v27, %v6230_v57  ;;  %v6202_v29 = vadd.f32 %v11174_v46, %v6163_v51  ;;  %v6236_v33 = vmax.f32 %v6204_v49, 0.0 }
 0x39d   : > { %v6099_v12 = vpop.f32.mrf.mxu1  ;;  %v5674_v53 = vadd.f32 %v5631_v43, %v11600_v24  ;;  %v4922_v57 = vadd.f32 %v11160_v2, %v4536_v22  ;;  %v5677_v7 = vadd.f32 %v8216_v5, %v4924_v39 }
 0x39e   : > { %v6205_v18 = vadd.f32 %v11174_v46, %v6166_v8  ;;  %v6164_v63 = vadd.f32 %v6099_v12, %v5667_v52  ;;  %8297 = vmatprep.mubr.bf16.mxu0 %v6254_v30  ;;  %v6234_v61 = vmax.f32 %v6202_v29, 0.0 }
 0x39f   : > { %v8259_v40 = vpop.f32.mrf.mxu1  ;;  %8298 = vmatmul.mubr.bf16.gmra.mxu0 %v6255_v15  ;;  %v5675_v34 = vadd.f32 %v5634_v56, %v4922_v57 }
 0x3a0   : > { %v6237_v54 = vmax.f32 %v6205_v18, 0.0  ;;  %v6203_v13 = vadd.f32 %v11174_v46, %v6164_v63  ;;  %v6169_v16 = vadd.f32 %v8259_v40, %v5672_v4 }
 0x3a1   : > { %v6112_v60 = vpop.f32.mrf.mxu1 }
 0x3a2   : > { %v6257_v38 = vpack.c.bf16 %v6237_v54, %v6236_v33  ;;  %v6235_v17 = vmax.f32 %v6203_v13, 0.0  ;;  %v6167_v36 = vadd.f32 %v6112_v60, %v5670_v62  ;;  %v6208_v44 = vadd.f32 %v11174_v46, %v6169_v16  ;;  %v11304_v62 = vld [vmem:[%s11429_s6] ss:$0 sm:$0xff]  ;;  %v7348_v54 = vld [vmem:[%s8954_s12] sm:$0xff]  }
 0x3a3   : > { %v8260_v47 = vpop.f32.mrf.mxu1  ;;  %v7353_v13 = vunpack.c.l.bf16 %v7491_v26  ;;  %v7349_v43 = vunpack.c.l.bf16 %v7348_v54 }
 0x3a4   : > { %v6170_v31 = vadd.f32 %v8260_v47, %v5673_v42  ;;  %v6256_v37 = vpack.c.bf16 %v6235_v17, %v6234_v61  ;;  %v6206_v21 = vadd.f32 %v11174_v46, %v6167_v36  ;;  %v6240_v32 = vmax.f32 %v6208_v44, 0.0 }
 0x3a5   : > { %v6115_v11 = vpop.f32.mrf.mxu1  ;;  %v7354_v42 = vunpack.c.h.bf16 %v7491_v26  ;;  %v7350_v36 = vunpack.c.h.bf16 %v7348_v54 }
 0x3a6   : > { %v6209_v3 = vadd.f32 %v11174_v46, %v6170_v31  ;;  %v6168_v6 = vadd.f32 %v6115_v11, %v5671_v23  ;;  %8301 = vmatprep.mubr.bf16.mxu0 %v6256_v37  ;;  %v6238_v1 = vmax.f32 %v6206_v21, 0.0  ;;  %v7492_v31 = vld [vmem:[%s8954_s12 + $0x10] sm:$0xff]   ;;  %v7361_v23 = vunpack.c.l.bf16 %v7493_v50 }
 0x3a7   : > { %v8263_v15 = vpop.f32.mrf.mxu1  ;;  %8302 = vmatmul.mubr.bf16.gmra.mxu0 %v6257_v38  ;;  %v7357_v5 = vunpack.c.l.bf16 %v7492_v31 }
 0x3a8   : > { %v6241_v27 = vmax.f32 %v6209_v3, 0.0  ;;  %v6207_v51 = vadd.f32 %v11174_v46, %v6168_v6  ;;  %v6173_v45 = vadd.f32 %v8263_v15, %v5676_v28 }
 0x3a9   : > { %v6128_v10 = vpop.f32.mrf.mxu1 }
 0x3aa   : > { %v6259_v49 = vpack.c.bf16 %v6241_v27, %v6240_v32  ;;  %v6239_v8 = vmax.f32 %v6207_v51, 0.0  ;;  %v6171_v52 = vadd.f32 %v6128_v10, %v5674_v53  ;;  %v6212_v35 = vadd.f32 %v11174_v46, %v6173_v45  ;;  %v7495_v27 = vld [vmem:[%s8954_s12 + $0x28] sm:$0xff]   ;;  %v7494_v10 = vld [vmem:[%s8954_s12 + $0x20] sm:$0xff]  }
 0x3ab   : > { %v8264_v30 = vpop.f32.mrf.mxu1  ;;  %v7358_v32 = vunpack.c.h.bf16 %v7492_v31 }
 0x3ac   : > { %v6174_v20 = vadd.f32 %v8264_v30, %v5677_v7  ;;  %v6258_v2 = vpack.c.bf16 %v6239_v8, %v6238_v1  ;;  %v6210_v41 = vadd.f32 %v11174_v46, %v6171_v52  ;;  %v6244_v18 = vmax.f32 %v6212_v35, 0.0 }
 0x3ad   : > { %v6131_v19 = vpop.f32.mrf.mxu1  ;;  %v7369_v1 = vunpack.c.l.bf16 %v7495_v27  ;;  %v7365_v35 = vunpack.c.l.bf16 %v7494_v10 }
 0x3ae   : > { %v6213_v12 = vadd.f32 %v11174_v46, %v6174_v20  ;;  %v6172_v29 = vadd.f32 %v6131_v19, %v5675_v34  ;;  %8305 = vmatprep.mubr.bf16.mxu0 %v6258_v2  ;;  %v6242_v4 = vmax.f32 %v6210_v41, 0.0  ;;  %v7370_v2 = vunpack.c.h.bf16 %v7495_v27 }
 0x3af   : > { %8306 = vmatmul.mubr.bf16.gmra.mxu0 %v6259_v49 }
 0x3b0   : > { %v6245_v63 = vmax.f32 %v6213_v12, 0.0  ;;  %v6211_v25 = vadd.f32 %v11174_v46, %v6172_v29 }
 0x3b2   : > { %v6261_v0 = vpack.c.bf16 %v6245_v63, %v6244_v18  ;;  %v6243_v55 = vmax.f32 %v6211_v25, 0.0 }
 0x3b4   : > { %v6260_v40 = vpack.c.bf16 %v6243_v55, %v6242_v4  ;;  %v7497_v55 = vld [vmem:[%s8954_s12 + $0x38] sm:$0xff]  }
 0x3b6   : > { %8309 = vmatprep.mubr.bf16.mxu0 %v6260_v40 }
 0x3b7   : > { %8310 = vmatmul.mubr.bf16.gmra.mxu0 %v6261_v0  ;;  %v7366_v0 = vunpack.c.h.bf16 %v7494_v10 }
 0x43f   : > { %v8283_v33 = vpop.f32.mrf.mxu0 }
 0x440   : > { %v6440_v16 = vadd.f32 %v8283_v33, %v11304_v62 }
 0x441   : > { %v6431_v46 = vpop.f32.mrf.mxu0 }
 0x442   : > { %v6432_v60 = vadd.f32 %v11304_v62, %v6431_v46  ;;  %v6560_v38 = vadd.f32 %v7353_v13, %v6440_v16  ;;  %v7496_v13 = vld [vmem:[%s8954_s12 + $0x30] sm:$0xff]   ;;  %v7377_v16 = vunpack.c.l.bf16 %v7497_v55 }
 0x443   : > { %v8284_v61 = vpop.f32.mrf.mxu0 }
 0x444   : > { %v6443_v17 = vadd.f32 %v8284_v61, %v11304_v62  ;;  %v6558_v14 = vadd.f32 %v7349_v43, %v6432_v60  ;;  %v6592_v39 = vmax.f32 %v6560_v38, 0.0  ;;  %v7373_v38 = vunpack.c.l.bf16 %v7496_v13 }
 0x445   : > { %v6434_v59 = vpop.f32.mrf.mxu0 }
 0x446   : > { %v6561_v47 = vadd.f32 %v7354_v42, %v6443_v17  ;;  %v6435_v44 = vadd.f32 %v11304_v62, %v6434_v59  ;;  %v6590_v28 = vmax.f32 %v6558_v14, 0.0 }
 0x447   : > { %v8287_v37 = vpop.f32.mrf.mxu0 }
 0x448   : > { %v6593_v58 = vmax.f32 %v6561_v47, 0.0  ;;  %v6559_v48 = vadd.f32 %v7350_v36, %v6435_v44  ;;  %v6456_v22 = vadd.f32 %v8287_v37, %v11304_v62  ;;  %v7378_v36 = vunpack.c.h.bf16 %v7497_v55 }
 0x449   : > { %v6447_v11 = vpop.f32.mrf.mxu0 }
 0x44a   : > { %v7419_v21 = vpack.c.bf16 %v6593_v58, %v6592_v39  ;;  %v6591_v3 = vmax.f32 %v6559_v48, 0.0  ;;  %v6448_v6 = vadd.f32 %v11304_v62, %v6447_v11  ;;  %v6564_v57 = vadd.f32 %v7361_v23, %v6456_v22  ;;  %v7499_v58 = vld [vmem:[%s8954_s12 + $0x48] sm:$0xff]  }
 0x44b   : > { %v8288_v24 = vpop.f32.mrf.mxu0  ;;  %v7374_v39 = vunpack.c.h.bf16 %v7496_v13 }
 0x44c   : > { %7506 = vst [vmem:[%s11317_s22 + $0x8] sm:$0xff] %v7419_v21   ;;  %v7414_v53 = vpack.c.bf16 %v6591_v3, %v6590_v28  ;;  %v6459_v15 = vadd.f32 %v8288_v24, %v11304_v62  ;;  %v6562_v45 = vadd.f32 %v7357_v5, %v6448_v6  ;;  %v6596_v8 = vmax.f32 %v6564_v57, 0.0 }
 0x44d   : > { %v6450_v51 = vpop.f32.mrf.mxu0  ;;  %v7385_v28 = vunpack.c.l.bf16 %v7499_v58 }
 0x44e   : > { %7415 = vst [vmem:[%s11317_s22] sm:$0xff] %v7414_v53   ;;  %v6565_v7 = vadd.f32 %v7362_v9, %v6459_v15  ;;  %v6451_v56 = vadd.f32 %v11304_v62, %v6450_v51  ;;  %v6594_v19 = vmax.f32 %v6562_v45, 0.0  ;;  %v7498_v9 = vld [vmem:[%s8954_s12 + $0x40] sm:$0xff]  }
 0x44f   : > { %v8291_v49 = vpop.f32.mrf.mxu0  ;;  %v7381_v57 = vunpack.c.l.bf16 %v7498_v9 }
 0x450   : > { %v6597_v52 = vmax.f32 %v6565_v7, 0.0  ;;  %v6563_v30 = vadd.f32 %v7358_v32, %v6451_v56  ;;  %v6472_v34 = vadd.f32 %v8291_v49, %v11304_v62  ;;  %v7386_v32 = vunpack.c.h.bf16 %v7499_v58 }
 0x451   : > { %v6463_v20 = vpop.f32.mrf.mxu0 }
 0x452   : > { %v7429_v41 = vpack.c.bf16 %v6597_v52, %v6596_v8  ;;  %v6595_v12 = vmax.f32 %v6563_v30, 0.0  ;;  %v6464_v29 = vadd.f32 %v11304_v62, %v6463_v20  ;;  %v6568_v25 = vadd.f32 %v7369_v1, %v6472_v34  ;;  %v7501_v52 = vld [vmem:[%s8954_s12 + $0x58] sm:$0xff]  }
 0x453   : > { %v8292_v18 = vpop.f32.mrf.mxu0  ;;  %v7382_v8 = vunpack.c.h.bf16 %v7498_v9 }
 0x454   : > { %7508 = vst [vmem:[%s11317_s22 + $0x18] sm:$0xff] %v7429_v41   ;;  %v7424_v63 = vpack.c.bf16 %v6595_v12, %v6594_v19  ;;  %v6475_v4 = vadd.f32 %v8292_v18, %v11304_v62  ;;  %v6566_v26 = vadd.f32 %v7365_v35, %v6464_v29  ;;  %v6600_v43 = vmax.f32 %v6568_v25, 0.0 }
 0x455   : > { %v6466_v40 = vpop.f32.mrf.mxu0  ;;  %v7393_v19 = vunpack.c.l.bf16 %v7501_v52 }
 0x456   : > { %7507 = vst [vmem:[%s11317_s22 + $0x10] sm:$0xff] %v7424_v63   ;;  %v6569_v33 = vadd.f32 %v7370_v2, %v6475_v4  ;;  %v6467_v54 = vadd.f32 %v11304_v62, %v6466_v40  ;;  %v6598_v50 = vmax.f32 %v6566_v26, 0.0  ;;  %v7500_v2 = vld [vmem:[%s8954_s12 + $0x50] sm:$0xff]  }
 0x457   : > { %v8295_v46 = vpop.f32.mrf.mxu0  ;;  %v7389_v25 = vunpack.c.l.bf16 %v7500_v2 }
 0x458   : > { %v6601_v60 = vmax.f32 %v6569_v33, 0.0  ;;  %v6567_v42 = vadd.f32 %v7366_v0, %v6467_v54  ;;  %v6488_v61 = vadd.f32 %v8295_v46, %v11304_v62  ;;  %v7394_v0 = vunpack.c.h.bf16 %v7501_v52 }
 0x459   : > { %v6479_v17 = vpop.f32.mrf.mxu0 }
 0x45a   : > { %v7439_v59 = vpack.c.bf16 %v6601_v60, %v6600_v43  ;;  %v6599_v14 = vmax.f32 %v6567_v42, 0.0  ;;  %v6480_v47 = vadd.f32 %v11304_v62, %v6479_v17  ;;  %v6572_v23 = vadd.f32 %v7377_v16, %v6488_v61  ;;  %v7503_v60 = vld [vmem:[%s8954_s12 + $0x68] sm:$0xff]  }
 0x45b   : > { %v8296_v44 = vpop.f32.mrf.mxu0  ;;  %v7390_v43 = vunpack.c.h.bf16 %v7500_v2 }
 0x45c   : > { %7510 = vst [vmem:[%s11317_s22 + $0x28] sm:$0xff] %v7439_v59   ;;  %v7434_v31 = vpack.c.bf16 %v6599_v14, %v6598_v50  ;;  %v6491_v37 = vadd.f32 %v8296_v44, %v11304_v62  ;;  %v6570_v22 = vadd.f32 %v7373_v38, %v6480_v47  ;;  %v6604_v3 = vmax.f32 %v6572_v23, 0.0 }
 0x45d   : > { %v6482_v48 = vpop.f32.mrf.mxu0  ;;  %v7401_v50 = vunpack.c.l.bf16 %v7503_v60 }
 0x45e   : > { %7509 = vst [vmem:[%s11317_s22 + $0x20] sm:$0xff] %v7434_v31   ;;  %v6573_v5 = vadd.f32 %v7378_v36, %v6491_v37  ;;  %v6483_v11 = vadd.f32 %v11304_v62, %v6482_v48  ;;  %v6602_v27 = vmax.f32 %v6570_v22, 0.0  ;;  %v7502_v36 = vld [vmem:[%s8954_s12 + $0x60] sm:$0xff]  }
 0x45f   : > { %v8299_v21 = vpop.f32.mrf.mxu0  ;;  %v7397_v23 = vunpack.c.l.bf16 %v7502_v36 }
 0x460   : > { %v6605_v6 = vmax.f32 %v6573_v5, 0.0  ;;  %v6571_v24 = vadd.f32 %v7374_v39, %v6483_v11  ;;  %v6504_v53 = vadd.f32 %v8299_v21, %v11304_v62  ;;  %v7402_v39 = vunpack.c.h.bf16 %v7503_v60 }
 0x461   : > { %v6495_v15 = vpop.f32.mrf.mxu0 }
 0x462   : > { %v7449_v51 = vpack.c.bf16 %v6605_v6, %v6604_v3  ;;  %v6603_v45 = vmax.f32 %v6571_v24, 0.0  ;;  %v6496_v7 = vadd.f32 %v11304_v62, %v6495_v15  ;;  %v6576_v1 = vadd.f32 %v7385_v28, %v6504_v53  ;;  %v7505_v6 = vld [vmem:[%s8954_s12 + $0x78] sm:$0xff]  }
 0x463   : > { %v8300_v56 = vpop.f32.mrf.mxu0  ;;  %v7398_v3 = vunpack.c.h.bf16 %v7502_v36 }
 0x464   : > { %7512 = vst [vmem:[%s11317_s22 + $0x38] sm:$0xff] %v7449_v51   ;;  %v7444_v10 = vpack.c.bf16 %v6603_v45, %v6602_v27  ;;  %v6507_v49 = vadd.f32 %v8300_v56, %v11304_v62  ;;  %v6574_v34 = vadd.f32 %v7381_v57, %v6496_v7  ;;  %v6608_v12 = vmax.f32 %v6576_v1, 0.0 }
 0x465   : > { %v6498_v30 = vpop.f32.mrf.mxu0  ;;  %v7409_v27 = vunpack.c.l.bf16 %v7505_v6 }
 0x466   : > { %7511 = vst [vmem:[%s11317_s22 + $0x30] sm:$0xff] %v7444_v10   ;;  %v6577_v35 = vadd.f32 %v7386_v32, %v6507_v49  ;;  %v6499_v20 = vadd.f32 %v11304_v62, %v6498_v30  ;;  %v6606_v55 = vmax.f32 %v6574_v34, 0.0  ;;  %v7504_v32 = vld [vmem:[%s8954_s12 + $0x70] sm:$0xff]   ;;  %s11376_s12 = scalar_lea.hbm %s11430_s7, %s7346_s18 }
 0x467   : > { %v8303_v41 = vpop.f32.mrf.mxu0  ;;  %v7405_v1 = vunpack.c.l.bf16 %v7504_v32 }
 0x468   : > { %v6609_v29 = vmax.f32 %v6577_v35, 0.0  ;;  %v6575_v18 = vadd.f32 %v7382_v8, %v6499_v20  ;;  %v6520_v63 = vadd.f32 %v8303_v41, %v11304_v62  ;;  %v7410_v8 = vunpack.c.h.bf16 %v7505_v6 }
 0x469   : > { %v6511_v4 = vpop.f32.mrf.mxu0 }
 0x46a   : > { %v7459_v40 = vpack.c.bf16 %v6609_v29, %v6608_v12  ;;  %v6607_v26 = vmax.f32 %v6575_v18, 0.0  ;;  %v6512_v33 = vadd.f32 %v11304_v62, %v6511_v4  ;;  %v6580_v16 = vadd.f32 %v7393_v19, %v6520_v63 }
 0x46b   : > { %v8304_v54 = vpop.f32.mrf.mxu0  ;;  %v7406_v12 = vunpack.c.h.bf16 %v7504_v32 }
 0x46c   : > { %7514 = vst [vmem:[%s11317_s22 + $0x48] sm:$0xff] %v7459_v40   ;;  %v7454_v13 = vpack.c.bf16 %v6607_v26, %v6606_v55  ;;  %v6523_v46 = vadd.f32 %v8304_v54, %v11304_v62  ;;  %v6578_v61 = vadd.f32 %v7389_v25, %v6512_v33  ;;  %v6612_v14 = vmax.f32 %v6580_v16, 0.0 }
 0x46d   : > { %v6514_v42 = vpop.f32.mrf.mxu0 }
 0x46e   : > { %7513 = vst [vmem:[%s11317_s22 + $0x40] sm:$0xff] %v7454_v13   ;;  %v6581_v38 = vadd.f32 %v7394_v0, %v6523_v46  ;;  %v6515_v17 = vadd.f32 %v11304_v62, %v6514_v42  ;;  %v6610_v58 = vmax.f32 %v6578_v61, 0.0 }
 0x46f   : > { %v8307_v59 = vpop.f32.mrf.mxu0 }
 0x470   : > { %v6613_v47 = vmax.f32 %v6581_v38, 0.0  ;;  %v6579_v44 = vadd.f32 %v7390_v43, %v6515_v17  ;;  %v6536_v31 = vadd.f32 %v8307_v59, %v11304_v62 }
 0x471   : > { %v6527_v37 = vpop.f32.mrf.mxu0 }
 0x472   : > { %v7469_v48 = vpack.c.bf16 %v6613_v47, %v6612_v14  ;;  %v6611_v22 = vmax.f32 %v6579_v44, 0.0  ;;  %v6528_v5 = vadd.f32 %v11304_v62, %v6527_v37  ;;  %v6584_v28 = vadd.f32 %v7401_v50, %v6536_v31 }
 0x473   : > { %v8308_v11 = vpop.f32.mrf.mxu0 }
 0x474   : > { %7516 = vst [vmem:[%s11317_s22 + $0x58] sm:$0xff] %v7469_v48   ;;  %v7464_v9 = vpack.c.bf16 %v6611_v22, %v6610_v58  ;;  %v6539_v21 = vadd.f32 %v8308_v11, %v11304_v62  ;;  %v6582_v53 = vadd.f32 %v7397_v23, %v6528_v5  ;;  %v6616_v45 = vmax.f32 %v6584_v28, 0.0 }
 0x475   : > { %v6530_v24 = vpop.f32.mrf.mxu0 }
 0x476   : > { %7515 = vst [vmem:[%s11317_s22 + $0x50] sm:$0xff] %v7464_v9   ;;  %v6585_v57 = vadd.f32 %v7402_v39, %v6539_v21  ;;  %v6531_v15 = vadd.f32 %v11304_v62, %v6530_v24  ;;  %v6614_v52 = vmax.f32 %v6582_v53, 0.0 }
 0x477   : > { %v8311_v51 = vpop.f32.mrf.mxu0 }
 0x478   : > { %v6617_v7 = vmax.f32 %v6585_v57, 0.0  ;;  %v6583_v56 = vadd.f32 %v7398_v3, %v6531_v15  ;;  %v6552_v10 = vadd.f32 %v8311_v51, %v11304_v62 }
 0x479   : > { %v6543_v49 = vpop.f32.mrf.mxu0 }
 0x47a   : > { %v7479_v30 = vpack.c.bf16 %v6617_v7, %v6616_v45  ;;  %v6615_v34 = vmax.f32 %v6583_v56, 0.0  ;;  %v6544_v35 = vadd.f32 %v11304_v62, %v6543_v49  ;;  %v6588_v19 = vadd.f32 %v7409_v27, %v6552_v10 }
 0x47b   : > { %v8312_v20 = vpop.f32.mrf.mxu0 }
 0x47c   : > { %7518 = vst [vmem:[%s11317_s22 + $0x68] sm:$0xff] %v7479_v30   ;;  %v7474_v2 = vpack.c.bf16 %v6615_v34, %v6614_v52  ;;  %v6555_v41 = vadd.f32 %v8312_v20, %v11304_v62  ;;  %v6586_v18 = vadd.f32 %v7405_v1, %v6544_v35  ;;  %v6620_v4 = vmax.f32 %v6588_v19, 0.0 }
 0x47d   : > { %v6546_v29 = vpop.f32.mrf.mxu0 }
 0x47e   : > { %7517 = vst [vmem:[%s11317_s22 + $0x60] sm:$0xff] %v7474_v2   ;;  %v6589_v63 = vadd.f32 %v7410_v8, %v6555_v41  ;;  %v6547_v25 = vadd.f32 %v11304_v62, %v6546_v29  ;;  %v6618_v40 = vmax.f32 %v6586_v18, 0.0 }
 0x480   : > { %v6621_v0 = vmax.f32 %v6589_v63, 0.0  ;;  %v6587_v55 = vadd.f32 %v7406_v12, %v6547_v25 }
 0x482   : > { %v7489_v26 = vpack.c.bf16 %v6621_v0, %v6620_v4  ;;  %v6619_v33 = vmax.f32 %v6587_v55, 0.0 }
 0x484   : > { %7520 = vst [vmem:[%s11317_s22 + $0x78] sm:$0xff] %v7489_v26   ;;  %v7484_v62 = vpack.c.bf16 %v6619_v33, %v6618_v40 }
 0x486   : > { %7519 = vst [vmem:[%s11317_s22 + $0x70] sm:$0xff] %v7484_v62  }
 0x487   : > { %8690 = shalt.err (!%p8687_p10)
}
 0x488   : > { %s8691_s15 = scalar_lea.hbm %s11376_s12, 2048  ;;  %s8695_s21 = scalar_lea.hbm %s11430_s7, 4096 }
 0x489   : > { %p8692_p6 = scmp.ne.s32.totalorder %s11376_s12, %s8691_s15  ;;  %p8696_p3 = scmp.lt.s32.totalorder %s11376_s12, %s11430_s7 }
 0x48a   : > { %p8697_p11 = scmp.lt.s32.totalorder %s8695_s21, %s8691_s15 }
 0x48b   : > { %p8693_p4 = pnand %p8692_p6, %p11601_p1 }
 0x48c   : > { %p8698_p5 = por %p8697_p11, %p8696_p3 }
 0x48d   : > { %p8694_p8 = pneg %p8693_p4 }
 0x48f   : > { %p8699_p7 = pnand %p8698_p5, %p8694_p8 }
 0x491   : > { %8702 = shalt.err (!%p8699_p7)
}
 0x492   : > { %s8759_s1 = smov 64   ;;  %s8760_s16 = smov 4  }
 0x493   : > { %8343 = dma.vmem_to_hbm [thread:$0]  (%p11601_p1), %s11378_s23, 2048, %s11376_s12, %s6783_s30, %s8759_s1, %s8759_s1, %s8760_s16  }
 0x494 PF: > { %s6811_s9 = sand.u32 1, %s8737_s24   ;;  %p11602_p12 = scmp.ne.s32.totalorder %s11447_s8, 0 }
 0x495   : > { %p11603_p9 = scmp.ge.s32.totalorder %s8749_s27, 2  ;;  %s6812_s28 = scalar_lea.sflag [#allocation5], %s6811_s9 }
 0x497   : > { %p8360_p13 = pnand %p11603_p9, %p11602_p12 }
 0x499   : > { %p8361_p0 = pneg %p8360_p13 }
 0x49b   : > { %8732 = dma.done.wait (%p8361_p0), %s6812_s28, 2048  }
 0x49c   : > { %8734 = vsyncadd (%p8361_p0), %s6812_s28, 4294965248  ;;  %p22_p2 = scmp.ge.s32.totalorder %s8890_s14, 4   ;;  %s11604_s24 = smov %s8741_s25 }
 0x49d   : > { %s11605_s25 = smov %s8745_s26  ;;  %s11606_s26 = smov %s8900_s17 }
 0x49e   : > { %s11607_s27 = smov %s8890_s14  ;;  %24 = sbr.rel (!%p22_p2) target bundleno = 9 (0x9), region = 108 }
 0x4a3   :  { %6817 = vsyncpa [#allocation4], 1 }
 0x4a4   :  { %6819 = vsyncpa [#allocation4 + $0x1], 1 }
 0x4a5   :  { %6820 = vsyncpa [#allocation7], 1 }
 0x4a6   :  { %6821 = vsyncpa [#allocation10], 1 }
 0x4a7   :  { %6822 = vsyncpa [#allocation5], 1 }
 0x4a8   :  { %6824 = vsyncpa [#allocation5 + $0x1], 1 }

</bundles_post_ra>
